<compile_context>
chip_gen: v7x
topology: tpu7x:2x2x1
jax: 0.10.0
libtpu: 0.0.40
codegen_flags: <defaults>
</compile_context>

<pallas_src>
import functools
import math

import jax
import jax.numpy as jnp
import numpy as np
from jax.experimental import pallas as pl
from jax.experimental.pallas import tpu as pltpu

MAX_LOG_STD = 2.0
MIN_LOG_STD = -20.0


# ----------------------------------------------------------------------------
# Pallas kernels
# ----------------------------------------------------------------------------
def _perception_kernel(x_ref, w1_ref, b1_ref, w2_ref, b2_ref, o_ref):
    """2-layer MLP stand-in for the Perception image encoder (row tile of (T*B, obs_dim))."""
    # TODO(synk): Perception(128, 128, out_dim, hidden_size) definition is unavailable;
    #             approximated as a 2-layer MLP over per-timestep feature vectors.
    h = jnp.dot(x_ref[...].astype(jnp.bfloat16), w1_ref[...],
                preferred_element_type=jnp.float32) + b1_ref[...]
    h = jnp.maximum(h, 0.0)
    o = jnp.dot(h.astype(jnp.bfloat16), w2_ref[...],
                preferred_element_type=jnp.float32) + b2_ref[...]
    o_ref[...] = o.astype(o_ref.dtype)


def _gi_kernel(x1_ref, x2_ref, w1_ref, w2_ref, b_ref, gif_ref, gib_ref):
    """Precompute input-to-hidden gate pre-activations for ALL timesteps (row tile).

    x1/x2 are the two halves of the layer input (emb/act for layer 0, y_f/y_b afterwards).
    Output gi = [gi_fwd | gi_bwd], split into two lane-dense (rows, 3H) slabs.
    """
    gi = (jnp.dot(x1_ref[...].astype(jnp.bfloat16), w1_ref[...],
                  preferred_element_type=jnp.float32)
          + jnp.dot(x2_ref[...].astype(jnp.bfloat16), w2_ref[...],
                    preferred_element_type=jnp.float32)
          + b_ref[...])
    g = gif_ref.shape[-1]  # 3H
    gif_ref[...] = gi[:, :g]
    gib_ref[...] = gi[:, g:]


def _bidir_gru_step(gif, gib, gh, h, hidden):
    """Fused fwd+bwd GRU gate update (PyTorch gate order r, z, n). All f32."""
    g = 3 * hidden

    def gate(gi_d, gh_d, h_d):
        r = jax.nn.sigmoid(gi_d[:, :hidden] + gh_d[:, :hidden])
        z = jax.nn.sigmoid(gi_d[:, hidden:2 * hidden] + gh_d[:, hidden:2 * hidden])
        n = jnp.tanh(gi_d[:, 2 * hidden:] + r * gh_d[:, 2 * hidden:])
        return (1.0 - z) * n + z * h_d

    h_f = gate(gif, gh[:, :g], h[:, :hidden])
    h_b = gate(gib, gh[:, g:], h[:, hidden:])
    return h_f, h_b


def _gru_bidir_seq_kernel(gif_ref, gib_ref, whh_ref, bhh_ref, yf_ref, yb_ref, h_ref):
    """One bidirectional GRU layer, TS timesteps per grid step, full sequence output.

    gif_ref : (TS, B, 3H) fwd gate pre-activations for time chunk c
    gib_ref : (TS, B, 3H) bwd gate pre-activations for time chunk nC-1-c
    whh_ref : (2H, 6H)    block-diagonal [W_hh_f^T | W_hh_b^T], bf16
    bhh_ref : (1, 6H)     [b_hh_f | b_hh_b]
    yf_ref  : (TS, B, H)  fwd outputs for chunk c
    yb_ref  : (TS, B, H)  bwd outputs for chunk nC-1-c
    h_ref   : (B, 2H)     VMEM scratch carrying [h_f | h_b] across grid steps
    """
    @pl.when(pl.program_id(0) == 0)
    def _():
        h_ref[...] = jnp.zeros_like(h_ref)

    ts = yf_ref.shape[0]
    hidden = yf_ref.shape[-1]
    whh = whh_ref[...]
    bhh = bhh_ref[...]

    def step(s, carry):
        h = h_ref[...]
        gh = jnp.dot(h.astype(jnp.bfloat16), whh,
                     preferred_element_type=jnp.float32) + bhh
        h_f, h_b = _bidir_gru_step(gif_ref[s], gib_ref[ts - 1 - s], gh, h, hidden)
        h_ref[...] = jnp.concatenate([h_f, h_b], axis=-1)
        yf_ref[s] = h_f.astype(yf_ref.dtype)
        yb_ref[ts - 1 - s] = h_b.astype(yb_ref.dtype)
        return carry

    jax.lax.fori_loop(0, ts, step, 0, unroll=True)


def _gru_bidir_final_kernel(gif_ref, gib_ref, whh_ref, bhh_ref, fcw_ref, fcb_ref,
                            mean_ref, std_ref, h_ref):
    """Last bidirectional GRU layer + fused fc head; only the final hidden is consumed."""
    @pl.when(pl.program_id(0) == 0)
    def _():
        h_ref[...] = jnp.zeros_like(h_ref)

    ts = gif_ref.shape[0]
    g = gif_ref.shape[-1]
    hidden = g // 3
    whh = whh_ref[...]
    bhh = bhh_ref[...]

    def step(s, carry):
        h = h_ref[...]
        gh = jnp.dot(h.astype(jnp.bfloat16), whh,
                     preferred_element_type=jnp.float32) + bhh
        h_f, h_b = _bidir_gru_step(gif_ref[s], gib_ref[ts - 1 - s], gh, h, hidden)
        h_ref[...] = jnp.concatenate([h_f, h_b], axis=-1)
        return carry

    jax.lax.fori_loop(0, ts, step, 0, unroll=True)

    @pl.when(pl.program_id(0) == pl.num_programs(0) - 1)
    def _():
        # h_ref = [h_f at t=T-1 | h_b at t=0]  ==  cat([y[:,-1,:H], y[:,0,H:]], -1)
        feat = h_ref[...]
        y = jnp.dot(feat.astype(jnp.bfloat16), fcw_ref[...],
                    preferred_element_type=jnp.float32) + fcb_ref[...]
        k = mean_ref.shape[-1]
        mean_ref[...] = y[:, :k].astype(mean_ref.dtype)
        logstd = jnp.clip(y[:, k:], MIN_LOG_STD, MAX_LOG_STD)
        std_ref[...] = jnp.exp(logstd).astype(std_ref.dtype)


# ----------------------------------------------------------------------------
# Wrappers
# ----------------------------------------------------------------------------
def _pick_row_tile(rows, cap=256):
    if rows <= cap:
        return rows
    best = None
    for tr in range(8, cap + 1, 8):
        if rows % tr == 0:
            best = tr
    return best if best is not None else rows


def _pick_time_chunk(t, cap):
    for ts in range(min(t, cap), 0, -1):
        if t % ts == 0:
            return ts
    return 1


def perception_forward(obs_flat, w1, b1, w2, b2):
    rows, obs_dim = obs_flat.shape
    out_dim = w2.shape[1]
    tr = _pick_row_tile(rows)
    return pl.pallas_call(
        _perception_kernel,
        out_shape=jax.ShapeDtypeStruct((rows, out_dim), jnp.float32),
        grid=(rows // tr,),
        in_specs=[
            pl.BlockSpec((tr, obs_dim), lambda i: (i, 0)),
            pl.BlockSpec(w1.shape, lambda i: (0, 0)),
            pl.BlockSpec(b1.shape, lambda i: (0, 0)),
            pl.BlockSpec(w2.shape, lambda i: (0, 0)),
            pl.BlockSpec(b2.shape, lambda i: (0, 0)),
        ],
        out_specs=pl.BlockSpec((tr, out_dim), lambda i: (i, 0)),
        compiler_params=pltpu.CompilerParams(dimension_semantics=("parallel",)),
    )(obs_flat, w1, b1, w2, b2)


def gi_precompute(x1, x2, w1, w2, b_ih, hidden_size):
    rows, d1 = x1.shape
    d2 = x2.shape[1]
    g = 3 * hidden_size
    tr = _pick_row_tile(rows)
    return pl.pallas_call(
        _gi_kernel,
        out_shape=(jax.ShapeDtypeStruct((rows, g), jnp.float32),
                   jax.ShapeDtypeStruct((rows, g), jnp.float32)),
        grid=(rows // tr,),
        in_specs=[
            pl.BlockSpec((tr, d1), lambda i: (i, 0)),
            pl.BlockSpec((tr, d2), lambda i: (i, 0)),
            pl.BlockSpec(w1.shape, lambda i: (0, 0)),
            pl.BlockSpec(w2.shape, lambda i: (0, 0)),
            pl.BlockSpec(b_ih.shape, lambda i: (0, 0)),
        ],
        out_specs=(pl.BlockSpec((tr, g), lambda i: (i, 0)),
                   pl.BlockSpec((tr, g), lambda i: (i, 0))),
        compiler_params=pltpu.CompilerParams(dimension_semantics=("parallel",)),
    )(x1, x2, w1, w2, b_ih)


def gru_bidir_layer(gi_f, gi_b, w_hh, b_hh, ts):
    t, b, g = gi_f.shape
    hidden = g // 3
    nc = t // ts
    fwd_map = lambda c: (c, 0, 0)
    bwd_map = lambda c: (nc - 1 - c, 0, 0)
    const_map = lambda c: (0, 0)
    return pl.pallas_call(
        _gru_bidir_seq_kernel,
        out_shape=(jax.ShapeDtypeStruct((t, b, hidden), jnp.float32),
                   jax.ShapeDtypeStruct((t, b, hidden), jnp.float32)),
        grid=(nc,),
        in_specs=[
            pl.BlockSpec((ts, b, g), fwd_map),
            pl.BlockSpec((ts, b, g), bwd_map),
            pl.BlockSpec(w_hh.shape, const_map),
            pl.BlockSpec(b_hh.shape, const_map),
        ],
        out_specs=(pl.BlockSpec((ts, b, hidden), fwd_map),
                   pl.BlockSpec((ts, b, hidden), bwd_map)),
        scratch_shapes=[pltpu.VMEM((b, 2 * hidden), jnp.float32)],
        compiler_params=pltpu.CompilerParams(dimension_semantics=("arbitrary",)),
    )(gi_f, gi_b, w_hh, b_hh)


def gru_bidir_final(gi_f, gi_b, w_hh, b_hh, fc_w, fc_b, skill_dim, ts):
    t, b, g = gi_f.shape
    hidden = g // 3
    nc = t // ts
    fwd_map = lambda c: (c, 0, 0)
    bwd_map = lambda c: (nc - 1 - c, 0, 0)
    const_map = lambda c: (0, 0)
    return pl.pallas_call(
        _gru_bidir_final_kernel,
        out_shape=(jax.ShapeDtypeStruct((b, skill_dim), jnp.float32),
                   jax.ShapeDtypeStruct((b, skill_dim), jnp.float32)),
        grid=(nc,),
        in_specs=[
            pl.BlockSpec((ts, b, g), fwd_map),
            pl.BlockSpec((ts, b, g), bwd_map),
            pl.BlockSpec(w_hh.shape, const_map),
            pl.BlockSpec(b_hh.shape, const_map),
            pl.BlockSpec(fc_w.shape, const_map),
            pl.BlockSpec(fc_b.shape, const_map),
        ],
        out_specs=(pl.BlockSpec((b, skill_dim), const_map),
                   pl.BlockSpec((b, skill_dim), const_map)),
        scratch_shapes=[pltpu.VMEM((b, 2 * hidden), jnp.float32)],
        compiler_params=pltpu.CompilerParams(dimension_semantics=("arbitrary",)),
    )(gi_f, gi_b, w_hh, b_hh, fc_w, fc_b)


@functools.partial(jax.jit, static_argnames=("skill_dim", "hidden_size", "time_chunk"))
def skill_recognition_forward(obs, act, params, *, skill_dim, hidden_size, time_chunk=16):
    b, t, obs_dim = obs.shape
    h = hidden_size
    ts = _pick_time_chunk(t, time_chunk)

    # Time-major flatten (row index = time*B + batch) so (rows, F) <-> (T, B, F)
    # reshapes are free and the GRU kernels can block over contiguous time chunks.
    obs_tm = jnp.transpose(obs, (1, 0, 2)).reshape(t * b, obs_dim)
    act_tm = jnp.transpose(act, (1, 0, 2)).reshape(t * b, act.shape[-1])

    x1 = perception_forward(obs_tm, *params["perception"])  # (T*B, state_dim)
    x2 = act_tm

    n_layers = len(params["gru"])
    mean = std = None
    for li, layer in enumerate(params["gru"]):
        gi_f, gi_b = gi_precompute(x1, x2, layer["w_ih_1"], layer["w_ih_2"],
                                   layer["b_ih"], h)
        gi_f = gi_f.reshape(t, b, 3 * h)
        gi_b = gi_b.reshape(t, b, 3 * h)
        if li + 1 < n_layers:
            y_f, y_b = gru_bidir_layer(gi_f, gi_b, layer["w_hh"], layer["b_hh"], ts)
            x1 = y_f.reshape(t * b, h)
            x2 = y_b.reshape(t * b, h)
        else:
            mean, std = gru_bidir_final(gi_f, gi_b, layer["w_hh"], layer["b_hh"],
                                        params["fc_w"], params["fc_b"], skill_dim, ts)
    # TODO(synk): PyTorch returns SquashedNormal(mean, std); we return its parameters.
    return mean, std


# ----------------------------------------------------------------------------
# Deterministic parameters (pre-transposed / pre-concatenated, bf16 matmul weights)
# ----------------------------------------------------------------------------
def make_params(key, obs_dim, state_dim, act_dim, skill_dim, hidden_size):
    h = hidden_size
    g = 3 * h
    n_layers = 4
    keys = iter(jax.random.split(key, 8 + 8 * n_layers))

    def u(shape, fan_in):
        s = 1.0 / math.sqrt(fan_in)
        return jax.random.uniform(next(keys), shape, jnp.float32, -s, s)

    perception = (
        u((obs_dim, h), obs_dim).astype(jnp.bfloat16),   # w1
        u((1, h), obs_dim),                              # b1
        u((h, state_dim), h).astype(jnp.bfloat16),       # w2
        u((1, state_dim), h),                            # b2
    )

    gru = []
    d1, d2 = state_dim, act_dim
    for _ in range(n_layers):
        fan = d1 + d2
        w_hh = jnp.zeros((2 * h, 2 * g), jnp.float32)
        w_hh = w_hh.at[:h, :g].set(u((h, g), h)).at[h:, g:].set(u((h, g), h))
        gru.append({
            # columns: [fwd r|z|n  |  bwd r|z|n], rows: the (x1, x2) halves of the input
            "w_ih_1": u((d1, 2 * g), fan).astype(jnp.bfloat16),
            "w_ih_2": u((d2, 2 * g), fan).astype(jnp.bfloat16),
            "b_ih": u((1, 2 * g), h),
            "w_hh": w_hh.astype(jnp.bfloat16),            # block-diagonal (2H, 6H)
            "b_hh": u((1, 2 * g), h),
        })
        d1 = d2 = h

    fc_w = u((2 * h, 2 * skill_dim), 2 * h).astype(jnp.bfloat16)
    fc_b = u((1, 2 * skill_dim), 2 * h)
    return {"perception": perception, "gru": gru, "fc_w": fc_w, "fc_b": fc_b}


# ----------------------------------------------------------------------------
# Pure-JAX reference (same math and bf16 matmul policy) for correctness check
# ----------------------------------------------------------------------------
def _bdot(a, w):
    return jnp.dot(a.astype(jnp.bfloat16), w.astype(jnp.bfloat16),
                   preferred_element_type=jnp.float32)


def reference_forward(obs, act, params, skill_dim, hidden_size):
    h_dim = hidden_size
    g = 3 * h_dim
    b = obs.shape[0]
    w1, b1, w2, b2 = params["perception"]
    emb = jnp.maximum(_bdot(obs, w1) + b1[0], 0.0)
    x1 = _bdot(emb, w2) + b2[0]
    x2 = act
    for layer in params["gru"]:
        gi = _bdot(x1, layer["w_ih_1"]) + _bdot(x2, layer["w_ih_2"]) + layer["b_ih"][0]
        whh = layer["w_hh"]
        bhh = layer["b_hh"][0]

        def run_dir(gi_d, whh_d, bhh_d, reverse):
            def step(h_prev, g_t):
                gh = _bdot(h_prev, whh_d) + bhh_d
                r = jax.nn.sigmoid(g_t[:, :h_dim] + gh[:, :h_dim])
                z = jax.nn.sigmoid(g_t[:, h_dim:2 * h_dim] + gh[:, h_dim:2 * h_dim])
                n = jnp.tanh(g_t[:, 2 * h_dim:] + r * gh[:, 2 * h_dim:])
                h_new = (1.0 - z) * n + z * h_prev
                return h_new, h_new

            g_tb = jnp.transpose(gi_d, (1, 0, 2))
            _, ys = jax.lax.scan(step, jnp.zeros((b, h_dim), jnp.float32), g_tb,
                                 reverse=reverse)
            return jnp.transpose(ys, (1, 0, 2))

        y_f = run_dir(gi[..., :g], whh[:h_dim, :g], bhh[:g], False)
        y_b = run_dir(gi[..., g:], whh[h_dim:, g:], bhh[g:], True)
        x1, x2 = y_f, y_b
    feat = jnp.concatenate([x1[:, -1], x2[:, 0]], axis=-1)
    y = _bdot(feat, params["fc_w"]) + params["fc_b"][0]
    mean = y[:, :skill_dim]
    std = jnp.exp(jnp.clip(y[:, skill_dim:], MIN_LOG_STD, MAX_LOG_STD))
    return mean, std


# ----------------------------------------------------------------------------
if __name__ == "__main__":
    B, T = 2, 8
    obs_dim, state_dim, act_dim, skill_dim, hidden_size = 16, 8, 4, 6, 128

    key = jax.random.PRNGKey(0)
    k_param, k_obs, k_act = jax.random.split(key, 3)

    params = make_params(k_param, obs_dim, state_dim, act_dim, skill_dim, hidden_size)
    obs = jax.random.normal(k_obs, (B, T, obs_dim), jnp.float32)
    act = jax.random.normal(k_act, (B, T, act_dim), jnp.float32)

    mean, std = skill_recognition_forward(
        obs, act, params, skill_dim=skill_dim, hidden_size=hidden_size, time_chunk=4)
    jax.block_until_ready((mean, std))

    assert mean.shape == (B, skill_dim) and std.shape == (B, skill_dim)
    assert bool(jnp.all(std > 0.0)) and bool(jnp.all(jnp.isfinite(mean)))

    ref_mean, ref_std = reference_forward(obs, act, params, skill_dim, hidden_size)
    np.testing.assert_allclose(np.asarray(mean), np.asarray(ref_mean), rtol=2e-2, atol=2e-2)
    np.testing.assert_allclose(np.asarray(std), np.asarray(ref_std), rtol=2e-2, atol=2e-2)

    print("KERNEL_OK")
</pallas_src>

<mosaic_0001>
module attributes {stable_mosaic.version = 11 : i64} {
  func.func @_perception_kernel(%arg0: i32, %arg1: memref<16x16xf32, #tpu.memory_space<vmem>>, %arg2: memref<16x128xbf16, #tpu.memory_space<vmem>>, %arg3: memref<1x128xf32, #tpu.memory_space<vmem>>, %arg4: memref<128x8xbf16, #tpu.memory_space<vmem>>, %arg5: memref<1x8xf32, #tpu.memory_space<vmem>>, %arg6: memref<16x8xf32, #tpu.memory_space<vmem>>) attributes {dimension_semantics = [#tpu.dimension_semantics<parallel>], iteration_bounds = array<i64: 1>, scalar_prefetch = 0 : i64, scratch_operands = 0 : i64, tpu.core_type = #tpu.core_type<tc>, window_params = [{transform_indices = @transform_0, window_bounds = array<i64: 16, 16>}, {pipeline_mode = #tpu.pipeline_mode<synchronous>, transform_indices = @transform_1, window_bounds = array<i64: 16, 128>}, {pipeline_mode = #tpu.pipeline_mode<synchronous>, transform_indices = @transform_2, window_bounds = array<i64: 1, 128>}, {pipeline_mode = #tpu.pipeline_mode<synchronous>, transform_indices = @transform_3, window_bounds = array<i64: 128, 8>}, {pipeline_mode = #tpu.pipeline_mode<synchronous>, transform_indices = @transform_4, window_bounds = array<i64: 1, 8>}, {transform_indices = @transform_5, window_bounds = array<i64: 16, 8>}]} {
    %c0 = arith.constant 0 : index
    %c0_0 = arith.constant 0 : index
    %0 = vector.load %arg1[%c0, %c0_0] : memref<16x16xf32, #tpu.memory_space<vmem>>, vector<16x16xf32>
    %1 = arith.truncf %0 : vector<16x16xf32> to vector<16x16xbf16>
    %c0_1 = arith.constant 0 : index
    %c0_2 = arith.constant 0 : index
    %2 = vector.load %arg2[%c0_1, %c0_2] : memref<16x128xbf16, #tpu.memory_space<vmem>>, vector<16x128xbf16>
    %cst = arith.constant dense<0.000000e+00> : vector<16x128xf32>
    %3 = tpu.matmul %1, %2, %cst {dimension_numbers = #tpu.dot_dimension_numbers<[1], [0], [0], [1], [0, 0, 1, 1], [], []>} : vector<16x16xbf16>, vector<16x128xbf16>, vector<16x128xf32> -> vector<16x128xf32>
    %c0_3 = arith.constant 0 : index
    %c0_4 = arith.constant 0 : index
    %4 = vector.load %arg3[%c0_3, %c0_4] : memref<1x128xf32, #tpu.memory_space<vmem>>, vector<1x128xf32>
    %5 = vector.broadcast %4 : vector<1x128xf32> to vector<16x128xf32>
    %6 = arith.addf %3, %5 : vector<16x128xf32>
    %cst_5 = arith.constant 0.000000e+00 : f32
    %7 = vector.broadcast %cst_5 : f32 to vector<16x128xf32>
    %8 = arith.maximumf %6, %7 : vector<16x128xf32>
    %9 = arith.truncf %8 : vector<16x128xf32> to vector<16x128xbf16>
    %c0_6 = arith.constant 0 : index
    %c0_7 = arith.constant 0 : index
    %10 = vector.load %arg4[%c0_6, %c0_7] : memref<128x8xbf16, #tpu.memory_space<vmem>>, vector<128x8xbf16>
    %cst_8 = arith.constant dense<0.000000e+00> : vector<16x8xf32>
    %11 = tpu.matmul %9, %10, %cst_8 {dimension_numbers = #tpu.dot_dimension_numbers<[1], [0], [0], [1], [0, 0, 1, 1], [], []>} : vector<16x128xbf16>, vector<128x8xbf16>, vector<16x8xf32> -> vector<16x8xf32>
    %c0_9 = arith.constant 0 : index
    %c0_10 = arith.constant 0 : index
    %12 = vector.load %arg5[%c0_9, %c0_10] : memref<1x8xf32, #tpu.memory_space<vmem>>, vector<1x8xf32>
    %13 = vector.broadcast %12 : vector<1x8xf32> to vector<16x8xf32>
    %14 = arith.addf %11, %13 : vector<16x8xf32>
    %c0_11 = arith.constant 0 : index
    %c0_12 = arith.constant 0 : index
    %15 = vector.load %arg6[%c0_11, %c0_12] : memref<16x8xf32, #tpu.memory_space<vmem>>, vector<16x8xf32>
    tpu.vector_store %arg6[%c0_11, %c0_12], %14 {strides = array<i32>} : memref<16x8xf32, #tpu.memory_space<vmem>>, vector<16x8xf32>,
    return
  }
  func.func @transform_0(%arg0: i32) -> (i32, i32) {
    %c0_i32 = arith.constant 0 : i32
    %c0_i32_0 = arith.constant 0 : i32
    return %arg0, %c0_i32 : i32, i32
  }
  func.func @transform_1(%arg0: i32) -> (i32, i32) {
    %c0_i32 = arith.constant 0 : i32
    %c0_i32_0 = arith.constant 0 : i32
    %c0_i32_1 = arith.constant 0 : i32
    return %c0_i32, %c0_i32_0 : i32, i32
  }
  func.func @transform_2(%arg0: i32) -> (i32, i32) {
    %c0_i32 = arith.constant 0 : i32
    %c0_i32_0 = arith.constant 0 : i32
    %c0_i32_1 = arith.constant 0 : i32
    return %c0_i32, %c0_i32_0 : i32, i32
  }
  func.func @transform_3(%arg0: i32) -> (i32, i32) {
    %c0_i32 = arith.constant 0 : i32
    %c0_i32_0 = arith.constant 0 : i32
    %c0_i32_1 = arith.constant 0 : i32
    return %c0_i32, %c0_i32_0 : i32, i32
  }
  func.func @transform_4(%arg0: i32) -> (i32, i32) {
    %c0_i32 = arith.constant 0 : i32
    %c0_i32_0 = arith.constant 0 : i32
    %c0_i32_1 = arith.constant 0 : i32
    return %c0_i32, %c0_i32_0 : i32, i32
  }
  func.func @transform_5(%arg0: i32) -> (i32, i32) {
    %c0_i32 = arith.constant 0 : i32
    %c0_i32_0 = arith.constant 0 : i32
    return %arg0, %c0_i32 : i32, i32
  }
}

module attributes {stable_mosaic.version = 11 : i64} {
  func.func @_gi_kernel(%arg0: i32, %arg1: memref<16x8xf32, #tpu.memory_space<vmem>>, %arg2: memref<16x4xf32, #tpu.memory_space<vmem>>, %arg3: memref<8x768xbf16, #tpu.memory_space<vmem>>, %arg4: memref<4x768xbf16, #tpu.memory_space<vmem>>, %arg5: memref<1x768xf32, #tpu.memory_space<vmem>>, %arg6: memref<16x384xf32, #tpu.memory_space<vmem>>, %arg7: memref<16x384xf32, #tpu.memory_space<vmem>>) attributes {dimension_semantics = [#tpu.dimension_semantics<parallel>], iteration_bounds = array<i64: 1>, scalar_prefetch = 0 : i64, scratch_operands = 0 : i64, tpu.core_type = #tpu.core_type<tc>, window_params = [{transform_indices = @transform_0, window_bounds = array<i64: 16, 8>}, {transform_indices = @transform_1, window_bounds = array<i64: 16, 4>}, {pipeline_mode = #tpu.pipeline_mode<synchronous>, transform_indices = @transform_2, window_bounds = array<i64: 8, 768>}, {pipeline_mode = #tpu.pipeline_mode<synchronous>, transform_indices = @transform_3, window_bounds = array<i64: 4, 768>}, {pipeline_mode = #tpu.pipeline_mode<synchronous>, transform_indices = @transform_4, window_bounds = array<i64: 1, 768>}, {transform_indices = @transform_5, window_bounds = array<i64: 16, 384>}, {transform_indices = @transform_6, window_bounds = array<i64: 16, 384>}]} {
    %c0 = arith.constant 0 : index
    %c0_0 = arith.constant 0 : index
    %0 = vector.load %arg1[%c0, %c0_0] : memref<16x8xf32, #tpu.memory_space<vmem>>, vector<16x8xf32>
    %1 = arith.truncf %0 : vector<16x8xf32> to vector<16x8xbf16>
    %c0_1 = arith.constant 0 : index
    %c0_2 = arith.constant 0 : index
    %2 = vector.load %arg3[%c0_1, %c0_2] : memref<8x768xbf16, #tpu.memory_space<vmem>>, vector<8x768xbf16>
    %cst = arith.constant dense<0.000000e+00> : vector<16x768xf32>
    %3 = tpu.matmul %1, %2, %cst {dimension_numbers = #tpu.dot_dimension_numbers<[1], [0], [0], [1], [0, 0, 1, 1], [], []>} : vector<16x8xbf16>, vector<8x768xbf16>, vector<16x768xf32> -> vector<16x768xf32>
    %c0_3 = arith.constant 0 : index
    %c0_4 = arith.constant 0 : index
    %4 = vector.load %arg2[%c0_3, %c0_4] : memref<16x4xf32, #tpu.memory_space<vmem>>, vector<16x4xf32>
    %5 = arith.truncf %4 : vector<16x4xf32> to vector<16x4xbf16>
    %c0_5 = arith.constant 0 : index
    %c0_6 = arith.constant 0 : index
    %6 = vector.load %arg4[%c0_5, %c0_6] : memref<4x768xbf16, #tpu.memory_space<vmem>>, vector<4x768xbf16>
    %cst_7 = arith.constant dense<0.000000e+00> : vector<16x768xf32>
    %7 = tpu.matmul %5, %6, %cst_7 {dimension_numbers = #tpu.dot_dimension_numbers<[1], [0], [0], [1], [0, 0, 1, 1], [], []>} : vector<16x4xbf16>, vector<4x768xbf16>, vector<16x768xf32> -> vector<16x768xf32>
    %8 = arith.addf %3, %7 : vector<16x768xf32>
    %c0_8 = arith.constant 0 : index
    %c0_9 = arith.constant 0 : index
    %9 = vector.load %arg5[%c0_8, %c0_9] : memref<1x768xf32, #tpu.memory_space<vmem>>, vector<1x768xf32>
    %10 = vector.broadcast %9 : vector<1x768xf32> to vector<16x768xf32>
    %11 = arith.addf %8, %10 : vector<16x768xf32>
    %12 = vector.extract_strided_slice %11 {offsets = [0, 0], sizes = [16, 384], strides = [1, 1]} : vector<16x768xf32> to vector<16x384xf32>
    %c0_10 = arith.constant 0 : index
    %c0_11 = arith.constant 0 : index
    %13 = vector.load %arg6[%c0_10, %c0_11] : memref<16x384xf32, #tpu.memory_space<vmem>>, vector<16x384xf32>
    tpu.vector_store %arg6[%c0_10, %c0_11], %12 {strides = array<i32>} : memref<16x384xf32, #tpu.memory_space<vmem>>, vector<16x384xf32>,
    %14 = vector.extract_strided_slice %11 {offsets = [0, 384], sizes = [16, 384], strides = [1, 1]} : vector<16x768xf32> to vector<16x384xf32>
    %c0_12 = arith.constant 0 : index
    %c0_13 = arith.constant 0 : index
    %15 = vector.load %arg7[%c0_12, %c0_13] : memref<16x384xf32, #tpu.memory_space<vmem>>, vector<16x384xf32>
    tpu.vector_store %arg7[%c0_12, %c0_13], %14 {strides = array<i32>} : memref<16x384xf32, #tpu.memory_space<vmem>>, vector<16x384xf32>,
    return
  }
  func.func @transform_0(%arg0: i32) -> (i32, i32) {
    %c0_i32 = arith.constant 0 : i32
    %c0_i32_0 = arith.constant 0 : i32
    return %arg0, %c0_i32 : i32, i32
  }
  func.func @transform_1(%arg0: i32) -> (i32, i32) {
    %c0_i32 = arith.constant 0 : i32
    %c0_i32_0 = arith.constant 0 : i32
    return %arg0, %c0_i32 : i32, i32
  }
  func.func @transform_2(%arg0: i32) -> (i32, i32) {
    %c0_i32 = arith.constant 0 : i32
    %c0_i32_0 = arith.constant 0 : i32
    %c0_i32_1 = arith.constant 0 : i32
    return %c0_i32, %c0_i32_0 : i32, i32
  }
  func.func @transform_3(%arg0: i32) -> (i32, i32) {
    %c0_i32 = arith.constant 0 : i32
    %c0_i32_0 = arith.constant 0 : i32
    %c0_i32_1 = arith.constant 0 : i32
    return %c0_i32, %c0_i32_0 : i32, i32
  }
  func.func @transform_4(%arg0: i32) -> (i32, i32) {
    %c0_i32 = arith.constant 0 : i32
    %c0_i32_0 = arith.constant 0 : i32
    %c0_i32_1 = arith.constant 0 : i32
    return %c0_i32, %c0_i32_0 : i32, i32
  }
  func.func @transform_5(%arg0: i32) -> (i32, i32) {
    %c0_i32 = arith.constant 0 : i32
    %c0_i32_0 = arith.constant 0 : i32
    return %arg0, %c0_i32 : i32, i32
  }
  func.func @transform_6(%arg0: i32) -> (i32, i32) {
    %c0_i32 = arith.constant 0 : i32
    %c0_i32_0 = arith.constant 0 : i32
    return %arg0, %c0_i32 : i32, i32
  }
}

module attributes {stable_mosaic.version = 11 : i64} {
  func.func @_gi_kernel(%arg0: i32, %arg1: memref<16x128xf32, #tpu.memory_space<vmem>>, %arg2: memref<16x128xf32, #tpu.memory_space<vmem>>, %arg3: memref<128x768xbf16, #tpu.memory_space<vmem>>, %arg4: memref<128x768xbf16, #tpu.memory_space<vmem>>, %arg5: memref<1x768xf32, #tpu.memory_space<vmem>>, %arg6: memref<16x384xf32, #tpu.memory_space<vmem>>, %arg7: memref<16x384xf32, #tpu.memory_space<vmem>>) attributes {dimension_semantics = [#tpu.dimension_semantics<parallel>], iteration_bounds = array<i64: 1>, scalar_prefetch = 0 : i64, scratch_operands = 0 : i64, tpu.core_type = #tpu.core_type<tc>, window_params = [{transform_indices = @transform_0, window_bounds = array<i64: 16, 128>}, {transform_indices = @transform_1, window_bounds = array<i64: 16, 128>}, {pipeline_mode = #tpu.pipeline_mode<synchronous>, transform_indices = @transform_2, window_bounds = array<i64: 128, 768>}, {pipeline_mode = #tpu.pipeline_mode<synchronous>, transform_indices = @transform_3, window_bounds = array<i64: 128, 768>}, {pipeline_mode = #tpu.pipeline_mode<synchronous>, transform_indices = @transform_4, window_bounds = array<i64: 1, 768>}, {transform_indices = @transform_5, window_bounds = array<i64: 16, 384>}, {transform_indices = @transform_6, window_bounds = array<i64: 16, 384>}]} {
    %c0 = arith.constant 0 : index
    %c0_0 = arith.constant 0 : index
    %0 = vector.load %arg1[%c0, %c0_0] : memref<16x128xf32, #tpu.memory_space<vmem>>, vector<16x128xf32>
    %1 = arith.truncf %0 : vector<16x128xf32> to vector<16x128xbf16>
    %c0_1 = arith.constant 0 : index
    %c0_2 = arith.constant 0 : index
    %2 = vector.load %arg3[%c0_1, %c0_2] : memref<128x768xbf16, #tpu.memory_space<vmem>>, vector<128x768xbf16>
    %cst = arith.constant dense<0.000000e+00> : vector<16x768xf32>
    %3 = tpu.matmul %1, %2, %cst {dimension_numbers = #tpu.dot_dimension_numbers<[1], [0], [0], [1], [0, 0, 1, 1], [], []>} : vector<16x128xbf16>, vector<128x768xbf16>, vector<16x768xf32> -> vector<16x768xf32>
    %c0_3 = arith.constant 0 : index
    %c0_4 = arith.constant 0 : index
    %4 = vector.load %arg2[%c0_3, %c0_4] : memref<16x128xf32, #tpu.memory_space<vmem>>, vector<16x128xf32>
    %5 = arith.truncf %4 : vector<16x128xf32> to vector<16x128xbf16>
    %c0_5 = arith.constant 0 : index
    %c0_6 = arith.constant 0 : index
    %6 = vector.load %arg4[%c0_5, %c0_6] : memref<128x768xbf16, #tpu.memory_space<vmem>>, vector<128x768xbf16>
    %cst_7 = arith.constant dense<0.000000e+00> : vector<16x768xf32>
    %7 = tpu.matmul %5, %6, %cst_7 {dimension_numbers = #tpu.dot_dimension_numbers<[1], [0], [0], [1], [0, 0, 1, 1], [], []>} : vector<16x128xbf16>, vector<128x768xbf16>, vector<16x768xf32> -> vector<16x768xf32>
    %8 = arith.addf %3, %7 : vector<16x768xf32>
    %c0_8 = arith.constant 0 : index
    %c0_9 = arith.constant 0 : index
    %9 = vector.load %arg5[%c0_8, %c0_9] : memref<1x768xf32, #tpu.memory_space<vmem>>, vector<1x768xf32>
    %10 = vector.broadcast %9 : vector<1x768xf32> to vector<16x768xf32>
    %11 = arith.addf %8, %10 : vector<16x768xf32>
    %12 = vector.extract_strided_slice %11 {offsets = [0, 0], sizes = [16, 384], strides = [1, 1]} : vector<16x768xf32> to vector<16x384xf32>
    %c0_10 = arith.constant 0 : index
    %c0_11 = arith.constant 0 : index
    %13 = vector.load %arg6[%c0_10, %c0_11] : memref<16x384xf32, #tpu.memory_space<vmem>>, vector<16x384xf32>
    tpu.vector_store %arg6[%c0_10, %c0_11], %12 {strides = array<i32>} : memref<16x384xf32, #tpu.memory_space<vmem>>, vector<16x384xf32>,
    %14 = vector.extract_strided_slice %11 {offsets = [0, 384], sizes = [16, 384], strides = [1, 1]} : vector<16x768xf32> to vector<16x384xf32>
    %c0_12 = arith.constant 0 : index
    %c0_13 = arith.constant 0 : index
    %15 = vector.load %arg7[%c0_12, %c0_13] : memref<16x384xf32, #tpu.memory_space<vmem>>, vector<16x384xf32>
    tpu.vector_store %arg7[%c0_12, %c0_13], %14 {strides = array<i32>} : memref<16x384xf32, #tpu.memory_space<vmem>>, vector<16x384xf32>,
    return
  }
  func.func @transform_0(%arg0: i32) -> (i32, i32) {
    %c0_i32 = arith.constant 0 : i32
    %c0_i32_0 = arith.constant 0 : i32
    return %arg0, %c0_i32 : i32, i32
  }
  func.func @transform_1(%arg0: i32) -> (i32, i32) {
    %c0_i32 = arith.constant 0 : i32
    %c0_i32_0 = arith.constant 0 : i32
    return %arg0, %c0_i32 : i32, i32
  }
  func.func @transform_2(%arg0: i32) -> (i32, i32) {
    %c0_i32 = arith.constant 0 : i32
    %c0_i32_0 = arith.constant 0 : i32
    %c0_i32_1 = arith.constant 0 : i32
    return %c0_i32, %c0_i32_0 : i32, i32
  }
  func.func @transform_3(%arg0: i32) -> (i32, i32) {
    %c0_i32 = arith.constant 0 : i32
    %c0_i32_0 = arith.constant 0 : i32
    %c0_i32_1 = arith.constant 0 : i32
    return %c0_i32, %c0_i32_0 : i32, i32
  }
  func.func @transform_4(%arg0: i32) -> (i32, i32) {
    %c0_i32 = arith.constant 0 : i32
    %c0_i32_0 = arith.constant 0 : i32
    %c0_i32_1 = arith.constant 0 : i32
    return %c0_i32, %c0_i32_0 : i32, i32
  }
  func.func @transform_5(%arg0: i32) -> (i32, i32) {
    %c0_i32 = arith.constant 0 : i32
    %c0_i32_0 = arith.constant 0 : i32
    return %arg0, %c0_i32 : i32, i32
  }
  func.func @transform_6(%arg0: i32) -> (i32, i32) {
    %c0_i32 = arith.constant 0 : i32
    %c0_i32_0 = arith.constant 0 : i32
    return %arg0, %c0_i32 : i32, i32
  }
}

module attributes {stable_mosaic.version = 11 : i64} {
  func.func @_gru_bidir_seq_kernel(%arg0: i32, %arg1: memref<4x2x384xf32, #tpu.memory_space<vmem>>, %arg2: memref<4x2x384xf32, #tpu.memory_space<vmem>>, %arg3: memref<256x768xbf16, #tpu.memory_space<vmem>>, %arg4: memref<1x768xf32, #tpu.memory_space<vmem>>, %arg5: memref<4x2x128xf32, #tpu.memory_space<vmem>>, %arg6: memref<4x2x128xf32, #tpu.memory_space<vmem>>, %arg7: memref<2x256xf32, #tpu.memory_space<vmem>>) attributes {dimension_semantics = [#tpu.dimension_semantics<arbitrary>], iteration_bounds = array<i64: 2>, scalar_prefetch = 0 : i64, scratch_operands = 1 : i64, tpu.core_type = #tpu.core_type<tc>, window_params = [{transform_indices = @transform_0, window_bounds = array<i64: 4, 2, 384>}, {transform_indices = @transform_1, window_bounds = array<i64: 4, 2, 384>}, {pipeline_mode = #tpu.pipeline_mode<synchronous>, transform_indices = @transform_2, window_bounds = array<i64: 256, 768>}, {pipeline_mode = #tpu.pipeline_mode<synchronous>, transform_indices = @transform_3, window_bounds = array<i64: 1, 768>}, {transform_indices = @transform_4, window_bounds = array<i64: 4, 2, 128>}, {transform_indices = @transform_5, window_bounds = array<i64: 4, 2, 128>}]} {
    %c0_i32 = arith.constant 0 : i32
    %0 = arith.cmpi eq, %arg0, %c0_i32 : i32
    %1 = arith.extui %0 : i1 to i32
    %c0_i32_0 = arith.constant 0 : i32
    %2 = arith.cmpi ne, %1, %c0_i32_0 : i32
    scf.if %2 {
      %cst_88 = arith.constant 0.000000e+00 : f32
      %321 = vector.broadcast %cst_88 : f32 to vector<2x256xf32>
      %c0_89 = arith.constant 0 : index
      %c0_90 = arith.constant 0 : index
      %322 = vector.load %arg7[%c0_89, %c0_90] : memref<2x256xf32, #tpu.memory_space<vmem>>, vector<2x256xf32>
      tpu.vector_store %arg7[%c0_89, %c0_90], %321 {strides = array<i32>} : memref<2x256xf32, #tpu.memory_space<vmem>>, vector<2x256xf32>,
    } else {
    }
    %c0 = arith.constant 0 : index
    %c0_1 = arith.constant 0 : index
    %3 = vector.load %arg3[%c0, %c0_1] : memref<256x768xbf16, #tpu.memory_space<vmem>>, vector<256x768xbf16>
    %c0_2 = arith.constant 0 : index
    %c0_3 = arith.constant 0 : index
    %4 = vector.load %arg4[%c0_2, %c0_3] : memref<1x768xf32, #tpu.memory_space<vmem>>, vector<1x768xf32>
    %c0_i32_4 = arith.constant 0 : i32
    %c0_5 = arith.constant 0 : index
    %c0_6 = arith.constant 0 : index
    %5 = vector.load %arg7[%c0_5, %c0_6] : memref<2x256xf32, #tpu.memory_space<vmem>>, vector<2x256xf32>
    %6 = arith.truncf %5 : vector<2x256xf32> to vector<2x256xbf16>
    %cst = arith.constant dense<0.000000e+00> : vector<2x768xf32>
    %7 = tpu.matmul %6, %3, %cst {dimension_numbers = #tpu.dot_dimension_numbers<[1], [0], [0], [1], [0, 0, 1, 1], [], []>} : vector<2x256xbf16>, vector<256x768xbf16>, vector<2x768xf32> -> vector<2x768xf32>
    %8 = vector.broadcast %4 : vector<1x768xf32> to vector<2x768xf32>
    %9 = arith.addf %7, %8 : vector<2x768xf32>
    %10 = arith.index_cast %c0_i32_4 : i32 to index
    %c0_7 = arith.constant 0 : index
    %c0_8 = arith.constant 0 : index
    %11 = vector.load %arg1[%10, %c0_7, %c0_8] : memref<4x2x384xf32, #tpu.memory_space<vmem>>, vector<1x2x384xf32>
    %12 = vector.shape_cast %11 : vector<1x2x384xf32> to vector<2x384xf32>
    %c3_i32 = arith.constant 3 : i32
    %13 = arith.subi %c3_i32, %c0_i32_4 : i32
    %14 = arith.index_cast %13 : i32 to index
    %c0_9 = arith.constant 0 : index
    %c0_10 = arith.constant 0 : index
    %15 = vector.load %arg2[%14, %c0_9, %c0_10] : memref<4x2x384xf32, #tpu.memory_space<vmem>>, vector<1x2x384xf32>
    %16 = vector.shape_cast %15 : vector<1x2x384xf32> to vector<2x384xf32>
    %17 = vector.extract_strided_slice %9 {offsets = [0, 0], sizes = [2, 384], strides = [1, 1]} : vector<2x768xf32> to vector<2x384xf32>
    %18 = vector.extract_strided_slice %5 {offsets = [0, 0], sizes = [2, 128], strides = [1, 1]} : vector<2x256xf32> to vector<2x128xf32>
    %19 = vector.extract_strided_slice %12 {offsets = [0, 0], sizes = [2, 128], strides = [1, 1]} : vector<2x384xf32> to vector<2x128xf32>
    %20 = vector.extract_strided_slice %17 {offsets = [0, 0], sizes = [2, 128], strides = [1, 1]} : vector<2x384xf32> to vector<2x128xf32>
    %21 = arith.addf %19, %20 : vector<2x128xf32>
    %22 = arith.negf %21 : vector<2x128xf32>
    %23 = math.exp %22 : vector<2x128xf32>
    %cst_11 = arith.constant 1.000000e+00 : f32
    %24 = vector.broadcast %cst_11 : f32 to vector<2x128xf32>
    %25 = arith.addf %24, %23 : vector<2x128xf32>
    %26 = arith.divf %24, %25 : vector<2x128xf32>
    %27 = vector.extract_strided_slice %12 {offsets = [0, 128], sizes = [2, 128], strides = [1, 1]} : vector<2x384xf32> to vector<2x128xf32>
    %28 = vector.extract_strided_slice %17 {offsets = [0, 128], sizes = [2, 128], strides = [1, 1]} : vector<2x384xf32> to vector<2x128xf32>
    %29 = arith.addf %27, %28 : vector<2x128xf32>
    %30 = arith.negf %29 : vector<2x128xf32>
    %31 = math.exp %30 : vector<2x128xf32>
    %cst_12 = arith.constant 1.000000e+00 : f32
    %32 = vector.broadcast %cst_12 : f32 to vector<2x128xf32>
    %33 = arith.addf %32, %31 : vector<2x128xf32>
    %34 = arith.divf %32, %33 : vector<2x128xf32>
    %35 = vector.extract_strided_slice %12 {offsets = [0, 256], sizes = [2, 128], strides = [1, 1]} : vector<2x384xf32> to vector<2x128xf32>
    %36 = vector.extract_strided_slice %17 {offsets = [0, 256], sizes = [2, 128], strides = [1, 1]} : vector<2x384xf32> to vector<2x128xf32>
    %37 = arith.mulf %26, %36 : vector<2x128xf32>
    %38 = arith.addf %35, %37 : vector<2x128xf32>
    %39 = math.tanh %38 : vector<2x128xf32>
    %cst_13 = arith.constant 1.000000e+00 : f32
    %40 = vector.broadcast %cst_13 : f32 to vector<2x128xf32>
    %41 = arith.subf %40, %34 : vector<2x128xf32>
    %42 = arith.mulf %41, %39 : vector<2x128xf32>
    %43 = arith.mulf %34, %18 : vector<2x128xf32>
    %44 = arith.addf %42, %43 : vector<2x128xf32>
    %45 = vector.extract_strided_slice %9 {offsets = [0, 384], sizes = [2, 384], strides = [1, 1]} : vector<2x768xf32> to vector<2x384xf32>
    %46 = vector.extract_strided_slice %5 {offsets = [0, 128], sizes = [2, 128], strides = [1, 1]} : vector<2x256xf32> to vector<2x128xf32>
    %47 = vector.extract_strided_slice %16 {offsets = [0, 0], sizes = [2, 128], strides = [1, 1]} : vector<2x384xf32> to vector<2x128xf32>
    %48 = vector.extract_strided_slice %45 {offsets = [0, 0], sizes = [2, 128], strides = [1, 1]} : vector<2x384xf32> to vector<2x128xf32>
    %49 = arith.addf %47, %48 : vector<2x128xf32>
    %50 = arith.negf %49 : vector<2x128xf32>
    %51 = math.exp %50 : vector<2x128xf32>
    %cst_14 = arith.constant 1.000000e+00 : f32
    %52 = vector.broadcast %cst_14 : f32 to vector<2x128xf32>
    %53 = arith.addf %52, %51 : vector<2x128xf32>
    %54 = arith.divf %52, %53 : vector<2x128xf32>
    %55 = vector.extract_strided_slice %16 {offsets = [0, 128], sizes = [2, 128], strides = [1, 1]} : vector<2x384xf32> to vector<2x128xf32>
    %56 = vector.extract_strided_slice %45 {offsets = [0, 128], sizes = [2, 128], strides = [1, 1]} : vector<2x384xf32> to vector<2x128xf32>
    %57 = arith.addf %55, %56 : vector<2x128xf32>
    %58 = arith.negf %57 : vector<2x128xf32>
    %59 = math.exp %58 : vector<2x128xf32>
    %cst_15 = arith.constant 1.000000e+00 : f32
    %60 = vector.broadcast %cst_15 : f32 to vector<2x128xf32>
    %61 = arith.addf %60, %59 : vector<2x128xf32>
    %62 = arith.divf %60, %61 : vector<2x128xf32>
    %63 = vector.extract_strided_slice %16 {offsets = [0, 256], sizes = [2, 128], strides = [1, 1]} : vector<2x384xf32> to vector<2x128xf32>
    %64 = vector.extract_strided_slice %45 {offsets = [0, 256], sizes = [2, 128], strides = [1, 1]} : vector<2x384xf32> to vector<2x128xf32>
    %65 = arith.mulf %54, %64 : vector<2x128xf32>
    %66 = arith.addf %63, %65 : vector<2x128xf32>
    %67 = math.tanh %66 : vector<2x128xf32>
    %cst_16 = arith.constant 1.000000e+00 : f32
    %68 = vector.broadcast %cst_16 : f32 to vector<2x128xf32>
    %69 = arith.subf %68, %62 : vector<2x128xf32>
    %70 = arith.mulf %69, %67 : vector<2x128xf32>
    %71 = arith.mulf %62, %46 : vector<2x128xf32>
    %72 = arith.addf %70, %71 : vector<2x128xf32>
    %73 = tpu.concatenate %44, %72 in 1 : vector<2x128xf32>, vector<2x128xf32> -> vector<2x256xf32>
    %c0_17 = arith.constant 0 : index
    %c0_18 = arith.constant 0 : index
    %74 = vector.load %arg7[%c0_17, %c0_18] : memref<2x256xf32, #tpu.memory_space<vmem>>, vector<2x256xf32>
    tpu.vector_store %arg7[%c0_17, %c0_18], %73 {strides = array<i32>} : memref<2x256xf32, #tpu.memory_space<vmem>>, vector<2x256xf32>,
    %75 = arith.index_cast %c0_i32_4 : i32 to index
    %c0_19 = arith.constant 0 : index
    %c0_20 = arith.constant 0 : index
    %76 = vector.load %arg5[%75, %c0_19, %c0_20] : memref<4x2x128xf32, #tpu.memory_space<vmem>>, vector<1x2x128xf32>
    %77 = vector.shape_cast %76 : vector<1x2x128xf32> to vector<2x128xf32>
    %78 = vector.shape_cast %44 : vector<2x128xf32> to vector<1x2x128xf32>
    tpu.vector_store %arg5[%75, %c0_19, %c0_20], %78 {strides = array<i32>} : memref<4x2x128xf32, #tpu.memory_space<vmem>>, vector<1x2x128xf32>,
    %c3_i32_21 = arith.constant 3 : i32
    %79 = arith.subi %c3_i32_21, %c0_i32_4 : i32
    %80 = arith.index_cast %79 : i32 to index
    %c0_22 = arith.constant 0 : index
    %c0_23 = arith.constant 0 : index
    %81 = vector.load %arg6[%80, %c0_22, %c0_23] : memref<4x2x128xf32, #tpu.memory_space<vmem>>, vector<1x2x128xf32>
    %82 = vector.shape_cast %81 : vector<1x2x128xf32> to vector<2x128xf32>
    %83 = vector.shape_cast %72 : vector<2x128xf32> to vector<1x2x128xf32>
    tpu.vector_store %arg6[%80, %c0_22, %c0_23], %83 {strides = array<i32>} : memref<4x2x128xf32, #tpu.memory_space<vmem>>, vector<1x2x128xf32>,
    %c1_i32 = arith.constant 1 : i32
    %c0_24 = arith.constant 0 : index
    %c0_25 = arith.constant 0 : index
    %84 = vector.load %arg7[%c0_24, %c0_25] : memref<2x256xf32, #tpu.memory_space<vmem>>, vector<2x256xf32>
    %85 = arith.truncf %84 : vector<2x256xf32> to vector<2x256xbf16>
    %cst_26 = arith.constant dense<0.000000e+00> : vector<2x768xf32>
    %86 = tpu.matmul %85, %3, %cst_26 {dimension_numbers = #tpu.dot_dimension_numbers<[1], [0], [0], [1], [0, 0, 1, 1], [], []>} : vector<2x256xbf16>, vector<256x768xbf16>, vector<2x768xf32> -> vector<2x768xf32>
    %87 = vector.broadcast %4 : vector<1x768xf32> to vector<2x768xf32>
    %88 = arith.addf %86, %87 : vector<2x768xf32>
    %89 = arith.index_cast %c1_i32 : i32 to index
    %c0_27 = arith.constant 0 : index
    %c0_28 = arith.constant 0 : index
    %90 = vector.load %arg1[%89, %c0_27, %c0_28] : memref<4x2x384xf32, #tpu.memory_space<vmem>>, vector<1x2x384xf32>
    %91 = vector.shape_cast %90 : vector<1x2x384xf32> to vector<2x384xf32>
    %c3_i32_29 = arith.constant 3 : i32
    %92 = arith.subi %c3_i32_29, %c1_i32 : i32
    %93 = arith.index_cast %92 : i32 to index
    %c0_30 = arith.constant 0 : index
    %c0_31 = arith.constant 0 : index
    %94 = vector.load %arg2[%93, %c0_30, %c0_31] : memref<4x2x384xf32, #tpu.memory_space<vmem>>, vector<1x2x384xf32>
    %95 = vector.shape_cast %94 : vector<1x2x384xf32> to vector<2x384xf32>
    %96 = vector.extract_strided_slice %88 {offsets = [0, 0], sizes = [2, 384], strides = [1, 1]} : vector<2x768xf32> to vector<2x384xf32>
    %97 = vector.extract_strided_slice %84 {offsets = [0, 0], sizes = [2, 128], strides = [1, 1]} : vector<2x256xf32> to vector<2x128xf32>
    %98 = vector.extract_strided_slice %91 {offsets = [0, 0], sizes = [2, 128], strides = [1, 1]} : vector<2x384xf32> to vector<2x128xf32>
    %99 = vector.extract_strided_slice %96 {offsets = [0, 0], sizes = [2, 128], strides = [1, 1]} : vector<2x384xf32> to vector<2x128xf32>
    %100 = arith.addf %98, %99 : vector<2x128xf32>
    %101 = arith.negf %100 : vector<2x128xf32>
    %102 = math.exp %101 : vector<2x128xf32>
    %cst_32 = arith.constant 1.000000e+00 : f32
    %103 = vector.broadcast %cst_32 : f32 to vector<2x128xf32>
    %104 = arith.addf %103, %102 : vector<2x128xf32>
    %105 = arith.divf %103, %104 : vector<2x128xf32>
    %106 = vector.extract_strided_slice %91 {offsets = [0, 128], sizes = [2, 128], strides = [1, 1]} : vector<2x384xf32> to vector<2x128xf32>
    %107 = vector.extract_strided_slice %96 {offsets = [0, 128], sizes = [2, 128], strides = [1, 1]} : vector<2x384xf32> to vector<2x128xf32>
    %108 = arith.addf %106, %107 : vector<2x128xf32>
    %109 = arith.negf %108 : vector<2x128xf32>
    %110 = math.exp %109 : vector<2x128xf32>
    %cst_33 = arith.constant 1.000000e+00 : f32
    %111 = vector.broadcast %cst_33 : f32 to vector<2x128xf32>
    %112 = arith.addf %111, %110 : vector<2x128xf32>
    %113 = arith.divf %111, %112 : vector<2x128xf32>
    %114 = vector.extract_strided_slice %91 {offsets = [0, 256], sizes = [2, 128], strides = [1, 1]} : vector<2x384xf32> to vector<2x128xf32>
    %115 = vector.extract_strided_slice %96 {offsets = [0, 256], sizes = [2, 128], strides = [1, 1]} : vector<2x384xf32> to vector<2x128xf32>
    %116 = arith.mulf %105, %115 : vector<2x128xf32>
    %117 = arith.addf %114, %116 : vector<2x128xf32>
    %118 = math.tanh %117 : vector<2x128xf32>
    %cst_34 = arith.constant 1.000000e+00 : f32
    %119 = vector.broadcast %cst_34 : f32 to vector<2x128xf32>
    %120 = arith.subf %119, %113 : vector<2x128xf32>
    %121 = arith.mulf %120, %118 : vector<2x128xf32>
    %122 = arith.mulf %113, %97 : vector<2x128xf32>
    %123 = arith.addf %121, %122 : vector<2x128xf32>
    %124 = vector.extract_strided_slice %88 {offsets = [0, 384], sizes = [2, 384], strides = [1, 1]} : vector<2x768xf32> to vector<2x384xf32>
    %125 = vector.extract_strided_slice %84 {offsets = [0, 128], sizes = [2, 128], strides = [1, 1]} : vector<2x256xf32> to vector<2x128xf32>
    %126 = vector.extract_strided_slice %95 {offsets = [0, 0], sizes = [2, 128], strides = [1, 1]} : vector<2x384xf32> to vector<2x128xf32>
    %127 = vector.extract_strided_slice %124 {offsets = [0, 0], sizes = [2, 128], strides = [1, 1]} : vector<2x384xf32> to vector<2x128xf32>
    %128 = arith.addf %126, %127 : vector<2x128xf32>
    %129 = arith.negf %128 : vector<2x128xf32>
    %130 = math.exp %129 : vector<2x128xf32>
    %cst_35 = arith.constant 1.000000e+00 : f32
    %131 = vector.broadcast %cst_35 : f32 to vector<2x128xf32>
    %132 = arith.addf %131, %130 : vector<2x128xf32>
    %133 = arith.divf %131, %132 : vector<2x128xf32>
    %134 = vector.extract_strided_slice %95 {offsets = [0, 128], sizes = [2, 128], strides = [1, 1]} : vector<2x384xf32> to vector<2x128xf32>
    %135 = vector.extract_strided_slice %124 {offsets = [0, 128], sizes = [2, 128], strides = [1, 1]} : vector<2x384xf32> to vector<2x128xf32>
    %136 = arith.addf %134, %135 : vector<2x128xf32>
    %137 = arith.negf %136 : vector<2x128xf32>
    %138 = math.exp %137 : vector<2x128xf32>
    %cst_36 = arith.constant 1.000000e+00 : f32
    %139 = vector.broadcast %cst_36 : f32 to vector<2x128xf32>
    %140 = arith.addf %139, %138 : vector<2x128xf32>
    %141 = arith.divf %139, %140 : vector<2x128xf32>
    %142 = vector.extract_strided_slice %95 {offsets = [0, 256], sizes = [2, 128], strides = [1, 1]} : vector<2x384xf32> to vector<2x128xf32>
    %143 = vector.extract_strided_slice %124 {offsets = [0, 256], sizes = [2, 128], strides = [1, 1]} : vector<2x384xf32> to vector<2x128xf32>
    %144 = arith.mulf %133, %143 : vector<2x128xf32>
    %145 = arith.addf %142, %144 : vector<2x128xf32>
    %146 = math.tanh %145 : vector<2x128xf32>
    %cst_37 = arith.constant 1.000000e+00 : f32
    %147 = vector.broadcast %cst_37 : f32 to vector<2x128xf32>
    %148 = arith.subf %147, %141 : vector<2x128xf32>
    %149 = arith.mulf %148, %146 : vector<2x128xf32>
    %150 = arith.mulf %141, %125 : vector<2x128xf32>
    %151 = arith.addf %149, %150 : vector<2x128xf32>
    %152 = tpu.concatenate %123, %151 in 1 : vector<2x128xf32>, vector<2x128xf32> -> vector<2x256xf32>
    %c0_38 = arith.constant 0 : index
    %c0_39 = arith.constant 0 : index
    %153 = vector.load %arg7[%c0_38, %c0_39] : memref<2x256xf32, #tpu.memory_space<vmem>>, vector<2x256xf32>
    tpu.vector_store %arg7[%c0_38, %c0_39], %152 {strides = array<i32>} : memref<2x256xf32, #tpu.memory_space<vmem>>, vector<2x256xf32>,
    %154 = arith.index_cast %c1_i32 : i32 to index
    %c0_40 = arith.constant 0 : index
    %c0_41 = arith.constant 0 : index
    %155 = vector.load %arg5[%154, %c0_40, %c0_41] : memref<4x2x128xf32, #tpu.memory_space<vmem>>, vector<1x2x128xf32>
    %156 = vector.shape_cast %155 : vector<1x2x128xf32> to vector<2x128xf32>
    %157 = vector.shape_cast %123 : vector<2x128xf32> to vector<1x2x128xf32>
    tpu.vector_store %arg5[%154, %c0_40, %c0_41], %157 {strides = array<i32>} : memref<4x2x128xf32, #tpu.memory_space<vmem>>, vector<1x2x128xf32>,
    %c3_i32_42 = arith.constant 3 : i32
    %158 = arith.subi %c3_i32_42, %c1_i32 : i32
    %159 = arith.index_cast %158 : i32 to index
    %c0_43 = arith.constant 0 : index
    %c0_44 = arith.constant 0 : index
    %160 = vector.load %arg6[%159, %c0_43, %c0_44] : memref<4x2x128xf32, #tpu.memory_space<vmem>>, vector<1x2x128xf32>
    %161 = vector.shape_cast %160 : vector<1x2x128xf32> to vector<2x128xf32>
    %162 = vector.shape_cast %151 : vector<2x128xf32> to vector<1x2x128xf32>
    tpu.vector_store %arg6[%159, %c0_43, %c0_44], %162 {strides = array<i32>} : memref<4x2x128xf32, #tpu.memory_space<vmem>>, vector<1x2x128xf32>,
    %c2_i32 = arith.constant 2 : i32
    %c0_45 = arith.constant 0 : index
    %c0_46 = arith.constant 0 : index
    %163 = vector.load %arg7[%c0_45, %c0_46] : memref<2x256xf32, #tpu.memory_space<vmem>>, vector<2x256xf32>
    %164 = arith.truncf %163 : vector<2x256xf32> to vector<2x256xbf16>
    %cst_47 = arith.constant dense<0.000000e+00> : vector<2x768xf32>
    %165 = tpu.matmul %164, %3, %cst_47 {dimension_numbers = #tpu.dot_dimension_numbers<[1], [0], [0], [1], [0, 0, 1, 1], [], []>} : vector<2x256xbf16>, vector<256x768xbf16>, vector<2x768xf32> -> vector<2x768xf32>
    %166 = vector.broadcast %4 : vector<1x768xf32> to vector<2x768xf32>
    %167 = arith.addf %165, %166 : vector<2x768xf32>
    %168 = arith.index_cast %c2_i32 : i32 to index
    %c0_48 = arith.constant 0 : index
    %c0_49 = arith.constant 0 : index
    %169 = vector.load %arg1[%168, %c0_48, %c0_49] : memref<4x2x384xf32, #tpu.memory_space<vmem>>, vector<1x2x384xf32>
    %170 = vector.shape_cast %169 : vector<1x2x384xf32> to vector<2x384xf32>
    %c3_i32_50 = arith.constant 3 : i32
    %171 = arith.subi %c3_i32_50, %c2_i32 : i32
    %172 = arith.index_cast %171 : i32 to index
    %c0_51 = arith.constant 0 : index
    %c0_52 = arith.constant 0 : index
    %173 = vector.load %arg2[%172, %c0_51, %c0_52] : memref<4x2x384xf32, #tpu.memory_space<vmem>>, vector<1x2x384xf32>
    %174 = vector.shape_cast %173 : vector<1x2x384xf32> to vector<2x384xf32>
    %175 = vector.extract_strided_slice %167 {offsets = [0, 0], sizes = [2, 384], strides = [1, 1]} : vector<2x768xf32> to vector<2x384xf32>
    %176 = vector.extract_strided_slice %163 {offsets = [0, 0], sizes = [2, 128], strides = [1, 1]} : vector<2x256xf32> to vector<2x128xf32>
    %177 = vector.extract_strided_slice %170 {offsets = [0, 0], sizes = [2, 128], strides = [1, 1]} : vector<2x384xf32> to vector<2x128xf32>
    %178 = vector.extract_strided_slice %175 {offsets = [0, 0], sizes = [2, 128], strides = [1, 1]} : vector<2x384xf32> to vector<2x128xf32>
    %179 = arith.addf %177, %178 : vector<2x128xf32>
    %180 = arith.negf %179 : vector<2x128xf32>
    %181 = math.exp %180 : vector<2x128xf32>
    %cst_53 = arith.constant 1.000000e+00 : f32
    %182 = vector.broadcast %cst_53 : f32 to vector<2x128xf32>
    %183 = arith.addf %182, %181 : vector<2x128xf32>
    %184 = arith.divf %182, %183 : vector<2x128xf32>
    %185 = vector.extract_strided_slice %170 {offsets = [0, 128], sizes = [2, 128], strides = [1, 1]} : vector<2x384xf32> to vector<2x128xf32>
    %186 = vector.extract_strided_slice %175 {offsets = [0, 128], sizes = [2, 128], strides = [1, 1]} : vector<2x384xf32> to vector<2x128xf32>
    %187 = arith.addf %185, %186 : vector<2x128xf32>
    %188 = arith.negf %187 : vector<2x128xf32>
    %189 = math.exp %188 : vector<2x128xf32>
    %cst_54 = arith.constant 1.000000e+00 : f32
    %190 = vector.broadcast %cst_54 : f32 to vector<2x128xf32>
    %191 = arith.addf %190, %189 : vector<2x128xf32>
    %192 = arith.divf %190, %191 : vector<2x128xf32>
    %193 = vector.extract_strided_slice %170 {offsets = [0, 256], sizes = [2, 128], strides = [1, 1]} : vector<2x384xf32> to vector<2x128xf32>
    %194 = vector.extract_strided_slice %175 {offsets = [0, 256], sizes = [2, 128], strides = [1, 1]} : vector<2x384xf32> to vector<2x128xf32>
    %195 = arith.mulf %184, %194 : vector<2x128xf32>
    %196 = arith.addf %193, %195 : vector<2x128xf32>
    %197 = math.tanh %196 : vector<2x128xf32>
    %cst_55 = arith.constant 1.000000e+00 : f32
    %198 = vector.broadcast %cst_55 : f32 to vector<2x128xf32>
    %199 = arith.subf %198, %192 : vector<2x128xf32>
    %200 = arith.mulf %199, %197 : vector<2x128xf32>
    %201 = arith.mulf %192, %176 : vector<2x128xf32>
    %202 = arith.addf %200, %201 : vector<2x128xf32>
    %203 = vector.extract_strided_slice %167 {offsets = [0, 384], sizes = [2, 384], strides = [1, 1]} : vector<2x768xf32> to vector<2x384xf32>
    %204 = vector.extract_strided_slice %163 {offsets = [0, 128], sizes = [2, 128], strides = [1, 1]} : vector<2x256xf32> to vector<2x128xf32>
    %205 = vector.extract_strided_slice %174 {offsets = [0, 0], sizes = [2, 128], strides = [1, 1]} : vector<2x384xf32> to vector<2x128xf32>
    %206 = vector.extract_strided_slice %203 {offsets = [0, 0], sizes = [2, 128], strides = [1, 1]} : vector<2x384xf32> to vector<2x128xf32>
    %207 = arith.addf %205, %206 : vector<2x128xf32>
    %208 = arith.negf %207 : vector<2x128xf32>
    %209 = math.exp %208 : vector<2x128xf32>
    %cst_56 = arith.constant 1.000000e+00 : f32
    %210 = vector.broadcast %cst_56 : f32 to vector<2x128xf32>
    %211 = arith.addf %210, %209 : vector<2x128xf32>
    %212 = arith.divf %210, %211 : vector<2x128xf32>
    %213 = vector.extract_strided_slice %174 {offsets = [0, 128], sizes = [2, 128], strides = [1, 1]} : vector<2x384xf32> to vector<2x128xf32>
    %214 = vector.extract_strided_slice %203 {offsets = [0, 128], sizes = [2, 128], strides = [1, 1]} : vector<2x384xf32> to vector<2x128xf32>
    %215 = arith.addf %213, %214 : vector<2x128xf32>
    %216 = arith.negf %215 : vector<2x128xf32>
    %217 = math.exp %216 : vector<2x128xf32>
    %cst_57 = arith.constant 1.000000e+00 : f32
    %218 = vector.broadcast %cst_57 : f32 to vector<2x128xf32>
    %219 = arith.addf %218, %217 : vector<2x128xf32>
    %220 = arith.divf %218, %219 : vector<2x128xf32>
    %221 = vector.extract_strided_slice %174 {offsets = [0, 256], sizes = [2, 128], strides = [1, 1]} : vector<2x384xf32> to vector<2x128xf32>
    %222 = vector.extract_strided_slice %203 {offsets = [0, 256], sizes = [2, 128], strides = [1, 1]} : vector<2x384xf32> to vector<2x128xf32>
    %223 = arith.mulf %212, %222 : vector<2x128xf32>
    %224 = arith.addf %221, %223 : vector<2x128xf32>
    %225 = math.tanh %224 : vector<2x128xf32>
    %cst_58 = arith.constant 1.000000e+00 : f32
    %226 = vector.broadcast %cst_58 : f32 to vector<2x128xf32>
    %227 = arith.subf %226, %220 : vector<2x128xf32>
    %228 = arith.mulf %227, %225 : vector<2x128xf32>
    %229 = arith.mulf %220, %204 : vector<2x128xf32>
    %230 = arith.addf %228, %229 : vector<2x128xf32>
    %231 = tpu.concatenate %202, %230 in 1 : vector<2x128xf32>, vector<2x128xf32> -> vector<2x256xf32>
    %c0_59 = arith.constant 0 : index
    %c0_60 = arith.constant 0 : index
    %232 = vector.load %arg7[%c0_59, %c0_60] : memref<2x256xf32, #tpu.memory_space<vmem>>, vector<2x256xf32>
    tpu.vector_store %arg7[%c0_59, %c0_60], %231 {strides = array<i32>} : memref<2x256xf32, #tpu.memory_space<vmem>>, vector<2x256xf32>,
    %233 = arith.index_cast %c2_i32 : i32 to index
    %c0_61 = arith.constant 0 : index
    %c0_62 = arith.constant 0 : index
    %234 = vector.load %arg5[%233, %c0_61, %c0_62] : memref<4x2x128xf32, #tpu.memory_space<vmem>>, vector<1x2x128xf32>
    %235 = vector.shape_cast %234 : vector<1x2x128xf32> to vector<2x128xf32>
    %236 = vector.shape_cast %202 : vector<2x128xf32> to vector<1x2x128xf32>
    tpu.vector_store %arg5[%233, %c0_61, %c0_62], %236 {strides = array<i32>} : memref<4x2x128xf32, #tpu.memory_space<vmem>>, vector<1x2x128xf32>,
    %c3_i32_63 = arith.constant 3 : i32
    %237 = arith.subi %c3_i32_63, %c2_i32 : i32
    %238 = arith.index_cast %237 : i32 to index
    %c0_64 = arith.constant 0 : index
    %c0_65 = arith.constant 0 : index
    %239 = vector.load %arg6[%238, %c0_64, %c0_65] : memref<4x2x128xf32, #tpu.memory_space<vmem>>, vector<1x2x128xf32>
    %240 = vector.shape_cast %239 : vector<1x2x128xf32> to vector<2x128xf32>
    %241 = vector.shape_cast %230 : vector<2x128xf32> to vector<1x2x128xf32>
    tpu.vector_store %arg6[%238, %c0_64, %c0_65], %241 {strides = array<i32>} : memref<4x2x128xf32, #tpu.memory_space<vmem>>, vector<1x2x128xf32>,
    %c3_i32_66 = arith.constant 3 : i32
    %c0_67 = arith.constant 0 : index
    %c0_68 = arith.constant 0 : index
    %242 = vector.load %arg7[%c0_67, %c0_68] : memref<2x256xf32, #tpu.memory_space<vmem>>, vector<2x256xf32>
    %243 = arith.truncf %242 : vector<2x256xf32> to vector<2x256xbf16>
    %cst_69 = arith.constant dense<0.000000e+00> : vector<2x768xf32>
    %244 = tpu.matmul %243, %3, %cst_69 {dimension_numbers = #tpu.dot_dimension_numbers<[1], [0], [0], [1], [0, 0, 1, 1], [], []>} : vector<2x256xbf16>, vector<256x768xbf16>, vector<2x768xf32> -> vector<2x768xf32>
    %245 = vector.broadcast %4 : vector<1x768xf32> to vector<2x768xf32>
    %246 = arith.addf %244, %245 : vector<2x768xf32>
    %247 = arith.index_cast %c3_i32_66 : i32 to index
    %c0_70 = arith.constant 0 : index
    %c0_71 = arith.constant 0 : index
    %248 = vector.load %arg1[%247, %c0_70, %c0_71] : memref<4x2x384xf32, #tpu.memory_space<vmem>>, vector<1x2x384xf32>
    %249 = vector.shape_cast %248 : vector<1x2x384xf32> to vector<2x384xf32>
    %c3_i32_72 = arith.constant 3 : i32
    %250 = arith.subi %c3_i32_72, %c3_i32_66 : i32
    %251 = arith.index_cast %250 : i32 to index
    %c0_73 = arith.constant 0 : index
    %c0_74 = arith.constant 0 : index
    %252 = vector.load %arg2[%251, %c0_73, %c0_74] : memref<4x2x384xf32, #tpu.memory_space<vmem>>, vector<1x2x384xf32>
    %253 = vector.shape_cast %252 : vector<1x2x384xf32> to vector<2x384xf32>
    %254 = vector.extract_strided_slice %246 {offsets = [0, 0], sizes = [2, 384], strides = [1, 1]} : vector<2x768xf32> to vector<2x384xf32>
    %255 = vector.extract_strided_slice %242 {offsets = [0, 0], sizes = [2, 128], strides = [1, 1]} : vector<2x256xf32> to vector<2x128xf32>
    %256 = vector.extract_strided_slice %249 {offsets = [0, 0], sizes = [2, 128], strides = [1, 1]} : vector<2x384xf32> to vector<2x128xf32>
    %257 = vector.extract_strided_slice %254 {offsets = [0, 0], sizes = [2, 128], strides = [1, 1]} : vector<2x384xf32> to vector<2x128xf32>
    %258 = arith.addf %256, %257 : vector<2x128xf32>
    %259 = arith.negf %258 : vector<2x128xf32>
    %260 = math.exp %259 : vector<2x128xf32>
    %cst_75 = arith.constant 1.000000e+00 : f32
    %261 = vector.broadcast %cst_75 : f32 to vector<2x128xf32>
    %262 = arith.addf %261, %260 : vector<2x128xf32>
    %263 = arith.divf %261, %262 : vector<2x128xf32>
    %264 = vector.extract_strided_slice %249 {offsets = [0, 128], sizes = [2, 128], strides = [1, 1]} : vector<2x384xf32> to vector<2x128xf32>
    %265 = vector.extract_strided_slice %254 {offsets = [0, 128], sizes = [2, 128], strides = [1, 1]} : vector<2x384xf32> to vector<2x128xf32>
    %266 = arith.addf %264, %265 : vector<2x128xf32>
    %267 = arith.negf %266 : vector<2x128xf32>
    %268 = math.exp %267 : vector<2x128xf32>
    %cst_76 = arith.constant 1.000000e+00 : f32
    %269 = vector.broadcast %cst_76 : f32 to vector<2x128xf32>
    %270 = arith.addf %269, %268 : vector<2x128xf32>
    %271 = arith.divf %269, %270 : vector<2x128xf32>
    %272 = vector.extract_strided_slice %249 {offsets = [0, 256], sizes = [2, 128], strides = [1, 1]} : vector<2x384xf32> to vector<2x128xf32>
    %273 = vector.extract_strided_slice %254 {offsets = [0, 256], sizes = [2, 128], strides = [1, 1]} : vector<2x384xf32> to vector<2x128xf32>
    %274 = arith.mulf %263, %273 : vector<2x128xf32>
    %275 = arith.addf %272, %274 : vector<2x128xf32>
    %276 = math.tanh %275 : vector<2x128xf32>
    %cst_77 = arith.constant 1.000000e+00 : f32
    %277 = vector.broadcast %cst_77 : f32 to vector<2x128xf32>
    %278 = arith.subf %277, %271 : vector<2x128xf32>
    %279 = arith.mulf %278, %276 : vector<2x128xf32>
    %280 = arith.mulf %271, %255 : vector<2x128xf32>
    %281 = arith.addf %279, %280 : vector<2x128xf32>
    %282 = vector.extract_strided_slice %246 {offsets = [0, 384], sizes = [2, 384], strides = [1, 1]} : vector<2x768xf32> to vector<2x384xf32>
    %283 = vector.extract_strided_slice %242 {offsets = [0, 128], sizes = [2, 128], strides = [1, 1]} : vector<2x256xf32> to vector<2x128xf32>
    %284 = vector.extract_strided_slice %253 {offsets = [0, 0], sizes = [2, 128], strides = [1, 1]} : vector<2x384xf32> to vector<2x128xf32>
    %285 = vector.extract_strided_slice %282 {offsets = [0, 0], sizes = [2, 128], strides = [1, 1]} : vector<2x384xf32> to vector<2x128xf32>
    %286 = arith.addf %284, %285 : vector<2x128xf32>
    %287 = arith.negf %286 : vector<2x128xf32>
    %288 = math.exp %287 : vector<2x128xf32>
    %cst_78 = arith.constant 1.000000e+00 : f32
    %289 = vector.broadcast %cst_78 : f32 to vector<2x128xf32>
    %290 = arith.addf %289, %288 : vector<2x128xf32>
    %291 = arith.divf %289, %290 : vector<2x128xf32>
    %292 = vector.extract_strided_slice %253 {offsets = [0, 128], sizes = [2, 128], strides = [1, 1]} : vector<2x384xf32> to vector<2x128xf32>
    %293 = vector.extract_strided_slice %282 {offsets = [0, 128], sizes = [2, 128], strides = [1, 1]} : vector<2x384xf32> to vector<2x128xf32>
    %294 = arith.addf %292, %293 : vector<2x128xf32>
    %295 = arith.negf %294 : vector<2x128xf32>
    %296 = math.exp %295 : vector<2x128xf32>
    %cst_79 = arith.constant 1.000000e+00 : f32
    %297 = vector.broadcast %cst_79 : f32 to vector<2x128xf32>
    %298 = arith.addf %297, %296 : vector<2x128xf32>
    %299 = arith.divf %297, %298 : vector<2x128xf32>
    %300 = vector.extract_strided_slice %253 {offsets = [0, 256], sizes = [2, 128], strides = [1, 1]} : vector<2x384xf32> to vector<2x128xf32>
    %301 = vector.extract_strided_slice %282 {offsets = [0, 256], sizes = [2, 128], strides = [1, 1]} : vector<2x384xf32> to vector<2x128xf32>
    %302 = arith.mulf %291, %301 : vector<2x128xf32>
    %303 = arith.addf %300, %302 : vector<2x128xf32>
    %304 = math.tanh %303 : vector<2x128xf32>
    %cst_80 = arith.constant 1.000000e+00 : f32
    %305 = vector.broadcast %cst_80 : f32 to vector<2x128xf32>
    %306 = arith.subf %305, %299 : vector<2x128xf32>
    %307 = arith.mulf %306, %304 : vector<2x128xf32>
    %308 = arith.mulf %299, %283 : vector<2x128xf32>
    %309 = arith.addf %307, %308 : vector<2x128xf32>
    %310 = tpu.concatenate %281, %309 in 1 : vector<2x128xf32>, vector<2x128xf32> -> vector<2x256xf32>
    %c0_81 = arith.constant 0 : index
    %c0_82 = arith.constant 0 : index
    %311 = vector.load %arg7[%c0_81, %c0_82] : memref<2x256xf32, #tpu.memory_space<vmem>>, vector<2x256xf32>
    tpu.vector_store %arg7[%c0_81, %c0_82], %310 {strides = array<i32>} : memref<2x256xf32, #tpu.memory_space<vmem>>, vector<2x256xf32>,
    %312 = arith.index_cast %c3_i32_66 : i32 to index
    %c0_83 = arith.constant 0 : index
    %c0_84 = arith.constant 0 : index
    %313 = vector.load %arg5[%312, %c0_83, %c0_84] : memref<4x2x128xf32, #tpu.memory_space<vmem>>, vector<1x2x128xf32>
    %314 = vector.shape_cast %313 : vector<1x2x128xf32> to vector<2x128xf32>
    %315 = vector.shape_cast %281 : vector<2x128xf32> to vector<1x2x128xf32>
    tpu.vector_store %arg5[%312, %c0_83, %c0_84], %315 {strides = array<i32>} : memref<4x2x128xf32, #tpu.memory_space<vmem>>, vector<1x2x128xf32>,
    %c3_i32_85 = arith.constant 3 : i32
    %316 = arith.subi %c3_i32_85, %c3_i32_66 : i32
    %317 = arith.index_cast %316 : i32 to index
    %c0_86 = arith.constant 0 : index
    %c0_87 = arith.constant 0 : index
    %318 = vector.load %arg6[%317, %c0_86, %c0_87] : memref<4x2x128xf32, #tpu.memory_space<vmem>>, vector<1x2x128xf32>
    %319 = vector.shape_cast %318 : vector<1x2x128xf32> to vector<2x128xf32>
    %320 = vector.shape_cast %309 : vector<2x128xf32> to vector<1x2x128xf32>
    tpu.vector_store %arg6[%317, %c0_86, %c0_87], %320 {strides = array<i32>} : memref<4x2x128xf32, #tpu.memory_space<vmem>>, vector<1x2x128xf32>,
    %c4_i32 = arith.constant 4 : i32
    return
  }
  func.func @transform_0(%arg0: i32) -> (i32, i32, i32) {
    %c0_i32 = arith.constant 0 : i32
    %c0_i32_0 = arith.constant 0 : i32
    %c0_i32_1 = arith.constant 0 : i32
    return %arg0, %c0_i32, %c0_i32_0 : i32, i32, i32
  }
  func.func @transform_1(%arg0: i32) -> (i32, i32, i32) {
    %c1_i32 = arith.constant 1 : i32
    %0 = arith.subi %c1_i32, %arg0 : i32
    %c0_i32 = arith.constant 0 : i32
    %c0_i32_0 = arith.constant 0 : i32
    %c0_i32_1 = arith.constant 0 : i32
    return %0, %c0_i32, %c0_i32_0 : i32, i32, i32
  }
  func.func @transform_2(%arg0: i32) -> (i32, i32) {
    %c0_i32 = arith.constant 0 : i32
    %c0_i32_0 = arith.constant 0 : i32
    %c0_i32_1 = arith.constant 0 : i32
    return %c0_i32, %c0_i32_0 : i32, i32
  }
  func.func @transform_3(%arg0: i32) -> (i32, i32) {
    %c0_i32 = arith.constant 0 : i32
    %c0_i32_0 = arith.constant 0 : i32
    %c0_i32_1 = arith.constant 0 : i32
    return %c0_i32, %c0_i32_0 : i32, i32
  }
  func.func @transform_4(%arg0: i32) -> (i32, i32, i32) {
    %c0_i32 = arith.constant 0 : i32
    %c0_i32_0 = arith.constant 0 : i32
    %c0_i32_1 = arith.constant 0 : i32
    return %arg0, %c0_i32, %c0_i32_0 : i32, i32, i32
  }
  func.func @transform_5(%arg0: i32) -> (i32, i32, i32) {
    %c1_i32 = arith.constant 1 : i32
    %0 = arith.subi %c1_i32, %arg0 : i32
    %c0_i32 = arith.constant 0 : i32
    %c0_i32_0 = arith.constant 0 : i32
    %c0_i32_1 = arith.constant 0 : i32
    return %0, %c0_i32, %c0_i32_0 : i32, i32, i32
  }
}

module attributes {stable_mosaic.version = 11 : i64} {
  func.func @_gru_bidir_seq_kernel(%arg0: i32, %arg1: memref<4x2x384xf32, #tpu.memory_space<vmem>>, %arg2: memref<4x2x384xf32, #tpu.memory_space<vmem>>, %arg3: memref<256x768xbf16, #tpu.memory_space<vmem>>, %arg4: memref<1x768xf32, #tpu.memory_space<vmem>>, %arg5: memref<4x2x128xf32, #tpu.memory_space<vmem>>, %arg6: memref<4x2x128xf32, #tpu.memory_space<vmem>>, %arg7: memref<2x256xf32, #tpu.memory_space<vmem>>) attributes {dimension_semantics = [#tpu.dimension_semantics<arbitrary>], iteration_bounds = array<i64: 2>, scalar_prefetch = 0 : i64, scratch_operands = 1 : i64, tpu.core_type = #tpu.core_type<tc>, window_params = [{transform_indices = @transform_0, window_bounds = array<i64: 4, 2, 384>}, {transform_indices = @transform_1, window_bounds = array<i64: 4, 2, 384>}, {pipeline_mode = #tpu.pipeline_mode<synchronous>, transform_indices = @transform_2, window_bounds = array<i64: 256, 768>}, {pipeline_mode = #tpu.pipeline_mode<synchronous>, transform_indices = @transform_3, window_bounds = array<i64: 1, 768>}, {transform_indices = @transform_4, window_bounds = array<i64: 4, 2, 128>}, {transform_indices = @transform_5, window_bounds = array<i64: 4, 2, 128>}]} {
    %c0_i32 = arith.constant 0 : i32
    %0 = arith.cmpi eq, %arg0, %c0_i32 : i32
    %1 = arith.extui %0 : i1 to i32
    %c0_i32_0 = arith.constant 0 : i32
    %2 = arith.cmpi ne, %1, %c0_i32_0 : i32
    scf.if %2 {
      %cst_88 = arith.constant 0.000000e+00 : f32
      %321 = vector.broadcast %cst_88 : f32 to vector<2x256xf32>
      %c0_89 = arith.constant 0 : index
      %c0_90 = arith.constant 0 : index
      %322 = vector.load %arg7[%c0_89, %c0_90] : memref<2x256xf32, #tpu.memory_space<vmem>>, vector<2x256xf32>
      tpu.vector_store %arg7[%c0_89, %c0_90], %321 {strides = array<i32>} : memref<2x256xf32, #tpu.memory_space<vmem>>, vector<2x256xf32>,
    } else {
    }
    %c0 = arith.constant 0 : index
    %c0_1 = arith.constant 0 : index
    %3 = vector.load %arg3[%c0, %c0_1] : memref<256x768xbf16, #tpu.memory_space<vmem>>, vector<256x768xbf16>
    %c0_2 = arith.constant 0 : index
    %c0_3 = arith.constant 0 : index
    %4 = vector.load %arg4[%c0_2, %c0_3] : memref<1x768xf32, #tpu.memory_space<vmem>>, vector<1x768xf32>
    %c0_i32_4 = arith.constant 0 : i32
    %c0_5 = arith.constant 0 : index
    %c0_6 = arith.constant 0 : index
    %5 = vector.load %arg7[%c0_5, %c0_6] : memref<2x256xf32, #tpu.memory_space<vmem>>, vector<2x256xf32>
    %6 = arith.truncf %5 : vector<2x256xf32> to vector<2x256xbf16>
    %cst = arith.constant dense<0.000000e+00> : vector<2x768xf32>
    %7 = tpu.matmul %6, %3, %cst {dimension_numbers = #tpu.dot_dimension_numbers<[1], [0], [0], [1], [0, 0, 1, 1], [], []>} : vector<2x256xbf16>, vector<256x768xbf16>, vector<2x768xf32> -> vector<2x768xf32>
    %8 = vector.broadcast %4 : vector<1x768xf32> to vector<2x768xf32>
    %9 = arith.addf %7, %8 : vector<2x768xf32>
    %10 = arith.index_cast %c0_i32_4 : i32 to index
    %c0_7 = arith.constant 0 : index
    %c0_8 = arith.constant 0 : index
    %11 = vector.load %arg1[%10, %c0_7, %c0_8] : memref<4x2x384xf32, #tpu.memory_space<vmem>>, vector<1x2x384xf32>
    %12 = vector.shape_cast %11 : vector<1x2x384xf32> to vector<2x384xf32>
    %c3_i32 = arith.constant 3 : i32
    %13 = arith.subi %c3_i32, %c0_i32_4 : i32
    %14 = arith.index_cast %13 : i32 to index
    %c0_9 = arith.constant 0 : index
    %c0_10 = arith.constant 0 : index
    %15 = vector.load %arg2[%14, %c0_9, %c0_10] : memref<4x2x384xf32, #tpu.memory_space<vmem>>, vector<1x2x384xf32>
    %16 = vector.shape_cast %15 : vector<1x2x384xf32> to vector<2x384xf32>
    %17 = vector.extract_strided_slice %9 {offsets = [0, 0], sizes = [2, 384], strides = [1, 1]} : vector<2x768xf32> to vector<2x384xf32>
    %18 = vector.extract_strided_slice %5 {offsets = [0, 0], sizes = [2, 128], strides = [1, 1]} : vector<2x256xf32> to vector<2x128xf32>
    %19 = vector.extract_strided_slice %12 {offsets = [0, 0], sizes = [2, 128], strides = [1, 1]} : vector<2x384xf32> to vector<2x128xf32>
    %20 = vector.extract_strided_slice %17 {offsets = [0, 0], sizes = [2, 128], strides = [1, 1]} : vector<2x384xf32> to vector<2x128xf32>
    %21 = arith.addf %19, %20 : vector<2x128xf32>
    %22 = arith.negf %21 : vector<2x128xf32>
    %23 = math.exp %22 : vector<2x128xf32>
    %cst_11 = arith.constant 1.000000e+00 : f32
    %24 = vector.broadcast %cst_11 : f32 to vector<2x128xf32>
    %25 = arith.addf %24, %23 : vector<2x128xf32>
    %26 = arith.divf %24, %25 : vector<2x128xf32>
    %27 = vector.extract_strided_slice %12 {offsets = [0, 128], sizes = [2, 128], strides = [1, 1]} : vector<2x384xf32> to vector<2x128xf32>
    %28 = vector.extract_strided_slice %17 {offsets = [0, 128], sizes = [2, 128], strides = [1, 1]} : vector<2x384xf32> to vector<2x128xf32>
    %29 = arith.addf %27, %28 : vector<2x128xf32>
    %30 = arith.negf %29 : vector<2x128xf32>
    %31 = math.exp %30 : vector<2x128xf32>
    %cst_12 = arith.constant 1.000000e+00 : f32
    %32 = vector.broadcast %cst_12 : f32 to vector<2x128xf32>
    %33 = arith.addf %32, %31 : vector<2x128xf32>
    %34 = arith.divf %32, %33 : vector<2x128xf32>
    %35 = vector.extract_strided_slice %12 {offsets = [0, 256], sizes = [2, 128], strides = [1, 1]} : vector<2x384xf32> to vector<2x128xf32>
    %36 = vector.extract_strided_slice %17 {offsets = [0, 256], sizes = [2, 128], strides = [1, 1]} : vector<2x384xf32> to vector<2x128xf32>
    %37 = arith.mulf %26, %36 : vector<2x128xf32>
    %38 = arith.addf %35, %37 : vector<2x128xf32>
    %39 = math.tanh %38 : vector<2x128xf32>
    %cst_13 = arith.constant 1.000000e+00 : f32
    %40 = vector.broadcast %cst_13 : f32 to vector<2x128xf32>
    %41 = arith.subf %40, %34 : vector<2x128xf32>
    %42 = arith.mulf %41, %39 : vector<2x128xf32>
    %43 = arith.mulf %34, %18 : vector<2x128xf32>
    %44 = arith.addf %42, %43 : vector<2x128xf32>
    %45 = vector.extract_strided_slice %9 {offsets = [0, 384], sizes = [2, 384], strides = [1, 1]} : vector<2x768xf32> to vector<2x384xf32>
    %46 = vector.extract_strided_slice %5 {offsets = [0, 128], sizes = [2, 128], strides = [1, 1]} : vector<2x256xf32> to vector<2x128xf32>
    %47 = vector.extract_strided_slice %16 {offsets = [0, 0], sizes = [2, 128], strides = [1, 1]} : vector<2x384xf32> to vector<2x128xf32>
    %48 = vector.extract_strided_slice %45 {offsets = [0, 0], sizes = [2, 128], strides = [1, 1]} : vector<2x384xf32> to vector<2x128xf32>
    %49 = arith.addf %47, %48 : vector<2x128xf32>
    %50 = arith.negf %49 : vector<2x128xf32>
    %51 = math.exp %50 : vector<2x128xf32>
    %cst_14 = arith.constant 1.000000e+00 : f32
    %52 = vector.broadcast %cst_14 : f32 to vector<2x128xf32>
    %53 = arith.addf %52, %51 : vector<2x128xf32>
    %54 = arith.divf %52, %53 : vector<2x128xf32>
    %55 = vector.extract_strided_slice %16 {offsets = [0, 128], sizes = [2, 128], strides = [1, 1]} : vector<2x384xf32> to vector<2x128xf32>
    %56 = vector.extract_strided_slice %45 {offsets = [0, 128], sizes = [2, 128], strides = [1, 1]} : vector<2x384xf32> to vector<2x128xf32>
    %57 = arith.addf %55, %56 : vector<2x128xf32>
    %58 = arith.negf %57 : vector<2x128xf32>
    %59 = math.exp %58 : vector<2x128xf32>
    %cst_15 = arith.constant 1.000000e+00 : f32
    %60 = vector.broadcast %cst_15 : f32 to vector<2x128xf32>
    %61 = arith.addf %60, %59 : vector<2x128xf32>
    %62 = arith.divf %60, %61 : vector<2x128xf32>
    %63 = vector.extract_strided_slice %16 {offsets = [0, 256], sizes = [2, 128], strides = [1, 1]} : vector<2x384xf32> to vector<2x128xf32>
    %64 = vector.extract_strided_slice %45 {offsets = [0, 256], sizes = [2, 128], strides = [1, 1]} : vector<2x384xf32> to vector<2x128xf32>
    %65 = arith.mulf %54, %64 : vector<2x128xf32>
    %66 = arith.addf %63, %65 : vector<2x128xf32>
    %67 = math.tanh %66 : vector<2x128xf32>
    %cst_16 = arith.constant 1.000000e+00 : f32
    %68 = vector.broadcast %cst_16 : f32 to vector<2x128xf32>
    %69 = arith.subf %68, %62 : vector<2x128xf32>
    %70 = arith.mulf %69, %67 : vector<2x128xf32>
    %71 = arith.mulf %62, %46 : vector<2x128xf32>
    %72 = arith.addf %70, %71 : vector<2x128xf32>
    %73 = tpu.concatenate %44, %72 in 1 : vector<2x128xf32>, vector<2x128xf32> -> vector<2x256xf32>
    %c0_17 = arith.constant 0 : index
    %c0_18 = arith.constant 0 : index
    %74 = vector.load %arg7[%c0_17, %c0_18] : memref<2x256xf32, #tpu.memory_space<vmem>>, vector<2x256xf32>
    tpu.vector_store %arg7[%c0_17, %c0_18], %73 {strides = array<i32>} : memref<2x256xf32, #tpu.memory_space<vmem>>, vector<2x256xf32>,
    %75 = arith.index_cast %c0_i32_4 : i32 to index
    %c0_19 = arith.constant 0 : index
    %c0_20 = arith.constant 0 : index
    %76 = vector.load %arg5[%75, %c0_19, %c0_20] : memref<4x2x128xf32, #tpu.memory_space<vmem>>, vector<1x2x128xf32>
    %77 = vector.shape_cast %76 : vector<1x2x128xf32> to vector<2x128xf32>
    %78 = vector.shape_cast %44 : vector<2x128xf32> to vector<1x2x128xf32>
    tpu.vector_store %arg5[%75, %c0_19, %c0_20], %78 {strides = array<i32>} : memref<4x2x128xf32, #tpu.memory_space<vmem>>, vector<1x2x128xf32>,
    %c3_i32_21 = arith.constant 3 : i32
    %79 = arith.subi %c3_i32_21, %c0_i32_4 : i32
    %80 = arith.index_cast %79 : i32 to index
    %c0_22 = arith.constant 0 : index
    %c0_23 = arith.constant 0 : index
    %81 = vector.load %arg6[%80, %c0_22, %c0_23] : memref<4x2x128xf32, #tpu.memory_space<vmem>>, vector<1x2x128xf32>
    %82 = vector.shape_cast %81 : vector<1x2x128xf32> to vector<2x128xf32>
    %83 = vector.shape_cast %72 : vector<2x128xf32> to vector<1x2x128xf32>
    tpu.vector_store %arg6[%80, %c0_22, %c0_23], %83 {strides = array<i32>} : memref<4x2x128xf32, #tpu.memory_space<vmem>>, vector<1x2x128xf32>,
    %c1_i32 = arith.constant 1 : i32
    %c0_24 = arith.constant 0 : index
    %c0_25 = arith.constant 0 : index
    %84 = vector.load %arg7[%c0_24, %c0_25] : memref<2x256xf32, #tpu.memory_space<vmem>>, vector<2x256xf32>
    %85 = arith.truncf %84 : vector<2x256xf32> to vector<2x256xbf16>
    %cst_26 = arith.constant dense<0.000000e+00> : vector<2x768xf32>
    %86 = tpu.matmul %85, %3, %cst_26 {dimension_numbers = #tpu.dot_dimension_numbers<[1], [0], [0], [1], [0, 0, 1, 1], [], []>} : vector<2x256xbf16>, vector<256x768xbf16>, vector<2x768xf32> -> vector<2x768xf32>
    %87 = vector.broadcast %4 : vector<1x768xf32> to vector<2x768xf32>
    %88 = arith.addf %86, %87 : vector<2x768xf32>
    %89 = arith.index_cast %c1_i32 : i32 to index
    %c0_27 = arith.constant 0 : index
    %c0_28 = arith.constant 0 : index
    %90 = vector.load %arg1[%89, %c0_27, %c0_28] : memref<4x2x384xf32, #tpu.memory_space<vmem>>, vector<1x2x384xf32>
    %91 = vector.shape_cast %90 : vector<1x2x384xf32> to vector<2x384xf32>
    %c3_i32_29 = arith.constant 3 : i32
    %92 = arith.subi %c3_i32_29, %c1_i32 : i32
    %93 = arith.index_cast %92 : i32 to index
    %c0_30 = arith.constant 0 : index
    %c0_31 = arith.constant 0 : index
    %94 = vector.load %arg2[%93, %c0_30, %c0_31] : memref<4x2x384xf32, #tpu.memory_space<vmem>>, vector<1x2x384xf32>
    %95 = vector.shape_cast %94 : vector<1x2x384xf32> to vector<2x384xf32>
    %96 = vector.extract_strided_slice %88 {offsets = [0, 0], sizes = [2, 384], strides = [1, 1]} : vector<2x768xf32> to vector<2x384xf32>
    %97 = vector.extract_strided_slice %84 {offsets = [0, 0], sizes = [2, 128], strides = [1, 1]} : vector<2x256xf32> to vector<2x128xf32>
    %98 = vector.extract_strided_slice %91 {offsets = [0, 0], sizes = [2, 128], strides = [1, 1]} : vector<2x384xf32> to vector<2x128xf32>
    %99 = vector.extract_strided_slice %96 {offsets = [0, 0], sizes = [2, 128], strides = [1, 1]} : vector<2x384xf32> to vector<2x128xf32>
    %100 = arith.addf %98, %99 : vector<2x128xf32>
    %101 = arith.negf %100 : vector<2x128xf32>
    %102 = math.exp %101 : vector<2x128xf32>
    %cst_32 = arith.constant 1.000000e+00 : f32
    %103 = vector.broadcast %cst_32 : f32 to vector<2x128xf32>
    %104 = arith.addf %103, %102 : vector<2x128xf32>
    %105 = arith.divf %103, %104 : vector<2x128xf32>
    %106 = vector.extract_strided_slice %91 {offsets = [0, 128], sizes = [2, 128], strides = [1, 1]} : vector<2x384xf32> to vector<2x128xf32>
    %107 = vector.extract_strided_slice %96 {offsets = [0, 128], sizes = [2, 128], strides = [1, 1]} : vector<2x384xf32> to vector<2x128xf32>
    %108 = arith.addf %106, %107 : vector<2x128xf32>
    %109 = arith.negf %108 : vector<2x128xf32>
    %110 = math.exp %109 : vector<2x128xf32>
    %cst_33 = arith.constant 1.000000e+00 : f32
    %111 = vector.broadcast %cst_33 : f32 to vector<2x128xf32>
    %112 = arith.addf %111, %110 : vector<2x128xf32>
    %113 = arith.divf %111, %112 : vector<2x128xf32>
    %114 = vector.extract_strided_slice %91 {offsets = [0, 256], sizes = [2, 128], strides = [1, 1]} : vector<2x384xf32> to vector<2x128xf32>
    %115 = vector.extract_strided_slice %96 {offsets = [0, 256], sizes = [2, 128], strides = [1, 1]} : vector<2x384xf32> to vector<2x128xf32>
    %116 = arith.mulf %105, %115 : vector<2x128xf32>
    %117 = arith.addf %114, %116 : vector<2x128xf32>
    %118 = math.tanh %117 : vector<2x128xf32>
    %cst_34 = arith.constant 1.000000e+00 : f32
    %119 = vector.broadcast %cst_34 : f32 to vector<2x128xf32>
    %120 = arith.subf %119, %113 : vector<2x128xf32>
    %121 = arith.mulf %120, %118 : vector<2x128xf32>
    %122 = arith.mulf %113, %97 : vector<2x128xf32>
    %123 = arith.addf %121, %122 : vector<2x128xf32>
    %124 = vector.extract_strided_slice %88 {offsets = [0, 384], sizes = [2, 384], strides = [1, 1]} : vector<2x768xf32> to vector<2x384xf32>
    %125 = vector.extract_strided_slice %84 {offsets = [0, 128], sizes = [2, 128], strides = [1, 1]} : vector<2x256xf32> to vector<2x128xf32>
    %126 = vector.extract_strided_slice %95 {offsets = [0, 0], sizes = [2, 128], strides = [1, 1]} : vector<2x384xf32> to vector<2x128xf32>
    %127 = vector.extract_strided_slice %124 {offsets = [0, 0], sizes = [2, 128], strides = [1, 1]} : vector<2x384xf32> to vector<2x128xf32>
    %128 = arith.addf %126, %127 : vector<2x128xf32>
    %129 = arith.negf %128 : vector<2x128xf32>
    %130 = math.exp %129 : vector<2x128xf32>
    %cst_35 = arith.constant 1.000000e+00 : f32
    %131 = vector.broadcast %cst_35 : f32 to vector<2x128xf32>
    %132 = arith.addf %131, %130 : vector<2x128xf32>
    %133 = arith.divf %131, %132 : vector<2x128xf32>
    %134 = vector.extract_strided_slice %95 {offsets = [0, 128], sizes = [2, 128], strides = [1, 1]} : vector<2x384xf32> to vector<2x128xf32>
    %135 = vector.extract_strided_slice %124 {offsets = [0, 128], sizes = [2, 128], strides = [1, 1]} : vector<2x384xf32> to vector<2x128xf32>
    %136 = arith.addf %134, %135 : vector<2x128xf32>
    %137 = arith.negf %136 : vector<2x128xf32>
    %138 = math.exp %137 : vector<2x128xf32>
    %cst_36 = arith.constant 1.000000e+00 : f32
    %139 = vector.broadcast %cst_36 : f32 to vector<2x128xf32>
    %140 = arith.addf %139, %138 : vector<2x128xf32>
    %141 = arith.divf %139, %140 : vector<2x128xf32>
    %142 = vector.extract_strided_slice %95 {offsets = [0, 256], sizes = [2, 128], strides = [1, 1]} : vector<2x384xf32> to vector<2x128xf32>
    %143 = vector.extract_strided_slice %124 {offsets = [0, 256], sizes = [2, 128], strides = [1, 1]} : vector<2x384xf32> to vector<2x128xf32>
    %144 = arith.mulf %133, %143 : vector<2x128xf32>
    %145 = arith.addf %142, %144 : vector<2x128xf32>
    %146 = math.tanh %145 : vector<2x128xf32>
    %cst_37 = arith.constant 1.000000e+00 : f32
    %147 = vector.broadcast %cst_37 : f32 to vector<2x128xf32>
    %148 = arith.subf %147, %141 : vector<2x128xf32>
    %149 = arith.mulf %148, %146 : vector<2x128xf32>
    %150 = arith.mulf %141, %125 : vector<2x128xf32>
    %151 = arith.addf %149, %150 : vector<2x128xf32>
    %152 = tpu.concatenate %123, %151 in 1 : vector<2x128xf32>, vector<2x128xf32> -> vector<2x256xf32>
    %c0_38 = arith.constant 0 : index
    %c0_39 = arith.constant 0 : index
    %153 = vector.load %arg7[%c0_38, %c0_39] : memref<2x256xf32, #tpu.memory_space<vmem>>, vector<2x256xf32>
    tpu.vector_store %arg7[%c0_38, %c0_39], %152 {strides = array<i32>} : memref<2x256xf32, #tpu.memory_space<vmem>>, vector<2x256xf32>,
    %154 = arith.index_cast %c1_i32 : i32 to index
    %c0_40 = arith.constant 0 : index
    %c0_41 = arith.constant 0 : index
    %155 = vector.load %arg5[%154, %c0_40, %c0_41] : memref<4x2x128xf32, #tpu.memory_space<vmem>>, vector<1x2x128xf32>
    %156 = vector.shape_cast %155 : vector<1x2x128xf32> to vector<2x128xf32>
    %157 = vector.shape_cast %123 : vector<2x128xf32> to vector<1x2x128xf32>
    tpu.vector_store %arg5[%154, %c0_40, %c0_41], %157 {strides = array<i32>} : memref<4x2x128xf32, #tpu.memory_space<vmem>>, vector<1x2x128xf32>,
    %c3_i32_42 = arith.constant 3 : i32
    %158 = arith.subi %c3_i32_42, %c1_i32 : i32
    %159 = arith.index_cast %158 : i32 to index
    %c0_43 = arith.constant 0 : index
    %c0_44 = arith.constant 0 : index
    %160 = vector.load %arg6[%159, %c0_43, %c0_44] : memref<4x2x128xf32, #tpu.memory_space<vmem>>, vector<1x2x128xf32>
    %161 = vector.shape_cast %160 : vector<1x2x128xf32> to vector<2x128xf32>
    %162 = vector.shape_cast %151 : vector<2x128xf32> to vector<1x2x128xf32>
    tpu.vector_store %arg6[%159, %c0_43, %c0_44], %162 {strides = array<i32>} : memref<4x2x128xf32, #tpu.memory_space<vmem>>, vector<1x2x128xf32>,
    %c2_i32 = arith.constant 2 : i32
    %c0_45 = arith.constant 0 : index
    %c0_46 = arith.constant 0 : index
    %163 = vector.load %arg7[%c0_45, %c0_46] : memref<2x256xf32, #tpu.memory_space<vmem>>, vector<2x256xf32>
    %164 = arith.truncf %163 : vector<2x256xf32> to vector<2x256xbf16>
    %cst_47 = arith.constant dense<0.000000e+00> : vector<2x768xf32>
    %165 = tpu.matmul %164, %3, %cst_47 {dimension_numbers = #tpu.dot_dimension_numbers<[1], [0], [0], [1], [0, 0, 1, 1], [], []>} : vector<2x256xbf16>, vector<256x768xbf16>, vector<2x768xf32> -> vector<2x768xf32>
    %166 = vector.broadcast %4 : vector<1x768xf32> to vector<2x768xf32>
    %167 = arith.addf %165, %166 : vector<2x768xf32>
    %168 = arith.index_cast %c2_i32 : i32 to index
    %c0_48 = arith.constant 0 : index
    %c0_49 = arith.constant 0 : index
    %169 = vector.load %arg1[%168, %c0_48, %c0_49] : memref<4x2x384xf32, #tpu.memory_space<vmem>>, vector<1x2x384xf32>
    %170 = vector.shape_cast %169 : vector<1x2x384xf32> to vector<2x384xf32>
    %c3_i32_50 = arith.constant 3 : i32
    %171 = arith.subi %c3_i32_50, %c2_i32 : i32
    %172 = arith.index_cast %171 : i32 to index
    %c0_51 = arith.constant 0 : index
    %c0_52 = arith.constant 0 : index
    %173 = vector.load %arg2[%172, %c0_51, %c0_52] : memref<4x2x384xf32, #tpu.memory_space<vmem>>, vector<1x2x384xf32>
    %174 = vector.shape_cast %173 : vector<1x2x384xf32> to vector<2x384xf32>
    %175 = vector.extract_strided_slice %167 {offsets = [0, 0], sizes = [2, 384], strides = [1, 1]} : vector<2x768xf32> to vector<2x384xf32>
    %176 = vector.extract_strided_slice %163 {offsets = [0, 0], sizes = [2, 128], strides = [1, 1]} : vector<2x256xf32> to vector<2x128xf32>
    %177 = vector.extract_strided_slice %170 {offsets = [0, 0], sizes = [2, 128], strides = [1, 1]} : vector<2x384xf32> to vector<2x128xf32>
    %178 = vector.extract_strided_slice %175 {offsets = [0, 0], sizes = [2, 128], strides = [1, 1]} : vector<2x384xf32> to vector<2x128xf32>
    %179 = arith.addf %177, %178 : vector<2x128xf32>
    %180 = arith.negf %179 : vector<2x128xf32>
    %181 = math.exp %180 : vector<2x128xf32>
    %cst_53 = arith.constant 1.000000e+00 : f32
    %182 = vector.broadcast %cst_53 : f32 to vector<2x128xf32>
    %183 = arith.addf %182, %181 : vector<2x128xf32>
    %184 = arith.divf %182, %183 : vector<2x128xf32>
    %185 = vector.extract_strided_slice %170 {offsets = [0, 128], sizes = [2, 128], strides = [1, 1]} : vector<2x384xf32> to vector<2x128xf32>
    %186 = vector.extract_strided_slice %175 {offsets = [0, 128], sizes = [2, 128], strides = [1, 1]} : vector<2x384xf32> to vector<2x128xf32>
    %187 = arith.addf %185, %186 : vector<2x128xf32>
    %188 = arith.negf %187 : vector<2x128xf32>
    %189 = math.exp %188 : vector<2x128xf32>
    %cst_54 = arith.constant 1.000000e+00 : f32
    %190 = vector.broadcast %cst_54 : f32 to vector<2x128xf32>
    %191 = arith.addf %190, %189 : vector<2x128xf32>
    %192 = arith.divf %190, %191 : vector<2x128xf32>
    %193 = vector.extract_strided_slice %170 {offsets = [0, 256], sizes = [2, 128], strides = [1, 1]} : vector<2x384xf32> to vector<2x128xf32>
    %194 = vector.extract_strided_slice %175 {offsets = [0, 256], sizes = [2, 128], strides = [1, 1]} : vector<2x384xf32> to vector<2x128xf32>
    %195 = arith.mulf %184, %194 : vector<2x128xf32>
    %196 = arith.addf %193, %195 : vector<2x128xf32>
    %197 = math.tanh %196 : vector<2x128xf32>
    %cst_55 = arith.constant 1.000000e+00 : f32
    %198 = vector.broadcast %cst_55 : f32 to vector<2x128xf32>
    %199 = arith.subf %198, %192 : vector<2x128xf32>
    %200 = arith.mulf %199, %197 : vector<2x128xf32>
    %201 = arith.mulf %192, %176 : vector<2x128xf32>
    %202 = arith.addf %200, %201 : vector<2x128xf32>
    %203 = vector.extract_strided_slice %167 {offsets = [0, 384], sizes = [2, 384], strides = [1, 1]} : vector<2x768xf32> to vector<2x384xf32>
    %204 = vector.extract_strided_slice %163 {offsets = [0, 128], sizes = [2, 128], strides = [1, 1]} : vector<2x256xf32> to vector<2x128xf32>
    %205 = vector.extract_strided_slice %174 {offsets = [0, 0], sizes = [2, 128], strides = [1, 1]} : vector<2x384xf32> to vector<2x128xf32>
    %206 = vector.extract_strided_slice %203 {offsets = [0, 0], sizes = [2, 128], strides = [1, 1]} : vector<2x384xf32> to vector<2x128xf32>
    %207 = arith.addf %205, %206 : vector<2x128xf32>
    %208 = arith.negf %207 : vector<2x128xf32>
    %209 = math.exp %208 : vector<2x128xf32>
    %cst_56 = arith.constant 1.000000e+00 : f32
    %210 = vector.broadcast %cst_56 : f32 to vector<2x128xf32>
    %211 = arith.addf %210, %209 : vector<2x128xf32>
    %212 = arith.divf %210, %211 : vector<2x128xf32>
    %213 = vector.extract_strided_slice %174 {offsets = [0, 128], sizes = [2, 128], strides = [1, 1]} : vector<2x384xf32> to vector<2x128xf32>
    %214 = vector.extract_strided_slice %203 {offsets = [0, 128], sizes = [2, 128], strides = [1, 1]} : vector<2x384xf32> to vector<2x128xf32>
    %215 = arith.addf %213, %214 : vector<2x128xf32>
    %216 = arith.negf %215 : vector<2x128xf32>
    %217 = math.exp %216 : vector<2x128xf32>
    %cst_57 = arith.constant 1.000000e+00 : f32
    %218 = vector.broadcast %cst_57 : f32 to vector<2x128xf32>
    %219 = arith.addf %218, %217 : vector<2x128xf32>
    %220 = arith.divf %218, %219 : vector<2x128xf32>
    %221 = vector.extract_strided_slice %174 {offsets = [0, 256], sizes = [2, 128], strides = [1, 1]} : vector<2x384xf32> to vector<2x128xf32>
    %222 = vector.extract_strided_slice %203 {offsets = [0, 256], sizes = [2, 128], strides = [1, 1]} : vector<2x384xf32> to vector<2x128xf32>
    %223 = arith.mulf %212, %222 : vector<2x128xf32>
    %224 = arith.addf %221, %223 : vector<2x128xf32>
    %225 = math.tanh %224 : vector<2x128xf32>
    %cst_58 = arith.constant 1.000000e+00 : f32
    %226 = vector.broadcast %cst_58 : f32 to vector<2x128xf32>
    %227 = arith.subf %226, %220 : vector<2x128xf32>
    %228 = arith.mulf %227, %225 : vector<2x128xf32>
    %229 = arith.mulf %220, %204 : vector<2x128xf32>
    %230 = arith.addf %228, %229 : vector<2x128xf32>
    %231 = tpu.concatenate %202, %230 in 1 : vector<2x128xf32>, vector<2x128xf32> -> vector<2x256xf32>
    %c0_59 = arith.constant 0 : index
    %c0_60 = arith.constant 0 : index
    %232 = vector.load %arg7[%c0_59, %c0_60] : memref<2x256xf32, #tpu.memory_space<vmem>>, vector<2x256xf32>
    tpu.vector_store %arg7[%c0_59, %c0_60], %231 {strides = array<i32>} : memref<2x256xf32, #tpu.memory_space<vmem>>, vector<2x256xf32>,
    %233 = arith.index_cast %c2_i32 : i32 to index
    %c0_61 = arith.constant 0 : index
    %c0_62 = arith.constant 0 : index
    %234 = vector.load %arg5[%233, %c0_61, %c0_62] : memref<4x2x128xf32, #tpu.memory_space<vmem>>, vector<1x2x128xf32>
    %235 = vector.shape_cast %234 : vector<1x2x128xf32> to vector<2x128xf32>
    %236 = vector.shape_cast %202 : vector<2x128xf32> to vector<1x2x128xf32>
    tpu.vector_store %arg5[%233, %c0_61, %c0_62], %236 {strides = array<i32>} : memref<4x2x128xf32, #tpu.memory_space<vmem>>, vector<1x2x128xf32>,
    %c3_i32_63 = arith.constant 3 : i32
    %237 = arith.subi %c3_i32_63, %c2_i32 : i32
    %238 = arith.index_cast %237 : i32 to index
    %c0_64 = arith.constant 0 : index
    %c0_65 = arith.constant 0 : index
    %239 = vector.load %arg6[%238, %c0_64, %c0_65] : memref<4x2x128xf32, #tpu.memory_space<vmem>>, vector<1x2x128xf32>
    %240 = vector.shape_cast %239 : vector<1x2x128xf32> to vector<2x128xf32>
    %241 = vector.shape_cast %230 : vector<2x128xf32> to vector<1x2x128xf32>
    tpu.vector_store %arg6[%238, %c0_64, %c0_65], %241 {strides = array<i32>} : memref<4x2x128xf32, #tpu.memory_space<vmem>>, vector<1x2x128xf32>,
    %c3_i32_66 = arith.constant 3 : i32
    %c0_67 = arith.constant 0 : index
    %c0_68 = arith.constant 0 : index
    %242 = vector.load %arg7[%c0_67, %c0_68] : memref<2x256xf32, #tpu.memory_space<vmem>>, vector<2x256xf32>
    %243 = arith.truncf %242 : vector<2x256xf32> to vector<2x256xbf16>
    %cst_69 = arith.constant dense<0.000000e+00> : vector<2x768xf32>
    %244 = tpu.matmul %243, %3, %cst_69 {dimension_numbers = #tpu.dot_dimension_numbers<[1], [0], [0], [1], [0, 0, 1, 1], [], []>} : vector<2x256xbf16>, vector<256x768xbf16>, vector<2x768xf32> -> vector<2x768xf32>
    %245 = vector.broadcast %4 : vector<1x768xf32> to vector<2x768xf32>
    %246 = arith.addf %244, %245 : vector<2x768xf32>
    %247 = arith.index_cast %c3_i32_66 : i32 to index
    %c0_70 = arith.constant 0 : index
    %c0_71 = arith.constant 0 : index
    %248 = vector.load %arg1[%247, %c0_70, %c0_71] : memref<4x2x384xf32, #tpu.memory_space<vmem>>, vector<1x2x384xf32>
    %249 = vector.shape_cast %248 : vector<1x2x384xf32> to vector<2x384xf32>
    %c3_i32_72 = arith.constant 3 : i32
    %250 = arith.subi %c3_i32_72, %c3_i32_66 : i32
    %251 = arith.index_cast %250 : i32 to index
    %c0_73 = arith.constant 0 : index
    %c0_74 = arith.constant 0 : index
    %252 = vector.load %arg2[%251, %c0_73, %c0_74] : memref<4x2x384xf32, #tpu.memory_space<vmem>>, vector<1x2x384xf32>
    %253 = vector.shape_cast %252 : vector<1x2x384xf32> to vector<2x384xf32>
    %254 = vector.extract_strided_slice %246 {offsets = [0, 0], sizes = [2, 384], strides = [1, 1]} : vector<2x768xf32> to vector<2x384xf32>
    %255 = vector.extract_strided_slice %242 {offsets = [0, 0], sizes = [2, 128], strides = [1, 1]} : vector<2x256xf32> to vector<2x128xf32>
    %256 = vector.extract_strided_slice %249 {offsets = [0, 0], sizes = [2, 128], strides = [1, 1]} : vector<2x384xf32> to vector<2x128xf32>
    %257 = vector.extract_strided_slice %254 {offsets = [0, 0], sizes = [2, 128], strides = [1, 1]} : vector<2x384xf32> to vector<2x128xf32>
    %258 = arith.addf %256, %257 : vector<2x128xf32>
    %259 = arith.negf %258 : vector<2x128xf32>
    %260 = math.exp %259 : vector<2x128xf32>
    %cst_75 = arith.constant 1.000000e+00 : f32
    %261 = vector.broadcast %cst_75 : f32 to vector<2x128xf32>
    %262 = arith.addf %261, %260 : vector<2x128xf32>
    %263 = arith.divf %261, %262 : vector<2x128xf32>
    %264 = vector.extract_strided_slice %249 {offsets = [0, 128], sizes = [2, 128], strides = [1, 1]} : vector<2x384xf32> to vector<2x128xf32>
    %265 = vector.extract_strided_slice %254 {offsets = [0, 128], sizes = [2, 128], strides = [1, 1]} : vector<2x384xf32> to vector<2x128xf32>
    %266 = arith.addf %264, %265 : vector<2x128xf32>
    %267 = arith.negf %266 : vector<2x128xf32>
    %268 = math.exp %267 : vector<2x128xf32>
    %cst_76 = arith.constant 1.000000e+00 : f32
    %269 = vector.broadcast %cst_76 : f32 to vector<2x128xf32>
    %270 = arith.addf %269, %268 : vector<2x128xf32>
    %271 = arith.divf %269, %270 : vector<2x128xf32>
    %272 = vector.extract_strided_slice %249 {offsets = [0, 256], sizes = [2, 128], strides = [1, 1]} : vector<2x384xf32> to vector<2x128xf32>
    %273 = vector.extract_strided_slice %254 {offsets = [0, 256], sizes = [2, 128], strides = [1, 1]} : vector<2x384xf32> to vector<2x128xf32>
    %274 = arith.mulf %263, %273 : vector<2x128xf32>
    %275 = arith.addf %272, %274 : vector<2x128xf32>
    %276 = math.tanh %275 : vector<2x128xf32>
    %cst_77 = arith.constant 1.000000e+00 : f32
    %277 = vector.broadcast %cst_77 : f32 to vector<2x128xf32>
    %278 = arith.subf %277, %271 : vector<2x128xf32>
    %279 = arith.mulf %278, %276 : vector<2x128xf32>
    %280 = arith.mulf %271, %255 : vector<2x128xf32>
    %281 = arith.addf %279, %280 : vector<2x128xf32>
    %282 = vector.extract_strided_slice %246 {offsets = [0, 384], sizes = [2, 384], strides = [1, 1]} : vector<2x768xf32> to vector<2x384xf32>
    %283 = vector.extract_strided_slice %242 {offsets = [0, 128], sizes = [2, 128], strides = [1, 1]} : vector<2x256xf32> to vector<2x128xf32>
    %284 = vector.extract_strided_slice %253 {offsets = [0, 0], sizes = [2, 128], strides = [1, 1]} : vector<2x384xf32> to vector<2x128xf32>
    %285 = vector.extract_strided_slice %282 {offsets = [0, 0], sizes = [2, 128], strides = [1, 1]} : vector<2x384xf32> to vector<2x128xf32>
    %286 = arith.addf %284, %285 : vector<2x128xf32>
    %287 = arith.negf %286 : vector<2x128xf32>
    %288 = math.exp %287 : vector<2x128xf32>
    %cst_78 = arith.constant 1.000000e+00 : f32
    %289 = vector.broadcast %cst_78 : f32 to vector<2x128xf32>
    %290 = arith.addf %289, %288 : vector<2x128xf32>
    %291 = arith.divf %289, %290 : vector<2x128xf32>
    %292 = vector.extract_strided_slice %253 {offsets = [0, 128], sizes = [2, 128], strides = [1, 1]} : vector<2x384xf32> to vector<2x128xf32>
    %293 = vector.extract_strided_slice %282 {offsets = [0, 128], sizes = [2, 128], strides = [1, 1]} : vector<2x384xf32> to vector<2x128xf32>
    %294 = arith.addf %292, %293 : vector<2x128xf32>
    %295 = arith.negf %294 : vector<2x128xf32>
    %296 = math.exp %295 : vector<2x128xf32>
    %cst_79 = arith.constant 1.000000e+00 : f32
    %297 = vector.broadcast %cst_79 : f32 to vector<2x128xf32>
    %298 = arith.addf %297, %296 : vector<2x128xf32>
    %299 = arith.divf %297, %298 : vector<2x128xf32>
    %300 = vector.extract_strided_slice %253 {offsets = [0, 256], sizes = [2, 128], strides = [1, 1]} : vector<2x384xf32> to vector<2x128xf32>
    %301 = vector.extract_strided_slice %282 {offsets = [0, 256], sizes = [2, 128], strides = [1, 1]} : vector<2x384xf32> to vector<2x128xf32>
    %302 = arith.mulf %291, %301 : vector<2x128xf32>
    %303 = arith.addf %300, %302 : vector<2x128xf32>
    %304 = math.tanh %303 : vector<2x128xf32>
    %cst_80 = arith.constant 1.000000e+00 : f32
    %305 = vector.broadcast %cst_80 : f32 to vector<2x128xf32>
    %306 = arith.subf %305, %299 : vector<2x128xf32>
    %307 = arith.mulf %306, %304 : vector<2x128xf32>
    %308 = arith.mulf %299, %283 : vector<2x128xf32>
    %309 = arith.addf %307, %308 : vector<2x128xf32>
    %310 = tpu.concatenate %281, %309 in 1 : vector<2x128xf32>, vector<2x128xf32> -> vector<2x256xf32>
    %c0_81 = arith.constant 0 : index
    %c0_82 = arith.constant 0 : index
    %311 = vector.load %arg7[%c0_81, %c0_82] : memref<2x256xf32, #tpu.memory_space<vmem>>, vector<2x256xf32>
    tpu.vector_store %arg7[%c0_81, %c0_82], %310 {strides = array<i32>} : memref<2x256xf32, #tpu.memory_space<vmem>>, vector<2x256xf32>,
    %312 = arith.index_cast %c3_i32_66 : i32 to index
    %c0_83 = arith.constant 0 : index
    %c0_84 = arith.constant 0 : index
    %313 = vector.load %arg5[%312, %c0_83, %c0_84] : memref<4x2x128xf32, #tpu.memory_space<vmem>>, vector<1x2x128xf32>
    %314 = vector.shape_cast %313 : vector<1x2x128xf32> to vector<2x128xf32>
    %315 = vector.shape_cast %281 : vector<2x128xf32> to vector<1x2x128xf32>
    tpu.vector_store %arg5[%312, %c0_83, %c0_84], %315 {strides = array<i32>} : memref<4x2x128xf32, #tpu.memory_space<vmem>>, vector<1x2x128xf32>,
    %c3_i32_85 = arith.constant 3 : i32
    %316 = arith.subi %c3_i32_85, %c3_i32_66 : i32
    %317 = arith.index_cast %316 : i32 to index
    %c0_86 = arith.constant 0 : index
    %c0_87 = arith.constant 0 : index
    %318 = vector.load %arg6[%317, %c0_86, %c0_87] : memref<4x2x128xf32, #tpu.memory_space<vmem>>, vector<1x2x128xf32>
    %319 = vector.shape_cast %318 : vector<1x2x128xf32> to vector<2x128xf32>
    %320 = vector.shape_cast %309 : vector<2x128xf32> to vector<1x2x128xf32>
    tpu.vector_store %arg6[%317, %c0_86, %c0_87], %320 {strides = array<i32>} : memref<4x2x128xf32, #tpu.memory_space<vmem>>, vector<1x2x128xf32>,
    %c4_i32 = arith.constant 4 : i32
    return
  }
  func.func @transform_0(%arg0: i32) -> (i32, i32, i32) {
    %c0_i32 = arith.constant 0 : i32
    %c0_i32_0 = arith.constant 0 : i32
    %c0_i32_1 = arith.constant 0 : i32
    return %arg0, %c0_i32, %c0_i32_0 : i32, i32, i32
  }
  func.func @transform_1(%arg0: i32) -> (i32, i32, i32) {
    %c1_i32 = arith.constant 1 : i32
    %0 = arith.subi %c1_i32, %arg0 : i32
    %c0_i32 = arith.constant 0 : i32
    %c0_i32_0 = arith.constant 0 : i32
    %c0_i32_1 = arith.constant 0 : i32
    return %0, %c0_i32, %c0_i32_0 : i32, i32, i32
  }
  func.func @transform_2(%arg0: i32) -> (i32, i32) {
    %c0_i32 = arith.constant 0 : i32
    %c0_i32_0 = arith.constant 0 : i32
    %c0_i32_1 = arith.constant 0 : i32
    return %c0_i32, %c0_i32_0 : i32, i32
  }
  func.func @transform_3(%arg0: i32) -> (i32, i32) {
    %c0_i32 = arith.constant 0 : i32
    %c0_i32_0 = arith.constant 0 : i32
    %c0_i32_1 = arith.constant 0 : i32
    return %c0_i32, %c0_i32_0 : i32, i32
  }
  func.func @transform_4(%arg0: i32) -> (i32, i32, i32) {
    %c0_i32 = arith.constant 0 : i32
    %c0_i32_0 = arith.constant 0 : i32
    %c0_i32_1 = arith.constant 0 : i32
    return %arg0, %c0_i32, %c0_i32_0 : i32, i32, i32
  }
  func.func @transform_5(%arg0: i32) -> (i32, i32, i32) {
    %c1_i32 = arith.constant 1 : i32
    %0 = arith.subi %c1_i32, %arg0 : i32
    %c0_i32 = arith.constant 0 : i32
    %c0_i32_0 = arith.constant 0 : i32
    %c0_i32_1 = arith.constant 0 : i32
    return %0, %c0_i32, %c0_i32_0 : i32, i32, i32
  }
}

module attributes {stable_mosaic.version = 11 : i64} {
  func.func @_gru_bidir_final_kernel(%arg0: i32, %arg1: memref<4x2x384xf32, #tpu.memory_space<vmem>>, %arg2: memref<4x2x384xf32, #tpu.memory_space<vmem>>, %arg3: memref<256x768xbf16, #tpu.memory_space<vmem>>, %arg4: memref<1x768xf32, #tpu.memory_space<vmem>>, %arg5: memref<256x12xbf16, #tpu.memory_space<vmem>>, %arg6: memref<1x12xf32, #tpu.memory_space<vmem>>, %arg7: memref<2x6xf32, #tpu.memory_space<vmem>>, %arg8: memref<2x6xf32, #tpu.memory_space<vmem>>, %arg9: memref<2x256xf32, #tpu.memory_space<vmem>>) attributes {dimension_semantics = [#tpu.dimension_semantics<arbitrary>], iteration_bounds = array<i64: 2>, scalar_prefetch = 0 : i64, scratch_operands = 1 : i64, tpu.core_type = #tpu.core_type<tc>, window_params = [{transform_indices = @transform_0, window_bounds = array<i64: 4, 2, 384>}, {transform_indices = @transform_1, window_bounds = array<i64: 4, 2, 384>}, {pipeline_mode = #tpu.pipeline_mode<synchronous>, transform_indices = @transform_2, window_bounds = array<i64: 256, 768>}, {pipeline_mode = #tpu.pipeline_mode<synchronous>, transform_indices = @transform_3, window_bounds = array<i64: 1, 768>}, {pipeline_mode = #tpu.pipeline_mode<synchronous>, transform_indices = @transform_4, window_bounds = array<i64: 256, 12>}, {pipeline_mode = #tpu.pipeline_mode<synchronous>, transform_indices = @transform_5, window_bounds = array<i64: 1, 12>}, {pipeline_mode = #tpu.pipeline_mode<synchronous>, transform_indices = @transform_6, window_bounds = array<i64: 2, 6>}, {pipeline_mode = #tpu.pipeline_mode<synchronous>, transform_indices = @transform_7, window_bounds = array<i64: 2, 6>}]} {
    %c0_i32 = arith.constant 0 : i32
    %0 = arith.cmpi eq, %arg0, %c0_i32 : i32
    %1 = arith.extui %0 : i1 to i32
    %c0_i32_0 = arith.constant 0 : i32
    %2 = arith.cmpi ne, %1, %c0_i32_0 : i32
    scf.if %2 {
      %cst_70 = arith.constant 0.000000e+00 : f32
      %288 = vector.broadcast %cst_70 : f32 to vector<2x256xf32>
      %c0_71 = arith.constant 0 : index
      %c0_72 = arith.constant 0 : index
      %289 = vector.load %arg9[%c0_71, %c0_72] : memref<2x256xf32, #tpu.memory_space<vmem>>, vector<2x256xf32>
      tpu.vector_store %arg9[%c0_71, %c0_72], %288 {strides = array<i32>} : memref<2x256xf32, #tpu.memory_space<vmem>>, vector<2x256xf32>,
    } else {
    }
    %c0 = arith.constant 0 : index
    %c0_1 = arith.constant 0 : index
    %3 = vector.load %arg3[%c0, %c0_1] : memref<256x768xbf16, #tpu.memory_space<vmem>>, vector<256x768xbf16>
    %c0_2 = arith.constant 0 : index
    %c0_3 = arith.constant 0 : index
    %4 = vector.load %arg4[%c0_2, %c0_3] : memref<1x768xf32, #tpu.memory_space<vmem>>, vector<1x768xf32>
    %c0_i32_4 = arith.constant 0 : i32
    %c0_5 = arith.constant 0 : index
    %c0_6 = arith.constant 0 : index
    %5 = vector.load %arg9[%c0_5, %c0_6] : memref<2x256xf32, #tpu.memory_space<vmem>>, vector<2x256xf32>
    %6 = arith.truncf %5 : vector<2x256xf32> to vector<2x256xbf16>
    %cst = arith.constant dense<0.000000e+00> : vector<2x768xf32>
    %7 = tpu.matmul %6, %3, %cst {dimension_numbers = #tpu.dot_dimension_numbers<[1], [0], [0], [1], [0, 0, 1, 1], [], []>} : vector<2x256xbf16>, vector<256x768xbf16>, vector<2x768xf32> -> vector<2x768xf32>
    %8 = vector.broadcast %4 : vector<1x768xf32> to vector<2x768xf32>
    %9 = arith.addf %7, %8 : vector<2x768xf32>
    %10 = arith.index_cast %c0_i32_4 : i32 to index
    %c0_7 = arith.constant 0 : index
    %c0_8 = arith.constant 0 : index
    %11 = vector.load %arg1[%10, %c0_7, %c0_8] : memref<4x2x384xf32, #tpu.memory_space<vmem>>, vector<1x2x384xf32>
    %12 = vector.shape_cast %11 : vector<1x2x384xf32> to vector<2x384xf32>
    %c3_i32 = arith.constant 3 : i32
    %13 = arith.subi %c3_i32, %c0_i32_4 : i32
    %14 = arith.index_cast %13 : i32 to index
    %c0_9 = arith.constant 0 : index
    %c0_10 = arith.constant 0 : index
    %15 = vector.load %arg2[%14, %c0_9, %c0_10] : memref<4x2x384xf32, #tpu.memory_space<vmem>>, vector<1x2x384xf32>
    %16 = vector.shape_cast %15 : vector<1x2x384xf32> to vector<2x384xf32>
    %17 = vector.extract_strided_slice %9 {offsets = [0, 0], sizes = [2, 384], strides = [1, 1]} : vector<2x768xf32> to vector<2x384xf32>
    %18 = vector.extract_strided_slice %5 {offsets = [0, 0], sizes = [2, 128], strides = [1, 1]} : vector<2x256xf32> to vector<2x128xf32>
    %19 = vector.extract_strided_slice %12 {offsets = [0, 0], sizes = [2, 128], strides = [1, 1]} : vector<2x384xf32> to vector<2x128xf32>
    %20 = vector.extract_strided_slice %17 {offsets = [0, 0], sizes = [2, 128], strides = [1, 1]} : vector<2x384xf32> to vector<2x128xf32>
    %21 = arith.addf %19, %20 : vector<2x128xf32>
    %22 = arith.negf %21 : vector<2x128xf32>
    %23 = math.exp %22 : vector<2x128xf32>
    %cst_11 = arith.constant 1.000000e+00 : f32
    %24 = vector.broadcast %cst_11 : f32 to vector<2x128xf32>
    %25 = arith.addf %24, %23 : vector<2x128xf32>
    %26 = arith.divf %24, %25 : vector<2x128xf32>
    %27 = vector.extract_strided_slice %12 {offsets = [0, 128], sizes = [2, 128], strides = [1, 1]} : vector<2x384xf32> to vector<2x128xf32>
    %28 = vector.extract_strided_slice %17 {offsets = [0, 128], sizes = [2, 128], strides = [1, 1]} : vector<2x384xf32> to vector<2x128xf32>
    %29 = arith.addf %27, %28 : vector<2x128xf32>
    %30 = arith.negf %29 : vector<2x128xf32>
    %31 = math.exp %30 : vector<2x128xf32>
    %cst_12 = arith.constant 1.000000e+00 : f32
    %32 = vector.broadcast %cst_12 : f32 to vector<2x128xf32>
    %33 = arith.addf %32, %31 : vector<2x128xf32>
    %34 = arith.divf %32, %33 : vector<2x128xf32>
    %35 = vector.extract_strided_slice %12 {offsets = [0, 256], sizes = [2, 128], strides = [1, 1]} : vector<2x384xf32> to vector<2x128xf32>
    %36 = vector.extract_strided_slice %17 {offsets = [0, 256], sizes = [2, 128], strides = [1, 1]} : vector<2x384xf32> to vector<2x128xf32>
    %37 = arith.mulf %26, %36 : vector<2x128xf32>
    %38 = arith.addf %35, %37 : vector<2x128xf32>
    %39 = math.tanh %38 : vector<2x128xf32>
    %cst_13 = arith.constant 1.000000e+00 : f32
    %40 = vector.broadcast %cst_13 : f32 to vector<2x128xf32>
    %41 = arith.subf %40, %34 : vector<2x128xf32>
    %42 = arith.mulf %41, %39 : vector<2x128xf32>
    %43 = arith.mulf %34, %18 : vector<2x128xf32>
    %44 = arith.addf %42, %43 : vector<2x128xf32>
    %45 = vector.extract_strided_slice %9 {offsets = [0, 384], sizes = [2, 384], strides = [1, 1]} : vector<2x768xf32> to vector<2x384xf32>
    %46 = vector.extract_strided_slice %5 {offsets = [0, 128], sizes = [2, 128], strides = [1, 1]} : vector<2x256xf32> to vector<2x128xf32>
    %47 = vector.extract_strided_slice %16 {offsets = [0, 0], sizes = [2, 128], strides = [1, 1]} : vector<2x384xf32> to vector<2x128xf32>
    %48 = vector.extract_strided_slice %45 {offsets = [0, 0], sizes = [2, 128], strides = [1, 1]} : vector<2x384xf32> to vector<2x128xf32>
    %49 = arith.addf %47, %48 : vector<2x128xf32>
    %50 = arith.negf %49 : vector<2x128xf32>
    %51 = math.exp %50 : vector<2x128xf32>
    %cst_14 = arith.constant 1.000000e+00 : f32
    %52 = vector.broadcast %cst_14 : f32 to vector<2x128xf32>
    %53 = arith.addf %52, %51 : vector<2x128xf32>
    %54 = arith.divf %52, %53 : vector<2x128xf32>
    %55 = vector.extract_strided_slice %16 {offsets = [0, 128], sizes = [2, 128], strides = [1, 1]} : vector<2x384xf32> to vector<2x128xf32>
    %56 = vector.extract_strided_slice %45 {offsets = [0, 128], sizes = [2, 128], strides = [1, 1]} : vector<2x384xf32> to vector<2x128xf32>
    %57 = arith.addf %55, %56 : vector<2x128xf32>
    %58 = arith.negf %57 : vector<2x128xf32>
    %59 = math.exp %58 : vector<2x128xf32>
    %cst_15 = arith.constant 1.000000e+00 : f32
    %60 = vector.broadcast %cst_15 : f32 to vector<2x128xf32>
    %61 = arith.addf %60, %59 : vector<2x128xf32>
    %62 = arith.divf %60, %61 : vector<2x128xf32>
    %63 = vector.extract_strided_slice %16 {offsets = [0, 256], sizes = [2, 128], strides = [1, 1]} : vector<2x384xf32> to vector<2x128xf32>
    %64 = vector.extract_strided_slice %45 {offsets = [0, 256], sizes = [2, 128], strides = [1, 1]} : vector<2x384xf32> to vector<2x128xf32>
    %65 = arith.mulf %54, %64 : vector<2x128xf32>
    %66 = arith.addf %63, %65 : vector<2x128xf32>
    %67 = math.tanh %66 : vector<2x128xf32>
    %cst_16 = arith.constant 1.000000e+00 : f32
    %68 = vector.broadcast %cst_16 : f32 to vector<2x128xf32>
    %69 = arith.subf %68, %62 : vector<2x128xf32>
    %70 = arith.mulf %69, %67 : vector<2x128xf32>
    %71 = arith.mulf %62, %46 : vector<2x128xf32>
    %72 = arith.addf %70, %71 : vector<2x128xf32>
    %73 = tpu.concatenate %44, %72 in 1 : vector<2x128xf32>, vector<2x128xf32> -> vector<2x256xf32>
    %c0_17 = arith.constant 0 : index
    %c0_18 = arith.constant 0 : index
    %74 = vector.load %arg9[%c0_17, %c0_18] : memref<2x256xf32, #tpu.memory_space<vmem>>, vector<2x256xf32>
    tpu.vector_store %arg9[%c0_17, %c0_18], %73 {strides = array<i32>} : memref<2x256xf32, #tpu.memory_space<vmem>>, vector<2x256xf32>,
    %c1_i32 = arith.constant 1 : i32
    %c0_19 = arith.constant 0 : index
    %c0_20 = arith.constant 0 : index
    %75 = vector.load %arg9[%c0_19, %c0_20] : memref<2x256xf32, #tpu.memory_space<vmem>>, vector<2x256xf32>
    %76 = arith.truncf %75 : vector<2x256xf32> to vector<2x256xbf16>
    %cst_21 = arith.constant dense<0.000000e+00> : vector<2x768xf32>
    %77 = tpu.matmul %76, %3, %cst_21 {dimension_numbers = #tpu.dot_dimension_numbers<[1], [0], [0], [1], [0, 0, 1, 1], [], []>} : vector<2x256xbf16>, vector<256x768xbf16>, vector<2x768xf32> -> vector<2x768xf32>
    %78 = vector.broadcast %4 : vector<1x768xf32> to vector<2x768xf32>
    %79 = arith.addf %77, %78 : vector<2x768xf32>
    %80 = arith.index_cast %c1_i32 : i32 to index
    %c0_22 = arith.constant 0 : index
    %c0_23 = arith.constant 0 : index
    %81 = vector.load %arg1[%80, %c0_22, %c0_23] : memref<4x2x384xf32, #tpu.memory_space<vmem>>, vector<1x2x384xf32>
    %82 = vector.shape_cast %81 : vector<1x2x384xf32> to vector<2x384xf32>
    %c3_i32_24 = arith.constant 3 : i32
    %83 = arith.subi %c3_i32_24, %c1_i32 : i32
    %84 = arith.index_cast %83 : i32 to index
    %c0_25 = arith.constant 0 : index
    %c0_26 = arith.constant 0 : index
    %85 = vector.load %arg2[%84, %c0_25, %c0_26] : memref<4x2x384xf32, #tpu.memory_space<vmem>>, vector<1x2x384xf32>
    %86 = vector.shape_cast %85 : vector<1x2x384xf32> to vector<2x384xf32>
    %87 = vector.extract_strided_slice %79 {offsets = [0, 0], sizes = [2, 384], strides = [1, 1]} : vector<2x768xf32> to vector<2x384xf32>
    %88 = vector.extract_strided_slice %75 {offsets = [0, 0], sizes = [2, 128], strides = [1, 1]} : vector<2x256xf32> to vector<2x128xf32>
    %89 = vector.extract_strided_slice %82 {offsets = [0, 0], sizes = [2, 128], strides = [1, 1]} : vector<2x384xf32> to vector<2x128xf32>
    %90 = vector.extract_strided_slice %87 {offsets = [0, 0], sizes = [2, 128], strides = [1, 1]} : vector<2x384xf32> to vector<2x128xf32>
    %91 = arith.addf %89, %90 : vector<2x128xf32>
    %92 = arith.negf %91 : vector<2x128xf32>
    %93 = math.exp %92 : vector<2x128xf32>
    %cst_27 = arith.constant 1.000000e+00 : f32
    %94 = vector.broadcast %cst_27 : f32 to vector<2x128xf32>
    %95 = arith.addf %94, %93 : vector<2x128xf32>
    %96 = arith.divf %94, %95 : vector<2x128xf32>
    %97 = vector.extract_strided_slice %82 {offsets = [0, 128], sizes = [2, 128], strides = [1, 1]} : vector<2x384xf32> to vector<2x128xf32>
    %98 = vector.extract_strided_slice %87 {offsets = [0, 128], sizes = [2, 128], strides = [1, 1]} : vector<2x384xf32> to vector<2x128xf32>
    %99 = arith.addf %97, %98 : vector<2x128xf32>
    %100 = arith.negf %99 : vector<2x128xf32>
    %101 = math.exp %100 : vector<2x128xf32>
    %cst_28 = arith.constant 1.000000e+00 : f32
    %102 = vector.broadcast %cst_28 : f32 to vector<2x128xf32>
    %103 = arith.addf %102, %101 : vector<2x128xf32>
    %104 = arith.divf %102, %103 : vector<2x128xf32>
    %105 = vector.extract_strided_slice %82 {offsets = [0, 256], sizes = [2, 128], strides = [1, 1]} : vector<2x384xf32> to vector<2x128xf32>
    %106 = vector.extract_strided_slice %87 {offsets = [0, 256], sizes = [2, 128], strides = [1, 1]} : vector<2x384xf32> to vector<2x128xf32>
    %107 = arith.mulf %96, %106 : vector<2x128xf32>
    %108 = arith.addf %105, %107 : vector<2x128xf32>
    %109 = math.tanh %108 : vector<2x128xf32>
    %cst_29 = arith.constant 1.000000e+00 : f32
    %110 = vector.broadcast %cst_29 : f32 to vector<2x128xf32>
    %111 = arith.subf %110, %104 : vector<2x128xf32>
    %112 = arith.mulf %111, %109 : vector<2x128xf32>
    %113 = arith.mulf %104, %88 : vector<2x128xf32>
    %114 = arith.addf %112, %113 : vector<2x128xf32>
    %115 = vector.extract_strided_slice %79 {offsets = [0, 384], sizes = [2, 384], strides = [1, 1]} : vector<2x768xf32> to vector<2x384xf32>
    %116 = vector.extract_strided_slice %75 {offsets = [0, 128], sizes = [2, 128], strides = [1, 1]} : vector<2x256xf32> to vector<2x128xf32>
    %117 = vector.extract_strided_slice %86 {offsets = [0, 0], sizes = [2, 128], strides = [1, 1]} : vector<2x384xf32> to vector<2x128xf32>
    %118 = vector.extract_strided_slice %115 {offsets = [0, 0], sizes = [2, 128], strides = [1, 1]} : vector<2x384xf32> to vector<2x128xf32>
    %119 = arith.addf %117, %118 : vector<2x128xf32>
    %120 = arith.negf %119 : vector<2x128xf32>
    %121 = math.exp %120 : vector<2x128xf32>
    %cst_30 = arith.constant 1.000000e+00 : f32
    %122 = vector.broadcast %cst_30 : f32 to vector<2x128xf32>
    %123 = arith.addf %122, %121 : vector<2x128xf32>
    %124 = arith.divf %122, %123 : vector<2x128xf32>
    %125 = vector.extract_strided_slice %86 {offsets = [0, 128], sizes = [2, 128], strides = [1, 1]} : vector<2x384xf32> to vector<2x128xf32>
    %126 = vector.extract_strided_slice %115 {offsets = [0, 128], sizes = [2, 128], strides = [1, 1]} : vector<2x384xf32> to vector<2x128xf32>
    %127 = arith.addf %125, %126 : vector<2x128xf32>
    %128 = arith.negf %127 : vector<2x128xf32>
    %129 = math.exp %128 : vector<2x128xf32>
    %cst_31 = arith.constant 1.000000e+00 : f32
    %130 = vector.broadcast %cst_31 : f32 to vector<2x128xf32>
    %131 = arith.addf %130, %129 : vector<2x128xf32>
    %132 = arith.divf %130, %131 : vector<2x128xf32>
    %133 = vector.extract_strided_slice %86 {offsets = [0, 256], sizes = [2, 128], strides = [1, 1]} : vector<2x384xf32> to vector<2x128xf32>
    %134 = vector.extract_strided_slice %115 {offsets = [0, 256], sizes = [2, 128], strides = [1, 1]} : vector<2x384xf32> to vector<2x128xf32>
    %135 = arith.mulf %124, %134 : vector<2x128xf32>
    %136 = arith.addf %133, %135 : vector<2x128xf32>
    %137 = math.tanh %136 : vector<2x128xf32>
    %cst_32 = arith.constant 1.000000e+00 : f32
    %138 = vector.broadcast %cst_32 : f32 to vector<2x128xf32>
    %139 = arith.subf %138, %132 : vector<2x128xf32>
    %140 = arith.mulf %139, %137 : vector<2x128xf32>
    %141 = arith.mulf %132, %116 : vector<2x128xf32>
    %142 = arith.addf %140, %141 : vector<2x128xf32>
    %143 = tpu.concatenate %114, %142 in 1 : vector<2x128xf32>, vector<2x128xf32> -> vector<2x256xf32>
    %c0_33 = arith.constant 0 : index
    %c0_34 = arith.constant 0 : index
    %144 = vector.load %arg9[%c0_33, %c0_34] : memref<2x256xf32, #tpu.memory_space<vmem>>, vector<2x256xf32>
    tpu.vector_store %arg9[%c0_33, %c0_34], %143 {strides = array<i32>} : memref<2x256xf32, #tpu.memory_space<vmem>>, vector<2x256xf32>,
    %c2_i32 = arith.constant 2 : i32
    %c0_35 = arith.constant 0 : index
    %c0_36 = arith.constant 0 : index
    %145 = vector.load %arg9[%c0_35, %c0_36] : memref<2x256xf32, #tpu.memory_space<vmem>>, vector<2x256xf32>
    %146 = arith.truncf %145 : vector<2x256xf32> to vector<2x256xbf16>
    %cst_37 = arith.constant dense<0.000000e+00> : vector<2x768xf32>
    %147 = tpu.matmul %146, %3, %cst_37 {dimension_numbers = #tpu.dot_dimension_numbers<[1], [0], [0], [1], [0, 0, 1, 1], [], []>} : vector<2x256xbf16>, vector<256x768xbf16>, vector<2x768xf32> -> vector<2x768xf32>
    %148 = vector.broadcast %4 : vector<1x768xf32> to vector<2x768xf32>
    %149 = arith.addf %147, %148 : vector<2x768xf32>
    %150 = arith.index_cast %c2_i32 : i32 to index
    %c0_38 = arith.constant 0 : index
    %c0_39 = arith.constant 0 : index
    %151 = vector.load %arg1[%150, %c0_38, %c0_39] : memref<4x2x384xf32, #tpu.memory_space<vmem>>, vector<1x2x384xf32>
    %152 = vector.shape_cast %151 : vector<1x2x384xf32> to vector<2x384xf32>
    %c3_i32_40 = arith.constant 3 : i32
    %153 = arith.subi %c3_i32_40, %c2_i32 : i32
    %154 = arith.index_cast %153 : i32 to index
    %c0_41 = arith.constant 0 : index
    %c0_42 = arith.constant 0 : index
    %155 = vector.load %arg2[%154, %c0_41, %c0_42] : memref<4x2x384xf32, #tpu.memory_space<vmem>>, vector<1x2x384xf32>
    %156 = vector.shape_cast %155 : vector<1x2x384xf32> to vector<2x384xf32>
    %157 = vector.extract_strided_slice %149 {offsets = [0, 0], sizes = [2, 384], strides = [1, 1]} : vector<2x768xf32> to vector<2x384xf32>
    %158 = vector.extract_strided_slice %145 {offsets = [0, 0], sizes = [2, 128], strides = [1, 1]} : vector<2x256xf32> to vector<2x128xf32>
    %159 = vector.extract_strided_slice %152 {offsets = [0, 0], sizes = [2, 128], strides = [1, 1]} : vector<2x384xf32> to vector<2x128xf32>
    %160 = vector.extract_strided_slice %157 {offsets = [0, 0], sizes = [2, 128], strides = [1, 1]} : vector<2x384xf32> to vector<2x128xf32>
    %161 = arith.addf %159, %160 : vector<2x128xf32>
    %162 = arith.negf %161 : vector<2x128xf32>
    %163 = math.exp %162 : vector<2x128xf32>
    %cst_43 = arith.constant 1.000000e+00 : f32
    %164 = vector.broadcast %cst_43 : f32 to vector<2x128xf32>
    %165 = arith.addf %164, %163 : vector<2x128xf32>
    %166 = arith.divf %164, %165 : vector<2x128xf32>
    %167 = vector.extract_strided_slice %152 {offsets = [0, 128], sizes = [2, 128], strides = [1, 1]} : vector<2x384xf32> to vector<2x128xf32>
    %168 = vector.extract_strided_slice %157 {offsets = [0, 128], sizes = [2, 128], strides = [1, 1]} : vector<2x384xf32> to vector<2x128xf32>
    %169 = arith.addf %167, %168 : vector<2x128xf32>
    %170 = arith.negf %169 : vector<2x128xf32>
    %171 = math.exp %170 : vector<2x128xf32>
    %cst_44 = arith.constant 1.000000e+00 : f32
    %172 = vector.broadcast %cst_44 : f32 to vector<2x128xf32>
    %173 = arith.addf %172, %171 : vector<2x128xf32>
    %174 = arith.divf %172, %173 : vector<2x128xf32>
    %175 = vector.extract_strided_slice %152 {offsets = [0, 256], sizes = [2, 128], strides = [1, 1]} : vector<2x384xf32> to vector<2x128xf32>
    %176 = vector.extract_strided_slice %157 {offsets = [0, 256], sizes = [2, 128], strides = [1, 1]} : vector<2x384xf32> to vector<2x128xf32>
    %177 = arith.mulf %166, %176 : vector<2x128xf32>
    %178 = arith.addf %175, %177 : vector<2x128xf32>
    %179 = math.tanh %178 : vector<2x128xf32>
    %cst_45 = arith.constant 1.000000e+00 : f32
    %180 = vector.broadcast %cst_45 : f32 to vector<2x128xf32>
    %181 = arith.subf %180, %174 : vector<2x128xf32>
    %182 = arith.mulf %181, %179 : vector<2x128xf32>
    %183 = arith.mulf %174, %158 : vector<2x128xf32>
    %184 = arith.addf %182, %183 : vector<2x128xf32>
    %185 = vector.extract_strided_slice %149 {offsets = [0, 384], sizes = [2, 384], strides = [1, 1]} : vector<2x768xf32> to vector<2x384xf32>
    %186 = vector.extract_strided_slice %145 {offsets = [0, 128], sizes = [2, 128], strides = [1, 1]} : vector<2x256xf32> to vector<2x128xf32>
    %187 = vector.extract_strided_slice %156 {offsets = [0, 0], sizes = [2, 128], strides = [1, 1]} : vector<2x384xf32> to vector<2x128xf32>
    %188 = vector.extract_strided_slice %185 {offsets = [0, 0], sizes = [2, 128], strides = [1, 1]} : vector<2x384xf32> to vector<2x128xf32>
    %189 = arith.addf %187, %188 : vector<2x128xf32>
    %190 = arith.negf %189 : vector<2x128xf32>
    %191 = math.exp %190 : vector<2x128xf32>
    %cst_46 = arith.constant 1.000000e+00 : f32
    %192 = vector.broadcast %cst_46 : f32 to vector<2x128xf32>
    %193 = arith.addf %192, %191 : vector<2x128xf32>
    %194 = arith.divf %192, %193 : vector<2x128xf32>
    %195 = vector.extract_strided_slice %156 {offsets = [0, 128], sizes = [2, 128], strides = [1, 1]} : vector<2x384xf32> to vector<2x128xf32>
    %196 = vector.extract_strided_slice %185 {offsets = [0, 128], sizes = [2, 128], strides = [1, 1]} : vector<2x384xf32> to vector<2x128xf32>
    %197 = arith.addf %195, %196 : vector<2x128xf32>
    %198 = arith.negf %197 : vector<2x128xf32>
    %199 = math.exp %198 : vector<2x128xf32>
    %cst_47 = arith.constant 1.000000e+00 : f32
    %200 = vector.broadcast %cst_47 : f32 to vector<2x128xf32>
    %201 = arith.addf %200, %199 : vector<2x128xf32>
    %202 = arith.divf %200, %201 : vector<2x128xf32>
    %203 = vector.extract_strided_slice %156 {offsets = [0, 256], sizes = [2, 128], strides = [1, 1]} : vector<2x384xf32> to vector<2x128xf32>
    %204 = vector.extract_strided_slice %185 {offsets = [0, 256], sizes = [2, 128], strides = [1, 1]} : vector<2x384xf32> to vector<2x128xf32>
    %205 = arith.mulf %194, %204 : vector<2x128xf32>
    %206 = arith.addf %203, %205 : vector<2x128xf32>
    %207 = math.tanh %206 : vector<2x128xf32>
    %cst_48 = arith.constant 1.000000e+00 : f32
    %208 = vector.broadcast %cst_48 : f32 to vector<2x128xf32>
    %209 = arith.subf %208, %202 : vector<2x128xf32>
    %210 = arith.mulf %209, %207 : vector<2x128xf32>
    %211 = arith.mulf %202, %186 : vector<2x128xf32>
    %212 = arith.addf %210, %211 : vector<2x128xf32>
    %213 = tpu.concatenate %184, %212 in 1 : vector<2x128xf32>, vector<2x128xf32> -> vector<2x256xf32>
    %c0_49 = arith.constant 0 : index
    %c0_50 = arith.constant 0 : index
    %214 = vector.load %arg9[%c0_49, %c0_50] : memref<2x256xf32, #tpu.memory_space<vmem>>, vector<2x256xf32>
    tpu.vector_store %arg9[%c0_49, %c0_50], %213 {strides = array<i32>} : memref<2x256xf32, #tpu.memory_space<vmem>>, vector<2x256xf32>,
    %c3_i32_51 = arith.constant 3 : i32
    %c0_52 = arith.constant 0 : index
    %c0_53 = arith.constant 0 : index
    %215 = vector.load %arg9[%c0_52, %c0_53] : memref<2x256xf32, #tpu.memory_space<vmem>>, vector<2x256xf32>
    %216 = arith.truncf %215 : vector<2x256xf32> to vector<2x256xbf16>
    %cst_54 = arith.constant dense<0.000000e+00> : vector<2x768xf32>
    %217 = tpu.matmul %216, %3, %cst_54 {dimension_numbers = #tpu.dot_dimension_numbers<[1], [0], [0], [1], [0, 0, 1, 1], [], []>} : vector<2x256xbf16>, vector<256x768xbf16>, vector<2x768xf32> -> vector<2x768xf32>
    %218 = vector.broadcast %4 : vector<1x768xf32> to vector<2x768xf32>
    %219 = arith.addf %217, %218 : vector<2x768xf32>
    %220 = arith.index_cast %c3_i32_51 : i32 to index
    %c0_55 = arith.constant 0 : index
    %c0_56 = arith.constant 0 : index
    %221 = vector.load %arg1[%220, %c0_55, %c0_56] : memref<4x2x384xf32, #tpu.memory_space<vmem>>, vector<1x2x384xf32>
    %222 = vector.shape_cast %221 : vector<1x2x384xf32> to vector<2x384xf32>
    %c3_i32_57 = arith.constant 3 : i32
    %223 = arith.subi %c3_i32_57, %c3_i32_51 : i32
    %224 = arith.index_cast %223 : i32 to index
    %c0_58 = arith.constant 0 : index
    %c0_59 = arith.constant 0 : index
    %225 = vector.load %arg2[%224, %c0_58, %c0_59] : memref<4x2x384xf32, #tpu.memory_space<vmem>>, vector<1x2x384xf32>
    %226 = vector.shape_cast %225 : vector<1x2x384xf32> to vector<2x384xf32>
    %227 = vector.extract_strided_slice %219 {offsets = [0, 0], sizes = [2, 384], strides = [1, 1]} : vector<2x768xf32> to vector<2x384xf32>
    %228 = vector.extract_strided_slice %215 {offsets = [0, 0], sizes = [2, 128], strides = [1, 1]} : vector<2x256xf32> to vector<2x128xf32>
    %229 = vector.extract_strided_slice %222 {offsets = [0, 0], sizes = [2, 128], strides = [1, 1]} : vector<2x384xf32> to vector<2x128xf32>
    %230 = vector.extract_strided_slice %227 {offsets = [0, 0], sizes = [2, 128], strides = [1, 1]} : vector<2x384xf32> to vector<2x128xf32>
    %231 = arith.addf %229, %230 : vector<2x128xf32>
    %232 = arith.negf %231 : vector<2x128xf32>
    %233 = math.exp %232 : vector<2x128xf32>
    %cst_60 = arith.constant 1.000000e+00 : f32
    %234 = vector.broadcast %cst_60 : f32 to vector<2x128xf32>
    %235 = arith.addf %234, %233 : vector<2x128xf32>
    %236 = arith.divf %234, %235 : vector<2x128xf32>
    %237 = vector.extract_strided_slice %222 {offsets = [0, 128], sizes = [2, 128], strides = [1, 1]} : vector<2x384xf32> to vector<2x128xf32>
    %238 = vector.extract_strided_slice %227 {offsets = [0, 128], sizes = [2, 128], strides = [1, 1]} : vector<2x384xf32> to vector<2x128xf32>
    %239 = arith.addf %237, %238 : vector<2x128xf32>
    %240 = arith.negf %239 : vector<2x128xf32>
    %241 = math.exp %240 : vector<2x128xf32>
    %cst_61 = arith.constant 1.000000e+00 : f32
    %242 = vector.broadcast %cst_61 : f32 to vector<2x128xf32>
    %243 = arith.addf %242, %241 : vector<2x128xf32>
    %244 = arith.divf %242, %243 : vector<2x128xf32>
    %245 = vector.extract_strided_slice %222 {offsets = [0, 256], sizes = [2, 128], strides = [1, 1]} : vector<2x384xf32> to vector<2x128xf32>
    %246 = vector.extract_strided_slice %227 {offsets = [0, 256], sizes = [2, 128], strides = [1, 1]} : vector<2x384xf32> to vector<2x128xf32>
    %247 = arith.mulf %236, %246 : vector<2x128xf32>
    %248 = arith.addf %245, %247 : vector<2x128xf32>
    %249 = math.tanh %248 : vector<2x128xf32>
    %cst_62 = arith.constant 1.000000e+00 : f32
    %250 = vector.broadcast %cst_62 : f32 to vector<2x128xf32>
    %251 = arith.subf %250, %244 : vector<2x128xf32>
    %252 = arith.mulf %251, %249 : vector<2x128xf32>
    %253 = arith.mulf %244, %228 : vector<2x128xf32>
    %254 = arith.addf %252, %253 : vector<2x128xf32>
    %255 = vector.extract_strided_slice %219 {offsets = [0, 384], sizes = [2, 384], strides = [1, 1]} : vector<2x768xf32> to vector<2x384xf32>
    %256 = vector.extract_strided_slice %215 {offsets = [0, 128], sizes = [2, 128], strides = [1, 1]} : vector<2x256xf32> to vector<2x128xf32>
    %257 = vector.extract_strided_slice %226 {offsets = [0, 0], sizes = [2, 128], strides = [1, 1]} : vector<2x384xf32> to vector<2x128xf32>
    %258 = vector.extract_strided_slice %255 {offsets = [0, 0], sizes = [2, 128], strides = [1, 1]} : vector<2x384xf32> to vector<2x128xf32>
    %259 = arith.addf %257, %258 : vector<2x128xf32>
    %260 = arith.negf %259 : vector<2x128xf32>
    %261 = math.exp %260 : vector<2x128xf32>
    %cst_63 = arith.constant 1.000000e+00 : f32
    %262 = vector.broadcast %cst_63 : f32 to vector<2x128xf32>
    %263 = arith.addf %262, %261 : vector<2x128xf32>
    %264 = arith.divf %262, %263 : vector<2x128xf32>
    %265 = vector.extract_strided_slice %226 {offsets = [0, 128], sizes = [2, 128], strides = [1, 1]} : vector<2x384xf32> to vector<2x128xf32>
    %266 = vector.extract_strided_slice %255 {offsets = [0, 128], sizes = [2, 128], strides = [1, 1]} : vector<2x384xf32> to vector<2x128xf32>
    %267 = arith.addf %265, %266 : vector<2x128xf32>
    %268 = arith.negf %267 : vector<2x128xf32>
    %269 = math.exp %268 : vector<2x128xf32>
    %cst_64 = arith.constant 1.000000e+00 : f32
    %270 = vector.broadcast %cst_64 : f32 to vector<2x128xf32>
    %271 = arith.addf %270, %269 : vector<2x128xf32>
    %272 = arith.divf %270, %271 : vector<2x128xf32>
    %273 = vector.extract_strided_slice %226 {offsets = [0, 256], sizes = [2, 128], strides = [1, 1]} : vector<2x384xf32> to vector<2x128xf32>
    %274 = vector.extract_strided_slice %255 {offsets = [0, 256], sizes = [2, 128], strides = [1, 1]} : vector<2x384xf32> to vector<2x128xf32>
    %275 = arith.mulf %264, %274 : vector<2x128xf32>
    %276 = arith.addf %273, %275 : vector<2x128xf32>
    %277 = math.tanh %276 : vector<2x128xf32>
    %cst_65 = arith.constant 1.000000e+00 : f32
    %278 = vector.broadcast %cst_65 : f32 to vector<2x128xf32>
    %279 = arith.subf %278, %272 : vector<2x128xf32>
    %280 = arith.mulf %279, %277 : vector<2x128xf32>
    %281 = arith.mulf %272, %256 : vector<2x128xf32>
    %282 = arith.addf %280, %281 : vector<2x128xf32>
    %283 = tpu.concatenate %254, %282 in 1 : vector<2x128xf32>, vector<2x128xf32> -> vector<2x256xf32>
    %c0_66 = arith.constant 0 : index
    %c0_67 = arith.constant 0 : index
    %284 = vector.load %arg9[%c0_66, %c0_67] : memref<2x256xf32, #tpu.memory_space<vmem>>, vector<2x256xf32>
    tpu.vector_store %arg9[%c0_66, %c0_67], %283 {strides = array<i32>} : memref<2x256xf32, #tpu.memory_space<vmem>>, vector<2x256xf32>,
    %c4_i32 = arith.constant 4 : i32
    %c1_i32_68 = arith.constant 1 : i32
    %285 = arith.cmpi eq, %arg0, %c1_i32_68 : i32
    %286 = arith.extui %285 : i1 to i32
    %c0_i32_69 = arith.constant 0 : i32
    %287 = arith.cmpi ne, %286, %c0_i32_69 : i32
    scf.if %287 {
      %c0_70 = arith.constant 0 : index
      %c0_71 = arith.constant 0 : index
      %288 = vector.load %arg9[%c0_70, %c0_71] : memref<2x256xf32, #tpu.memory_space<vmem>>, vector<2x256xf32>
      %289 = arith.truncf %288 : vector<2x256xf32> to vector<2x256xbf16>
      %c0_72 = arith.constant 0 : index
      %c0_73 = arith.constant 0 : index
      %290 = vector.load %arg5[%c0_72, %c0_73] : memref<256x12xbf16, #tpu.memory_space<vmem>>, vector<256x12xbf16>
      %cst_74 = arith.constant dense<0.000000e+00> : vector<2x12xf32>
      %291 = tpu.matmul %289, %290, %cst_74 {dimension_numbers = #tpu.dot_dimension_numbers<[1], [0], [0], [1], [0, 0, 1, 1], [], []>} : vector<2x256xbf16>, vector<256x12xbf16>, vector<2x12xf32> -> vector<2x12xf32>
      %c0_75 = arith.constant 0 : index
      %c0_76 = arith.constant 0 : index
      %292 = vector.load %arg6[%c0_75, %c0_76] : memref<1x12xf32, #tpu.memory_space<vmem>>, vector<1x12xf32>
      %293 = vector.broadcast %292 : vector<1x12xf32> to vector<2x12xf32>
      %294 = arith.addf %291, %293 : vector<2x12xf32>
      %295 = vector.extract_strided_slice %294 {offsets = [0, 0], sizes = [2, 6], strides = [1, 1]} : vector<2x12xf32> to vector<2x6xf32>
      %c0_77 = arith.constant 0 : index
      %c0_78 = arith.constant 0 : index
      %296 = vector.load %arg7[%c0_77, %c0_78] : memref<2x6xf32, #tpu.memory_space<vmem>>, vector<2x6xf32>
      tpu.vector_store %arg7[%c0_77, %c0_78], %295 {strides = array<i32>} : memref<2x6xf32, #tpu.memory_space<vmem>>, vector<2x6xf32>,
      %297 = vector.extract_strided_slice %294 {offsets = [0, 6], sizes = [2, 6], strides = [1, 1]} : vector<2x12xf32> to vector<2x6xf32>
      %cst_79 = arith.constant -2.000000e+01 : f32
      %cst_80 = arith.constant 2.000000e+00 : f32
      %298 = vector.broadcast %cst_79 : f32 to vector<2x6xf32>
      %299 = arith.maximumf %298, %297 : vector<2x6xf32>
      %300 = vector.broadcast %cst_80 : f32 to vector<2x6xf32>
      %301 = arith.minimumf %300, %299 : vector<2x6xf32>
      %302 = math.exp %301 : vector<2x6xf32>
      %c0_81 = arith.constant 0 : index
      %c0_82 = arith.constant 0 : index
      %303 = vector.load %arg8[%c0_81, %c0_82] : memref<2x6xf32, #tpu.memory_space<vmem>>, vector<2x6xf32>
      tpu.vector_store %arg8[%c0_81, %c0_82], %302 {strides = array<i32>} : memref<2x6xf32, #tpu.memory_space<vmem>>, vector<2x6xf32>,
    } else {
    }
    return
  }
  func.func @transform_0(%arg0: i32) -> (i32, i32, i32) {
    %c0_i32 = arith.constant 0 : i32
    %c0_i32_0 = arith.constant 0 : i32
    %c0_i32_1 = arith.constant 0 : i32
    return %arg0, %c0_i32, %c0_i32_0 : i32, i32, i32
  }
  func.func @transform_1(%arg0: i32) -> (i32, i32, i32) {
    %c1_i32 = arith.constant 1 : i32
    %0 = arith.subi %c1_i32, %arg0 : i32
    %c0_i32 = arith.constant 0 : i32
    %c0_i32_0 = arith.constant 0 : i32
    %c0_i32_1 = arith.constant 0 : i32
    return %0, %c0_i32, %c0_i32_0 : i32, i32, i32
  }
  func.func @transform_2(%arg0: i32) -> (i32, i32) {
    %c0_i32 = arith.constant 0 : i32
    %c0_i32_0 = arith.constant 0 : i32
    %c0_i32_1 = arith.constant 0 : i32
    return %c0_i32, %c0_i32_0 : i32, i32
  }
  func.func @transform_3(%arg0: i32) -> (i32, i32) {
    %c0_i32 = arith.constant 0 : i32
    %c0_i32_0 = arith.constant 0 : i32
    %c0_i32_1 = arith.constant 0 : i32
    return %c0_i32, %c0_i32_0 : i32, i32
  }
  func.func @transform_4(%arg0: i32) -> (i32, i32) {
    %c0_i32 = arith.constant 0 : i32
    %c0_i32_0 = arith.constant 0 : i32
    %c0_i32_1 = arith.constant 0 : i32
    return %c0_i32, %c0_i32_0 : i32, i32
  }
  func.func @transform_5(%arg0: i32) -> (i32, i32) {
    %c0_i32 = arith.constant 0 : i32
    %c0_i32_0 = arith.constant 0 : i32
    %c0_i32_1 = arith.constant 0 : i32
    return %c0_i32, %c0_i32_0 : i32, i32
  }
  func.func @transform_6(%arg0: i32) -> (i32, i32) {
    %c0_i32 = arith.constant 0 : i32
    %c0_i32_0 = arith.constant 0 : i32
    %c0_i32_1 = arith.constant 0 : i32
    return %c0_i32, %c0_i32_0 : i32, i32
  }
  func.func @transform_7(%arg0: i32) -> (i32, i32) {
    %c0_i32 = arith.constant 0 : i32
    %c0_i32_0 = arith.constant 0 : i32
    %c0_i32_1 = arith.constant 0 : i32
    return %c0_i32, %c0_i32_0 : i32, i32
  }
}

</mosaic_0001>

<bundles_post_ra>
// kernel: skill_recognition_forward.9
= control target key start
LH: loop header
LB: loop body
LE: loop exit
PB: predicated region body
PF: predicated region fallthrough
CT: control target
= control target key end

     0   :  { %v266_v0 = vmov 0.0   ;;  %vm267_vm0 = vmmov 0   ;;  %vm39_vm1 = vcmask 130048   ;;  %vm199_vm2 = vcmask 64512   ;;  %s343_s1 = inlined_call_operand.vmem [shape: bf16[16,128], index: 1, kind: input, shape index: {}]   ;;  %s344_s0 = inlined_call_operand.vmem [shape: f32[16,16], index: 0, kind: input, shape index: {}]   ;;  %s345_s3 = inlined_call_operand.vmem [shape: bf16[128,8], index: 3, kind: input, shape index: {}]   ;;  %s346_s2 = inlined_call_operand.vmem [shape: f32[1,128], index: 2, kind: input, shape index: {}]   ;;  %s347_s4 = inlined_call_operand.vmem [shape: f32[1,8], index: 4, kind: input, shape index: {}]   ;;  %s348_s5 = inlined_call_operand.vmem [shape: f32[16,8], index: 5, kind: output, shape index: {}]  }
   0x1   :  { %229 = vmatprep.subr.bf16.mxu0 %v266_v0  ;;  %v257_v1 = vld [vmem:[%s343_s1] sm:$0xff]   ;;  %231 = vmatprep.mubr.msk.bf16.mxu0 %vm267_vm0, %v266_v0  ;;  %v22_v3 = vld [vmem:[%s344_s0 + $0x8] sm:$0xff]  ;;  %v260_v7 = vld [vmem:[%s345_s3 + $0x10] sm:$0xff]  }
   0x2   :  { %v21_v2 = vld [vmem:[%s344_s0] sm:$0xff]  ;;  %235 = vmatprep.subr.bf16.mxu1 %v266_v0  ;;  %251 = vmatprep.mubr.msk.bf16.mxu1 %vm267_vm0, %v266_v0  ;;  %v259_v6 = vld [vmem:[%s345_s3 + $0x8] sm:$0xff]   ;;  %v261_v8 = vld [vmem:[%s345_s3 + $0x18] sm:$0xff]  }
   0x3   :  { %230 = vmatpush3.bf16.msra.mxu0 %v257_v1  ;;  %v23_v4 = vpack.c.bf16 %v22_v3, %v21_v2  ;;  %v258_v5 = vld [vmem:[%s345_s3] sm:$0xff]   ;;  %v263_v10 = vld [vmem:[%s345_s3 + $0x28] sm:$0xff]   ;;  %v264_v11 = vld [vmem:[%s345_s3 + $0x30] sm:$0xff]  }
   0x4   :  { %236 = vmatpush3.bf16.msra.mxu1 %v258_v5  ;;  %v262_v9 = vld [vmem:[%s345_s3 + $0x20] sm:$0xff]   ;;  %v265_v12 = vld [vmem:[%s345_s3 + $0x38] sm:$0xff]  }
   0x5   :  { %237 = vmatprep.subr.bf16.mxu1 %v266_v0  ;;  %v206_v13 = vld [vmem:[%s346_s2] ss:$0 sm:$0xff] }
   0x6   :  { %232 = vmatmul.mubr.msk.bf16.vlgmr.msra.gmra.mrb[0].mxu0 %vm39_vm1, %v23_v4  ;;  %v209_v23 = vld [vmem:[%s347_s4] ss:$0 sm:$0xff] }
   0x8   :  { %238 = vmatpush3.bf16.msra.mxu1 %v259_v6 }
   0x9   :  { %239 = vmatprep.subr.bf16.mxu1 %v266_v0 }
   0xc   :  { %240 = vmatpush3.bf16.msra.mxu1 %v260_v7 }
   0xd   :  { %241 = vmatprep.subr.bf16.mxu1 %v266_v0 }
  0x10   :  { %242 = vmatpush3.bf16.msra.mxu1 %v261_v8 }
  0x11   :  { %243 = vmatprep.subr.bf16.mxu1 %v266_v0 }
  0x14   :  { %244 = vmatpush3.bf16.msra.mxu1 %v262_v9 }
  0x15   :  { %245 = vmatprep.subr.bf16.mxu1 %v266_v0 }
  0x18   :  { %246 = vmatpush3.bf16.msra.mxu1 %v263_v10 }
  0x19   :  { %247 = vmatprep.subr.bf16.mxu1 %v266_v0 }
  0x1c   :  { %248 = vmatpush3.bf16.msra.mxu1 %v264_v11 }
  0x1d   :  { %249 = vmatprep.subr.bf16.mxu1 %v266_v0 }
  0x20   :  { %250 = vmatpush3.bf16.msra.mxu1 %v265_v12 }
  0xd9   :  { %v77_v14 = vpop.f32.mrb[0].mxu0 }
  0xda   :  { %v78_v15 = vadd.f32 %v206_v13, %v77_v14  ;;  %v233_v16 = vpop.f32.mrb[1].mxu0 }
  0xdb   :  { %v80_v17 = vpop.f32.mrb[2].mxu0 }
  0xdc   :  { %v81_v18 = vadd.f32 %v206_v13, %v80_v17  ;;  %v234_v19 = vpop.f32.mrb[3].mxu0  ;;  %v84_v20 = vmax.f32 %v78_v15, 0.0 }
  0xde   :  { %v85_v21 = vmax.f32 %v81_v18, 0.0 }
  0xe0   :  { %v86_v22 = vpack.c.bf16 %v85_v21, %v84_v20 }
  0xe2   :  { %252 = vmatmul.mubr.bf16.vlgmr.msra.gmra.mrb[0].mxu1 %v86_v22 }
 0x1b5   :  { %v192_v24 = vpop.f32.mrb[0].mxu1 }
 0x1b6   :  { %v193_v25 = vadd.f32 %v209_v23, %v192_v24  ;;  %v253_v26 = vpop.f32.mrb[1].mxu1 }
 0x1b7   :  { %v195_v27 = vpop.f32.mrb[2].mxu1 }
 0x1b8   :  { %200 = vst.msk [vmem:[%s348_s5] sm:$0xff] %vm199_vm2, %v193_v25  ;;  %v196_v28 = vadd.f32 %v209_v23, %v195_v27  ;;  %v254_v29 = vpop.f32.mrb[3].mxu1 }
 0x1ba   :  { %201 = vst.msk [vmem:[%s348_s5 + $0x8] sm:$0xff] %vm199_vm2, %v196_v28 }

// kernel: skill_recognition_forward.10
= control target key start
LH: loop header
LB: loop body
LE: loop exit
PB: predicated region body
PF: predicated region fallthrough
CT: control target
= control target key end

     0   :  { %vm65_vm0 = vcmask 1041408   ;;  %v484_v1 = vmov 0   ;;  %v485_v4 = vmov 1983009808   ;;  %v40_v6 = vlaneseq  ;;  %s614_s3 = inlined_call_operand.vmem [shape: bf16[4,768], index: 3, kind: input, shape index: {}]   ;;  %s615_s1 = inlined_call_operand.vmem [shape: f32[16,4], index: 1, kind: input, shape index: {}]   ;;  %s616_s2 = inlined_call_operand.vmem [shape: bf16[8,768], index: 2, kind: input, shape index: {}]   ;;  %s617_s0 = inlined_call_operand.vmem [shape: f32[16,8], index: 0, kind: input, shape index: {}]   ;;  %s618_s4 = inlined_call_operand.vmem [shape: f32[1,768], index: 4, kind: input, shape index: {}]   ;;  %s619_s5 = inlined_call_operand.vmem [shape: f32[16,384], index: 5, kind: output, shape index: {0}]   ;;  %s620_s6 = inlined_call_operand.vmem [shape: f32[16,384], index: 6, kind: output, shape index: {1}]  }
   0x1   :  { %v444_v0 = vld.sshfl [vmem:[%s614_s3 + $0x8] sm:$0x33 pattern:$0x76325410]  ;;  %202 = vmatprep.mubr.bf16.mxu0 %v484_v1  ;;  %v29_v2 = vld [vmem:[%s615_s1] sm:$0xff]  ;;  %v38_v5 = vunpack.c.l.s4 %v485_v4  ;;  %116 = vmatprep.mubr.bf16.mxu1 %v484_v1  ;;  %vm232_vm1 = vcmask 1043456  }
   0x2   :  { %v30_v3 = vld [vmem:[%s615_s1 + $0x8] sm:$0xff]  ;;  %v60_v7 = vcombine.high %v444_v0, %v444_v0  ;;  %v79_v8 = vsel %vm65_vm0, %v444_v0, 0  ;;  %v32_v9 = vld [vmem:[%s614_s3] sm:$0xff]  ;;  %v537_v13 = vshrl.u32 %v40_v6, 7  ;;  %v28_v15 = vld [vmem:[%s616_s2 + $0x10] sm:$0xff]  ;;  %vm61_vm2 = vcmask 31744  }
   0x3   :  { %v26_v10 = vld [vmem:[%s616_s2] sm:$0xff]  ;;  %v36_v11 = vcombine.high %v32_v9, %v32_v9  ;;  %v39_v12 = vunpack.c.0.s8 %v38_v5  ;;  %v31_v16 = vpack.c.bf16 %v30_v3, %v29_v2  ;;  %v456_v20 = vcombine.high %v28_v15, %v28_v15  ;;  %v24_v27 = vld [vmem:[%s617_s0 + $0x8] sm:$0xff] }
   0x4   :  { %v452_v14 = vcombine.high %v26_v10, %v26_v10  ;;  %449 = vmatprep.subr.msk.bf16.mxu0 %vm65_vm0, %v60_v7  ;;  %v451_v17 = vcombine.low %v26_v10, %v26_v10  ;;  %v23_v26 = vld [vmem:[%s617_s0] sm:$0xff]  ;;  %v455_v28 = vcombine.low %v28_v15, %v28_v15  ;;  %v27_v29 = vld [vmem:[%s616_s2 + $0x8] sm:$0xff]  ;;  %vm228_vm3 = vcmask 64512  }
   0x5   :  { %171 = vmatpush1.bf16.msra.mxu0 %v79_v8  ;;  %v42_v18 = vsub.s32 %v39_v12, %v537_v13  ;;  %v25_v30 = vpack.c.bf16 %v24_v27, %v23_v26  ;;  %v454_v33 = vcombine.high %v27_v29, %v27_v29  ;;  %v453_v34 = vcombine.low %v27_v29, %v27_v29  ;;  %v380_v37 = vld [vmem:[%s618_s4] sm:$0x3f] }
   0x6   :  { %457 = vmatprep.subr.msk.bf16.mxu0 %vm232_vm1, %v452_v14  ;;  %v234_v19 = vsel %vm232_vm1, %v451_v17, 0  ;;  %v246_v32 = vsel %vm232_vm1, %v455_v28, 0  ;;  %v384_v36 = vsub.s32 0, %v537_v13  ;;  %v388_v38 = vsub.s32 1, %v537_v13 }
   0x7   :  { %v43_v21 = vrot.slane %v32_v9, %v42_v18  ;;  %v50_v22 = vrot.slane %v36_v11, %v42_v18  ;;  %v240_v35 = vsel %vm232_vm1, %v453_v34, 0  ;;  %v400_v47 = vsub.s32 4, %v537_v13 }
   0x8   :  { %450 = vmatmul.mubr.msk.bf16.vlgmr.msra.gmra.mrb[0].mxu0 %vm61_vm2, %v31_v16  ;;  %v385_v40 = vrot.slane %v380_v37, %v384_v36  ;;  %v389_v43 = vrot.slane %v380_v37, %v388_v38  ;;  %v404_v51 = vsub.s32 5, %v537_v13  ;;  %v392_v5 = vsub.s32 2, %v537_v13 }
   0x9   :  { %v51_v23 = vcombine.high %v43_v21, %v43_v21  ;;  %v67_v24 = vsel %vm65_vm0, %v43_v21, 0  ;;  %252 = vmatpush1.bf16.msra.mxu0 %v234_v19  ;;  %v52_v25 = vcombine.high %v50_v22, %v50_v22  ;;  %283 = vmatprep.mubr.bf16.mxu0 %v484_v1  ;;  %v73_v31 = vsel %vm65_vm0, %v50_v22, 0 }
   0xa   :  { %461 = vmatprep.subr.msk.bf16.mxu0 %vm232_vm1, %v456_v20  ;;  %v401_v58 = vrot.slane %v380_v37, %v400_v47  ;;  %v405_v60 = vrot.slane %v380_v37, %v404_v51  ;;  %v396_v6 = vsub.s32 3, %v537_v13  ;;  %v393_v7 = vrot.slane %v380_v37, %v392_v5 }
   0xb   :  { %445 = vmatprep.subr.msk.bf16.mxu1 %vm65_vm0, %v51_v23 }
   0xc   :  { %85 = vmatpush1.bf16.msra.mxu1 %v67_v24  ;;  %v397_v8 = vrot.slane %v380_v37, %v396_v6 }
   0xd   :  { %447 = vmatprep.subr.msk.bf16.mxu1 %vm65_vm0, %v52_v25 }
   0xf   :  { %446 = vmatmul.mubr.msk.bf16.vlgmr.msra.gmra.mrb[0].mxu1 %vm61_vm2, %v31_v16 }
  0x10   :  { %128 = vmatpush1.bf16.msra.mxu1 %v73_v31  ;;  %458 = vmatmul.mubr.msk.bf16.vlgmr.msra.gmra.mrb[4].mxu0 %vm228_vm3, %v25_v30 }
  0x11   :  { %338 = vmatpush1.bf16.msra.mxu0 %v246_v32  ;;  %159 = vmatprep.mubr.bf16.mxu1 %v484_v1 }
  0x12   :  { %459 = vmatprep.subr.msk.bf16.mxu1 %vm232_vm1, %v454_v33  ;;  %369 = vmatprep.mubr.bf16.mxu0 %v484_v1 }
  0x17   :  { %448 = vmatmul.mubr.msk.bf16.vlgmr.msra.gmra.mrb[4].mxu1 %vm61_vm2, %v31_v16 }
  0x18   :  { %295 = vmatpush1.bf16.msra.mxu1 %v240_v35  ;;  %462 = vmatmul.mubr.msk.bf16.vlgmr.msra.gmra.mrb[0].mxu0 %vm228_vm3, %v25_v30 }
  0x19   :  { %326 = vmatprep.mubr.bf16.mxu1 %v484_v1 }
  0x23   :  { %460 = vmatmul.mubr.msk.bf16.vlgmr.msra.gmra.mrb[4].mxu1 %vm228_vm3, %v25_v30 }
  0xe2   :  { %v118_v39 = vpop.f32.mrb[0].mxu1 }
  0xe3   :  { %v120_v41 = vpop.f32.mrb[1].mxu1  ;;  %v285_v42 = vpop.f32.mrb[4].mxu0 }
  0xe4   :  { %v286_v44 = vadd.f32 %v285_v42, %v118_v39  ;;  %v122_v45 = vpop.f32.mrb[2].mxu1  ;;  %v287_v46 = vpop.f32.mrb[5].mxu0 }
  0xe5   :  { %v288_v48 = vadd.f32 %v287_v46, %v120_v41  ;;  %v124_v49 = vpop.f32.mrb[3].mxu1  ;;  %v289_v50 = vpop.f32.mrb[6].mxu0 }
  0xe6   :  { %v412_v52 = vadd.f32 %v385_v40, %v286_v44  ;;  %v290_v53 = vadd.f32 %v289_v50, %v122_v45  ;;  %v291_v54 = vpop.f32.mrb[7].mxu0 }
  0xe7   :  { %v413_v55 = vadd.f32 %v389_v43, %v288_v48  ;;  %v292_v56 = vadd.f32 %v291_v54, %v124_v49 }
  0xe8   :  { %424 = vst [vmem:[%s619_s5] sm:$0xff] %v412_v52  ;;  %v418_v57 = vadd.f32 %v385_v40, %v290_v53 }
  0xe9   :  { %425 = vst [vmem:[%s619_s5 + $0x8] sm:$0xff] %v413_v55  ;;  %v419_v59 = vadd.f32 %v389_v43, %v292_v56 }
  0xea   :  { %427 = vst [vmem:[%s619_s5 + $0x18] sm:$0xff] %v418_v57 }
  0xeb   :  { %428 = vst [vmem:[%s619_s5 + $0x20] sm:$0xff] %v419_v59  ;;  %v371_v61 = vpop.f32.mrb[0].mxu0 }
  0xec   :  { %v416_v62 = vadd.f32 %v401_v58, %v371_v61  ;;  %v373_v63 = vpop.f32.mrb[1].mxu0 }
  0xed   :  { %v417_v0 = vadd.f32 %v405_v60, %v373_v63  ;;  %v375_v1 = vpop.f32.mrb[2].mxu0 }
  0xee   :  { %431 = vst [vmem:[%s620_s6 + $0x8] sm:$0xff] %v416_v62  ;;  %v422_v2 = vadd.f32 %v401_v58, %v375_v1  ;;  %v377_v3 = vpop.f32.mrb[3].mxu0 }
  0xef   :  { %432 = vst [vmem:[%s620_s6 + $0x10] sm:$0xff] %v417_v0  ;;  %v423_v4 = vadd.f32 %v405_v60, %v377_v3 }
  0xf0   :  { %434 = vst [vmem:[%s620_s6 + $0x20] sm:$0xff] %v422_v2 }
  0xf1   :  { %435 = vst [vmem:[%s620_s6 + $0x28] sm:$0xff] %v423_v4 }
  0xf6   :  { %v328_v9 = vpop.f32.mrb[4].mxu1 }
  0xf7   :  { %v414_v10 = vadd.f32 %v393_v7, %v328_v9  ;;  %v330_v11 = vpop.f32.mrb[5].mxu1 }
  0xf8   :  { %v415_v12 = vadd.f32 %v397_v8, %v330_v11  ;;  %v332_v14 = vpop.f32.mrb[6].mxu1 }
  0xf9   :  { %426 = vst [vmem:[%s619_s5 + $0x10] sm:$0xff] %v414_v10  ;;  %v420_v15 = vadd.f32 %v393_v7, %v332_v14  ;;  %v334_v16 = vpop.f32.mrb[7].mxu1 }
  0xfa   :  { %430 = vst [vmem:[%s620_s6] sm:$0xff] %v415_v12  ;;  %v421_v13 = vadd.f32 %v397_v8, %v334_v16 }
  0xfb   :  { %429 = vst [vmem:[%s619_s5 + $0x28] sm:$0xff] %v420_v15 }
  0xfc   :  { %433 = vst [vmem:[%s620_s6 + $0x18] sm:$0xff] %v421_v13 }

// kernel: skill_recognition_forward.12
= control target key start
LH: loop header
LB: loop body
LE: loop exit
PB: predicated region body
PF: predicated region fallthrough
CT: control target
= control target key end

     0   :  { %v1180_v1 = vmov 0   ;;  %s1571_s3 = inlined_call_operand.vmem [shape: bf16[128,768], index: 3, kind: input, shape index: {}]   ;;  %s1572_s2 = inlined_call_operand.vmem [shape: bf16[128,768], index: 2, kind: input, shape index: {}]   ;;  %s1573_s1 = inlined_call_operand.vmem [shape: f32[16,128], index: 1, kind: input, shape index: {}]   ;;  %s1574_s0 = inlined_call_operand.vmem [shape: f32[16,128], index: 0, kind: input, shape index: {}]   ;;  %s1575_s4 = inlined_call_operand.vmem [shape: f32[1,768], index: 4, kind: input, shape index: {}]   ;;  %s1576_s5 = inlined_call_operand.vmem [shape: f32[16,384], index: 5, kind: output, shape index: {0}]   ;;  %s1577_s6 = inlined_call_operand.vmem [shape: f32[16,384], index: 6, kind: output, shape index: {1}]  }
   0x1   :  { %v1036_v0 = vld [vmem:[%s1571_s3 + $0x4] ss:$24 sps:$4 sm:$0xff]   ;;  %397 = vmatprep.mubr.bf16.mxu1 %v1180_v1  ;;  %483 = vmatprep.mubr.bf16.mxu0 %v1180_v1  ;;  %v1038_v2 = vld [vmem:[%s1571_s3 + $0x14] ss:$24 sps:$4 sm:$0xff]   ;;  %v1040_v3 = vld [vmem:[%s1571_s3] ss:$24 sps:$4 sm:$0xff]  }
   0x2   :  { %365 = vmatprep.subr.bf16.mxu1 %v1036_v0  ;;  %v1041_v4 = vld [vmem:[%s1571_s3 + $0x10] ss:$24 sps:$4 sm:$0xff]   ;;  %451 = vmatprep.subr.bf16.mxu0 %v1038_v2  ;;  %v1042_v5 = vld [vmem:[%s1571_s3 + $0x34] ss:$24 sps:$4 sm:$0xff]   ;;  %v1044_v6 = vld [vmem:[%s1571_s3 + $0x44] ss:$24 sps:$4 sm:$0xff]  }
   0x3   :  { %366 = vmatpush1.bf16.msra.mxu1 %v1040_v3  ;;  %452 = vmatpush1.bf16.msra.mxu0 %v1041_v4  ;;  %v1046_v7 = vld [vmem:[%s1571_s3 + $0x30] ss:$24 sps:$4 sm:$0xff]   ;;  %v1047_v8 = vld [vmem:[%s1571_s3 + $0x40] ss:$24 sps:$4 sm:$0xff]   ;;  %v1048_v9 = vld [vmem:[%s1571_s3 + $0x64] ss:$24 sps:$4 sm:$0xff]  }
   0x4   :  { %367 = vmatprep.subr.bf16.mxu1 %v1042_v5  ;;  %453 = vmatprep.subr.bf16.mxu0 %v1044_v6  ;;  %v1050_v10 = vld [vmem:[%s1571_s3 + $0x74] ss:$24 sps:$4 sm:$0xff]   ;;  %v1052_v11 = vld [vmem:[%s1571_s3 + $0x60] ss:$24 sps:$4 sm:$0xff]   ;;  %v1053_v12 = vld [vmem:[%s1571_s3 + $0x70] ss:$24 sps:$4 sm:$0xff]  }
   0x5   :  { %v1054_v13 = vld [vmem:[%s1571_s3 + $0x94] ss:$24 sps:$4 sm:$0xff]   ;;  %v1056_v14 = vld [vmem:[%s1571_s3 + $0xa4] ss:$24 sps:$4 sm:$0xff]   ;;  %v1058_v15 = vld [vmem:[%s1571_s3 + $0x90] ss:$24 sps:$4 sm:$0xff]  }
   0x6   :  { %v1059_v16 = vld [vmem:[%s1571_s3 + $0xa0] ss:$24 sps:$4 sm:$0xff]   ;;  %v1060_v17 = vld [vmem:[%s1571_s3 + $0xc4] ss:$24 sps:$4 sm:$0xff]   ;;  %v1062_v18 = vld [vmem:[%s1571_s3 + $0xd4] ss:$24 sps:$4 sm:$0xff]  }
   0x7   :  { %368 = vmatpush1.bf16.msra.mxu1 %v1046_v7  ;;  %454 = vmatpush1.bf16.msra.mxu0 %v1047_v8  ;;  %v1064_v19 = vld [vmem:[%s1571_s3 + $0xc0] ss:$24 sps:$4 sm:$0xff]   ;;  %v1065_v20 = vld [vmem:[%s1571_s3 + $0xd0] ss:$24 sps:$4 sm:$0xff]   ;;  %v1066_v21 = vld [vmem:[%s1571_s3 + $0xf4] ss:$24 sps:$4 sm:$0xff]  }
   0x8   :  { %369 = vmatprep.subr.bf16.mxu1 %v1048_v9  ;;  %455 = vmatprep.subr.bf16.mxu0 %v1050_v10  ;;  %v1068_v22 = vld [vmem:[%s1571_s3 + $0x104] ss:$24 sps:$4 sm:$0xff]   ;;  %v1070_v23 = vld [vmem:[%s1571_s3 + $0xf0] ss:$24 sps:$4 sm:$0xff]   ;;  %v1071_v24 = vld [vmem:[%s1571_s3 + $0x100] ss:$24 sps:$4 sm:$0xff]  }
   0x9   :  { %v1072_v25 = vld [vmem:[%s1571_s3 + $0x124] ss:$24 sps:$4 sm:$0xff]   ;;  %v1074_v26 = vld [vmem:[%s1571_s3 + $0x134] ss:$24 sps:$4 sm:$0xff]   ;;  %v1076_v27 = vld [vmem:[%s1571_s3 + $0x120] ss:$24 sps:$4 sm:$0xff]  }
   0xa   :  { %v1077_v28 = vld [vmem:[%s1571_s3 + $0x130] ss:$24 sps:$4 sm:$0xff]   ;;  %v1078_v29 = vld [vmem:[%s1571_s3 + $0x154] ss:$24 sps:$4 sm:$0xff]   ;;  %v1080_v30 = vld [vmem:[%s1571_s3 + $0x164] ss:$24 sps:$4 sm:$0xff]  }
   0xb   :  { %370 = vmatpush1.bf16.msra.mxu1 %v1052_v11  ;;  %456 = vmatpush1.bf16.msra.mxu0 %v1053_v12  ;;  %v1082_v31 = vld [vmem:[%s1571_s3 + $0x150] ss:$24 sps:$4 sm:$0xff]   ;;  %v1083_v32 = vld [vmem:[%s1571_s3 + $0x160] ss:$24 sps:$4 sm:$0xff]   ;;  %v1086_v35 = vld [vmem:[%s1571_s3 + $0xc] ss:$24 sps:$4 sm:$0xff]  }
   0xc   :  { %371 = vmatprep.subr.bf16.mxu1 %v1054_v13  ;;  %457 = vmatprep.subr.bf16.mxu0 %v1056_v14  ;;  %v74_v33 = vld [vmem:[%s1573_s1] sm:$0xff]  ;;  %v75_v34 = vld [vmem:[%s1573_s1 + $0x8] sm:$0xff]  ;;  %v1092_v40 = vld [vmem:[%s1571_s3 + $0x3c] ss:$24 sps:$4 sm:$0xff]  }
   0xd   :  { %v1089_v36 = vld [vmem:[%s1572_s2 + $0x4] ss:$24 sps:$4 sm:$0xff]   ;;  %v1326_v37 = vpack.c.bf16 %v75_v34, %v74_v33  ;;  %v1084_v38 = vld [vmem:[%s1571_s3 + $0x8] ss:$24 sps:$4 sm:$0xff]   ;;  %v1095_v41 = vld [vmem:[%s1572_s2 + $0x34] ss:$24 sps:$4 sm:$0xff]  }
   0xe   :  { %v1087_v39 = vld [vmem:[%s1572_s2] ss:$24 sps:$4 sm:$0xff]   ;;  %v1093_v43 = vld [vmem:[%s1572_s2 + $0x30] ss:$24 sps:$4 sm:$0xff]   ;;  %v1098_v44 = vld [vmem:[%s1571_s3 + $0x6c] ss:$24 sps:$4 sm:$0xff]  }
   0xf   :  { %372 = vmatpush1.bf16.msra.mxu1 %v1058_v15  ;;  %458 = vmatpush1.bf16.msra.mxu0 %v1059_v16  ;;  %v1090_v42 = vld [vmem:[%s1571_s3 + $0x38] ss:$24 sps:$4 sm:$0xff]   ;;  %v1101_v45 = vld [vmem:[%s1572_s2 + $0x64] ss:$24 sps:$4 sm:$0xff]   ;;  %v1096_v46 = vld [vmem:[%s1571_s3 + $0x68] ss:$24 sps:$4 sm:$0xff]  }
  0x10   :  { %373 = vmatprep.subr.bf16.mxu1 %v1060_v17  ;;  %459 = vmatprep.subr.bf16.mxu0 %v1062_v18  ;;  %v1099_v47 = vld [vmem:[%s1572_s2 + $0x60] ss:$24 sps:$4 sm:$0xff]   ;;  %v1104_v48 = vld [vmem:[%s1571_s3 + $0x9c] ss:$24 sps:$4 sm:$0xff]   ;;  %v1105_v51 = vld [vmem:[%s1572_s2 + $0x90] ss:$24 sps:$4 sm:$0xff]  }
  0x11   :  { %v1107_v49 = vld [vmem:[%s1572_s2 + $0x94] ss:$24 sps:$4 sm:$0xff]   ;;  %v1102_v50 = vld [vmem:[%s1571_s3 + $0x98] ss:$24 sps:$4 sm:$0xff]   ;;  %v1113_v53 = vld [vmem:[%s1572_s2 + $0xc4] ss:$24 sps:$4 sm:$0xff]  }
  0x12   :  { %v1110_v52 = vld [vmem:[%s1571_s3 + $0xcc] ss:$24 sps:$4 sm:$0xff]   ;;  %v1108_v54 = vld [vmem:[%s1571_s3 + $0xc8] ss:$24 sps:$4 sm:$0xff]   ;;  %v1116_v56 = vld [vmem:[%s1571_s3 + $0xfc] ss:$24 sps:$4 sm:$0xff]  }
  0x13   :  { %374 = vmatpush1.bf16.msra.mxu1 %v1064_v19  ;;  %460 = vmatpush1.bf16.msra.mxu0 %v1065_v20  ;;  %v1111_v55 = vld [vmem:[%s1572_s2 + $0xc0] ss:$24 sps:$4 sm:$0xff]   ;;  %v1119_v57 = vld [vmem:[%s1572_s2 + $0xf4] ss:$24 sps:$4 sm:$0xff]   ;;  %v1117_v59 = vld [vmem:[%s1572_s2 + $0xf0] ss:$24 sps:$4 sm:$0xff]  }
  0x14   :  { %375 = vmatprep.subr.bf16.mxu1 %v1066_v21  ;;  %461 = vmatprep.subr.bf16.mxu0 %v1068_v22  ;;  %v1114_v58 = vld [vmem:[%s1571_s3 + $0xf8] ss:$24 sps:$4 sm:$0xff]   ;;  %v1122_v60 = vld [vmem:[%s1571_s3 + $0x12c] ss:$24 sps:$4 sm:$0xff]   ;;  %v1120_v62 = vld [vmem:[%s1571_s3 + $0x128] ss:$24 sps:$4 sm:$0xff]  }
  0x15   :  { %v1125_v61 = vld [vmem:[%s1572_s2 + $0x124] ss:$24 sps:$4 sm:$0xff]   ;;  %v1123_v63 = vld [vmem:[%s1572_s2 + $0x120] ss:$24 sps:$4 sm:$0xff]   ;;  %v1131_v2 = vld [vmem:[%s1572_s2 + $0x154] ss:$24 sps:$4 sm:$0xff]  }
  0x16   :  { %v1128_v0 = vld [vmem:[%s1571_s3 + $0x15c] ss:$24 sps:$4 sm:$0xff]   ;;  %v1126_v3 = vld [vmem:[%s1571_s3 + $0x158] ss:$24 sps:$4 sm:$0xff]   ;;  %v23_v5 = vld [vmem:[%s1574_s0] sm:$0xff] }
  0x17   :  { %376 = vmatpush1.bf16.msra.mxu1 %v1070_v23  ;;  %462 = vmatpush1.bf16.msra.mxu0 %v1071_v24  ;;  %v1129_v4 = vld [vmem:[%s1572_s2 + $0x150] ss:$24 sps:$4 sm:$0xff]   ;;  %v1134_v7 = vld [vmem:[%s1572_s2 + $0xc] ss:$24 sps:$4 sm:$0xff]   ;;  %v1140_v12 = vld [vmem:[%s1572_s2 + $0x3c] ss:$24 sps:$4 sm:$0xff]  }
  0x18   :  { %377 = vmatprep.subr.bf16.mxu1 %v1072_v25  ;;  %463 = vmatprep.subr.bf16.mxu0 %v1074_v26  ;;  %v24_v6 = vld [vmem:[%s1574_s0 + $0x8] sm:$0xff]  ;;  %v1143_v13 = vld [vmem:[%s1572_s2 + $0x44] ss:$24 sps:$4 sm:$0xff]   ;;  %v1138_v14 = vld [vmem:[%s1572_s2 + $0x38] ss:$24 sps:$4 sm:$0xff]  }
  0x19   :  { %v1137_v8 = vld [vmem:[%s1572_s2 + $0x14] ss:$24 sps:$4 sm:$0xff]   ;;  %v1434_v9 = vpack.c.bf16 %v24_v6, %v23_v5  ;;  %v1132_v10 = vld [vmem:[%s1572_s2 + $0x8] ss:$24 sps:$4 sm:$0xff]   ;;  %v1150_v21 = vld [vmem:[%s1572_s2 + $0x98] ss:$24 sps:$4 sm:$0xff]  }
  0x1a   :  { %v1135_v11 = vld [vmem:[%s1572_s2 + $0x10] ss:$24 sps:$4 sm:$0xff]   ;;  %v1141_v15 = vld [vmem:[%s1572_s2 + $0x40] ss:$24 sps:$4 sm:$0xff]   ;;  %v1146_v16 = vld [vmem:[%s1572_s2 + $0x6c] ss:$24 sps:$4 sm:$0xff]  }
  0x1b   :  { %378 = vmatpush1.bf16.msra.mxu1 %v1076_v27  ;;  %464 = vmatpush1.bf16.msra.mxu0 %v1077_v28  ;;  %v1149_v17 = vld [vmem:[%s1572_s2 + $0x74] ss:$24 sps:$4 sm:$0xff]   ;;  %v1144_v18 = vld [vmem:[%s1572_s2 + $0x68] ss:$24 sps:$4 sm:$0xff]   ;;  %v1167_v28 = vld [vmem:[%s1572_s2 + $0x104] ss:$24 sps:$4 sm:$0xff]  }
  0x1c   :  { %379 = vmatprep.subr.bf16.mxu1 %v1078_v29  ;;  %465 = vmatprep.subr.bf16.mxu0 %v1080_v30  ;;  %v1147_v19 = vld [vmem:[%s1572_s2 + $0x70] ss:$24 sps:$4 sm:$0xff]   ;;  %v1152_v20 = vld [vmem:[%s1572_s2 + $0x9c] ss:$24 sps:$4 sm:$0xff]   ;;  %v1153_v22 = vld [vmem:[%s1572_s2 + $0xa0] ss:$24 sps:$4 sm:$0xff]  }
  0x1d   :  { %v1158_v23 = vld [vmem:[%s1572_s2 + $0xcc] ss:$24 sps:$4 sm:$0xff]   ;;  %v1156_v25 = vld [vmem:[%s1572_s2 + $0xc8] ss:$24 sps:$4 sm:$0xff]   ;;  %v1164_v27 = vld [vmem:[%s1572_s2 + $0xfc] ss:$24 sps:$4 sm:$0xff]  }
  0x1e   :  { %v1161_v24 = vld [vmem:[%s1572_s2 + $0xd4] ss:$24 sps:$4 sm:$0xff]   ;;  %v1159_v26 = vld [vmem:[%s1572_s2 + $0xd0] ss:$24 sps:$4 sm:$0xff]   ;;  %v1165_v30 = vld [vmem:[%s1572_s2 + $0x100] ss:$24 sps:$4 sm:$0xff]  }
  0x1f   :  { %380 = vmatpush1.bf16.msra.mxu1 %v1082_v31  ;;  %466 = vmatpush1.bf16.msra.mxu0 %v1083_v32  ;;  %v1162_v29 = vld [vmem:[%s1572_s2 + $0xf8] ss:$24 sps:$4 sm:$0xff]   ;;  %v1170_v31 = vld [vmem:[%s1572_s2 + $0x12c] ss:$24 sps:$4 sm:$0xff]   ;;  %v1168_v33 = vld [vmem:[%s1572_s2 + $0x128] ss:$24 sps:$4 sm:$0xff]  }
  0x20   :  { %408 = vmatprep.subr.bf16.mxu1 %v1086_v35  ;;  %734 = vmatprep.subr.bf16.mxu0 %v1089_v36  ;;  %v1173_v32 = vld [vmem:[%s1572_s2 + $0x134] ss:$24 sps:$4 sm:$0xff]   ;;  %v1171_v34 = vld [vmem:[%s1572_s2 + $0x130] ss:$24 sps:$4 sm:$0xff]   ;;  %v1179_v36 = vld [vmem:[%s1572_s2 + $0x164] ss:$24 sps:$4 sm:$0xff]  }
  0x21   :  { %v1176_v35 = vld [vmem:[%s1572_s2 + $0x15c] ss:$24 sps:$4 sm:$0xff]  }
  0x22   :  { %398 = vmatmul.mubr.bf16.vlgmr.msra.gmra.mrb[0].mxu1 %v1326_v37  ;;  %484 = vmatmul.mubr.bf16.vlgmr.msra.gmra.mrb[0].mxu0 %v1326_v37 }
  0x23   :  { %409 = vmatpush1.bf16.msra.mxu1 %v1084_v38  ;;  %735 = vmatpush1.bf16.msra.mxu0 %v1087_v39  ;;  %v1177_v38 = vld [vmem:[%s1572_s2 + $0x160] ss:$24 sps:$4 sm:$0xff]  }
  0x24   :  { %410 = vmatprep.subr.bf16.mxu1 %v1092_v40  ;;  %736 = vmatprep.subr.bf16.mxu0 %v1095_v41 }
  0x25   :  { %766 = vmatprep.mubr.bf16.mxu0 %v1180_v1  ;;  %440 = vmatprep.mubr.bf16.mxu1 %v1180_v1 }
  0x27   :  { %411 = vmatpush1.bf16.msra.mxu1 %v1090_v42  ;;  %737 = vmatpush1.bf16.msra.mxu0 %v1093_v43  ;;  %v865_v43 = vlaneseq }
  0x28   :  { %412 = vmatprep.subr.bf16.mxu1 %v1098_v44  ;;  %738 = vmatprep.subr.bf16.mxu0 %v1101_v45 }
  0x29   :  { %v866_v44 = vshrl.u32 %v865_v43, 7 }
  0x2b   :  { %413 = vmatpush1.bf16.msra.mxu1 %v1096_v46  ;;  %739 = vmatpush1.bf16.msra.mxu0 %v1099_v47  ;;  %v867_v45 = vsub.s32 0, %v866_v44  ;;  %v863_v46 = vld [vmem:[%s1575_s4] sm:$0x3f]  ;;  %v871_v47 = vsub.s32 1, %v866_v44 }
  0x2c   :  { %414 = vmatprep.subr.bf16.mxu1 %v1104_v48  ;;  %740 = vmatprep.subr.bf16.mxu0 %v1107_v49 }
  0x2d   :  { %v868_v48 = vrot.slane %v863_v46, %v867_v45 }
  0x2f   :  { %415 = vmatpush1.bf16.msra.mxu1 %v1102_v50  ;;  %741 = vmatpush1.bf16.msra.mxu0 %v1105_v51  ;;  %v872_v50 = vrot.slane %v863_v46, %v871_v47 }
  0x30   :  { %416 = vmatprep.subr.bf16.mxu1 %v1110_v52  ;;  %742 = vmatprep.subr.bf16.mxu0 %v1113_v53 }
  0x33   :  { %417 = vmatpush1.bf16.msra.mxu1 %v1108_v54  ;;  %743 = vmatpush1.bf16.msra.mxu0 %v1111_v55 }
  0x34   :  { %418 = vmatprep.subr.bf16.mxu1 %v1116_v56  ;;  %744 = vmatprep.subr.bf16.mxu0 %v1119_v57 }
  0x37   :  { %419 = vmatpush1.bf16.msra.mxu1 %v1114_v58  ;;  %745 = vmatpush1.bf16.msra.mxu0 %v1117_v59 }
  0x38   :  { %420 = vmatprep.subr.bf16.mxu1 %v1122_v60  ;;  %746 = vmatprep.subr.bf16.mxu0 %v1125_v61 }
  0x3b   :  { %421 = vmatpush1.bf16.msra.mxu1 %v1120_v62  ;;  %747 = vmatpush1.bf16.msra.mxu0 %v1123_v63  ;;  %v875_v62 = vsub.s32 2, %v866_v44  ;;  %v883_v63 = vsub.s32 4, %v866_v44 }
  0x3c   :  { %422 = vmatprep.subr.bf16.mxu1 %v1128_v0  ;;  %748 = vmatprep.subr.bf16.mxu0 %v1131_v2  ;;  %v879_v0 = vsub.s32 3, %v866_v44  ;;  %v887_v2 = vsub.s32 5, %v866_v44 }
  0x3e   :  { %v880_v5 = vrot.slane %v863_v46, %v879_v0  ;;  %v888_v6 = vrot.slane %v863_v46, %v887_v2 }
  0x3f   :  { %423 = vmatpush1.bf16.msra.mxu1 %v1126_v3  ;;  %749 = vmatpush1.bf16.msra.mxu0 %v1129_v4  ;;  %v876_v3 = vrot.slane %v863_v46, %v875_v62  ;;  %v884_v4 = vrot.slane %v863_v46, %v883_v63 }
  0x40   :  { %777 = vmatprep.subr.bf16.mxu1 %v1134_v7  ;;  %820 = vmatprep.subr.bf16.mxu0 %v1137_v8 }
  0x42   :  { %767 = vmatmul.mubr.bf16.vlgmr.msra.gmra.mrb[4].mxu0 %v1434_v9  ;;  %441 = vmatmul.mubr.bf16.vlgmr.msra.gmra.mrb[4].mxu1 %v1326_v37  ;;  %v1174_v37 = vld [vmem:[%s1572_s2 + $0x158] ss:$24 sps:$4 sm:$0xff]  }
  0x43   :  { %778 = vmatpush1.bf16.msra.mxu1 %v1132_v10  ;;  %821 = vmatpush1.bf16.msra.mxu0 %v1135_v11 }
  0x44   :  { %779 = vmatprep.subr.bf16.mxu1 %v1140_v12  ;;  %822 = vmatprep.subr.bf16.mxu0 %v1143_v13 }
  0x45   :  { %809 = vmatprep.mubr.bf16.mxu1 %v1180_v1  ;;  %852 = vmatprep.mubr.bf16.mxu0 %v1180_v1  ;;  %v1155_v1 = vld [vmem:[%s1572_s2 + $0xa4] ss:$24 sps:$4 sm:$0xff]  }
  0x47   :  { %780 = vmatpush1.bf16.msra.mxu1 %v1138_v14  ;;  %823 = vmatpush1.bf16.msra.mxu0 %v1141_v15 }
  0x48   :  { %781 = vmatprep.subr.bf16.mxu1 %v1146_v16  ;;  %824 = vmatprep.subr.bf16.mxu0 %v1149_v17 }
  0x4b   :  { %782 = vmatpush1.bf16.msra.mxu1 %v1144_v18  ;;  %825 = vmatpush1.bf16.msra.mxu0 %v1147_v19 }
  0x4c   :  { %783 = vmatprep.subr.bf16.mxu1 %v1152_v20  ;;  %826 = vmatprep.subr.bf16.mxu0 %v1155_v1 }
  0x4f   :  { %784 = vmatpush1.bf16.msra.mxu1 %v1150_v21  ;;  %827 = vmatpush1.bf16.msra.mxu0 %v1153_v22 }
  0x50   :  { %785 = vmatprep.subr.bf16.mxu1 %v1158_v23  ;;  %828 = vmatprep.subr.bf16.mxu0 %v1161_v24 }
  0x53   :  { %786 = vmatpush1.bf16.msra.mxu1 %v1156_v25  ;;  %829 = vmatpush1.bf16.msra.mxu0 %v1159_v26 }
  0x54   :  { %787 = vmatprep.subr.bf16.mxu1 %v1164_v27  ;;  %830 = vmatprep.subr.bf16.mxu0 %v1167_v28 }
  0x57   :  { %788 = vmatpush1.bf16.msra.mxu1 %v1162_v29  ;;  %831 = vmatpush1.bf16.msra.mxu0 %v1165_v30 }
  0x58   :  { %789 = vmatprep.subr.bf16.mxu1 %v1170_v31  ;;  %832 = vmatprep.subr.bf16.mxu0 %v1173_v32 }
  0x5b   :  { %790 = vmatpush1.bf16.msra.mxu1 %v1168_v33  ;;  %833 = vmatpush1.bf16.msra.mxu0 %v1171_v34 }
  0x5c   :  { %791 = vmatprep.subr.bf16.mxu1 %v1176_v35  ;;  %834 = vmatprep.subr.bf16.mxu0 %v1179_v36 }
  0x5f   :  { %792 = vmatpush1.bf16.msra.mxu1 %v1174_v37  ;;  %835 = vmatpush1.bf16.msra.mxu0 %v1177_v38 }
  0x62   :  { %810 = vmatmul.mubr.bf16.vlgmr.msra.gmra.mrb[4].mxu1 %v1434_v9  ;;  %853 = vmatmul.mubr.bf16.vlgmr.msra.gmra.mrb[0].mxu0 %v1434_v9 }
  0xf5   :  { %v399_v39 = vpop.f32.mrb[0].mxu1 }
  0xf6   :  { %v401_v40 = vpop.f32.mrb[1].mxu1 }
  0xf7   :  { %v403_v41 = vpop.f32.mrb[2].mxu1 }
  0xf8   :  { %v405_v42 = vpop.f32.mrb[3].mxu1 }
 0x115   :  { %v768_v49 = vpop.f32.mrb[4].mxu0 }
 0x116   :  { %v769_v51 = vadd.f32 %v768_v49, %v399_v39  ;;  %v770_v52 = vpop.f32.mrb[5].mxu0 }
 0x117   :  { %v771_v53 = vadd.f32 %v770_v52, %v401_v40  ;;  %v772_v54 = vpop.f32.mrb[6].mxu0 }
 0x118   :  { %v895_v55 = vadd.f32 %v868_v48, %v769_v51  ;;  %v773_v56 = vadd.f32 %v772_v54, %v403_v41  ;;  %v774_v57 = vpop.f32.mrb[7].mxu0 }
 0x119   :  { %v896_v58 = vadd.f32 %v872_v50, %v771_v53  ;;  %v775_v59 = vadd.f32 %v774_v57, %v405_v42 }
 0x11a   :  { %907 = vst [vmem:[%s1576_s5] sm:$0xff] %v895_v55  ;;  %v901_v60 = vadd.f32 %v868_v48, %v773_v56 }
 0x11b   :  { %908 = vst [vmem:[%s1576_s5 + $0x8] sm:$0xff] %v896_v58  ;;  %v902_v61 = vadd.f32 %v872_v50, %v775_v59 }
 0x11c   :  { %910 = vst [vmem:[%s1576_s5 + $0x18] sm:$0xff] %v901_v60 }
 0x11d   :  { %911 = vst [vmem:[%s1576_s5 + $0x20] sm:$0xff] %v902_v61 }
 0x135   :  { %v811_v7 = vpop.f32.mrb[4].mxu1  ;;  %v854_v8 = vpop.f32.mrb[0].mxu0 }
 0x136   :  { %v897_v9 = vadd.f32 %v876_v3, %v811_v7  ;;  %v899_v10 = vadd.f32 %v884_v4, %v854_v8  ;;  %v813_v11 = vpop.f32.mrb[5].mxu1  ;;  %v856_v12 = vpop.f32.mrb[1].mxu0 }
 0x137   :  { %v898_v13 = vadd.f32 %v880_v5, %v813_v11  ;;  %v900_v14 = vadd.f32 %v888_v6, %v856_v12  ;;  %v815_v15 = vpop.f32.mrb[6].mxu1  ;;  %v858_v16 = vpop.f32.mrb[2].mxu0 }
 0x138   :  { %909 = vst [vmem:[%s1576_s5 + $0x10] sm:$0xff] %v897_v9  ;;  %914 = vst [vmem:[%s1577_s6 + $0x8] sm:$0xff] %v899_v10  ;;  %v903_v17 = vadd.f32 %v876_v3, %v815_v15  ;;  %v905_v18 = vadd.f32 %v884_v4, %v858_v16  ;;  %v817_v19 = vpop.f32.mrb[7].mxu1  ;;  %v860_v20 = vpop.f32.mrb[3].mxu0 }
 0x139   :  { %913 = vst [vmem:[%s1577_s6] sm:$0xff] %v898_v13  ;;  %915 = vst [vmem:[%s1577_s6 + $0x10] sm:$0xff] %v900_v14  ;;  %v904_v1 = vadd.f32 %v880_v5, %v817_v19  ;;  %v906_v21 = vadd.f32 %v888_v6, %v860_v20 }
 0x13a   :  { %912 = vst [vmem:[%s1576_s5 + $0x28] sm:$0xff] %v903_v17  ;;  %917 = vst [vmem:[%s1577_s6 + $0x20] sm:$0xff] %v905_v18 }
 0x13b   :  { %916 = vst [vmem:[%s1577_s6 + $0x18] sm:$0xff] %v904_v1  ;;  %918 = vst [vmem:[%s1577_s6 + $0x28] sm:$0xff] %v906_v21 }

// kernel: skill_recognition_forward.11
= control target key start
LH: loop header
LB: loop body
LE: loop exit
PB: predicated region body
PF: predicated region fallthrough
CT: control target
= control target key end

     0   :  { %11 = vsyncpa [#allocation4], 0  ;;  %s2426_s18 = smov 0   ;;  %s3101_s0 = inlined_call_operand.vmem [shape: f32[8,2,384], index: 0, kind: input, shape index: {}]   ;;  %s3102_s1 = inlined_call_operand.vmem [shape: f32[8,2,384], index: 1, kind: input, shape index: {}]   ;;  %s3103_s2 = inlined_call_operand.hbm [shape: bf16[256,768], index: 2, kind: input, shape index: {}]   ;;  %s3104_s3 = inlined_call_operand.vmem [shape: f32[1,768], index: 3, kind: input, shape index: {}]   ;;  %s3105_s4 = inlined_call_operand.vmem [shape: f32[8,2,128], index: 4, kind: output, shape index: {0}]   ;;  %s3106_s5 = inlined_call_operand.vmem [shape: f32[8,2,128], index: 5, kind: output, shape index: {1}]  }
   0x1 LB: > { %s2432_s19 = sadd.s32 4294967295, %s2389_s18   ;;  %p1869_p0 = scmp.ge.s32.totalorder %s2389_s18, 1  ;;  %s2389_s18 = sphi %s2426_s18, %s17_s18  }
   0x2   : > { %p172_p1 = scmp.lt.s32.totalorder %s2389_s18, 3  ;;  %s2391_s20 = smov [#allocation3]  }
   0x3   : > { %s184_s21 = sshll.u32 %s2391_s20, 4  ;;  %p3107_p4 = scmp.eq.s32.totalorder %s2432_s19, 0  ;;  %s185_s21 = int_to_ptr.vmem [resolvable:$true] %s184_s21 }
   0x4   : > { %p2437_p3 = pnand %p1869_p0, %p172_p1  ;;  %s2351_s26 = scalar_lea.hbm %s3103_s2, 12288 }
   0x5   : > { %p2352_p7 = scmp.ne.s32.totalorder %s3103_s2, %s2351_s26  ;;  %p2358_p11 = scmp.lt.u32.totalorder %s2351_s26, %s3103_s2 }
   0x6   : > { %s3218_s22 = scalar_select %p2437_p3, 1, 0 }
   0x7   : > { %p2019_p5 = pneg %p2437_p3 }
   0x9   : > { %p2446_p6 = pnand %p3107_p4, %p2019_p5 }
   0xb   : > { %p2353_p8 = pneg %p2446_p6 }
   0xd   : > { %p2354_p9 = pnand %p2353_p8, %p2352_p7 }
   0xf   : > { %p2355_p10 = pneg %p2354_p9 }
  0x11   : > { %p2360_p12 = pnand %p2358_p11, %p2355_p10 }
  0x13   : > { %2363 = shalt.err (!%p2360_p12)
}
  0x14   : > { %s2364_s6 = scalar_lea.vmem %s185_s21, 12288  ;;  %p2372_p5 = scmp.lt.s32.totalorder %s185_s21, %s185_s21 }
  0x15   : > { %p2365_p13 = scmp.ne.s32.totalorder %s185_s21, %s2364_s6  ;;  %p2373_p2 = scmp.lt.s32.totalorder %s2364_s6, %s2364_s6 }
  0x17   : > { %p2367_p0 = pnand %p2365_p13, %p2353_p8  ;;  %p2374_p4 = por %p2373_p2, %p2372_p5 }
  0x19   : > { %p2368_p1 = pneg %p2367_p0 }
  0x1b   : > { %p2375_p3 = pnand %p2374_p4, %p2368_p1 }
  0x1d   : > { %2378 = shalt.err (!%p2375_p3)
}
  0x1e   : > { %s2392_s7 = smov 384   ;;  %s2393_s8 = smov 24  }
  0x1f   : > { %2022 = dma.hbm_to_vmem [thread:$0]  (!%p2446_p6), %s3103_s2, 12288, %s185_s21, [#allocation4], %s2392_s7, %s2392_s7, %s2393_s8  }
  0x20   : > { %p3220_p7 = scmp.ne.s32.totalorder %s3218_s22, 0 }
  0x22   : > { %225 = sbr.rel (%p3220_p7) target bundleno = 1426 (0x592), region = 36 }
  0x29   : > { %p3221_p9 = scmp.eq.s32.totalorder %s2432_s19, 0 }
  0x2b   : > { %2384 = dma.done.wait (%p3221_p9), [#allocation4], 12288   ;;  %p3222_p8 = pmov %p3221_p9 }
  0x2c   : > { %s1874_s11 = sshll.u32 %s2432_s19, 2  ;;  %s274_s12 = ssub.s32 1, %s2432_s19 }
  0x2d   : > { %2386 = vsyncadd (%p3222_p8), [#allocation4], 4294955008  ;;  %p268_p2 = scmp.lt.s32.totalorder %s1874_s11, 7  ;;  %s1876_s13 = sshll.u32 %s274_s12, 2 }
  0x2e   : > { %p276_p3 = scmp.lt.s32.totalorder %s1876_s13, 7  ;;  %p3223_p4 = scmp.ne.s32.totalorder %s2432_s19, 0 }
  0x2f   : > { %s3361_s11 = smov (!%p268_p2, %s1874_s11), 7  ;;  %v2394_v0 = vmov (!%p3223_p4), 0.0  }
  0x30   : > { %s3363_s13 = smov (!%p276_p3, %s1876_s13), 7  ;;  %s2013_s14 = smul.u32 6, %s3361_s11  ;;  %301 = vst [vmem:[#allocation2] sm:$0xf] (!%p3223_p4), %v2394_v0 }
  0x31   : > { %s1879_s15 = sshll.u32 %s3361_s11, 1  ;;  %s2014_s16 = smul.u32 6, %s3363_s13 }
  0x32   : > { %s2477_s21 = scalar_lea.vmem %s3105_s4, %s1879_s15  ;;  %s2482_s24 = scalar_lea.vmem %s3101_s0, %s2013_s14 }
  0x33   : > { %s1881_s25 = sshll.u32 %s3363_s13, 1  ;;  %s2487_s28 = scalar_lea.vmem %s3102_s1, %s2014_s16 }
  0x34   : > { %s2492_s6 = scalar_lea.vmem %s3106_s5, %s1881_s25  ;;  %300 = sbr.rel (%p3223_p4) target bundleno = 59 (0x3b), region = 44 }
  0x3b PF: > { %v2496_v1 = vld [vmem:[#allocation3 + $0x4] ss:$24 sps:$4 sm:$0xff]   ;;  %v2498_v2 = vld [vmem:[#allocation3] ss:$24 sps:$4 sm:$0xff]   ;;  %v2501_v3 = vld [vmem:[#allocation3 + $0x34] ss:$24 sps:$4 sm:$0xff]   ;;  %v404_v25 = vlaneseq }
  0x3c   : > { %924 = vmatprep.subr.bf16.mxu0 %v2496_v1  ;;  %v2504_v4 = vld [vmem:[#allocation3 + $0x30] ss:$24 sps:$4 sm:$0xff]   ;;  %v2507_v5 = vld [vmem:[#allocation3 + $0x64] ss:$24 sps:$4 sm:$0xff]   ;;  %v2510_v6 = vld [vmem:[#allocation3 + $0x60] ss:$24 sps:$4 sm:$0xff]  }
  0x3d   : > { %925 = vmatpush1.bf16.msra.mxu0 %v2498_v2  ;;  %v2513_v7 = vld [vmem:[#allocation3 + $0x94] ss:$24 sps:$4 sm:$0xff]   ;;  %v2516_v8 = vld [vmem:[#allocation3 + $0x90] ss:$24 sps:$4 sm:$0xff]   ;;  %v2523_v11 = vld [vmem:[#allocation3 + $0xc4] ss:$24 sps:$4 sm:$0xff]  }
  0x3e   : > { %926 = vmatprep.subr.bf16.mxu0 %v2501_v3  ;;  %v2518_v9 = vld [vmem:[#allocation3 + $0xc] ss:$24 sps:$4 sm:$0xff]   ;;  %v2520_v10 = vld [vmem:[#allocation3 + $0x8] ss:$24 sps:$4 sm:$0xff]   ;;  %v2526_v12 = vld [vmem:[#allocation3 + $0x3c] ss:$24 sps:$4 sm:$0xff]  }
  0x3f   : > { %965 = vmatprep.subr.bf16.mxu1 %v2518_v9  ;;  %v2529_v13 = vld [vmem:[#allocation3 + $0x38] ss:$24 sps:$4 sm:$0xff]   ;;  %v2536_v15 = vld [vmem:[#allocation3 + $0xf4] ss:$24 sps:$4 sm:$0xff]   ;;  %v2541_v17 = vld [vmem:[#allocation3 + $0x68] ss:$24 sps:$4 sm:$0xff]  }
  0x40   : > { %966 = vmatpush1.bf16.msra.mxu1 %v2520_v10  ;;  %3224 = vst [vmem:[#allocation6_spill] sm:$0xff] %v2529_v13  ;;  %v2532_v14 = vld [vmem:[#allocation3 + $0xc0] ss:$24 sps:$4 sm:$0xff]   ;;  %v2538_v16 = vld [vmem:[#allocation3 + $0x6c] ss:$24 sps:$4 sm:$0xff]   ;;  %3226 = vst [vmem:[#allocation8_spill] sm:$0xff] %v2541_v17 }
  0x41   : > { %927 = vmatpush1.bf16.msra.mxu0 %v2504_v4  ;;  %967 = vmatprep.subr.bf16.mxu1 %v2526_v12  ;;  %3225 = vst [vmem:[#allocation7_spill] sm:$0xff] %v2538_v16  ;;  %v2544_v18 = vld [vmem:[#allocation3 + $0xf0] ss:$24 sps:$4 sm:$0xff]   ;;  %v2547_v19 = vld [vmem:[#allocation3 + $0x9c] ss:$24 sps:$4 sm:$0xff]   ;;  %v2567_v30 = vshrl.u32 %v404_v25, 7 }
  0x42   : > { %928 = vmatprep.subr.bf16.mxu0 %v2507_v5  ;;  %3227 = vst [vmem:[#allocation9_spill] sm:$0xff] %v2547_v19  ;;  %v2550_v20 = vld [vmem:[#allocation3 + $0x124] ss:$24 sps:$4 sm:$0xff]   ;;  %v2552_v21 = vld [vmem:[#allocation3 + $0x120] ss:$24 sps:$4 sm:$0xff]  }
  0x43   : > { %v2555_v22 = vld [vmem:[#allocation3 + $0x98] ss:$24 sps:$4 sm:$0xff]   ;;  %v2395_v23 = vmov 1983009808   ;;  %v2559_v26 = vld [vmem:[#allocation3 + $0xcc] ss:$24 sps:$4 sm:$0xff]  }
  0x44   : > { %968 = vmatpush1.bf16.msra.mxu1 %v2529_v13  ;;  %3228 = vst [vmem:[#allocation10_spill] sm:$0xff] %v2555_v22  ;;  %v402_v24 = vunpack.c.l.s4 %v2395_v23  ;;  %3229 = vst [vmem:[#allocation11_spill] sm:$0xff] %v2559_v26  ;;  %v2562_v27 = vld [vmem:[#allocation3 + $0x154] ss:$24 sps:$4 sm:$0xff]   ;;  %v2565_v28 = vld [vmem:[#allocation3 + $0xc8] ss:$24 sps:$4 sm:$0xff]  }
  0x45   : > { %929 = vmatpush1.bf16.msra.mxu0 %v2510_v6  ;;  %969 = vmatprep.subr.bf16.mxu1 %v2538_v16  ;;  %3230 = vst [vmem:[#allocation12_spill] sm:$0xff] %v2565_v28  ;;  %3231 = vst [vmem:[#allocation13_spill] sm:$0xff] %v2567_v30  ;;  %v2570_v31 = vld [vmem:[#allocation3 + $0x150] ss:$24 sps:$4 sm:$0xff]   ;;  %v2573_v32 = vld [vmem:[#allocation3 + $0xfc] ss:$24 sps:$4 sm:$0xff]  }
  0x46   : > { %930 = vmatprep.subr.bf16.mxu0 %v2513_v7  ;;  %v403_v29 = vunpack.c.0.s8 %v402_v24  ;;  %3232 = vst [vmem:[#allocation14_spill] sm:$0xff] %v2573_v32  ;;  %v2576_v33 = vld [vmem:[#allocation3 + $0x184] ss:$24 sps:$4 sm:$0xff]   ;;  %v2578_v34 = vld [vmem:[#allocation3 + $0x180] ss:$24 sps:$4 sm:$0xff]  }
  0x47   : > { %v2581_v35 = vld [vmem:[#allocation3 + $0xf8] ss:$24 sps:$4 sm:$0xff]   ;;  %v2588_v37 = vld [vmem:[#allocation3 + $0x12c] ss:$24 sps:$4 sm:$0xff]   ;;  %v2593_v39 = vld [vmem:[#allocation2] sm:$0xf] }
  0x48   : > { %970 = vmatpush1.bf16.msra.mxu1 %v2541_v17  ;;  %3233 = vst [vmem:[#allocation15_spill] sm:$0xff] %v2581_v35  ;;  %v2584_v36 = vsub.s32 %v403_v29, %v2567_v30  ;;  %3235 = vst [vmem:[#allocation17_spill] sm:$0xff] %v2588_v37  ;;  %v2591_v38 = vld [vmem:[#allocation3 + $0x1b4] ss:$24 sps:$4 sm:$0xff]   ;;  %v2596_v40 = vld [vmem:[#allocation3 + $0x128] ss:$24 sps:$4 sm:$0xff]  }
  0x49   : > { %931 = vmatpush1.bf16.msra.mxu0 %v2516_v8  ;;  %971 = vmatprep.subr.bf16.mxu1 %v2547_v19  ;;  %3236 = vst [vmem:[#allocation18_spill] sm:$0xff] %v2593_v39  ;;  %3237 = vst [vmem:[#allocation19_spill] sm:$0xff] %v2596_v40  ;;  %v2601_v42 = vld [vmem:[#allocation3 + $0x1b0] ss:$24 sps:$4 sm:$0xff]   ;;  %v2604_v43 = vld [vmem:[#allocation3 + $0x15c] ss:$24 sps:$4 sm:$0xff]  }
  0x4a   : > { %932 = vmatprep.subr.bf16.mxu0 %v2523_v11  ;;  %3234 = vst [vmem:[#allocation16_spill] sm:$0xff] %v2584_v36  ;;  %v407_v41 = vrot.slane %v2593_v39, %v2584_v36  ;;  %3238 = vst [vmem:[#allocation20_spill] sm:$0xff] %v2604_v43  ;;  %v2607_v44 = vld [vmem:[#allocation3 + $0x1e4] ss:$24 sps:$4 sm:$0xff]   ;;  %v2609_v46 = vld [vmem:[#allocation3 + $0x1e0] ss:$24 sps:$4 sm:$0xff]  }
  0x4b   : > { %v2612_v47 = vld [vmem:[#allocation3 + $0x158] ss:$24 sps:$4 sm:$0xff]   ;;  %v2618_v49 = vld [vmem:[#allocation3 + $0x18c] ss:$24 sps:$4 sm:$0xff]   ;;  %v2626_v51 = vld [vmem:[#allocation3 + $0x188] ss:$24 sps:$4 sm:$0xff]  }
  0x4c   : > { %972 = vmatpush1.bf16.msra.mxu1 %v2555_v22  ;;  %v408_v45 = vcombine.high %v407_v41, %v407_v41  ;;  %3239 = vst [vmem:[#allocation21_spill] sm:$0xff] %v2612_v47  ;;  %3240 = vst [vmem:[#allocation22_spill] sm:$0xff] %v2618_v49  ;;  %v2621_v50 = vld [vmem:[#allocation3 + $0x214] ss:$24 sps:$4 sm:$0xff]   ;;  %v2629_v52 = vld [vmem:[#allocation3 + $0x210] ss:$24 sps:$4 sm:$0xff]   ;;  %v2685_v39 = vpack.c.bf16 %v407_v41, %v407_v41 }
  0x4d   : > { %933 = vmatpush1.bf16.msra.mxu0 %v2532_v14  ;;  %973 = vmatprep.subr.bf16.mxu1 %v2559_v26  ;;  %3241 = vst [vmem:[#allocation23_spill] sm:$0xff] %v2626_v51  ;;  %v2632_v53 = vld [vmem:[#allocation3 + $0x1bc] ss:$24 sps:$4 sm:$0xff]   ;;  %v2637_v55 = vld [vmem:[#allocation3 + $0x240] ss:$24 sps:$4 sm:$0xff]  }
  0x4e   : > { %934 = vmatprep.subr.bf16.mxu0 %v2536_v15  ;;  %v2614_v48 = vpack.c.bf16 %v408_v45, %v408_v45  ;;  %3242 = vst [vmem:[#allocation24_spill] sm:$0xff] %v2632_v53  ;;  %v2635_v54 = vld [vmem:[#allocation3 + $0x244] ss:$24 sps:$4 sm:$0xff]   ;;  %v2640_v56 = vld [vmem:[#allocation3 + $0x1b8] ss:$24 sps:$4 sm:$0xff]  }
  0x4f   : > { %3243 = vst [vmem:[#allocation25_spill] sm:$0xff] %v2640_v56  ;;  %v2644_v57 = vld [vmem:[#allocation3 + $0x1ec] ss:$24 sps:$4 sm:$0xff]   ;;  %v2650_v59 = vld [vmem:[#allocation3 + $0x1e8] ss:$24 sps:$4 sm:$0xff]  }
  0x50   : > { %974 = vmatpush1.bf16.msra.mxu1 %v2565_v28  ;;  %956 = vmatprep.mubr.bf16.mxu0 %v2614_v48  ;;  %3244 = vst [vmem:[#allocation26_spill] sm:$0xff] %v2644_v57  ;;  %v2647_v58 = vld [vmem:[#allocation3 + $0x274] ss:$24 sps:$4 sm:$0xff]   ;;  %3245 = vst [vmem:[#allocation27_spill] sm:$0xff] %v2650_v59  ;;  %v2653_v60 = vld [vmem:[#allocation3 + $0x270] ss:$24 sps:$4 sm:$0xff]  }
  0x51   : > { %935 = vmatpush1.bf16.msra.mxu0 %v2544_v18  ;;  %975 = vmatprep.subr.bf16.mxu1 %v2573_v32  ;;  %v2656_v61 = vld [vmem:[#allocation3 + $0x21c] ss:$24 sps:$4 sm:$0xff]   ;;  %v2661_v63 = vld [vmem:[#allocation3 + $0x2a0] ss:$24 sps:$4 sm:$0xff]   ;;  %v2668_v23 = vld [vmem:[#allocation3 + $0x24c] ss:$24 sps:$4 sm:$0xff]  }
  0x52   : > { %936 = vmatprep.subr.bf16.mxu0 %v2550_v20  ;;  %997 = vmatprep.mubr.bf16.mxu1 %v2614_v48  ;;  %3246 = vst [vmem:[#allocation28_spill] sm:$0xff] %v2656_v61  ;;  %v2659_v62 = vld [vmem:[#allocation3 + $0x2a4] ss:$24 sps:$4 sm:$0xff]   ;;  %v2664_v0 = vld [vmem:[#allocation3 + $0x218] ss:$24 sps:$4 sm:$0xff]   ;;  %3248 = vst [vmem:[#allocation30_spill] sm:$0xff] %v2668_v23 }
  0x53   : > { %3247 = vst [vmem:[#allocation29_spill] sm:$0xff] %v2664_v0  ;;  %v2671_v24 = vld [vmem:[#allocation3 + $0x2d4] ss:$24 sps:$4 sm:$0xff]   ;;  %v2673_v25 = vld [vmem:[#allocation3 + $0x2d0] ss:$24 sps:$4 sm:$0xff]  }
  0x54   : > { %976 = vmatpush1.bf16.msra.mxu1 %v2581_v35  ;;  %v2676_v29 = vld [vmem:[#allocation3 + $0x248] ss:$24 sps:$4 sm:$0xff]   ;;  %v2680_v45 = vld [vmem:[#allocation3 + $0x27c] ss:$24 sps:$4 sm:$0xff]  }
  0x55   : > { %937 = vmatpush1.bf16.msra.mxu0 %v2552_v21  ;;  %977 = vmatprep.subr.bf16.mxu1 %v2588_v37  ;;  %3249 = vst [vmem:[#allocation31_spill] sm:$0xff] %v2676_v29  ;;  %3250 = vst [vmem:[#allocation32_spill] sm:$0xff] %v2680_v45  ;;  %v2683_v36 = vld [vmem:[#allocation3 + $0x14] ss:$24 sps:$4 sm:$0xff]   ;;  %v2687_v30 = vld [vmem:[#allocation3 + $0x10] ss:$24 sps:$4 sm:$0xff]  }
  0x56   : > { %938 = vmatprep.subr.bf16.mxu0 %v2562_v27  ;;  %3251 = vst [vmem:[#allocation33_spill] sm:$0xff] %v2687_v30  ;;  %v2701_v41 = vld [vmem:[#allocation3 + $0x2a8] ss:$24 sps:$4 sm:$0xff]  }
  0x57   : > { %3255 = vst [vmem:[#allocation37_spill] sm:$0xff] %v2701_v41 }
  0x58   : > { %978 = vmatpush1.bf16.msra.mxu1 %v2596_v40 }
  0x59   : > { %939 = vmatpush1.bf16.msra.mxu0 %v2570_v31  ;;  %979 = vmatprep.subr.bf16.mxu1 %v2604_v43 }
  0x5a   : > { %940 = vmatprep.subr.bf16.mxu0 %v2576_v33 }
  0x5c   : > { %980 = vmatpush1.bf16.msra.mxu1 %v2612_v47 }
  0x5d   : > { %941 = vmatpush1.bf16.msra.mxu0 %v2578_v34  ;;  %981 = vmatprep.subr.bf16.mxu1 %v2618_v49 }
  0x5e   : > { %942 = vmatprep.subr.bf16.mxu0 %v2591_v38 }
  0x60   : > { %982 = vmatpush1.bf16.msra.mxu1 %v2626_v51 }
  0x61   : > { %943 = vmatpush1.bf16.msra.mxu0 %v2601_v42  ;;  %983 = vmatprep.subr.bf16.mxu1 %v2632_v53 }
  0x62   : > { %944 = vmatprep.subr.bf16.mxu0 %v2607_v44 }
  0x64   : > { %984 = vmatpush1.bf16.msra.mxu1 %v2640_v56 }
  0x65   : > { %945 = vmatpush1.bf16.msra.mxu0 %v2609_v46  ;;  %985 = vmatprep.subr.bf16.mxu1 %v2644_v57  ;;  %v2714_v57 = vld [vmem:[#allocation3 + $0x2d8] ss:$24 sps:$4 sm:$0xff]  }
  0x66   : > { %946 = vmatprep.subr.bf16.mxu0 %v2621_v50  ;;  %3259 = vst [vmem:[#allocation41_spill] sm:$0xff] %v2714_v57 }
  0x68   : > { %986 = vmatpush1.bf16.msra.mxu1 %v2650_v59  ;;  %v2707_v59 = vld [vmem:[#allocation3 + $0x2dc] ss:$24 sps:$4 sm:$0xff]  }
  0x69   : > { %947 = vmatpush1.bf16.msra.mxu0 %v2629_v52  ;;  %987 = vmatprep.subr.bf16.mxu1 %v2656_v61  ;;  %v2690_v61 = vld [vmem:[#allocation3 + $0x278] ss:$24 sps:$4 sm:$0xff]   ;;  %3257 = vst [vmem:[#allocation39_spill] sm:$0xff] %v2707_v59 }
  0x6a   : > { %948 = vmatprep.subr.bf16.mxu0 %v2635_v54  ;;  %3252 = vst [vmem:[#allocation34_spill] sm:$0xff] %v2690_v61 }
  0x6c   : > { %988 = vmatpush1.bf16.msra.mxu1 %v2664_v0  ;;  %v2694_v0 = vld [vmem:[#allocation3 + $0x2ac] ss:$24 sps:$4 sm:$0xff]  }
  0x6d   : > { %949 = vmatpush1.bf16.msra.mxu0 %v2637_v55  ;;  %989 = vmatprep.subr.bf16.mxu1 %v2668_v23  ;;  %3253 = vst [vmem:[#allocation35_spill] sm:$0xff] %v2694_v0  ;;  %v2697_v23 = vld [vmem:[#allocation3 + $0x44] ss:$24 sps:$4 sm:$0xff]  }
  0x6e   : > { %950 = vmatprep.subr.bf16.mxu0 %v2647_v58  ;;  %3254 = vst [vmem:[#allocation36_spill] sm:$0xff] %v2697_v23 }
  0x70   : > { %990 = vmatpush1.bf16.msra.mxu1 %v2676_v29  ;;  %v2704_v29 = vld [vmem:[#allocation3 + $0x40] ss:$24 sps:$4 sm:$0xff]  }
  0x71   : > { %951 = vmatpush1.bf16.msra.mxu0 %v2653_v60  ;;  %991 = vmatprep.subr.bf16.mxu1 %v2680_v45  ;;  %3256 = vst [vmem:[#allocation38_spill] sm:$0xff] %v2704_v29  ;;  %v2710_v45 = vld [vmem:[#allocation3 + $0x74] ss:$24 sps:$4 sm:$0xff]  }
  0x72   : > { %952 = vmatprep.subr.bf16.mxu0 %v2659_v62  ;;  %3258 = vst [vmem:[#allocation40_spill] sm:$0xff] %v2710_v45 }
  0x74   : > { %992 = vmatpush1.bf16.msra.mxu1 %v2690_v61  ;;  %v2717_v61 = vld [vmem:[#allocation3 + $0x70] ss:$24 sps:$4 sm:$0xff]  }
  0x75   : > { %953 = vmatpush1.bf16.msra.mxu0 %v2661_v63  ;;  %993 = vmatprep.subr.bf16.mxu1 %v2694_v0  ;;  %3260 = vst [vmem:[#allocation42_spill] sm:$0xff] %v2717_v61 }
  0x76   : > { %954 = vmatprep.subr.bf16.mxu0 %v2671_v24 }
  0x78   : > { %994 = vmatpush1.bf16.msra.mxu1 %v2701_v41 }
  0x79   : > { %955 = vmatpush1.bf16.msra.mxu0 %v2673_v25  ;;  %995 = vmatprep.subr.bf16.mxu1 %v2707_v59 }
  0x7a   : > { %1006 = vmatprep.subr.bf16.mxu0 %v2683_v36 }
  0x7c   : > { %957 = vmatmul.mubr.bf16.vlgmr.msra.gmra.mrb[0].mxu0 %v2685_v39  ;;  %996 = vmatpush1.bf16.msra.mxu1 %v2714_v57 }
  0x7d   : > { %1007 = vmatpush1.bf16.msra.mxu0 %v2687_v30  ;;  %1038 = vmatprep.mubr.bf16.mxu0 %v2614_v48  ;;  %v2721_v30 = vld [vmem:[#allocation3 + $0xa4] ss:$24 sps:$4 sm:$0xff]   ;;  %v2729_v48 = vld [vmem:[#allocation3 + $0xd4] ss:$24 sps:$4 sm:$0xff]  }
  0x7e   : > { %1008 = vmatprep.subr.bf16.mxu0 %v2697_v23  ;;  %3261 = vst [vmem:[#allocation43_spill] sm:$0xff] %v2721_v30  ;;  %v2725_v23 = vld [vmem:[#allocation3 + $0xa0] ss:$24 sps:$4 sm:$0xff]   ;;  %1133 = vmatprep.subr.bf16.mxu1 %v2496_v1  ;;  %3263 = vst [vmem:[#allocation45_spill] sm:$0xff] %v2729_v48 }
  0x7f   : > { %3262 = vst [vmem:[#allocation44_spill] sm:$0xff] %v2725_v23  ;;  %998 = vmatmul.mubr.bf16.vlgmr.msra.gmra.mrb[0].mxu1 %v2685_v39 }
  0x80   : > { %1134 = vmatpush1.bf16.msra.mxu1 %v2498_v2 }
  0x81   : > { %1009 = vmatpush1.bf16.msra.mxu0 %v2704_v29  ;;  %1135 = vmatprep.subr.bf16.mxu1 %v2501_v3  ;;  %v2746_v29 = vld [vmem:[#allocation3 + $0x134] ss:$24 sps:$4 sm:$0xff]  }
  0x82   : > { %1010 = vmatprep.subr.bf16.mxu0 %v2710_v45  ;;  %v2734_v45 = vld [vmem:[#allocation3 + $0xd0] ss:$24 sps:$4 sm:$0xff]   ;;  %3267 = vst [vmem:[#allocation49_spill] sm:$0xff] %v2746_v29 }
  0x83   : > { %3264 = vst [vmem:[#allocation46_spill] sm:$0xff] %v2734_v45 }
  0x84   : > { %1136 = vmatpush1.bf16.msra.mxu1 %v2504_v4 }
  0x85   : > { %1011 = vmatpush1.bf16.msra.mxu0 %v2717_v61  ;;  %v2738_v61 = vld [vmem:[#allocation3 + $0x104] ss:$24 sps:$4 sm:$0xff]   ;;  %1137 = vmatprep.subr.bf16.mxu1 %v2507_v5 }
  0x86   : > { %1012 = vmatprep.subr.bf16.mxu0 %v2721_v30  ;;  %3265 = vst [vmem:[#allocation47_spill] sm:$0xff] %v2738_v61  ;;  %v2742_v30 = vld [vmem:[#allocation3 + $0x100] ss:$24 sps:$4 sm:$0xff]  }
  0x87   : > { %3266 = vst [vmem:[#allocation48_spill] sm:$0xff] %v2742_v30 }
  0x88   : > { %1138 = vmatpush1.bf16.msra.mxu1 %v2510_v6 }
  0x89   : > { %1013 = vmatpush1.bf16.msra.mxu0 %v2725_v23  ;;  %v2750_v23 = vld [vmem:[#allocation3 + $0x130] ss:$24 sps:$4 sm:$0xff]   ;;  %1139 = vmatprep.subr.bf16.mxu1 %v2513_v7 }
  0x8a   : > { %1014 = vmatprep.subr.bf16.mxu0 %v2729_v48  ;;  %3268 = vst [vmem:[#allocation50_spill] sm:$0xff] %v2750_v23  ;;  %v2754_v48 = vld [vmem:[#allocation3 + $0x164] ss:$24 sps:$4 sm:$0xff]  }
  0x8b   : > { %3269 = vst [vmem:[#allocation51_spill] sm:$0xff] %v2754_v48 }
  0x8c   : > { %1140 = vmatpush1.bf16.msra.mxu1 %v2516_v8 }
  0x8d   : > { %1015 = vmatpush1.bf16.msra.mxu0 %v2734_v45  ;;  %v2758_v45 = vld [vmem:[#allocation3 + $0x160] ss:$24 sps:$4 sm:$0xff]   ;;  %1141 = vmatprep.subr.bf16.mxu1 %v2523_v11 }
  0x8e   : > { %1016 = vmatprep.subr.bf16.mxu0 %v2738_v61  ;;  %3270 = vst [vmem:[#allocation52_spill] sm:$0xff] %v2758_v45  ;;  %v2762_v61 = vld [vmem:[#allocation3 + $0x194] ss:$24 sps:$4 sm:$0xff]  }
  0x8f   : > { %3271 = vst [vmem:[#allocation53_spill] sm:$0xff] %v2762_v61 }
  0x90   : > { %1142 = vmatpush1.bf16.msra.mxu1 %v2532_v14 }
  0x91   : > { %1017 = vmatpush1.bf16.msra.mxu0 %v2742_v30  ;;  %v2766_v30 = vld [vmem:[#allocation3 + $0x190] ss:$24 sps:$4 sm:$0xff]   ;;  %1143 = vmatprep.subr.bf16.mxu1 %v2536_v15 }
  0x92   : > { %1018 = vmatprep.subr.bf16.mxu0 %v2746_v29  ;;  %3272 = vst [vmem:[#allocation54_spill] sm:$0xff] %v2766_v30  ;;  %v2770_v29 = vld [vmem:[#allocation3 + $0x1c4] ss:$24 sps:$4 sm:$0xff]  }
  0x93   : > { %3273 = vst [vmem:[#allocation55_spill] sm:$0xff] %v2770_v29 }
  0x94   : > { %1144 = vmatpush1.bf16.msra.mxu1 %v2544_v18 }
  0x95   : > { %1019 = vmatpush1.bf16.msra.mxu0 %v2750_v23  ;;  %v2774_v23 = vld [vmem:[#allocation3 + $0x1c0] ss:$24 sps:$4 sm:$0xff]   ;;  %1145 = vmatprep.subr.bf16.mxu1 %v2550_v20 }
  0x96   : > { %1020 = vmatprep.subr.bf16.mxu0 %v2754_v48  ;;  %3274 = vst [vmem:[#allocation56_spill] sm:$0xff] %v2774_v23  ;;  %v2778_v48 = vld [vmem:[#allocation3 + $0x1f4] ss:$24 sps:$4 sm:$0xff]  }
  0x97   : > { %3275 = vst [vmem:[#allocation57_spill] sm:$0xff] %v2778_v48 }
  0x98   : > { %1146 = vmatpush1.bf16.msra.mxu1 %v2552_v21 }
  0x99   : > { %1021 = vmatpush1.bf16.msra.mxu0 %v2758_v45  ;;  %v2782_v45 = vld [vmem:[#allocation3 + $0x1f0] ss:$24 sps:$4 sm:$0xff]   ;;  %1147 = vmatprep.subr.bf16.mxu1 %v2562_v27 }
  0x9a   : > { %1022 = vmatprep.subr.bf16.mxu0 %v2762_v61  ;;  %3276 = vst [vmem:[#allocation58_spill] sm:$0xff] %v2782_v45  ;;  %v2786_v61 = vld [vmem:[#allocation3 + $0x224] ss:$24 sps:$4 sm:$0xff]  }
  0x9b   : > { %3277 = vst [vmem:[#allocation59_spill] sm:$0xff] %v2786_v61 }
  0x9c   : > { %1148 = vmatpush1.bf16.msra.mxu1 %v2570_v31 }
  0x9d   : > { %1023 = vmatpush1.bf16.msra.mxu0 %v2766_v30  ;;  %v2790_v30 = vld [vmem:[#allocation3 + $0x220] ss:$24 sps:$4 sm:$0xff]   ;;  %1149 = vmatprep.subr.bf16.mxu1 %v2576_v33 }
  0x9e   : > { %1024 = vmatprep.subr.bf16.mxu0 %v2770_v29  ;;  %3278 = vst [vmem:[#allocation60_spill] sm:$0xff] %v2790_v30  ;;  %v2794_v29 = vld [vmem:[#allocation3 + $0x254] ss:$24 sps:$4 sm:$0xff]  }
  0x9f   : > { %3279 = vst [vmem:[#allocation61_spill] sm:$0xff] %v2794_v29 }
  0xa0   : > { %1150 = vmatpush1.bf16.msra.mxu1 %v2578_v34 }
  0xa1   : > { %1025 = vmatpush1.bf16.msra.mxu0 %v2774_v23  ;;  %v2798_v23 = vld [vmem:[#allocation3 + $0x250] ss:$24 sps:$4 sm:$0xff]   ;;  %1151 = vmatprep.subr.bf16.mxu1 %v2591_v38 }
  0xa2   : > { %1026 = vmatprep.subr.bf16.mxu0 %v2778_v48  ;;  %3280 = vst [vmem:[#allocation62_spill] sm:$0xff] %v2798_v23  ;;  %v2802_v48 = vld [vmem:[#allocation3 + $0x284] ss:$24 sps:$4 sm:$0xff]  }
  0xa4   : > { %1152 = vmatpush1.bf16.msra.mxu1 %v2601_v42 }
  0xa5   : > { %1027 = vmatpush1.bf16.msra.mxu0 %v2782_v45  ;;  %v2806_v45 = vld [vmem:[#allocation3 + $0x280] ss:$24 sps:$4 sm:$0xff]   ;;  %1153 = vmatprep.subr.bf16.mxu1 %v2607_v44 }
  0xa6   : > { %1028 = vmatprep.subr.bf16.mxu0 %v2786_v61  ;;  %v2810_v61 = vld [vmem:[#allocation3 + $0x2b4] ss:$24 sps:$4 sm:$0xff]  }
  0xa8   : > { %1154 = vmatpush1.bf16.msra.mxu1 %v2609_v46 }
  0xa9   : > { %1029 = vmatpush1.bf16.msra.mxu0 %v2790_v30  ;;  %v2814_v30 = vld [vmem:[#allocation3 + $0x2b0] ss:$24 sps:$4 sm:$0xff]   ;;  %1155 = vmatprep.subr.bf16.mxu1 %v2621_v50 }
  0xaa   : > { %1030 = vmatprep.subr.bf16.mxu0 %v2794_v29  ;;  %v2818_v29 = vld [vmem:[#allocation3 + $0x2e4] ss:$24 sps:$4 sm:$0xff]  }
  0xac   : > { %1156 = vmatpush1.bf16.msra.mxu1 %v2629_v52 }
  0xad   : > { %1031 = vmatpush1.bf16.msra.mxu0 %v2798_v23  ;;  %v2822_v23 = vld [vmem:[#allocation3 + $0x2e0] ss:$24 sps:$4 sm:$0xff]   ;;  %1157 = vmatprep.subr.bf16.mxu1 %v2635_v54 }
  0xae   : > { %1032 = vmatprep.subr.bf16.mxu0 %v2802_v48 }
  0xb0   : > { %1158 = vmatpush1.bf16.msra.mxu1 %v2637_v55 }
  0xb1   : > { %1033 = vmatpush1.bf16.msra.mxu0 %v2806_v45  ;;  %1159 = vmatprep.subr.bf16.mxu1 %v2647_v58 }
  0xb2   : > { %1034 = vmatprep.subr.bf16.mxu0 %v2810_v61 }
  0xb4   : > { %1160 = vmatpush1.bf16.msra.mxu1 %v2653_v60 }
  0xb5   : > { %1035 = vmatpush1.bf16.msra.mxu0 %v2814_v30  ;;  %1161 = vmatprep.subr.bf16.mxu1 %v2659_v62 }
  0xb6   : > { %1036 = vmatprep.subr.bf16.mxu0 %v2818_v29 }
  0xb8   : > { %1162 = vmatpush1.bf16.msra.mxu1 %v2661_v63 }
  0xb9   : > { %1037 = vmatpush1.bf16.msra.mxu0 %v2822_v23  ;;  %1163 = vmatprep.subr.bf16.mxu1 %v2671_v24 }
  0xba   : > { %1174 = vmatprep.subr.bf16.mxu0 %v2518_v9 }
  0xbc   : > { %1039 = vmatmul.mubr.bf16.vlgmr.msra.gmra.mrb[4].mxu0 %v2685_v39  ;;  %1164 = vmatpush1.bf16.msra.mxu1 %v2673_v25  ;;  %v3281_v39 = vld [vmem:[#allocation26_spill] sm:$0xff] }
  0xbd   : > { %1175 = vmatpush1.bf16.msra.mxu0 %v2520_v10  ;;  %1215 = vmatprep.subr.bf16.mxu1 %v2683_v36 }
  0xbe   : > { %1176 = vmatprep.subr.bf16.mxu0 %v2526_v12 }
  0xc1   : > { %1177 = vmatpush1.bf16.msra.mxu0 %v2529_v13 }
  0xc2   : > { %1178 = vmatprep.subr.bf16.mxu0 %v2538_v16 }
  0xc5   : > { %1179 = vmatpush1.bf16.msra.mxu0 %v2541_v17 }
  0xc6   : > { %1180 = vmatprep.subr.bf16.mxu0 %v2547_v19 }
  0xc9   : > { %1181 = vmatpush1.bf16.msra.mxu0 %v2555_v22 }
  0xca   : > { %1182 = vmatprep.subr.bf16.mxu0 %v2559_v26 }
  0xcd   : > { %1183 = vmatpush1.bf16.msra.mxu0 %v2565_v28 }
  0xce   : > { %1184 = vmatprep.subr.bf16.mxu0 %v2573_v32  ;;  %v3282_v32 = vld [vmem:[#allocation27_spill] sm:$0xff] }
  0xd1   : > { %1185 = vmatpush1.bf16.msra.mxu0 %v2581_v35  ;;  %v3283_v35 = vld [vmem:[#allocation28_spill] sm:$0xff] }
  0xd2   : > { %1186 = vmatprep.subr.bf16.mxu0 %v2588_v37  ;;  %v3284_v37 = vld [vmem:[#allocation29_spill] sm:$0xff] }
  0xd5   : > { %1187 = vmatpush1.bf16.msra.mxu0 %v2596_v40 }
  0xd6   : > { %1188 = vmatprep.subr.bf16.mxu0 %v2604_v43  ;;  %v3285_v43 = vld [vmem:[#allocation30_spill] sm:$0xff] }
  0xd9   : > { %1189 = vmatpush1.bf16.msra.mxu0 %v2612_v47  ;;  %v3286_v47 = vld [vmem:[#allocation31_spill] sm:$0xff] }
  0xda   : > { %1190 = vmatprep.subr.bf16.mxu0 %v2618_v49  ;;  %v3287_v49 = vld [vmem:[#allocation32_spill] sm:$0xff] }
  0xdd   : > { %1191 = vmatpush1.bf16.msra.mxu0 %v2626_v51  ;;  %v3288_v51 = vld [vmem:[#allocation34_spill] sm:$0xff] }
  0xde   : > { %1192 = vmatprep.subr.bf16.mxu0 %v2632_v53 }
  0xe1   : > { %1193 = vmatpush1.bf16.msra.mxu0 %v2640_v56 }
  0xe2   : > { %1194 = vmatprep.subr.bf16.mxu0 %v3281_v39 }
  0xe5   : > { %1195 = vmatpush1.bf16.msra.mxu0 %v3282_v32 }
  0xe6   : > { %1196 = vmatprep.subr.bf16.mxu0 %v3283_v35  ;;  %v3289_v35 = vld [vmem:[#allocation13_spill] sm:$0xff] }
  0xe9   : > { %1197 = vmatpush1.bf16.msra.mxu0 %v3284_v37  ;;  %v416_v37 = vsub.s32 0, %v3289_v35 }
  0xea   : > { %1198 = vmatprep.subr.bf16.mxu0 %v3285_v43 }
  0xed   : > { %1199 = vmatpush1.bf16.msra.mxu0 %v3286_v47  ;;  %v398_v47 = vld [vmem:[%s3104_s3] sm:$0x3f] }
  0xee   : > { %1200 = vmatprep.subr.bf16.mxu0 %v3287_v49  ;;  %v420_v49 = vsub.s32 1, %v3289_v35  ;;  %v2874_v43 = vrot.slane %v398_v47, %v416_v37 }
  0xf0   : > { %3290 = vst [vmem:[#allocation13_spill] sm:$0xff] %v2874_v43 }
  0xf1   : > { %1201 = vmatpush1.bf16.msra.mxu0 %v3288_v51  ;;  %v2876_v51 = vrot.slane %v398_v47, %v420_v49 }
  0xf2   : > { %1202 = vmatprep.subr.bf16.mxu0 %v2694_v0  ;;  %v1047_v0 = vld [vmem:[%s2482_s24] sm:$0x3f] }
  0xf3   : > { %3291 = vst [vmem:[#allocation63_spill] sm:$0xff] %v2876_v51 }
  0xf5   : > { %1203 = vmatpush1.bf16.msra.mxu0 %v2701_v41 }
  0xf6   : > { %1204 = vmatprep.subr.bf16.mxu0 %v2707_v59 }
  0xf9   : > { %1205 = vmatpush1.bf16.msra.mxu0 %v2714_v57 }
  0xfa   : > { %1344 = vmatprep.subr.bf16.mxu0 %v2496_v1  ;;  %v1058_v1 = vrot.slane %v1047_v0, 2 }
 0x14f   : > { %v958_v41 = vpop.f32.mrb[0].mxu0 }
 0x150   : > { %v959_v59 = vadd.f32 %v958_v41, %v2874_v43  ;;  %v960_v32 = vpop.f32.mrb[1].mxu0  ;;  %v428_v41 = vsub.s32 3, %v3289_v35  ;;  %v3294_v43 = vld [vmem:[#allocation18_spill] sm:$0xff] }
 0x151   : > { %v961_v57 = vadd.f32 %v960_v32, %v2876_v51  ;;  %v962_v39 = vpop.f32.mrb[2].mxu0  ;;  %v424_v32 = vsub.s32 2, %v3289_v35 }
 0x152   : > { %v1050_v56 = vadd.f32 %v1047_v0, %v959_v59  ;;  %v963_v53 = vpop.f32.mrb[3].mxu0  ;;  %v999_v22 = vpop.f32.mrb[0].mxu1  ;;  %v2883_v39 = vrot.slane %v398_v47, %v428_v41  ;;  %v1979_v59 = vld [vmem:[%s2487_s28 + $0x12] sm:$0x3f] }
 0x153   : > { %v1060_v28 = vadd.f32 %v1058_v1, %v961_v57  ;;  %v1001_v37 = vpop.f32.mrb[1].mxu1  ;;  %v2885_v53 = vrot.slane %v398_v47, %v424_v32 }
 0x154   : > { %v1980_v40 = vmul.f32 -1.442695, %v1050_v56  ;;  %v1003_v49 = vpop.f32.mrb[2].mxu1  ;;  %3292 = vst [vmem:[#allocation64_spill] sm:$0xff] %v2883_v39 }
 0x155   : > { %v1981_v26 = vmul.f32 -1.442695, %v1060_v28  ;;  %v1004_v19 = vpop.f32.mrb[3].mxu1  ;;  %3293 = vst [vmem:[#allocation65_spill] sm:$0xff] %v2885_v53  ;;  %v1002_v28 = vadd.f32 %v1001_v37, %v2883_v39  ;;  %v1000_v57 = vadd.f32 %v999_v22, %v2885_v53 }
 0x156   : > { %2182 = vpow2.f32 %v1980_v40 }
 0x157   : > { %2184 = vpow2.f32 %v1981_v26  ;;  %v1068_v26 = vrot.slane %v1047_v0, 4  ;;  %v432_v0 = vsub.s32 4, %v3289_v35 }
 0x160   : > { %v2183_v17 = vpop.eup %2182 }
 0x161   : > { %v1054_v16 = vadd.f32 1.0, %v2183_v17  ;;  %v2185_v56 = vpop.eup %2184  ;;  %v1076_v17 = vadd.f32 %v1979_v59, %v1002_v28  ;;  %v436_v28 = vsub.s32 5, %v3289_v35  ;;  %v1094_v35 = vrot.slane %v1979_v59, 4 }
 0x162   : > { %v1064_v40 = vadd.f32 1.0, %v2185_v56 }
 0x163   : > { %2186 = vrcp.f32 %v1054_v16  ;;  %v1982_v51 = vmul.f32 -1.442695, %v1076_v17 }
 0x164   : > { %2188 = vrcp.f32 %v1064_v40  ;;  %v2894_v40 = vrot.slane %v398_v47, %v432_v0  ;;  %v1100_v0 = vrot.slane %v3294_v43, 2 }
 0x166   : > { %3295 = vst [vmem:[#allocation18_spill] sm:$0xff] %v2894_v40 }
 0x16d   : > { %v2187_v19 = vpop.eup %2186 }
 0x16e   : > { %v1067_v1 = vmul.f32 %v2187_v19, %v1000_v57  ;;  %v2189_v16 = vpop.eup %2188  ;;  %v2896_v57 = vrot.slane %v398_v47, %v436_v28 }
 0x16f   : > { %v1072_v41 = vsub.f32 1.0, %v2189_v16  ;;  %v1074_v13 = vmul.f32 %v2189_v16, %v3294_v43  ;;  %v3298_v43 = vld [vmem:[#allocation33_spill] sm:$0xff] }
 0x170   : > { %v1070_v49 = vadd.f32 %v1068_v26, %v1067_v1  ;;  %3296 = vst [vmem:[#allocation66_spill] sm:$0xff] %v2896_v57 }
 0x172   : > { %2190 = vtanh.f32 %v1070_v49 }
 0x173   : > { %2192 = vpow2.f32 %v1982_v51  ;;  %v1084_v51 = vrot.slane %v1979_v59, 2 }
 0x17c   : > { %v2191_v32 = vpop.eup %2190 }
 0x17d   : > { %v1073_v37 = vmul.f32 %v2191_v32, %v1072_v41  ;;  %v2193_v56 = vpop.eup %2192 }
 0x17e   : > { %v1080_v22 = vadd.f32 1.0, %v2193_v56 }
 0x17f   : > { %v1075_v39 = vadd.f32 %v1074_v13, %v1073_v37 }
 0x180   : > { %2194 = vrcp.f32 %v1080_v22 }
 0x181   : > { %1116 = vst [vmem:[%s2477_s21] sm:$0x3] %v1075_v39 }
 0x18a   : > { %v2195_v19 = vpop.eup %2194 }
 0x18f   : > { %v1040_v26 = vpop.f32.mrb[4].mxu0 }
 0x190   : > { %v1041_v17 = vadd.f32 %v1040_v26, %v2894_v40  ;;  %v1042_v1 = vpop.f32.mrb[5].mxu0 }
 0x191   : > { %v1043_v49 = vadd.f32 %v1042_v1, %v2896_v57  ;;  %v1044_v13 = vpop.f32.mrb[6].mxu0 }
 0x192   : > { %v1086_v16 = vadd.f32 %v1084_v51, %v1041_v17  ;;  %v1045_v41 = vpop.f32.mrb[7].mxu0  ;;  %v3297_v17 = vld [vmem:[#allocation16_spill] sm:$0xff] }
 0x193   : > { %v1093_v32 = vmul.f32 %v2195_v19, %v1043_v49 }
 0x194   : > { %v1983_v37 = vmul.f32 -1.442695, %v1086_v16 }
 0x195   : > { %v1096_v47 = vadd.f32 %v1094_v35, %v1093_v32  ;;  %v3302_v32 = vld [vmem:[#allocation42_spill] sm:$0xff]  ;;  %v3304_v35 = vld [vmem:[#allocation44_spill] sm:$0xff] }
 0x196   : > { %2196 = vpow2.f32 %v1983_v37  ;;  %v3303_v37 = vld [vmem:[#allocation43_spill] sm:$0xff] }
 0x1a0   : > { %v2197_v56 = vpop.eup %2196 }
 0x1a1   : > { %v1090_v22 = vadd.f32 1.0, %v2197_v56  ;;  %v3337_v56 = vld [vmem:[#allocation23_spill] sm:$0xff] }
 0x1a3   : > { %2198 = vrcp.f32 %v1090_v22  ;;  %v3338_v22 = vld [vmem:[#allocation24_spill] sm:$0xff] }
 0x1a4   : > { %2200 = vtanh.f32 %v1096_v47  ;;  %v3339_v47 = vld [vmem:[#allocation25_spill] sm:$0xff] }
 0x1ad   : > { %v2199_v28 = vpop.eup %2198 }
 0x1ae   : > { %v1098_v26 = vsub.f32 1.0, %v2199_v28  ;;  %v2201_v40 = vpop.eup %2200  ;;  %v1102_v53 = vmul.f32 %v2199_v28, %v1100_v0  ;;  %v3340_v0 = vld [vmem:[#allocation26_spill] sm:$0xff]  ;;  %v3341_v28 = vld [vmem:[#allocation27_spill] sm:$0xff] }
 0x1b0   : > { %v1099_v1 = vmul.f32 %v2201_v40, %v1098_v26  ;;  %v3301_v40 = vld [vmem:[#allocation40_spill] sm:$0xff] }
 0x1b1   : > { %v3342_v26 = vld [vmem:[#allocation28_spill] sm:$0xff] }
 0x1b2   : > { %v1103_v13 = vadd.f32 %v1102_v53, %v1099_v1  ;;  %v3300_v53 = vld [vmem:[#allocation38_spill] sm:$0xff]  ;;  %v3343_v1 = vld [vmem:[#allocation29_spill] sm:$0xff] }
 0x1b4   : > { %v1106_v51 = vcombine.low %v1075_v39, %v1103_v13  ;;  %1985 = vst [vmem:[%s2492_s6 + $0x6] sm:$0x3] %v1103_v13  ;;  %v3299_v39 = vld [vmem:[#allocation36_spill] sm:$0xff]  ;;  %v3344_v13 = vld [vmem:[#allocation30_spill] sm:$0xff] }
 0x1b6   : > { %1984 = vst.sshfl [vmem:[#allocation2] sm:$0x33 pattern:$0x76325410] %v1106_v51  ;;  %v3345_v51 = vld [vmem:[#allocation31_spill] sm:$0xff] }
 0x1bd   : > { %v2902_v19 = vld [vmem:[#allocation2] sm:$0xf] }
 0x1be   : > { %v1127_v59 = vrot.slane %v2902_v19, %v3297_v17 }
 0x1c0   : > { %v1128_v49 = vcombine.high %v1127_v59, %v1127_v59  ;;  %v2906_v41 = vpack.c.bf16 %v1127_v59, %v1127_v59  ;;  %v3346_v59 = vld [vmem:[#allocation32_spill] sm:$0xff] }
 0x1c2   : > { %v1132_v16 = vpack.c.bf16 %v1128_v49, %v1128_v49  ;;  %v3347_v49 = vld [vmem:[#allocation34_spill] sm:$0xff] }
 0x1c4   : > { %1165 = vmatprep.mubr.bf16.mxu1 %v1132_v16  ;;  %1206 = vmatprep.mubr.bf16.mxu0 %v1132_v16 }
 0x1c5   : > { %1166 = vmatmul.mubr.bf16.vlgmr.msra.gmra.mrb[4].mxu1 %v2906_v41  ;;  %1207 = vmatmul.mubr.bf16.vlgmr.msra.gmra.mrb[8].mxu0 %v2906_v41 }
 0x1c6   : > { %1216 = vmatpush1.bf16.msra.mxu1 %v3298_v43  ;;  %1247 = vmatprep.mubr.bf16.mxu1 %v1132_v16  ;;  %v3348_v16 = vld [vmem:[#allocation35_spill] sm:$0xff] }
 0x1c7   : > { %1217 = vmatprep.subr.bf16.mxu1 %v3299_v39  ;;  %1345 = vmatpush1.bf16.msra.mxu0 %v2498_v2  ;;  %v3305_v2 = vld [vmem:[#allocation45_spill] sm:$0xff] }
 0x1c8   : > { %1346 = vmatprep.subr.bf16.mxu0 %v2501_v3  ;;  %v3306_v3 = vld [vmem:[#allocation46_spill] sm:$0xff] }
 0x1ca   : > { %1218 = vmatpush1.bf16.msra.mxu1 %v3300_v53 }
 0x1cb   : > { %1219 = vmatprep.subr.bf16.mxu1 %v3301_v40  ;;  %1347 = vmatpush1.bf16.msra.mxu0 %v2504_v4  ;;  %v3307_v4 = vld [vmem:[#allocation47_spill] sm:$0xff] }
 0x1cc   : > { %1348 = vmatprep.subr.bf16.mxu0 %v2507_v5  ;;  %v3308_v5 = vld [vmem:[#allocation48_spill] sm:$0xff] }
 0x1ce   : > { %1220 = vmatpush1.bf16.msra.mxu1 %v3302_v32 }
 0x1cf   : > { %1221 = vmatprep.subr.bf16.mxu1 %v3303_v37  ;;  %1349 = vmatpush1.bf16.msra.mxu0 %v2510_v6  ;;  %v3309_v6 = vld [vmem:[#allocation49_spill] sm:$0xff] }
 0x1d0   : > { %1350 = vmatprep.subr.bf16.mxu0 %v2513_v7  ;;  %v3310_v7 = vld [vmem:[#allocation50_spill] sm:$0xff] }
 0x1d2   : > { %1222 = vmatpush1.bf16.msra.mxu1 %v3304_v35 }
 0x1d3   : > { %1223 = vmatprep.subr.bf16.mxu1 %v3305_v2  ;;  %1351 = vmatpush1.bf16.msra.mxu0 %v2516_v8  ;;  %v3311_v8 = vld [vmem:[#allocation51_spill] sm:$0xff] }
 0x1d4   : > { %1352 = vmatprep.subr.bf16.mxu0 %v2523_v11  ;;  %v3312_v11 = vld [vmem:[#allocation52_spill] sm:$0xff] }
 0x1d6   : > { %1224 = vmatpush1.bf16.msra.mxu1 %v3306_v3 }
 0x1d7   : > { %1225 = vmatprep.subr.bf16.mxu1 %v3307_v4  ;;  %1353 = vmatpush1.bf16.msra.mxu0 %v2532_v14  ;;  %v3313_v14 = vld [vmem:[#allocation53_spill] sm:$0xff] }
 0x1d8   : > { %1354 = vmatprep.subr.bf16.mxu0 %v2536_v15  ;;  %v3314_v15 = vld [vmem:[#allocation54_spill] sm:$0xff] }
 0x1da   : > { %1226 = vmatpush1.bf16.msra.mxu1 %v3308_v5 }
 0x1db   : > { %1227 = vmatprep.subr.bf16.mxu1 %v3309_v6  ;;  %1355 = vmatpush1.bf16.msra.mxu0 %v2544_v18  ;;  %v3315_v18 = vld [vmem:[#allocation55_spill] sm:$0xff] }
 0x1dc   : > { %1356 = vmatprep.subr.bf16.mxu0 %v2550_v20  ;;  %v3316_v20 = vld [vmem:[#allocation56_spill] sm:$0xff] }
 0x1de   : > { %1228 = vmatpush1.bf16.msra.mxu1 %v3310_v7 }
 0x1df   : > { %1229 = vmatprep.subr.bf16.mxu1 %v3311_v8  ;;  %1357 = vmatpush1.bf16.msra.mxu0 %v2552_v21  ;;  %v3317_v21 = vld [vmem:[#allocation57_spill] sm:$0xff] }
 0x1e0   : > { %1358 = vmatprep.subr.bf16.mxu0 %v2562_v27  ;;  %v3318_v27 = vld [vmem:[#allocation58_spill] sm:$0xff] }
 0x1e2   : > { %1230 = vmatpush1.bf16.msra.mxu1 %v3312_v11 }
 0x1e3   : > { %1231 = vmatprep.subr.bf16.mxu1 %v3313_v14  ;;  %1359 = vmatpush1.bf16.msra.mxu0 %v2570_v31  ;;  %v3319_v31 = vld [vmem:[#allocation59_spill] sm:$0xff] }
 0x1e4   : > { %1360 = vmatprep.subr.bf16.mxu0 %v2576_v33  ;;  %v3320_v33 = vld [vmem:[#allocation60_spill] sm:$0xff] }
 0x1e6   : > { %1232 = vmatpush1.bf16.msra.mxu1 %v3314_v15 }
 0x1e7   : > { %1233 = vmatprep.subr.bf16.mxu1 %v3315_v18  ;;  %1361 = vmatpush1.bf16.msra.mxu0 %v2578_v34  ;;  %v3321_v34 = vld [vmem:[#allocation61_spill] sm:$0xff] }
 0x1e8   : > { %1362 = vmatprep.subr.bf16.mxu0 %v2591_v38  ;;  %v3322_v38 = vld [vmem:[#allocation62_spill] sm:$0xff] }
 0x1ea   : > { %1234 = vmatpush1.bf16.msra.mxu1 %v3316_v20 }
 0x1eb   : > { %1235 = vmatprep.subr.bf16.mxu1 %v3317_v21  ;;  %1363 = vmatpush1.bf16.msra.mxu0 %v2601_v42  ;;  %v3323_v42 = vld [vmem:[#allocation6_spill] sm:$0xff] }
 0x1ec   : > { %1364 = vmatprep.subr.bf16.mxu0 %v2607_v44  ;;  %v3324_v44 = vld [vmem:[#allocation7_spill] sm:$0xff] }
 0x1ee   : > { %1236 = vmatpush1.bf16.msra.mxu1 %v3318_v27 }
 0x1ef   : > { %1237 = vmatprep.subr.bf16.mxu1 %v3319_v31  ;;  %1365 = vmatpush1.bf16.msra.mxu0 %v2609_v46  ;;  %v3325_v46 = vld [vmem:[#allocation8_spill] sm:$0xff] }
 0x1f0   : > { %1366 = vmatprep.subr.bf16.mxu0 %v2621_v50  ;;  %v3326_v50 = vld [vmem:[#allocation9_spill] sm:$0xff] }
 0x1f2   : > { %1238 = vmatpush1.bf16.msra.mxu1 %v3320_v33 }
 0x1f3   : > { %1239 = vmatprep.subr.bf16.mxu1 %v3321_v34  ;;  %1367 = vmatpush1.bf16.msra.mxu0 %v2629_v52  ;;  %v3327_v52 = vld [vmem:[#allocation10_spill] sm:$0xff] }
 0x1f4   : > { %1368 = vmatprep.subr.bf16.mxu0 %v2635_v54  ;;  %v3329_v54 = vld [vmem:[#allocation12_spill] sm:$0xff] }
 0x1f6   : > { %1240 = vmatpush1.bf16.msra.mxu1 %v3322_v38 }
 0x1f7   : > { %1241 = vmatprep.subr.bf16.mxu1 %v2802_v48  ;;  %1369 = vmatpush1.bf16.msra.mxu0 %v2637_v55  ;;  %v3330_v55 = vld [vmem:[#allocation14_spill] sm:$0xff] }
 0x1f8   : > { %1370 = vmatprep.subr.bf16.mxu0 %v2647_v58  ;;  %v3331_v58 = vld [vmem:[#allocation15_spill] sm:$0xff] }
 0x1fa   : > { %1242 = vmatpush1.bf16.msra.mxu1 %v2806_v45 }
 0x1fb   : > { %1243 = vmatprep.subr.bf16.mxu1 %v2810_v61  ;;  %1371 = vmatpush1.bf16.msra.mxu0 %v2653_v60  ;;  %v3334_v60 = vld [vmem:[#allocation20_spill] sm:$0xff] }
 0x1fc   : > { %1372 = vmatprep.subr.bf16.mxu0 %v2659_v62  ;;  %v3335_v62 = vld [vmem:[#allocation21_spill] sm:$0xff] }
 0x1fe   : > { %1244 = vmatpush1.bf16.msra.mxu1 %v2814_v30 }
 0x1ff   : > { %1245 = vmatprep.subr.bf16.mxu1 %v2818_v29  ;;  %1373 = vmatpush1.bf16.msra.mxu0 %v2661_v63  ;;  %v3336_v63 = vld [vmem:[#allocation22_spill] sm:$0xff] }
 0x200   : > { %1374 = vmatprep.subr.bf16.mxu0 %v2671_v24 }
 0x202   : > { %1246 = vmatpush1.bf16.msra.mxu1 %v2822_v23 }
 0x203   : > { %1385 = vmatprep.subr.bf16.mxu1 %v2518_v9  ;;  %1375 = vmatpush1.bf16.msra.mxu0 %v2673_v25  ;;  %v3328_v9 = vld [vmem:[#allocation11_spill] sm:$0xff] }
 0x204   : > { %1426 = vmatprep.subr.bf16.mxu0 %v2683_v36 }
 0x205   : > { %1248 = vmatmul.mubr.bf16.vlgmr.msra.gmra.mrb[8].mxu1 %v2906_v41  ;;  %v3349_v41 = vld [vmem:[#allocation37_spill] sm:$0xff] }
 0x206   : > { %1386 = vmatpush1.bf16.msra.mxu1 %v2520_v10  ;;  %v3332_v10 = vld [vmem:[#allocation17_spill] sm:$0xff] }
 0x207   : > { %1387 = vmatprep.subr.bf16.mxu1 %v2526_v12  ;;  %v3333_v12 = vld [vmem:[#allocation19_spill] sm:$0xff] }
 0x20a   : > { %1388 = vmatpush1.bf16.msra.mxu1 %v3323_v42  ;;  %v3350_v42 = vld [vmem:[#allocation39_spill] sm:$0xff] }
 0x20b   : > { %1389 = vmatprep.subr.bf16.mxu1 %v3324_v44  ;;  %v3351_v44 = vld [vmem:[#allocation41_spill] sm:$0xff] }
 0x20e   : > { %1390 = vmatpush1.bf16.msra.mxu1 %v3325_v46  ;;  %v2262_v46 = vld [vmem:[#allocation3 + $0x4] ss:$24 sps:$4 sm:$0xff]  }
 0x20f   : > { %1391 = vmatprep.subr.bf16.mxu1 %v3326_v50  ;;  %v1986_v50 = vld [vmem:[%s2482_s24 + $0x6] sm:$0x3f] }
 0x212   : > { %1392 = vmatpush1.bf16.msra.mxu1 %v3327_v52 }
 0x213   : > { %1393 = vmatprep.subr.bf16.mxu1 %v3328_v9 }
 0x216   : > { %1394 = vmatpush1.bf16.msra.mxu1 %v3329_v54  ;;  %v3352_v54 = vld [vmem:[#allocation13_spill] sm:$0xff] }
 0x217   : > { %1395 = vmatprep.subr.bf16.mxu1 %v3330_v55 }
 0x21a   : > { %1396 = vmatpush1.bf16.msra.mxu1 %v3331_v58 }
 0x21b   : > { %1397 = vmatprep.subr.bf16.mxu1 %v3332_v10 }
 0x21e   : > { %1398 = vmatpush1.bf16.msra.mxu1 %v3333_v12  ;;  %v3353_v12 = vld [vmem:[#allocation63_spill] sm:$0xff] }
 0x21f   : > { %1399 = vmatprep.subr.bf16.mxu1 %v3334_v60 }
 0x222   : > { %1400 = vmatpush1.bf16.msra.mxu1 %v3335_v62  ;;  %v1268_v62 = vrot.slane %v1986_v50, 2 }
 0x223   : > { %1401 = vmatprep.subr.bf16.mxu1 %v3336_v63 }
 0x226   : > { %1402 = vmatpush1.bf16.msra.mxu1 %v3337_v56 }
 0x227   : > { %1403 = vmatprep.subr.bf16.mxu1 %v3338_v22 }
 0x22a   : > { %1404 = vmatpush1.bf16.msra.mxu1 %v3339_v47 }
 0x22b   : > { %1405 = vmatprep.subr.bf16.mxu1 %v3340_v0 }
 0x22e   : > { %1406 = vmatpush1.bf16.msra.mxu1 %v3341_v28 }
 0x22f   : > { %1407 = vmatprep.subr.bf16.mxu1 %v3342_v26 }
 0x232   : > { %1408 = vmatpush1.bf16.msra.mxu1 %v3343_v1 }
 0x233   : > { %1409 = vmatprep.subr.bf16.mxu1 %v3344_v13 }
 0x236   : > { %1410 = vmatpush1.bf16.msra.mxu1 %v3345_v51 }
 0x237   : > { %1411 = vmatprep.subr.bf16.mxu1 %v3346_v59 }
 0x23a   : > { %1412 = vmatpush1.bf16.msra.mxu1 %v3347_v49 }
 0x23b   : > { %1413 = vmatprep.subr.bf16.mxu1 %v3348_v16 }
 0x23e   : > { %1414 = vmatpush1.bf16.msra.mxu1 %v3349_v41 }
 0x23f   : > { %1415 = vmatprep.subr.bf16.mxu1 %v3350_v42 }
 0x242   : > { %1416 = vmatpush1.bf16.msra.mxu1 %v3351_v44 }
 0x243   : > { %1555 = vmatprep.subr.bf16.mxu1 %v2262_v46  ;;  %v3354_v46 = vld [vmem:[#allocation64_spill] sm:$0xff] }
 0x298   : > { %v1167_v52 = vpop.f32.mrb[4].mxu1  ;;  %v1208_v9 = vpop.f32.mrb[8].mxu0 }
 0x299   : > { %v1168_v55 = vadd.f32 %v1167_v52, %v3352_v54  ;;  %v1169_v58 = vpop.f32.mrb[5].mxu1  ;;  %v1210_v10 = vpop.f32.mrb[9].mxu0 }
 0x29a   : > { %v1170_v60 = vadd.f32 %v1169_v58, %v3353_v12  ;;  %v1171_v63 = vpop.f32.mrb[6].mxu1  ;;  %v1212_v56 = vpop.f32.mrb[10].mxu0  ;;  %v1211_v52 = vadd.f32 %v1210_v10, %v3354_v46  ;;  %v3355_v58 = vld [vmem:[#allocation65_spill] sm:$0xff] }
 0x29b   : > { %v1260_v22 = vadd.f32 %v1986_v50, %v1168_v55  ;;  %v1172_v47 = vpop.f32.mrb[7].mxu1  ;;  %v1213_v0 = vpop.f32.mrb[11].mxu0  ;;  %v1209_v12 = vadd.f32 %v1208_v9, %v3355_v58  ;;  %v1278_v63 = vrot.slane %v1986_v50, 4  ;;  %v1987_v56 = vld [vmem:[%s2487_s28 + $0xc] sm:$0x3f] }
 0x29c   : > { %v1270_v26 = vadd.f32 %v1268_v62, %v1170_v60  ;;  %v1294_v9 = vrot.slane %v1987_v56, 2 }
 0x29d   : > { %v1988_v28 = vmul.f32 -1.442695, %v1260_v22  ;;  %v1286_v22 = vadd.f32 %v1987_v56, %v1211_v52 }
 0x29e   : > { %v1989_v1 = vmul.f32 -1.442695, %v1270_v26 }
 0x29f   : > { %2202 = vpow2.f32 %v1988_v28  ;;  %v1990_v62 = vmul.f32 -1.442695, %v1286_v22 }
 0x2a0   : > { %2204 = vpow2.f32 %v1989_v1 }
 0x2a9   : > { %v2203_v13 = vpop.eup %2202 }
 0x2aa   : > { %v1264_v51 = vadd.f32 1.0, %v2203_v13  ;;  %v2205_v59 = vpop.eup %2204 }
 0x2ab   : > { %v1274_v49 = vadd.f32 1.0, %v2205_v59 }
 0x2ac   : > { %2206 = vrcp.f32 %v1264_v51 }
 0x2ad   : > { %2208 = vrcp.f32 %v1274_v49 }
 0x2b6   : > { %v2207_v55 = vpop.eup %2206 }
 0x2b7   : > { %v1277_v47 = vmul.f32 %v2207_v55, %v1209_v12  ;;  %v2209_v0 = vpop.eup %2208  ;;  %v3356_v12 = vld [vmem:[#allocation18_spill] sm:$0xff] }
 0x2b8   : > { %v1282_v28 = vsub.f32 1.0, %v2209_v0  ;;  %v1284_v13 = vmul.f32 %v2209_v0, %v2902_v19  ;;  %v1304_v0 = vrot.slane %v1987_v56, 4 }
 0x2b9   : > { %v1280_v60 = vadd.f32 %v1278_v63, %v1277_v47 }
 0x2bb   : > { %2210 = vtanh.f32 %v1280_v60 }
 0x2bc   : > { %2212 = vpow2.f32 %v1990_v62 }
 0x2c5   : > { %v2211_v26 = vpop.eup %2210 }
 0x2c6   : > { %v1283_v1 = vmul.f32 %v2211_v26, %v1282_v28  ;;  %v2213_v51 = vpop.eup %2212 }
 0x2c7   : > { %v1290_v50 = vadd.f32 1.0, %v2213_v51 }
 0x2c8   : > { %v1285_v10 = vadd.f32 %v1284_v13, %v1283_v1 }
 0x2c9   : > { %2214 = vrcp.f32 %v1290_v50 }
 0x2ca   : > { %1993 = vst [vmem:[%s2477_s21 + $0x2] sm:$0x3] %v1285_v10 }
 0x2d3   : > { %v2215_v47 = vpop.eup %2214 }
 0x2d8   : > { %v1249_v59 = vpop.f32.mrb[8].mxu1 }
 0x2d9   : > { %v1250_v49 = vadd.f32 %v1249_v59, %v3356_v12  ;;  %v1251_v52 = vpop.f32.mrb[9].mxu1  ;;  %v1310_v59 = vrot.slane %v2902_v19, 2  ;;  %v2264_v19 = vld [vmem:[#allocation3 + $0x34] ss:$24 sps:$4 sm:$0xff]  }
 0x2da   : > { %v1252_v63 = vadd.f32 %v1251_v52, %v2896_v57  ;;  %v1253_v55 = vpop.f32.mrb[10].mxu1 }
 0x2db   : > { %v1296_v22 = vadd.f32 %v1294_v9, %v1250_v49  ;;  %v1254_v60 = vpop.f32.mrb[11].mxu1 }
 0x2dc   : > { %v1303_v62 = vmul.f32 %v2215_v47, %v1252_v63  ;;  %v2268_v60 = vld [vmem:[#allocation3 + $0x94] ss:$24 sps:$4 sm:$0xff]  }
 0x2dd   : > { %v1991_v28 = vmul.f32 -1.442695, %v1296_v22 }
 0x2de   : > { %v1306_v13 = vadd.f32 %v1304_v0, %v1303_v62  ;;  %v2300_v62 = vld [vmem:[#allocation3 + $0xcc] ss:$24 sps:$4 sm:$0xff]  }
 0x2df   : > { %2216 = vpow2.f32 %v1991_v28  ;;  %v2303_v28 = vld [vmem:[#allocation3 + $0xf8] ss:$24 sps:$4 sm:$0xff]   ;;  %v2304_v0 = vld [vmem:[#allocation3 + $0x12c] ss:$24 sps:$4 sm:$0xff]  }
 0x2e9   : > { %v2217_v26 = vpop.eup %2216 }
 0x2ea   : > { %v1300_v1 = vadd.f32 1.0, %v2217_v26  ;;  %v2305_v26 = vld [vmem:[#allocation3 + $0x128] ss:$24 sps:$4 sm:$0xff]  }
 0x2ec   : > { %2218 = vrcp.f32 %v1300_v1  ;;  %v2306_v1 = vld [vmem:[#allocation3 + $0x15c] ss:$24 sps:$4 sm:$0xff]  }
 0x2ed   : > { %2220 = vtanh.f32 %v1306_v13  ;;  %v2307_v13 = vld [vmem:[#allocation3 + $0x158] ss:$24 sps:$4 sm:$0xff]  }
 0x2f6   : > { %v2219_v51 = vpop.eup %2218 }
 0x2f7   : > { %v1308_v50 = vsub.f32 1.0, %v2219_v51  ;;  %v2221_v12 = vpop.eup %2220  ;;  %v1312_v52 = vmul.f32 %v2219_v51, %v1310_v59  ;;  %v2308_v51 = vld [vmem:[#allocation3 + $0x18c] ss:$24 sps:$4 sm:$0xff]   ;;  %v2310_v59 = vld [vmem:[#allocation3 + $0x1bc] ss:$24 sps:$4 sm:$0xff]  }
 0x2f9   : > { %v1309_v55 = vmul.f32 %v2221_v12, %v1308_v50  ;;  %v2266_v12 = vld [vmem:[#allocation3 + $0x64] ss:$24 sps:$4 sm:$0xff]   ;;  %v2309_v50 = vld [vmem:[#allocation3 + $0x188] ss:$24 sps:$4 sm:$0xff]  }
 0x2fb   : > { %v1313_v57 = vadd.f32 %v1312_v52, %v1309_v55  ;;  %v2311_v52 = vld [vmem:[#allocation3 + $0x1b8] ss:$24 sps:$4 sm:$0xff]   ;;  %v2312_v55 = vld [vmem:[#allocation3 + $0x1ec] ss:$24 sps:$4 sm:$0xff]  }
 0x2fd   : > { %v1316_v9 = vcombine.low %v1285_v10, %v1313_v57  ;;  %1994 = vst [vmem:[%s2492_s6 + $0x4] sm:$0x3] %v1313_v57  ;;  %v2263_v57 = vld [vmem:[#allocation3] ss:$24 sps:$4 sm:$0xff]   ;;  %v2265_v10 = vld [vmem:[#allocation3 + $0x30] ss:$24 sps:$4 sm:$0xff]  }
 0x2ff   : > { %1992 = vst.sshfl [vmem:[#allocation2] sm:$0x33 pattern:$0x76325410] %v1316_v9  ;;  %v2313_v9 = vld [vmem:[#allocation3 + $0x1e8] ss:$24 sps:$4 sm:$0xff]  }
 0x306   : > { %v3018_v49 = vld [vmem:[#allocation2] sm:$0xf] }
 0x307   : > { %v1338_v56 = vrot.slane %v3018_v49, %v3297_v17 }
 0x309   : > { %v1339_v63 = vcombine.high %v1338_v56, %v1338_v56  ;;  %v3022_v22 = vpack.c.bf16 %v1338_v56, %v1338_v56  ;;  %v2314_v56 = vld [vmem:[#allocation3 + $0x21c] ss:$24 sps:$4 sm:$0xff]  }
 0x30b   : > { %v1343_v47 = vpack.c.bf16 %v1339_v63, %v1339_v63  ;;  %v2315_v63 = vld [vmem:[#allocation3 + $0x218] ss:$24 sps:$4 sm:$0xff]  }
 0x30d   : > { %1376 = vmatprep.mubr.bf16.mxu0 %v1343_v47  ;;  %1417 = vmatprep.mubr.bf16.mxu1 %v1343_v47 }
 0x30e   : > { %1377 = vmatmul.mubr.bf16.vlgmr.msra.gmra.mrb[12].mxu0 %v3022_v22  ;;  %1418 = vmatmul.mubr.bf16.vlgmr.msra.gmra.mrb[12].mxu1 %v3022_v22 }
 0x30f   : > { %1427 = vmatpush1.bf16.msra.mxu0 %v3298_v43  ;;  %1458 = vmatprep.mubr.bf16.mxu0 %v1343_v47  ;;  %v2267_v43 = vld [vmem:[#allocation3 + $0x60] ss:$24 sps:$4 sm:$0xff]   ;;  %v2316_v47 = vld [vmem:[#allocation3 + $0x24c] ss:$24 sps:$4 sm:$0xff]  }
 0x310   : > { %1428 = vmatprep.subr.bf16.mxu0 %v3299_v39  ;;  %1556 = vmatpush1.bf16.msra.mxu1 %v2263_v57  ;;  %v2269_v39 = vld [vmem:[#allocation3 + $0x90] ss:$24 sps:$4 sm:$0xff]   ;;  %v2318_v57 = vld [vmem:[#allocation3 + $0x27c] ss:$24 sps:$4 sm:$0xff]  }
 0x311   : > { %1557 = vmatprep.subr.bf16.mxu1 %v2264_v19  ;;  %v2319_v19 = vld [vmem:[#allocation3 + $0x278] ss:$24 sps:$4 sm:$0xff]  }
 0x313   : > { %1429 = vmatpush1.bf16.msra.mxu0 %v3300_v53  ;;  %v2270_v53 = vld [vmem:[#allocation3 + $0xc4] ss:$24 sps:$4 sm:$0xff]  }
 0x314   : > { %1430 = vmatprep.subr.bf16.mxu0 %v3301_v40  ;;  %1558 = vmatpush1.bf16.msra.mxu1 %v2265_v10  ;;  %v2271_v40 = vld [vmem:[#allocation3 + $0xc0] ss:$24 sps:$4 sm:$0xff]   ;;  %v1995_v10 = vld [vmem:[%s2482_s24 + $0xc] sm:$0x3f] }
 0x315   : > { %1559 = vmatprep.subr.bf16.mxu1 %v2266_v12 }
 0x317   : > { %1431 = vmatpush1.bf16.msra.mxu0 %v3302_v32  ;;  %v2272_v32 = vld [vmem:[#allocation3 + $0xf4] ss:$24 sps:$4 sm:$0xff]  }
 0x318   : > { %1432 = vmatprep.subr.bf16.mxu0 %v3303_v37  ;;  %1560 = vmatpush1.bf16.msra.mxu1 %v2267_v43  ;;  %v2273_v37 = vld [vmem:[#allocation3 + $0xf0] ss:$24 sps:$4 sm:$0xff]  }
 0x319   : > { %1561 = vmatprep.subr.bf16.mxu1 %v2268_v60 }
 0x31b   : > { %1433 = vmatpush1.bf16.msra.mxu0 %v3304_v35  ;;  %v2274_v35 = vld [vmem:[#allocation3 + $0x124] ss:$24 sps:$4 sm:$0xff]  }
 0x31c   : > { %1434 = vmatprep.subr.bf16.mxu0 %v3305_v2  ;;  %1562 = vmatpush1.bf16.msra.mxu1 %v2269_v39  ;;  %v2275_v2 = vld [vmem:[#allocation3 + $0x120] ss:$24 sps:$4 sm:$0xff]  }
 0x31d   : > { %1563 = vmatprep.subr.bf16.mxu1 %v2270_v53 }
 0x31f   : > { %1435 = vmatpush1.bf16.msra.mxu0 %v3306_v3  ;;  %v2276_v3 = vld [vmem:[#allocation3 + $0x154] ss:$24 sps:$4 sm:$0xff]  }
 0x320   : > { %1436 = vmatprep.subr.bf16.mxu0 %v3307_v4  ;;  %1564 = vmatpush1.bf16.msra.mxu1 %v2271_v40  ;;  %v2277_v4 = vld [vmem:[#allocation3 + $0x150] ss:$24 sps:$4 sm:$0xff]  }
 0x321   : > { %1565 = vmatprep.subr.bf16.mxu1 %v2272_v32  ;;  %v3357_v40 = vld [vmem:[#allocation63_spill] sm:$0xff] }
 0x323   : > { %1437 = vmatpush1.bf16.msra.mxu0 %v3308_v5  ;;  %v2278_v5 = vld [vmem:[#allocation3 + $0x184] ss:$24 sps:$4 sm:$0xff]  }
 0x324   : > { %1438 = vmatprep.subr.bf16.mxu0 %v3309_v6  ;;  %1566 = vmatpush1.bf16.msra.mxu1 %v2273_v37  ;;  %v2279_v6 = vld [vmem:[#allocation3 + $0x180] ss:$24 sps:$4 sm:$0xff]   ;;  %v1479_v37 = vrot.slane %v1995_v10, 2 }
 0x325   : > { %1567 = vmatprep.subr.bf16.mxu1 %v2274_v35 }
 0x327   : > { %1439 = vmatpush1.bf16.msra.mxu0 %v3310_v7  ;;  %v2280_v7 = vld [vmem:[#allocation3 + $0x1b4] ss:$24 sps:$4 sm:$0xff]  }
 0x328   : > { %1440 = vmatprep.subr.bf16.mxu0 %v3311_v8  ;;  %1568 = vmatpush1.bf16.msra.mxu1 %v2275_v2  ;;  %v2281_v8 = vld [vmem:[#allocation3 + $0x1b0] ss:$24 sps:$4 sm:$0xff]  }
 0x329   : > { %1569 = vmatprep.subr.bf16.mxu1 %v2276_v3 }
 0x32b   : > { %1441 = vmatpush1.bf16.msra.mxu0 %v3312_v11  ;;  %v2282_v11 = vld [vmem:[#allocation3 + $0x1e4] ss:$24 sps:$4 sm:$0xff]  }
 0x32c   : > { %1442 = vmatprep.subr.bf16.mxu0 %v3313_v14  ;;  %1570 = vmatpush1.bf16.msra.mxu1 %v2277_v4  ;;  %v2283_v14 = vld [vmem:[#allocation3 + $0x1e0] ss:$24 sps:$4 sm:$0xff]  }
 0x32d   : > { %1571 = vmatprep.subr.bf16.mxu1 %v2278_v5 }
 0x32f   : > { %1443 = vmatpush1.bf16.msra.mxu0 %v3314_v15  ;;  %v2284_v15 = vld [vmem:[#allocation3 + $0x214] ss:$24 sps:$4 sm:$0xff]  }
 0x330   : > { %1444 = vmatprep.subr.bf16.mxu0 %v3315_v18  ;;  %1572 = vmatpush1.bf16.msra.mxu1 %v2279_v6  ;;  %v2285_v18 = vld [vmem:[#allocation3 + $0x210] ss:$24 sps:$4 sm:$0xff]  }
 0x331   : > { %1573 = vmatprep.subr.bf16.mxu1 %v2280_v7 }
 0x333   : > { %1445 = vmatpush1.bf16.msra.mxu0 %v3316_v20  ;;  %v2286_v20 = vld [vmem:[#allocation3 + $0x244] ss:$24 sps:$4 sm:$0xff]  }
 0x334   : > { %1446 = vmatprep.subr.bf16.mxu0 %v3317_v21  ;;  %1574 = vmatpush1.bf16.msra.mxu1 %v2281_v8  ;;  %v2287_v21 = vld [vmem:[#allocation3 + $0x240] ss:$24 sps:$4 sm:$0xff]  }
 0x335   : > { %1575 = vmatprep.subr.bf16.mxu1 %v2282_v11 }
 0x337   : > { %1447 = vmatpush1.bf16.msra.mxu0 %v3318_v27  ;;  %v2288_v27 = vld [vmem:[#allocation3 + $0x274] ss:$24 sps:$4 sm:$0xff]  }
 0x338   : > { %1448 = vmatprep.subr.bf16.mxu0 %v3319_v31  ;;  %1576 = vmatpush1.bf16.msra.mxu1 %v2283_v14  ;;  %v2289_v31 = vld [vmem:[#allocation3 + $0x270] ss:$24 sps:$4 sm:$0xff]  }
 0x339   : > { %1577 = vmatprep.subr.bf16.mxu1 %v2284_v15  ;;  %v1489_v15 = vrot.slane %v1995_v10, 4 }
 0x33b   : > { %1449 = vmatpush1.bf16.msra.mxu0 %v3320_v33  ;;  %v2290_v33 = vld [vmem:[#allocation3 + $0x2a4] ss:$24 sps:$4 sm:$0xff]  }
 0x33c   : > { %1450 = vmatprep.subr.bf16.mxu0 %v3321_v34  ;;  %1578 = vmatpush1.bf16.msra.mxu1 %v2285_v18  ;;  %v2291_v34 = vld [vmem:[#allocation3 + $0x2a0] ss:$24 sps:$4 sm:$0xff]  }
 0x33d   : > { %1579 = vmatprep.subr.bf16.mxu1 %v2286_v20  ;;  %v1996_v18 = vld [vmem:[%s2487_s28 + $0x6] sm:$0x3f] }
 0x33f   : > { %1451 = vmatpush1.bf16.msra.mxu0 %v3322_v38  ;;  %v2297_v38 = vld [vmem:[#allocation3 + $0x68] ss:$24 sps:$4 sm:$0xff]  }
 0x340   : > { %1452 = vmatprep.subr.bf16.mxu0 %v2802_v48  ;;  %1580 = vmatpush1.bf16.msra.mxu1 %v2287_v21  ;;  %v2292_v48 = vld [vmem:[#allocation3 + $0xc] ss:$24 sps:$4 sm:$0xff]  }
 0x341   : > { %1581 = vmatprep.subr.bf16.mxu1 %v2288_v27 }
 0x343   : > { %1453 = vmatpush1.bf16.msra.mxu0 %v2806_v45  ;;  %v2294_v45 = vld [vmem:[#allocation3 + $0x3c] ss:$24 sps:$4 sm:$0xff]  }
 0x344   : > { %1454 = vmatprep.subr.bf16.mxu0 %v2810_v61  ;;  %1582 = vmatpush1.bf16.msra.mxu1 %v2289_v31  ;;  %v2293_v61 = vld [vmem:[#allocation3 + $0x8] ss:$24 sps:$4 sm:$0xff]  }
 0x345   : > { %1583 = vmatprep.subr.bf16.mxu1 %v2290_v33 }
 0x347   : > { %1455 = vmatpush1.bf16.msra.mxu0 %v2814_v30  ;;  %v2295_v30 = vld [vmem:[#allocation3 + $0x38] ss:$24 sps:$4 sm:$0xff]  }
 0x348   : > { %1456 = vmatprep.subr.bf16.mxu0 %v2818_v29  ;;  %1584 = vmatpush1.bf16.msra.mxu1 %v2291_v34  ;;  %v2296_v29 = vld [vmem:[#allocation3 + $0x6c] ss:$24 sps:$4 sm:$0xff]  }
 0x349   : > { %1585 = vmatprep.subr.bf16.mxu1 %v2671_v24  ;;  %v2298_v24 = vld [vmem:[#allocation3 + $0x9c] ss:$24 sps:$4 sm:$0xff]  }
 0x34b   : > { %1457 = vmatpush1.bf16.msra.mxu0 %v2822_v23  ;;  %v2299_v23 = vld [vmem:[#allocation3 + $0x98] ss:$24 sps:$4 sm:$0xff]  }
 0x34c   : > { %1596 = vmatprep.subr.bf16.mxu0 %v2292_v48  ;;  %1586 = vmatpush1.bf16.msra.mxu1 %v2673_v25  ;;  %v2301_v25 = vld [vmem:[#allocation3 + $0xc8] ss:$24 sps:$4 sm:$0xff]  }
 0x34d   : > { %1637 = vmatprep.subr.bf16.mxu1 %v2683_v36  ;;  %v2302_v36 = vld [vmem:[#allocation3 + $0xfc] ss:$24 sps:$4 sm:$0xff]  }
 0x34e   : > { %1459 = vmatmul.mubr.bf16.vlgmr.msra.gmra.mrb[16].mxu0 %v3022_v22  ;;  %v2317_v22 = vld [vmem:[#allocation3 + $0x248] ss:$24 sps:$4 sm:$0xff]  }
 0x34f   : > { %1597 = vmatpush1.bf16.msra.mxu0 %v2293_v61 }
 0x350   : > { %1598 = vmatprep.subr.bf16.mxu0 %v2294_v45 }
 0x353   : > { %1599 = vmatpush1.bf16.msra.mxu0 %v2295_v30 }
 0x354   : > { %1600 = vmatprep.subr.bf16.mxu0 %v2296_v29 }
 0x357   : > { %1601 = vmatpush1.bf16.msra.mxu0 %v2297_v38 }
 0x358   : > { %1602 = vmatprep.subr.bf16.mxu0 %v2298_v24 }
 0x35b   : > { %1603 = vmatpush1.bf16.msra.mxu0 %v2299_v23  ;;  %v1505_v23 = vrot.slane %v1996_v18, 2 }
 0x35c   : > { %1604 = vmatprep.subr.bf16.mxu0 %v2300_v62 }
 0x35f   : > { %1605 = vmatpush1.bf16.msra.mxu0 %v2301_v25  ;;  %v3358_v25 = vld [vmem:[#allocation18_spill] sm:$0xff] }
 0x360   : > { %1606 = vmatprep.subr.bf16.mxu0 %v2302_v36 }
 0x363   : > { %1607 = vmatpush1.bf16.msra.mxu0 %v2303_v28 }
 0x364   : > { %1608 = vmatprep.subr.bf16.mxu0 %v2304_v0  ;;  %v3359_v0 = vld [vmem:[#allocation66_spill] sm:$0xff] }
 0x367   : > { %1609 = vmatpush1.bf16.msra.mxu0 %v2305_v26 }
 0x368   : > { %1610 = vmatprep.subr.bf16.mxu0 %v2306_v1 }
 0x36b   : > { %1611 = vmatpush1.bf16.msra.mxu0 %v2307_v13 }
 0x36c   : > { %1612 = vmatprep.subr.bf16.mxu0 %v2308_v51 }
 0x36f   : > { %1613 = vmatpush1.bf16.msra.mxu0 %v2309_v50 }
 0x370   : > { %1614 = vmatprep.subr.bf16.mxu0 %v2310_v59 }
 0x373   : > { %1615 = vmatpush1.bf16.msra.mxu0 %v2311_v52 }
 0x374   : > { %1616 = vmatprep.subr.bf16.mxu0 %v2312_v55  ;;  %v1515_v55 = vrot.slane %v1996_v18, 4 }
 0x377   : > { %1617 = vmatpush1.bf16.msra.mxu0 %v2313_v9 }
 0x378   : > { %1618 = vmatprep.subr.bf16.mxu0 %v2314_v56 }
 0x37b   : > { %1619 = vmatpush1.bf16.msra.mxu0 %v2315_v63 }
 0x37c   : > { %1620 = vmatprep.subr.bf16.mxu0 %v2316_v47 }
 0x37f   : > { %1621 = vmatpush1.bf16.msra.mxu0 %v2317_v22  ;;  %v1521_v22 = vrot.slane %v3018_v49, 2 }
 0x380   : > { %1622 = vmatprep.subr.bf16.mxu0 %v2318_v57 }
 0x383   : > { %1623 = vmatpush1.bf16.msra.mxu0 %v2319_v19 }
 0x384   : > { %1624 = vmatprep.subr.bf16.mxu0 %v3348_v16 }
 0x387   : > { %1625 = vmatpush1.bf16.msra.mxu0 %v3349_v41 }
 0x388   : > { %1626 = vmatprep.subr.bf16.mxu0 %v3350_v42 }
 0x38b   : > { %1627 = vmatpush1.bf16.msra.mxu0 %v3351_v44 }
 0x3e1   : > { %v1378_v12 = vpop.f32.mrb[12].mxu0  ;;  %v1419_v43 = vpop.f32.mrb[12].mxu1 }
 0x3e2   : > { %v1379_v60 = vadd.f32 %v1378_v12, %v3352_v54  ;;  %v1380_v39 = vpop.f32.mrb[13].mxu0  ;;  %v1421_v53 = vpop.f32.mrb[13].mxu1  ;;  %v1420_v14 = vadd.f32 %v1419_v43, %v3355_v58 }
 0x3e3   : > { %v1381_v32 = vadd.f32 %v1380_v39, %v3357_v40  ;;  %v1382_v35 = vpop.f32.mrb[14].mxu0  ;;  %v1423_v2 = vpop.f32.mrb[14].mxu1  ;;  %v1422_v11 = vadd.f32 %v1421_v53, %v3354_v46 }
 0x3e4   : > { %v1471_v3 = vadd.f32 %v1995_v10, %v1379_v60  ;;  %v1383_v16 = vpop.f32.mrb[15].mxu0  ;;  %v1424_v41 = vpop.f32.mrb[15].mxu1  ;;  %v2321_v2 = vld [vmem:[#allocation3 + $0x44] ss:$24 sps:$4 sm:$0xff]  }
 0x3e5   : > { %v1481_v42 = vadd.f32 %v1479_v37, %v1381_v32  ;;  %v1497_v27 = vadd.f32 %v1996_v18, %v1422_v11  ;;  %v2323_v16 = vld [vmem:[#allocation3 + $0x74] ss:$24 sps:$4 sm:$0xff]   ;;  %v2325_v41 = vld [vmem:[#allocation3 + $0xa4] ss:$24 sps:$4 sm:$0xff]   ;;  %v2336_v18 = vld [vmem:[#allocation3 + $0x190] ss:$24 sps:$4 sm:$0xff]  }
 0x3e6   : > { %v1997_v4 = vmul.f32 -1.442695, %v1471_v3  ;;  %v2322_v3 = vld [vmem:[#allocation3 + $0x40] ss:$24 sps:$4 sm:$0xff]   ;;  %v2333_v11 = vld [vmem:[#allocation3 + $0x164] ss:$24 sps:$4 sm:$0xff]  }
 0x3e7   : > { %v1998_v44 = vmul.f32 -1.442695, %v1481_v42  ;;  %v1999_v33 = vmul.f32 -1.442695, %v1497_v27  ;;  %v2327_v42 = vld [vmem:[#allocation3 + $0xd4] ss:$24 sps:$4 sm:$0xff]  }
 0x3e8   : > { %2222 = vpow2.f32 %v1997_v4  ;;  %v2326_v4 = vld [vmem:[#allocation3 + $0xa0] ss:$24 sps:$4 sm:$0xff]   ;;  %v2339_v27 = vld [vmem:[#allocation3 + $0x1f4] ss:$24 sps:$4 sm:$0xff]  }
 0x3e9   : > { %2224 = vpow2.f32 %v1998_v44  ;;  %v2328_v44 = vld [vmem:[#allocation3 + $0xd0] ss:$24 sps:$4 sm:$0xff]  }
 0x3f2   : > { %v2223_v5 = vpop.eup %2222 }
 0x3f3   : > { %v1475_v6 = vadd.f32 1.0, %v2223_v5  ;;  %v2225_v7 = vpop.eup %2224  ;;  %v2329_v5 = vld [vmem:[#allocation3 + $0x104] ss:$24 sps:$4 sm:$0xff]  }
 0x3f4   : > { %v1485_v8 = vadd.f32 1.0, %v2225_v7  ;;  %v2331_v7 = vld [vmem:[#allocation3 + $0x134] ss:$24 sps:$4 sm:$0xff]  }
 0x3f5   : > { %2226 = vrcp.f32 %v1475_v6  ;;  %v2330_v6 = vld [vmem:[#allocation3 + $0x100] ss:$24 sps:$4 sm:$0xff]  }
 0x3f6   : > { %2228 = vrcp.f32 %v1485_v8  ;;  %v2332_v8 = vld [vmem:[#allocation3 + $0x130] ss:$24 sps:$4 sm:$0xff]  }
 0x3ff   : > { %v2227_v20 = vpop.eup %2226 }
 0x400   : > { %v1488_v21 = vmul.f32 %v2227_v20, %v1420_v14  ;;  %v2229_v34 = vpop.eup %2228  ;;  %v2334_v14 = vld [vmem:[#allocation3 + $0x160] ss:$24 sps:$4 sm:$0xff]   ;;  %v2337_v20 = vld [vmem:[#allocation3 + $0x1c4] ss:$24 sps:$4 sm:$0xff]  }
 0x401   : > { %v1493_v48 = vsub.f32 1.0, %v2229_v34  ;;  %v1495_v30 = vmul.f32 %v2229_v34, %v3018_v49  ;;  %v2320_v49 = vld [vmem:[#allocation3 + $0x10] ss:$24 sps:$4 sm:$0xff]   ;;  %v2342_v34 = vld [vmem:[#allocation3 + $0x220] ss:$24 sps:$4 sm:$0xff]  }
 0x402   : > { %v1491_v31 = vadd.f32 %v1489_v15, %v1488_v21  ;;  %v2335_v15 = vld [vmem:[#allocation3 + $0x194] ss:$24 sps:$4 sm:$0xff]   ;;  %v2338_v21 = vld [vmem:[#allocation3 + $0x1c0] ss:$24 sps:$4 sm:$0xff]  }
 0x404   : > { %2230 = vtanh.f32 %v1491_v31  ;;  %v2340_v31 = vld [vmem:[#allocation3 + $0x1f0] ss:$24 sps:$4 sm:$0xff]  }
 0x405   : > { %2232 = vpow2.f32 %v1999_v33  ;;  %v2341_v33 = vld [vmem:[#allocation3 + $0x224] ss:$24 sps:$4 sm:$0xff]  }
 0x40e   : > { %v2231_v61 = vpop.eup %2230 }
 0x40f   : > { %v1494_v45 = vmul.f32 %v2231_v61, %v1493_v48  ;;  %v2233_v38 = vpop.eup %2232  ;;  %v2343_v48 = vld [vmem:[#allocation3 + $0x254] ss:$24 sps:$4 sm:$0xff]   ;;  %v2344_v61 = vld [vmem:[#allocation3 + $0x250] ss:$24 sps:$4 sm:$0xff]  }
 0x410   : > { %v1501_v24 = vadd.f32 1.0, %v2233_v38  ;;  %v2348_v38 = vld [vmem:[#allocation3 + $0x2b0] ss:$24 sps:$4 sm:$0xff]  }
 0x411   : > { %v1496_v29 = vadd.f32 %v1495_v30, %v1494_v45  ;;  %v2345_v45 = vld [vmem:[#allocation3 + $0x284] ss:$24 sps:$4 sm:$0xff]   ;;  %v2346_v30 = vld [vmem:[#allocation3 + $0x280] ss:$24 sps:$4 sm:$0xff]  }
 0x412   : > { %2234 = vrcp.f32 %v1501_v24  ;;  %v2349_v24 = vld [vmem:[#allocation3 + $0x2e4] ss:$24 sps:$4 sm:$0xff]  }
 0x413   : > { %2002 = vst [vmem:[%s2477_s21 + $0x4] sm:$0x3] %v1496_v29 }
 0x41c   : > { %v2235_v13 = vpop.eup %2234 }
 0x421   : > { %v1460_v62 = vpop.f32.mrb[16].mxu0 }
 0x422   : > { %v1461_v36 = vadd.f32 %v1460_v62, %v3358_v25  ;;  %v1462_v28 = vpop.f32.mrb[17].mxu0  ;;  %v2004_v62 = vld [vmem:[%s2482_s24 + $0x12] sm:$0x3f] }
 0x423   : > { %v1463_v26 = vadd.f32 %v1462_v28, %v3359_v0  ;;  %v1464_v1 = vpop.f32.mrb[18].mxu0 }
 0x424   : > { %v1507_v51 = vadd.f32 %v1505_v23, %v1461_v36  ;;  %v1465_v50 = vpop.f32.mrb[19].mxu0  ;;  %v2350_v23 = vld [vmem:[#allocation3 + $0x2e0] ss:$24 sps:$4 sm:$0xff]  }
 0x425   : > { %v1514_v59 = vmul.f32 %v2235_v13, %v1463_v26  ;;  %v1689_v50 = vrot.slane %v2004_v62, 2 }
 0x426   : > { %v2000_v52 = vmul.f32 -1.442695, %v1507_v51 }
 0x427   : > { %v1517_v63 = vadd.f32 %v1515_v55, %v1514_v59 }
 0x428   : > { %2236 = vpow2.f32 %v2000_v52 }
 0x432   : > { %v2237_v9 = vpop.eup %2236 }
 0x433   : > { %v1511_v56 = vadd.f32 1.0, %v2237_v9 }
 0x435   : > { %2238 = vrcp.f32 %v1511_v56 }
 0x436   : > { %2240 = vtanh.f32 %v1517_v63 }
 0x43f   : > { %v2239_v47 = vpop.eup %2238 }
 0x440   : > { %v1519_v57 = vsub.f32 1.0, %v2239_v47  ;;  %v2241_v19 = vpop.eup %2240  ;;  %v1523_v10 = vmul.f32 %v2239_v47, %v1521_v22 }
 0x442   : > { %v1520_v12 = vmul.f32 %v2241_v19, %v1519_v57 }
 0x444   : > { %v1524_v43 = vadd.f32 %v1523_v10, %v1520_v12 }
 0x446   : > { %v1527_v60 = vcombine.low %v1496_v29, %v1524_v43  ;;  %2003 = vst [vmem:[%s2492_s6 + $0x2] sm:$0x3] %v1524_v43  ;;  %v2347_v29 = vld [vmem:[#allocation3 + $0x2b4] ss:$24 sps:$4 sm:$0xff]   ;;  %v1699_v43 = vrot.slane %v2004_v62, 4 }
 0x448   : > { %2001 = vst.sshfl [vmem:[#allocation2] sm:$0x33 pattern:$0x76325410] %v1527_v60  ;;  %v1680_v60 = vld [vmem:[%s2487_s28] sm:$0x3f] }
 0x44f   : > { %v3077_v39 = vld [vmem:[#allocation2] sm:$0xf] }
 0x450   : > { %v1549_v53 = vrot.slane %v3077_v39, %v3297_v17  ;;  %v2324_v17 = vld [vmem:[#allocation3 + $0x70] ss:$24 sps:$4 sm:$0xff]  }
 0x452   : > { %v1550_v32 = vcombine.high %v1549_v53, %v1549_v53  ;;  %v3081_v35 = vpack.c.bf16 %v1549_v53, %v1549_v53 }
 0x454   : > { %v1554_v37 = vpack.c.bf16 %v1550_v32, %v1550_v32 }
 0x456   : > { %1587 = vmatprep.mubr.bf16.mxu1 %v1554_v37  ;;  %1628 = vmatprep.mubr.bf16.mxu0 %v1554_v37 }
 0x457   : > { %1588 = vmatmul.mubr.bf16.vlgmr.msra.gmra.mrb[16].mxu1 %v3081_v35  ;;  %1629 = vmatmul.mubr.bf16.vlgmr.msra.gmra.mrb[20].mxu0 %v3081_v35 }
 0x458   : > { %1638 = vmatpush1.bf16.msra.mxu1 %v2320_v49  ;;  %1669 = vmatprep.mubr.bf16.mxu1 %v1554_v37 }
 0x459   : > { %1639 = vmatprep.subr.bf16.mxu1 %v2321_v2 }
 0x45c   : > { %1640 = vmatpush1.bf16.msra.mxu1 %v2322_v3 }
 0x45d   : > { %1641 = vmatprep.subr.bf16.mxu1 %v2323_v16 }
 0x460   : > { %1642 = vmatpush1.bf16.msra.mxu1 %v2324_v17 }
 0x461   : > { %1643 = vmatprep.subr.bf16.mxu1 %v2325_v41 }
 0x464   : > { %1644 = vmatpush1.bf16.msra.mxu1 %v2326_v4 }
 0x465   : > { %1645 = vmatprep.subr.bf16.mxu1 %v2327_v42  ;;  %v1715_v42 = vrot.slane %v1680_v60, 2 }
 0x468   : > { %1646 = vmatpush1.bf16.msra.mxu1 %v2328_v44 }
 0x469   : > { %1647 = vmatprep.subr.bf16.mxu1 %v2329_v5 }
 0x46c   : > { %1648 = vmatpush1.bf16.msra.mxu1 %v2330_v6 }
 0x46d   : > { %1649 = vmatprep.subr.bf16.mxu1 %v2331_v7 }
 0x470   : > { %1650 = vmatpush1.bf16.msra.mxu1 %v2332_v8 }
 0x471   : > { %1651 = vmatprep.subr.bf16.mxu1 %v2333_v11 }
 0x474   : > { %1652 = vmatpush1.bf16.msra.mxu1 %v2334_v14 }
 0x475   : > { %1653 = vmatprep.subr.bf16.mxu1 %v2335_v15 }
 0x478   : > { %1654 = vmatpush1.bf16.msra.mxu1 %v2336_v18 }
 0x479   : > { %1655 = vmatprep.subr.bf16.mxu1 %v2337_v20 }
 0x47c   : > { %1656 = vmatpush1.bf16.msra.mxu1 %v2338_v21  ;;  %v1725_v21 = vrot.slane %v1680_v60, 4 }
 0x47d   : > { %1657 = vmatprep.subr.bf16.mxu1 %v2339_v27 }
 0x480   : > { %1658 = vmatpush1.bf16.msra.mxu1 %v2340_v31 }
 0x481   : > { %1659 = vmatprep.subr.bf16.mxu1 %v2341_v33 }
 0x484   : > { %1660 = vmatpush1.bf16.msra.mxu1 %v2342_v34 }
 0x485   : > { %1661 = vmatprep.subr.bf16.mxu1 %v2343_v48 }
 0x488   : > { %1662 = vmatpush1.bf16.msra.mxu1 %v2344_v61 }
 0x489   : > { %1663 = vmatprep.subr.bf16.mxu1 %v2345_v45 }
 0x48c   : > { %1664 = vmatpush1.bf16.msra.mxu1 %v2346_v30 }
 0x48d   : > { %1665 = vmatprep.subr.bf16.mxu1 %v2347_v29 }
 0x490   : > { %1666 = vmatpush1.bf16.msra.mxu1 %v2348_v38 }
 0x491   : > { %1667 = vmatprep.subr.bf16.mxu1 %v2349_v24 }
 0x494   : > { %1668 = vmatpush1.bf16.msra.mxu1 %v2350_v23 }
 0x497   : > { %1670 = vmatmul.mubr.bf16.vlgmr.msra.gmra.mrb[20].mxu1 %v3081_v35 }
 0x52a   : > { %v1589_v36 = vpop.f32.mrb[16].mxu1  ;;  %v1630_v28 = vpop.f32.mrb[20].mxu0 }
 0x52b   : > { %v1590_v26 = vadd.f32 %v1589_v36, %v3352_v54  ;;  %v1591_v1 = vpop.f32.mrb[17].mxu1  ;;  %v1632_v13 = vpop.f32.mrb[21].mxu0 }
 0x52c   : > { %v1592_v51 = vadd.f32 %v1591_v1, %v3357_v40  ;;  %v1593_v59 = vpop.f32.mrb[18].mxu1  ;;  %v1634_v52 = vpop.f32.mrb[22].mxu0  ;;  %v1633_v12 = vadd.f32 %v1632_v13, %v3354_v46  ;;  %v1631_v40 = vadd.f32 %v1630_v28, %v3355_v58 }
 0x52d   : > { %v1681_v55 = vadd.f32 %v2004_v62, %v1590_v26  ;;  %v1594_v9 = vpop.f32.mrb[19].mxu1  ;;  %v1635_v56 = vpop.f32.mrb[23].mxu0 }
 0x52e   : > { %v1691_v47 = vadd.f32 %v1689_v50, %v1592_v51  ;;  %v1707_v37 = vadd.f32 %v1680_v60, %v1633_v12 }
 0x52f   : > { %v2005_v63 = vmul.f32 -1.442695, %v1681_v55 }
 0x530   : > { %v2006_v22 = vmul.f32 -1.442695, %v1691_v47  ;;  %v2007_v49 = vmul.f32 -1.442695, %v1707_v37 }
 0x531   : > { %2242 = vpow2.f32 %v2005_v63 }
 0x532   : > { %2244 = vpow2.f32 %v2006_v22 }
 0x53b   : > { %v2243_v57 = vpop.eup %2242 }
 0x53c   : > { %v1685_v19 = vadd.f32 1.0, %v2243_v57  ;;  %v2245_v54 = vpop.eup %2244 }
 0x53d   : > { %v1695_v10 = vadd.f32 1.0, %v2245_v54 }
 0x53e   : > { %2246 = vrcp.f32 %v1685_v19 }
 0x53f   : > { %2248 = vrcp.f32 %v1695_v10 }
 0x548   : > { %v2247_v53 = vpop.eup %2246 }
 0x549   : > { %v1698_v32 = vmul.f32 %v2247_v53, %v1631_v40  ;;  %v2249_v2 = vpop.eup %2248 }
 0x54a   : > { %v1703_v3 = vsub.f32 1.0, %v2249_v2  ;;  %v1705_v41 = vmul.f32 %v2249_v2, %v3077_v39 }
 0x54b   : > { %v1701_v35 = vadd.f32 %v1699_v43, %v1698_v32 }
 0x54d   : > { %2250 = vtanh.f32 %v1701_v35 }
 0x54e   : > { %2252 = vpow2.f32 %v2007_v49 }
 0x557   : > { %v2251_v16 = vpop.eup %2250 }
 0x558   : > { %v1704_v17 = vmul.f32 %v2251_v16, %v1703_v3  ;;  %v2253_v4 = vpop.eup %2252 }
 0x559   : > { %v1711_v58 = vadd.f32 1.0, %v2253_v4 }
 0x55a   : > { %v1706_v46 = vadd.f32 %v1705_v41, %v1704_v17 }
 0x55b   : > { %2254 = vrcp.f32 %v1711_v58 }
 0x55c   : > { %2010 = vst [vmem:[%s2477_s21 + $0x6] sm:$0x3] %v1706_v46 }
 0x565   : > { %v2255_v11 = vpop.eup %2254 }
 0x56a   : > { %v1671_v44 = vpop.f32.mrb[20].mxu1 }
 0x56b   : > { %v1672_v5 = vadd.f32 %v1671_v44, %v3358_v25  ;;  %v1673_v6 = vpop.f32.mrb[21].mxu1  ;;  %v1731_v25 = vrot.slane %v3077_v39, 2 }
 0x56c   : > { %v1674_v7 = vadd.f32 %v1673_v6, %v3359_v0  ;;  %v1675_v8 = vpop.f32.mrb[22].mxu1 }
 0x56d   : > { %v1717_v14 = vadd.f32 %v1715_v42, %v1672_v5  ;;  %v1676_v15 = vpop.f32.mrb[23].mxu1 }
 0x56e   : > { %v1724_v18 = vmul.f32 %v2255_v11, %v1674_v7 }
 0x56f   : > { %v2008_v20 = vmul.f32 -1.442695, %v1717_v14 }
 0x570   : > { %v1727_v33 = vadd.f32 %v1725_v21, %v1724_v18 }
 0x571   : > { %2256 = vpow2.f32 %v2008_v20 }
 0x57b   : > { %v2257_v27 = vpop.eup %2256 }
 0x57c   : > { %v1721_v31 = vadd.f32 1.0, %v2257_v27 }
 0x57e   : > { %2258 = vrcp.f32 %v1721_v31 }
 0x57f   : > { %2260 = vtanh.f32 %v1727_v33 }
 0x588   : > { %v2259_v34 = vpop.eup %2258 }
 0x589   : > { %v1729_v48 = vsub.f32 1.0, %v2259_v34  ;;  %v2261_v61 = vpop.eup %2260  ;;  %v1733_v0 = vmul.f32 %v2259_v34, %v1731_v25 }
 0x58b   : > { %v1730_v45 = vmul.f32 %v2261_v61, %v1729_v48 }
 0x58d   : > { %v1734_v30 = vadd.f32 %v1733_v0, %v1730_v45 }
 0x58f   : > { %v1737_v29 = vcombine.low %v1706_v46, %v1734_v30  ;;  %1749 = vst [vmem:[%s2492_s6] sm:$0x3] %v1734_v30 }
 0x591   : > { %2009 = vst.sshfl [vmem:[#allocation2] sm:$0x33 pattern:$0x76325410] %v1737_v29 }
 0x592 PF: > { %s17_s18 = sadd.s32 1, %s2389_s18  }
 0x593   : > { %p14_p6 = scmp.ge.s32.totalorder %s17_s18, 4  }
 0x595   :  { %16 = sbr.rel (!%p14_p6) target bundleno = 1 (0x1), region = 102 }
 0x59c   :  { %1792 = vsyncpa [#allocation4], 1 }
 0x59d   :  { %1794 = vsyncpa [#allocation4 + $0x1], 1 }

// kernel: skill_recognition_forward.13
= control target key start
LH: loop header
LB: loop body
LE: loop exit
PB: predicated region body
PF: predicated region fallthrough
CT: control target
= control target key end

     0   :  { %s2349_s18 = smov 0   ;;  %s3537_s0 = inlined_call_operand.vmem [shape: f32[8,2,384], index: 0, kind: input, shape index: {}]   ;;  %s3538_s1 = inlined_call_operand.vmem [shape: f32[8,2,384], index: 1, kind: input, shape index: {}]   ;;  %s3539_s2 = inlined_call_operand.vmem [shape: bf16[256,768], index: 2, kind: input, shape index: {}]   ;;  %s3540_s3 = inlined_call_operand.vmem [shape: f32[1,768], index: 3, kind: input, shape index: {}]   ;;  %s3541_s4 = inlined_call_operand.vmem [shape: f32[8,2,128], index: 4, kind: output, shape index: {0}]   ;;  %s3542_s5 = inlined_call_operand.vmem [shape: f32[8,2,128], index: 5, kind: output, shape index: {1}]  }
   0x1 LB: > { %s1840_s19 = sadd.s32 4294967295, %s2315_s18   ;;  %p1844_p0 = scmp.ge.s32.totalorder %s2315_s18, 1  ;;  %s2315_s18 = sphi %s2349_s18, %s16_s18  }
   0x2   : > { %p210_p1 = scmp.lt.s32.totalorder %s2315_s18, 3 }
   0x4   : > { %p211_p2 = pnand %p1844_p0, %p210_p1 }
   0x6   : > { %214 = sbr.rel (%p211_p2) target bundleno = 1395 (0x573), region = 36 }
   0xd   : > { %s1845_s20 = sshll.u32 %s1840_s19, 2  ;;  %s259_s21 = ssub.s32 1, %s1840_s19 }
   0xe   : > { %p253_p3 = scmp.lt.s32.totalorder %s1845_s20, 7  ;;  %s1847_s22 = sshll.u32 %s259_s21, 2 }
   0xf   : > { %p261_p4 = scmp.lt.s32.totalorder %s1847_s22, 7  ;;  %p1853_p5 = scmp.ne.s32.totalorder %s1840_s19, 0 }
  0x10   : > { %s3787_s20 = smov (!%p253_p3, %s1845_s20), 7  ;;  %v2317_v0 = vmov (!%p1853_p5), 0.0  }
  0x11   : > { %s3789_s22 = smov (!%p261_p4, %s1847_s22), 7  ;;  %s1984_s23 = smul.u32 6, %s3787_s20  ;;  %286 = vst [vmem:[#allocation2] sm:$0xf] (!%p1853_p5), %v2317_v0 }
  0x12   : > { %s1850_s24 = sshll.u32 %s3787_s20, 1  ;;  %s1985_s25 = smul.u32 6, %s3789_s22 }
  0x13   : > { %s2360_s28 = scalar_lea.vmem %s3541_s4, %s1850_s24  ;;  %s2365_s6 = scalar_lea.vmem %s3537_s0, %s1984_s23 }
  0x14   : > { %s1852_s7 = sshll.u32 %s3789_s22, 1  ;;  %s2370_s10 = scalar_lea.vmem %s3538_s1, %s1985_s25 }
  0x15   : > { %s2375_s13 = scalar_lea.vmem %s3542_s5, %s1852_s7  ;;  %285 = sbr.rel (%p1853_p5) target bundleno = 28 (0x1c), region = 40 }
  0x1c PF: > { %v2380_v1 = vld [vmem:[%s3539_s2 + $0x4] ss:$24 sps:$4 sm:$0xff]   ;;  %v2385_v2 = vld [vmem:[%s3539_s2] ss:$24 sps:$4 sm:$0xff]   ;;  %v2391_v3 = vld [vmem:[%s3539_s2 + $0x34] ss:$24 sps:$4 sm:$0xff]   ;;  %v389_v25 = vlaneseq }
  0x1d   : > { %909 = vmatprep.subr.bf16.mxu0 %v2380_v1  ;;  %v2397_v4 = vld [vmem:[%s3539_s2 + $0x30] ss:$24 sps:$4 sm:$0xff]   ;;  %v2403_v5 = vld [vmem:[%s3539_s2 + $0x64] ss:$24 sps:$4 sm:$0xff]   ;;  %v2409_v6 = vld [vmem:[%s3539_s2 + $0x60] ss:$24 sps:$4 sm:$0xff]  }
  0x1e   : > { %910 = vmatpush1.bf16.msra.mxu0 %v2385_v2  ;;  %v2415_v7 = vld [vmem:[%s3539_s2 + $0x94] ss:$24 sps:$4 sm:$0xff]   ;;  %v2421_v8 = vld [vmem:[%s3539_s2 + $0x90] ss:$24 sps:$4 sm:$0xff]   ;;  %v2437_v11 = vld [vmem:[%s3539_s2 + $0xc4] ss:$24 sps:$4 sm:$0xff]  }
  0x1f   : > { %911 = vmatprep.subr.bf16.mxu0 %v2391_v3  ;;  %v2426_v9 = vld [vmem:[%s3539_s2 + $0xc] ss:$24 sps:$4 sm:$0xff]   ;;  %v2431_v10 = vld [vmem:[%s3539_s2 + $0x8] ss:$24 sps:$4 sm:$0xff]   ;;  %v2443_v12 = vld [vmem:[%s3539_s2 + $0x3c] ss:$24 sps:$4 sm:$0xff]  }
  0x20   : > { %950 = vmatprep.subr.bf16.mxu1 %v2426_v9  ;;  %v2449_v13 = vld [vmem:[%s3539_s2 + $0x38] ss:$24 sps:$4 sm:$0xff]   ;;  %v2462_v15 = vld [vmem:[%s3539_s2 + $0xf4] ss:$24 sps:$4 sm:$0xff]   ;;  %v2473_v17 = vld [vmem:[%s3539_s2 + $0x68] ss:$24 sps:$4 sm:$0xff]  }
  0x21   : > { %951 = vmatpush1.bf16.msra.mxu1 %v2431_v10  ;;  %v2455_v14 = vld [vmem:[%s3539_s2 + $0xc0] ss:$24 sps:$4 sm:$0xff]   ;;  %v2467_v16 = vld [vmem:[%s3539_s2 + $0x6c] ss:$24 sps:$4 sm:$0xff]   ;;  %3652 = vst [vmem:[#allocation3_spill] sm:$0xff] %v2473_v17  ;;  %v2523_v30 = vshrl.u32 %v389_v25, 7 }
  0x22   : > { %912 = vmatpush1.bf16.msra.mxu0 %v2397_v4  ;;  %952 = vmatprep.subr.bf16.mxu1 %v2443_v12  ;;  %v2479_v18 = vld [vmem:[%s3539_s2 + $0xf0] ss:$24 sps:$4 sm:$0xff]   ;;  %v2485_v19 = vld [vmem:[%s3539_s2 + $0x9c] ss:$24 sps:$4 sm:$0xff]   ;;  %v2496_v21 = vld [vmem:[%s3539_s2 + $0x120] ss:$24 sps:$4 sm:$0xff]  }
  0x23   : > { %913 = vmatprep.subr.bf16.mxu0 %v2403_v5  ;;  %3653 = vst [vmem:[#allocation4_spill] sm:$0xff] %v2485_v19  ;;  %v2491_v20 = vld [vmem:[%s3539_s2 + $0x124] ss:$24 sps:$4 sm:$0xff]   ;;  %v2502_v22 = vld [vmem:[%s3539_s2 + $0x98] ss:$24 sps:$4 sm:$0xff]   ;;  %3657 = vst [vmem:[#allocation8_spill] sm:$0xff] %v2523_v30 }
  0x24   : > { %3654 = vst [vmem:[#allocation5_spill] sm:$0xff] %v2502_v22  ;;  %v2318_v23 = vmov 1983009808   ;;  %v2509_v26 = vld [vmem:[%s3539_s2 + $0xcc] ss:$24 sps:$4 sm:$0xff]  }
  0x25   : > { %953 = vmatpush1.bf16.msra.mxu1 %v2449_v13  ;;  %v387_v24 = vunpack.c.l.s4 %v2318_v23  ;;  %3655 = vst [vmem:[#allocation6_spill] sm:$0xff] %v2509_v26  ;;  %v2515_v27 = vld [vmem:[%s3539_s2 + $0x154] ss:$24 sps:$4 sm:$0xff]   ;;  %v2521_v28 = vld [vmem:[%s3539_s2 + $0xc8] ss:$24 sps:$4 sm:$0xff]  }
  0x26   : > { %914 = vmatpush1.bf16.msra.mxu0 %v2409_v6  ;;  %954 = vmatprep.subr.bf16.mxu1 %v2467_v16  ;;  %3656 = vst [vmem:[#allocation7_spill] sm:$0xff] %v2521_v28  ;;  %v2529_v31 = vld [vmem:[%s3539_s2 + $0x150] ss:$24 sps:$4 sm:$0xff]   ;;  %v2535_v32 = vld [vmem:[%s3539_s2 + $0xfc] ss:$24 sps:$4 sm:$0xff]  }
  0x27   : > { %915 = vmatprep.subr.bf16.mxu0 %v2415_v7  ;;  %v388_v29 = vunpack.c.0.s8 %v387_v24  ;;  %3658 = vst [vmem:[#allocation9_spill] sm:$0xff] %v2535_v32  ;;  %v2541_v33 = vld [vmem:[%s3539_s2 + $0x184] ss:$24 sps:$4 sm:$0xff]   ;;  %v2546_v34 = vld [vmem:[%s3539_s2 + $0x180] ss:$24 sps:$4 sm:$0xff]  }
  0x28   : > { %v2552_v35 = vld [vmem:[%s3539_s2 + $0xf8] ss:$24 sps:$4 sm:$0xff]   ;;  %v2562_v37 = vld [vmem:[%s3539_s2 + $0x12c] ss:$24 sps:$4 sm:$0xff]   ;;  %v2570_v39 = vld [vmem:[#allocation2] sm:$0xf] }
  0x29   : > { %955 = vmatpush1.bf16.msra.mxu1 %v2473_v17  ;;  %3659 = vst [vmem:[#allocation10_spill] sm:$0xff] %v2552_v35  ;;  %v2555_v36 = vsub.s32 %v388_v29, %v2523_v30  ;;  %3661 = vst [vmem:[#allocation12_spill] sm:$0xff] %v2562_v37  ;;  %v2568_v38 = vld [vmem:[%s3539_s2 + $0x1b4] ss:$24 sps:$4 sm:$0xff]   ;;  %v2576_v40 = vld [vmem:[%s3539_s2 + $0x128] ss:$24 sps:$4 sm:$0xff]  }
  0x2a   : > { %916 = vmatpush1.bf16.msra.mxu0 %v2421_v8  ;;  %956 = vmatprep.subr.bf16.mxu1 %v2485_v19  ;;  %3662 = vst [vmem:[#allocation13_spill] sm:$0xff] %v2570_v39  ;;  %3663 = vst [vmem:[#allocation14_spill] sm:$0xff] %v2576_v40  ;;  %v2584_v42 = vld [vmem:[%s3539_s2 + $0x1b0] ss:$24 sps:$4 sm:$0xff]   ;;  %v2590_v43 = vld [vmem:[%s3539_s2 + $0x15c] ss:$24 sps:$4 sm:$0xff]  }
  0x2b   : > { %917 = vmatprep.subr.bf16.mxu0 %v2437_v11  ;;  %3660 = vst [vmem:[#allocation11_spill] sm:$0xff] %v2555_v36  ;;  %v392_v41 = vrot.slane %v2570_v39, %v2555_v36  ;;  %3664 = vst [vmem:[#allocation15_spill] sm:$0xff] %v2590_v43  ;;  %v2596_v44 = vld [vmem:[%s3539_s2 + $0x1e4] ss:$24 sps:$4 sm:$0xff]   ;;  %v2601_v46 = vld [vmem:[%s3539_s2 + $0x1e0] ss:$24 sps:$4 sm:$0xff]  }
  0x2c   : > { %v2607_v47 = vld [vmem:[%s3539_s2 + $0x158] ss:$24 sps:$4 sm:$0xff]   ;;  %v2616_v49 = vld [vmem:[%s3539_s2 + $0x18c] ss:$24 sps:$4 sm:$0xff]   ;;  %v2630_v51 = vld [vmem:[%s3539_s2 + $0x188] ss:$24 sps:$4 sm:$0xff]  }
  0x2d   : > { %957 = vmatpush1.bf16.msra.mxu1 %v2502_v22  ;;  %v393_v45 = vcombine.high %v392_v41, %v392_v41  ;;  %3665 = vst [vmem:[#allocation16_spill] sm:$0xff] %v2607_v47  ;;  %3666 = vst [vmem:[#allocation17_spill] sm:$0xff] %v2616_v49  ;;  %v2622_v50 = vld [vmem:[%s3539_s2 + $0x214] ss:$24 sps:$4 sm:$0xff]   ;;  %v2636_v52 = vld [vmem:[%s3539_s2 + $0x210] ss:$24 sps:$4 sm:$0xff]   ;;  %v2746_v39 = vpack.c.bf16 %v392_v41, %v392_v41 }
  0x2e   : > { %918 = vmatpush1.bf16.msra.mxu0 %v2455_v14  ;;  %958 = vmatprep.subr.bf16.mxu1 %v2509_v26  ;;  %3667 = vst [vmem:[#allocation18_spill] sm:$0xff] %v2630_v51  ;;  %v2642_v53 = vld [vmem:[%s3539_s2 + $0x1bc] ss:$24 sps:$4 sm:$0xff]   ;;  %v2653_v55 = vld [vmem:[%s3539_s2 + $0x240] ss:$24 sps:$4 sm:$0xff]  }
  0x2f   : > { %919 = vmatprep.subr.bf16.mxu0 %v2462_v15  ;;  %v2609_v48 = vpack.c.bf16 %v393_v45, %v393_v45  ;;  %3668 = vst [vmem:[#allocation19_spill] sm:$0xff] %v2642_v53  ;;  %v2648_v54 = vld [vmem:[%s3539_s2 + $0x244] ss:$24 sps:$4 sm:$0xff]   ;;  %v2659_v56 = vld [vmem:[%s3539_s2 + $0x1b8] ss:$24 sps:$4 sm:$0xff]  }
  0x30   : > { %3669 = vst [vmem:[#allocation20_spill] sm:$0xff] %v2659_v56  ;;  %v2666_v57 = vld [vmem:[%s3539_s2 + $0x1ec] ss:$24 sps:$4 sm:$0xff]   ;;  %v2678_v59 = vld [vmem:[%s3539_s2 + $0x1e8] ss:$24 sps:$4 sm:$0xff]  }
  0x31   : > { %959 = vmatpush1.bf16.msra.mxu1 %v2521_v28  ;;  %941 = vmatprep.mubr.bf16.mxu0 %v2609_v48  ;;  %3670 = vst [vmem:[#allocation21_spill] sm:$0xff] %v2666_v57  ;;  %v2672_v58 = vld [vmem:[%s3539_s2 + $0x274] ss:$24 sps:$4 sm:$0xff]   ;;  %3671 = vst [vmem:[#allocation22_spill] sm:$0xff] %v2678_v59  ;;  %v2684_v60 = vld [vmem:[%s3539_s2 + $0x270] ss:$24 sps:$4 sm:$0xff]  }
  0x32   : > { %920 = vmatpush1.bf16.msra.mxu0 %v2479_v18  ;;  %960 = vmatprep.subr.bf16.mxu1 %v2535_v32  ;;  %v2690_v61 = vld [vmem:[%s3539_s2 + $0x21c] ss:$24 sps:$4 sm:$0xff]   ;;  %v2701_v63 = vld [vmem:[%s3539_s2 + $0x2a0] ss:$24 sps:$4 sm:$0xff]   ;;  %v2714_v23 = vld [vmem:[%s3539_s2 + $0x24c] ss:$24 sps:$4 sm:$0xff]  }
  0x33   : > { %921 = vmatprep.subr.bf16.mxu0 %v2491_v20  ;;  %982 = vmatprep.mubr.bf16.mxu1 %v2609_v48  ;;  %3672 = vst [vmem:[#allocation23_spill] sm:$0xff] %v2690_v61  ;;  %v2696_v62 = vld [vmem:[%s3539_s2 + $0x2a4] ss:$24 sps:$4 sm:$0xff]   ;;  %v2707_v0 = vld [vmem:[%s3539_s2 + $0x218] ss:$24 sps:$4 sm:$0xff]   ;;  %3674 = vst [vmem:[#allocation25_spill] sm:$0xff] %v2714_v23 }
  0x34   : > { %3673 = vst [vmem:[#allocation24_spill] sm:$0xff] %v2707_v0  ;;  %v2720_v24 = vld [vmem:[%s3539_s2 + $0x2d4] ss:$24 sps:$4 sm:$0xff]   ;;  %v2725_v25 = vld [vmem:[%s3539_s2 + $0x2d0] ss:$24 sps:$4 sm:$0xff]  }
  0x35   : > { %961 = vmatpush1.bf16.msra.mxu1 %v2552_v35  ;;  %v2731_v29 = vld [vmem:[%s3539_s2 + $0x248] ss:$24 sps:$4 sm:$0xff]   ;;  %v2738_v45 = vld [vmem:[%s3539_s2 + $0x27c] ss:$24 sps:$4 sm:$0xff]   ;;  %v2764_v41 = vld [vmem:[%s3539_s2 + $0x2ac] ss:$24 sps:$4 sm:$0xff]  }
  0x36   : > { %922 = vmatpush1.bf16.msra.mxu0 %v2496_v21  ;;  %962 = vmatprep.subr.bf16.mxu1 %v2562_v37  ;;  %3675 = vst [vmem:[#allocation26_spill] sm:$0xff] %v2731_v29  ;;  %3676 = vst [vmem:[#allocation27_spill] sm:$0xff] %v2738_v45  ;;  %v2744_v36 = vld [vmem:[%s3539_s2 + $0x14] ss:$24 sps:$4 sm:$0xff]   ;;  %v2751_v30 = vld [vmem:[%s3539_s2 + $0x10] ss:$24 sps:$4 sm:$0xff]  }
  0x37   : > { %923 = vmatprep.subr.bf16.mxu0 %v2515_v27  ;;  %3677 = vst [vmem:[#allocation28_spill] sm:$0xff] %v2751_v30  ;;  %3679 = vst [vmem:[#allocation30_spill] sm:$0xff] %v2764_v41 }
  0x39   : > { %963 = vmatpush1.bf16.msra.mxu1 %v2576_v40 }
  0x3a   : > { %924 = vmatpush1.bf16.msra.mxu0 %v2529_v31  ;;  %964 = vmatprep.subr.bf16.mxu1 %v2590_v43 }
  0x3b   : > { %925 = vmatprep.subr.bf16.mxu0 %v2541_v33 }
  0x3d   : > { %965 = vmatpush1.bf16.msra.mxu1 %v2607_v47 }
  0x3e   : > { %926 = vmatpush1.bf16.msra.mxu0 %v2546_v34  ;;  %966 = vmatprep.subr.bf16.mxu1 %v2616_v49 }
  0x3f   : > { %927 = vmatprep.subr.bf16.mxu0 %v2568_v38 }
  0x41   : > { %967 = vmatpush1.bf16.msra.mxu1 %v2630_v51 }
  0x42   : > { %928 = vmatpush1.bf16.msra.mxu0 %v2584_v42  ;;  %968 = vmatprep.subr.bf16.mxu1 %v2642_v53 }
  0x43   : > { %929 = vmatprep.subr.bf16.mxu0 %v2596_v44 }
  0x45   : > { %969 = vmatpush1.bf16.msra.mxu1 %v2659_v56 }
  0x46   : > { %930 = vmatpush1.bf16.msra.mxu0 %v2601_v46  ;;  %970 = vmatprep.subr.bf16.mxu1 %v2666_v57 }
  0x47   : > { %931 = vmatprep.subr.bf16.mxu0 %v2622_v50 }
  0x49   : > { %971 = vmatpush1.bf16.msra.mxu1 %v2678_v59 }
  0x4a   : > { %932 = vmatpush1.bf16.msra.mxu0 %v2636_v52  ;;  %972 = vmatprep.subr.bf16.mxu1 %v2690_v61  ;;  %v2789_v61 = vld [vmem:[%s3539_s2 + $0x2dc] ss:$24 sps:$4 sm:$0xff]  }
  0x4b   : > { %933 = vmatprep.subr.bf16.mxu0 %v2648_v54  ;;  %3683 = vst [vmem:[#allocation34_spill] sm:$0xff] %v2789_v61 }
  0x4d   : > { %973 = vmatpush1.bf16.msra.mxu1 %v2707_v0  ;;  %v2783_v0 = vld [vmem:[%s3539_s2 + $0x40] ss:$24 sps:$4 sm:$0xff]  }
  0x4e   : > { %934 = vmatpush1.bf16.msra.mxu0 %v2653_v55  ;;  %974 = vmatprep.subr.bf16.mxu1 %v2714_v23  ;;  %v2757_v23 = vld [vmem:[%s3539_s2 + $0x278] ss:$24 sps:$4 sm:$0xff]   ;;  %3682 = vst [vmem:[#allocation33_spill] sm:$0xff] %v2783_v0 }
  0x4f   : > { %935 = vmatprep.subr.bf16.mxu0 %v2672_v58  ;;  %3678 = vst [vmem:[#allocation29_spill] sm:$0xff] %v2757_v23 }
  0x51   : > { %975 = vmatpush1.bf16.msra.mxu1 %v2731_v29  ;;  %v2770_v29 = vld [vmem:[%s3539_s2 + $0x44] ss:$24 sps:$4 sm:$0xff]  }
  0x52   : > { %936 = vmatpush1.bf16.msra.mxu0 %v2684_v60  ;;  %976 = vmatprep.subr.bf16.mxu1 %v2738_v45  ;;  %3680 = vst [vmem:[#allocation31_spill] sm:$0xff] %v2770_v29  ;;  %v2777_v45 = vld [vmem:[%s3539_s2 + $0x2a8] ss:$24 sps:$4 sm:$0xff]  }
  0x53   : > { %937 = vmatprep.subr.bf16.mxu0 %v2696_v62  ;;  %3681 = vst [vmem:[#allocation32_spill] sm:$0xff] %v2777_v45 }
  0x55   : > { %977 = vmatpush1.bf16.msra.mxu1 %v2757_v23  ;;  %v2795_v23 = vld [vmem:[%s3539_s2 + $0x74] ss:$24 sps:$4 sm:$0xff]  }
  0x56   : > { %938 = vmatpush1.bf16.msra.mxu0 %v2701_v63  ;;  %978 = vmatprep.subr.bf16.mxu1 %v2764_v41  ;;  %3684 = vst [vmem:[#allocation35_spill] sm:$0xff] %v2795_v23 }
  0x57   : > { %939 = vmatprep.subr.bf16.mxu0 %v2720_v24 }
  0x59   : > { %979 = vmatpush1.bf16.msra.mxu1 %v2777_v45 }
  0x5a   : > { %940 = vmatpush1.bf16.msra.mxu0 %v2725_v25  ;;  %980 = vmatprep.subr.bf16.mxu1 %v2789_v61 }
  0x5b   : > { %991 = vmatprep.subr.bf16.mxu0 %v2744_v36 }
  0x5d   : > { %942 = vmatmul.mubr.bf16.vlgmr.msra.gmra.mrb[0].mxu0 %v2746_v39 }
  0x5e   : > { %992 = vmatpush1.bf16.msra.mxu0 %v2751_v30  ;;  %1023 = vmatprep.mubr.bf16.mxu0 %v2609_v48  ;;  %v2802_v30 = vld [vmem:[%s3539_s2 + $0x2d8] ss:$24 sps:$4 sm:$0xff]   ;;  %v2815_v48 = vld [vmem:[%s3539_s2 + $0xa4] ss:$24 sps:$4 sm:$0xff]  }
  0x5f   : > { %993 = vmatprep.subr.bf16.mxu0 %v2770_v29  ;;  %3685 = vst [vmem:[#allocation36_spill] sm:$0xff] %v2802_v30  ;;  %v2808_v29 = vld [vmem:[%s3539_s2 + $0x70] ss:$24 sps:$4 sm:$0xff]   ;;  %3687 = vst [vmem:[#allocation38_spill] sm:$0xff] %v2815_v48  ;;  %981 = vmatpush1.bf16.msra.mxu1 %v2802_v30 }
  0x60   : > { %3686 = vst [vmem:[#allocation37_spill] sm:$0xff] %v2808_v29  ;;  %1118 = vmatprep.subr.bf16.mxu1 %v2380_v1 }
  0x62   : > { %994 = vmatpush1.bf16.msra.mxu0 %v2783_v0  ;;  %v2822_v0 = vld [vmem:[%s3539_s2 + $0xa0] ss:$24 sps:$4 sm:$0xff]   ;;  %983 = vmatmul.mubr.bf16.vlgmr.msra.gmra.mrb[0].mxu1 %v2746_v39 }
  0x63   : > { %995 = vmatprep.subr.bf16.mxu0 %v2795_v23  ;;  %3688 = vst [vmem:[#allocation39_spill] sm:$0xff] %v2822_v0  ;;  %v2829_v23 = vld [vmem:[%s3539_s2 + $0xd4] ss:$24 sps:$4 sm:$0xff]   ;;  %1119 = vmatpush1.bf16.msra.mxu1 %v2385_v2 }
  0x64   : > { %3689 = vst [vmem:[#allocation40_spill] sm:$0xff] %v2829_v23  ;;  %1120 = vmatprep.subr.bf16.mxu1 %v2391_v3 }
  0x66   : > { %996 = vmatpush1.bf16.msra.mxu0 %v2808_v29  ;;  %v2837_v29 = vld [vmem:[%s3539_s2 + $0xd0] ss:$24 sps:$4 sm:$0xff]  }
  0x67   : > { %997 = vmatprep.subr.bf16.mxu0 %v2815_v48  ;;  %3690 = vst [vmem:[#allocation41_spill] sm:$0xff] %v2837_v29  ;;  %v2844_v48 = vld [vmem:[%s3539_s2 + $0x104] ss:$24 sps:$4 sm:$0xff]   ;;  %1121 = vmatpush1.bf16.msra.mxu1 %v2397_v4 }
  0x68   : > { %3691 = vst [vmem:[#allocation42_spill] sm:$0xff] %v2844_v48  ;;  %1122 = vmatprep.subr.bf16.mxu1 %v2403_v5 }
  0x6a   : > { %998 = vmatpush1.bf16.msra.mxu0 %v2822_v0  ;;  %v2851_v0 = vld [vmem:[%s3539_s2 + $0x100] ss:$24 sps:$4 sm:$0xff]  }
  0x6b   : > { %999 = vmatprep.subr.bf16.mxu0 %v2829_v23  ;;  %3692 = vst [vmem:[#allocation43_spill] sm:$0xff] %v2851_v0  ;;  %v2858_v23 = vld [vmem:[%s3539_s2 + $0x134] ss:$24 sps:$4 sm:$0xff]   ;;  %1123 = vmatpush1.bf16.msra.mxu1 %v2409_v6 }
  0x6c   : > { %3693 = vst [vmem:[#allocation44_spill] sm:$0xff] %v2858_v23  ;;  %1124 = vmatprep.subr.bf16.mxu1 %v2415_v7 }
  0x6e   : > { %1000 = vmatpush1.bf16.msra.mxu0 %v2837_v29  ;;  %v2865_v29 = vld [vmem:[%s3539_s2 + $0x130] ss:$24 sps:$4 sm:$0xff]  }
  0x6f   : > { %1001 = vmatprep.subr.bf16.mxu0 %v2844_v48  ;;  %3694 = vst [vmem:[#allocation45_spill] sm:$0xff] %v2865_v29  ;;  %v2872_v48 = vld [vmem:[%s3539_s2 + $0x164] ss:$24 sps:$4 sm:$0xff]   ;;  %1125 = vmatpush1.bf16.msra.mxu1 %v2421_v8 }
  0x70   : > { %3695 = vst [vmem:[#allocation46_spill] sm:$0xff] %v2872_v48  ;;  %1126 = vmatprep.subr.bf16.mxu1 %v2437_v11 }
  0x72   : > { %1002 = vmatpush1.bf16.msra.mxu0 %v2851_v0  ;;  %v2879_v0 = vld [vmem:[%s3539_s2 + $0x160] ss:$24 sps:$4 sm:$0xff]  }
  0x73   : > { %1003 = vmatprep.subr.bf16.mxu0 %v2858_v23  ;;  %3696 = vst [vmem:[#allocation47_spill] sm:$0xff] %v2879_v0  ;;  %v2886_v23 = vld [vmem:[%s3539_s2 + $0x194] ss:$24 sps:$4 sm:$0xff]   ;;  %1127 = vmatpush1.bf16.msra.mxu1 %v2455_v14 }
  0x74   : > { %3697 = vst [vmem:[#allocation48_spill] sm:$0xff] %v2886_v23  ;;  %1128 = vmatprep.subr.bf16.mxu1 %v2462_v15 }
  0x76   : > { %1004 = vmatpush1.bf16.msra.mxu0 %v2865_v29  ;;  %v2893_v29 = vld [vmem:[%s3539_s2 + $0x190] ss:$24 sps:$4 sm:$0xff]  }
  0x77   : > { %1005 = vmatprep.subr.bf16.mxu0 %v2872_v48  ;;  %3698 = vst [vmem:[#allocation49_spill] sm:$0xff] %v2893_v29  ;;  %v2900_v48 = vld [vmem:[%s3539_s2 + $0x1c4] ss:$24 sps:$4 sm:$0xff]   ;;  %1129 = vmatpush1.bf16.msra.mxu1 %v2479_v18 }
  0x78   : > { %3699 = vst [vmem:[#allocation50_spill] sm:$0xff] %v2900_v48  ;;  %1130 = vmatprep.subr.bf16.mxu1 %v2491_v20 }
  0x7a   : > { %1006 = vmatpush1.bf16.msra.mxu0 %v2879_v0  ;;  %v2907_v0 = vld [vmem:[%s3539_s2 + $0x1c0] ss:$24 sps:$4 sm:$0xff]  }
  0x7b   : > { %1007 = vmatprep.subr.bf16.mxu0 %v2886_v23  ;;  %3700 = vst [vmem:[#allocation51_spill] sm:$0xff] %v2907_v0  ;;  %v2914_v23 = vld [vmem:[%s3539_s2 + $0x1f4] ss:$24 sps:$4 sm:$0xff]   ;;  %1131 = vmatpush1.bf16.msra.mxu1 %v2496_v21 }
  0x7c   : > { %3701 = vst [vmem:[#allocation52_spill] sm:$0xff] %v2914_v23  ;;  %1132 = vmatprep.subr.bf16.mxu1 %v2515_v27 }
  0x7e   : > { %1008 = vmatpush1.bf16.msra.mxu0 %v2893_v29  ;;  %v2921_v29 = vld [vmem:[%s3539_s2 + $0x1f0] ss:$24 sps:$4 sm:$0xff]  }
  0x7f   : > { %1009 = vmatprep.subr.bf16.mxu0 %v2900_v48  ;;  %3702 = vst [vmem:[#allocation53_spill] sm:$0xff] %v2921_v29  ;;  %v2928_v48 = vld [vmem:[%s3539_s2 + $0x224] ss:$24 sps:$4 sm:$0xff]   ;;  %1133 = vmatpush1.bf16.msra.mxu1 %v2529_v31 }
  0x80   : > { %3703 = vst [vmem:[#allocation54_spill] sm:$0xff] %v2928_v48  ;;  %1134 = vmatprep.subr.bf16.mxu1 %v2541_v33 }
  0x82   : > { %1010 = vmatpush1.bf16.msra.mxu0 %v2907_v0  ;;  %v2935_v0 = vld [vmem:[%s3539_s2 + $0x220] ss:$24 sps:$4 sm:$0xff]  }
  0x83   : > { %1011 = vmatprep.subr.bf16.mxu0 %v2914_v23  ;;  %3704 = vst [vmem:[#allocation55_spill] sm:$0xff] %v2935_v0  ;;  %v2942_v23 = vld [vmem:[%s3539_s2 + $0x254] ss:$24 sps:$4 sm:$0xff]   ;;  %1135 = vmatpush1.bf16.msra.mxu1 %v2546_v34 }
  0x84   : > { %3705 = vst [vmem:[#allocation56_spill] sm:$0xff] %v2942_v23  ;;  %1136 = vmatprep.subr.bf16.mxu1 %v2568_v38 }
  0x86   : > { %1012 = vmatpush1.bf16.msra.mxu0 %v2921_v29  ;;  %v2949_v29 = vld [vmem:[%s3539_s2 + $0x250] ss:$24 sps:$4 sm:$0xff]  }
  0x87   : > { %1013 = vmatprep.subr.bf16.mxu0 %v2928_v48  ;;  %3706 = vst [vmem:[#allocation57_spill] sm:$0xff] %v2949_v29  ;;  %v2956_v48 = vld [vmem:[%s3539_s2 + $0x284] ss:$24 sps:$4 sm:$0xff]   ;;  %1137 = vmatpush1.bf16.msra.mxu1 %v2584_v42 }
  0x88   : > { %3707 = vst [vmem:[#allocation58_spill] sm:$0xff] %v2956_v48  ;;  %1138 = vmatprep.subr.bf16.mxu1 %v2596_v44 }
  0x8a   : > { %1014 = vmatpush1.bf16.msra.mxu0 %v2935_v0  ;;  %v2963_v0 = vld [vmem:[%s3539_s2 + $0x280] ss:$24 sps:$4 sm:$0xff]  }
  0x8b   : > { %1015 = vmatprep.subr.bf16.mxu0 %v2942_v23  ;;  %3708 = vst [vmem:[#allocation59_spill] sm:$0xff] %v2963_v0  ;;  %v2970_v23 = vld [vmem:[%s3539_s2 + $0x2b4] ss:$24 sps:$4 sm:$0xff]   ;;  %1139 = vmatpush1.bf16.msra.mxu1 %v2601_v46 }
  0x8c   : > { %1140 = vmatprep.subr.bf16.mxu1 %v2622_v50 }
  0x8e   : > { %1016 = vmatpush1.bf16.msra.mxu0 %v2949_v29  ;;  %v2977_v29 = vld [vmem:[%s3539_s2 + $0x2b0] ss:$24 sps:$4 sm:$0xff]  }
  0x8f   : > { %1017 = vmatprep.subr.bf16.mxu0 %v2956_v48  ;;  %v2984_v48 = vld [vmem:[%s3539_s2 + $0x2e4] ss:$24 sps:$4 sm:$0xff]   ;;  %1141 = vmatpush1.bf16.msra.mxu1 %v2636_v52 }
  0x90   : > { %1142 = vmatprep.subr.bf16.mxu1 %v2648_v54 }
  0x92   : > { %1018 = vmatpush1.bf16.msra.mxu0 %v2963_v0  ;;  %v2991_v0 = vld [vmem:[%s3539_s2 + $0x2e0] ss:$24 sps:$4 sm:$0xff]  }
  0x93   : > { %1019 = vmatprep.subr.bf16.mxu0 %v2970_v23  ;;  %1143 = vmatpush1.bf16.msra.mxu1 %v2653_v55 }
  0x94   : > { %1144 = vmatprep.subr.bf16.mxu1 %v2672_v58 }
  0x96   : > { %1020 = vmatpush1.bf16.msra.mxu0 %v2977_v29 }
  0x97   : > { %1021 = vmatprep.subr.bf16.mxu0 %v2984_v48  ;;  %1145 = vmatpush1.bf16.msra.mxu1 %v2684_v60 }
  0x98   : > { %1146 = vmatprep.subr.bf16.mxu1 %v2696_v62 }
  0x9a   : > { %1022 = vmatpush1.bf16.msra.mxu0 %v2991_v0 }
  0x9b   : > { %1159 = vmatprep.subr.bf16.mxu0 %v2426_v9  ;;  %1147 = vmatpush1.bf16.msra.mxu1 %v2701_v63 }
  0x9c   : > { %1148 = vmatprep.subr.bf16.mxu1 %v2720_v24 }
  0x9d   : > { %1024 = vmatmul.mubr.bf16.vlgmr.msra.gmra.mrb[4].mxu0 %v2746_v39  ;;  %v3709_v39 = vld [vmem:[#allocation23_spill] sm:$0xff] }
  0x9e   : > { %1160 = vmatpush1.bf16.msra.mxu0 %v2431_v10 }
  0x9f   : > { %1161 = vmatprep.subr.bf16.mxu0 %v2443_v12  ;;  %1149 = vmatpush1.bf16.msra.mxu1 %v2725_v25 }
  0xa0   : > { %1200 = vmatprep.subr.bf16.mxu1 %v2744_v36 }
  0xa2   : > { %1162 = vmatpush1.bf16.msra.mxu0 %v2449_v13 }
  0xa3   : > { %1163 = vmatprep.subr.bf16.mxu0 %v2467_v16 }
  0xa6   : > { %1164 = vmatpush1.bf16.msra.mxu0 %v2473_v17 }
  0xa7   : > { %1165 = vmatprep.subr.bf16.mxu0 %v2485_v19 }
  0xaa   : > { %1166 = vmatpush1.bf16.msra.mxu0 %v2502_v22 }
  0xab   : > { %1167 = vmatprep.subr.bf16.mxu0 %v2509_v26 }
  0xae   : > { %1168 = vmatpush1.bf16.msra.mxu0 %v2521_v28 }
  0xaf   : > { %1169 = vmatprep.subr.bf16.mxu0 %v2535_v32 }
  0xb2   : > { %1170 = vmatpush1.bf16.msra.mxu0 %v2552_v35 }
  0xb3   : > { %1171 = vmatprep.subr.bf16.mxu0 %v2562_v37  ;;  %v3710_v37 = vld [vmem:[#allocation24_spill] sm:$0xff] }
  0xb6   : > { %1172 = vmatpush1.bf16.msra.mxu0 %v2576_v40 }
  0xb7   : > { %1173 = vmatprep.subr.bf16.mxu0 %v2590_v43  ;;  %v3711_v43 = vld [vmem:[#allocation25_spill] sm:$0xff] }
  0xba   : > { %1174 = vmatpush1.bf16.msra.mxu0 %v2607_v47  ;;  %v3712_v47 = vld [vmem:[#allocation26_spill] sm:$0xff] }
  0xbb   : > { %1175 = vmatprep.subr.bf16.mxu0 %v2616_v49  ;;  %v3713_v49 = vld [vmem:[#allocation27_spill] sm:$0xff] }
  0xbe   : > { %1176 = vmatpush1.bf16.msra.mxu0 %v2630_v51  ;;  %v3714_v51 = vld [vmem:[#allocation29_spill] sm:$0xff] }
  0xbf   : > { %1177 = vmatprep.subr.bf16.mxu0 %v2642_v53 }
  0xc2   : > { %1178 = vmatpush1.bf16.msra.mxu0 %v2659_v56 }
  0xc3   : > { %1179 = vmatprep.subr.bf16.mxu0 %v2666_v57 }
  0xc6   : > { %1180 = vmatpush1.bf16.msra.mxu0 %v2678_v59 }
  0xc7   : > { %1181 = vmatprep.subr.bf16.mxu0 %v3709_v39  ;;  %v3715_v39 = vld [vmem:[#allocation8_spill] sm:$0xff] }
  0xca   : > { %1182 = vmatpush1.bf16.msra.mxu0 %v3710_v37  ;;  %v401_v37 = vsub.s32 0, %v3715_v39 }
  0xcb   : > { %1183 = vmatprep.subr.bf16.mxu0 %v3711_v43 }
  0xce   : > { %1184 = vmatpush1.bf16.msra.mxu0 %v3712_v47  ;;  %v383_v47 = vld [vmem:[%s3540_s3] sm:$0x3f] }
  0xcf   : > { %1185 = vmatprep.subr.bf16.mxu0 %v3713_v49  ;;  %v405_v49 = vsub.s32 1, %v3715_v39  ;;  %v3043_v43 = vrot.slane %v383_v47, %v401_v37 }
  0xd1   : > { %3716 = vst [vmem:[#allocation8_spill] sm:$0xff] %v3043_v43 }
  0xd2   : > { %1186 = vmatpush1.bf16.msra.mxu0 %v3714_v51  ;;  %v3045_v51 = vrot.slane %v383_v47, %v405_v49 }
  0xd3   : > { %1187 = vmatprep.subr.bf16.mxu0 %v2764_v41  ;;  %v1032_v41 = vld [vmem:[%s2365_s6] sm:$0x3f] }
  0xd4   : > { %3717 = vst [vmem:[#allocation60_spill] sm:$0xff] %v3045_v51 }
  0xd6   : > { %1188 = vmatpush1.bf16.msra.mxu0 %v2777_v45 }
  0xd7   : > { %1189 = vmatprep.subr.bf16.mxu0 %v2789_v61 }
  0xda   : > { %1190 = vmatpush1.bf16.msra.mxu0 %v2802_v30 }
  0xdb   : > { %1329 = vmatprep.subr.bf16.mxu0 %v2380_v1  ;;  %v1043_v1 = vrot.slane %v1032_v41, 2 }
 0x130   : > { %v943_v45 = vpop.f32.mrb[0].mxu0 }
 0x131   : > { %v944_v61 = vadd.f32 %v943_v45, %v3043_v43  ;;  %v945_v59 = vpop.f32.mrb[1].mxu0  ;;  %v413_v45 = vsub.s32 3, %v3715_v39  ;;  %v3720_v43 = vld [vmem:[#allocation13_spill] sm:$0xff] }
 0x132   : > { %v946_v30 = vadd.f32 %v945_v59, %v3045_v51  ;;  %v947_v57 = vpop.f32.mrb[2].mxu0  ;;  %v409_v59 = vsub.s32 2, %v3715_v39 }
 0x133   : > { %v1035_v56 = vadd.f32 %v1032_v41, %v944_v61  ;;  %v948_v53 = vpop.f32.mrb[3].mxu0  ;;  %v3052_v57 = vrot.slane %v383_v47, %v413_v45  ;;  %v1950_v61 = vld [vmem:[%s2370_s10 + $0x12] sm:$0x3f] }
 0x134   : > { %v1045_v35 = vadd.f32 %v1043_v1, %v946_v30  ;;  %v3054_v53 = vrot.slane %v383_v47, %v409_v59 }
 0x135   : > { %v1951_v40 = vmul.f32 -1.442695, %v1035_v56  ;;  %v984_v28 = vpop.f32.mrb[0].mxu1  ;;  %3718 = vst [vmem:[#allocation61_spill] sm:$0xff] %v3052_v57 }
 0x136   : > { %v1952_v32 = vmul.f32 -1.442695, %v1045_v35  ;;  %v986_v37 = vpop.f32.mrb[1].mxu1  ;;  %3719 = vst [vmem:[#allocation62_spill] sm:$0xff] %v3054_v53  ;;  %v985_v56 = vadd.f32 %v984_v28, %v3054_v53 }
 0x137   : > { %2140 = vpow2.f32 %v1951_v40  ;;  %v988_v49 = vpop.f32.mrb[2].mxu1  ;;  %v987_v35 = vadd.f32 %v986_v37, %v3052_v57 }
 0x138   : > { %2142 = vpow2.f32 %v1952_v32  ;;  %v989_v26 = vpop.f32.mrb[3].mxu1  ;;  %v1053_v32 = vrot.slane %v1032_v41, 4  ;;  %v417_v41 = vsub.s32 4, %v3715_v39 }
 0x141   : > { %v2141_v22 = vpop.eup %2140 }
 0x142   : > { %v1039_v19 = vadd.f32 1.0, %v2141_v22  ;;  %v2143_v30 = vpop.eup %2142  ;;  %v1061_v22 = vadd.f32 %v1950_v61, %v987_v35  ;;  %v421_v35 = vsub.s32 5, %v3715_v39  ;;  %v1079_v39 = vrot.slane %v1950_v61, 4 }
 0x143   : > { %v1049_v40 = vadd.f32 1.0, %v2143_v30 }
 0x144   : > { %2144 = vrcp.f32 %v1039_v19  ;;  %v1953_v51 = vmul.f32 -1.442695, %v1061_v22 }
 0x145   : > { %2146 = vrcp.f32 %v1049_v40  ;;  %v3063_v40 = vrot.slane %v383_v47, %v417_v41  ;;  %v1085_v41 = vrot.slane %v3720_v43, 2 }
 0x147   : > { %3721 = vst [vmem:[#allocation13_spill] sm:$0xff] %v3063_v40 }
 0x14e   : > { %v2145_v26 = vpop.eup %2144 }
 0x14f   : > { %v1052_v1 = vmul.f32 %v2145_v26, %v985_v56  ;;  %v2147_v19 = vpop.eup %2146  ;;  %v3065_v56 = vrot.slane %v383_v47, %v421_v35 }
 0x150   : > { %v1057_v45 = vsub.f32 1.0, %v2147_v19  ;;  %v1059_v17 = vmul.f32 %v2147_v19, %v3720_v43  ;;  %v3724_v43 = vld [vmem:[#allocation28_spill] sm:$0xff] }
 0x151   : > { %v1055_v49 = vadd.f32 %v1053_v32, %v1052_v1  ;;  %3722 = vst [vmem:[#allocation63_spill] sm:$0xff] %v3065_v56 }
 0x153   : > { %2148 = vtanh.f32 %v1055_v49 }
 0x154   : > { %2150 = vpow2.f32 %v1953_v51  ;;  %v1069_v51 = vrot.slane %v1950_v61, 2 }
 0x15d   : > { %v2149_v59 = vpop.eup %2148 }
 0x15e   : > { %v1058_v37 = vmul.f32 %v2149_v59, %v1057_v45  ;;  %v2151_v30 = vpop.eup %2150 }
 0x15f   : > { %v1065_v28 = vadd.f32 1.0, %v2151_v30 }
 0x160   : > { %v1060_v57 = vadd.f32 %v1059_v17, %v1058_v37 }
 0x161   : > { %2152 = vrcp.f32 %v1065_v28 }
 0x162   : > { %1101 = vst [vmem:[%s2360_s28] sm:$0x3] %v1060_v57 }
 0x16b   : > { %v2153_v26 = vpop.eup %2152 }
 0x170   : > { %v1025_v32 = vpop.f32.mrb[4].mxu0 }
 0x171   : > { %v1026_v22 = vadd.f32 %v1025_v32, %v3063_v40  ;;  %v1027_v1 = vpop.f32.mrb[5].mxu0 }
 0x172   : > { %v1028_v49 = vadd.f32 %v1027_v1, %v3065_v56  ;;  %v1029_v17 = vpop.f32.mrb[6].mxu0 }
 0x173   : > { %v1071_v19 = vadd.f32 %v1069_v51, %v1026_v22  ;;  %v1030_v45 = vpop.f32.mrb[7].mxu0  ;;  %v3723_v22 = vld [vmem:[#allocation11_spill] sm:$0xff] }
 0x174   : > { %v1078_v59 = vmul.f32 %v2153_v26, %v1028_v49 }
 0x175   : > { %v1954_v37 = vmul.f32 -1.442695, %v1071_v19 }
 0x176   : > { %v1081_v47 = vadd.f32 %v1079_v39, %v1078_v59  ;;  %v3728_v59 = vld [vmem:[#allocation37_spill] sm:$0xff]  ;;  %v3730_v39 = vld [vmem:[#allocation39_spill] sm:$0xff] }
 0x177   : > { %2154 = vpow2.f32 %v1954_v37  ;;  %v3729_v37 = vld [vmem:[#allocation38_spill] sm:$0xff] }
 0x181   : > { %v2155_v30 = vpop.eup %2154 }
 0x182   : > { %v1075_v28 = vadd.f32 1.0, %v2155_v30  ;;  %v3765_v30 = vld [vmem:[#allocation20_spill] sm:$0xff] }
 0x184   : > { %2156 = vrcp.f32 %v1075_v28  ;;  %v3766_v28 = vld [vmem:[#allocation21_spill] sm:$0xff] }
 0x185   : > { %2158 = vtanh.f32 %v1081_v47  ;;  %v3767_v47 = vld [vmem:[#allocation22_spill] sm:$0xff] }
 0x18e   : > { %v2157_v35 = vpop.eup %2156 }
 0x18f   : > { %v1083_v32 = vsub.f32 1.0, %v2157_v35  ;;  %v2159_v40 = vpop.eup %2158  ;;  %v1087_v53 = vmul.f32 %v2157_v35, %v1085_v41  ;;  %v3768_v41 = vld [vmem:[#allocation23_spill] sm:$0xff]  ;;  %v3769_v35 = vld [vmem:[#allocation24_spill] sm:$0xff] }
 0x191   : > { %v1084_v1 = vmul.f32 %v2159_v40, %v1083_v32  ;;  %v3727_v40 = vld [vmem:[#allocation35_spill] sm:$0xff]  ;;  %v3770_v32 = vld [vmem:[#allocation25_spill] sm:$0xff] }
 0x193   : > { %v1088_v17 = vadd.f32 %v1087_v53, %v1084_v1  ;;  %v3726_v53 = vld [vmem:[#allocation33_spill] sm:$0xff]  ;;  %v3771_v1 = vld [vmem:[#allocation26_spill] sm:$0xff] }
 0x195   : > { %v1091_v51 = vcombine.low %v1060_v57, %v1088_v17  ;;  %1956 = vst [vmem:[%s2375_s13 + $0x6] sm:$0x3] %v1088_v17  ;;  %v3725_v57 = vld [vmem:[#allocation31_spill] sm:$0xff] }
 0x196   : > { %v3772_v17 = vld [vmem:[#allocation27_spill] sm:$0xff] }
 0x197   : > { %1955 = vst.sshfl [vmem:[#allocation2] sm:$0x33 pattern:$0x76325410] %v1091_v51  ;;  %v3773_v51 = vld [vmem:[#allocation29_spill] sm:$0xff] }
 0x19e   : > { %v3071_v26 = vld [vmem:[#allocation2] sm:$0xf] }
 0x19f   : > { %v1112_v61 = vrot.slane %v3071_v26, %v3723_v22 }
 0x1a1   : > { %v1113_v49 = vcombine.high %v1112_v61, %v1112_v61  ;;  %v3075_v45 = vpack.c.bf16 %v1112_v61, %v1112_v61  ;;  %v3774_v61 = vld [vmem:[#allocation30_spill] sm:$0xff] }
 0x1a3   : > { %v1117_v19 = vpack.c.bf16 %v1113_v49, %v1113_v49  ;;  %v3775_v49 = vld [vmem:[#allocation32_spill] sm:$0xff] }
 0x1a5   : > { %1150 = vmatprep.mubr.bf16.mxu1 %v1117_v19  ;;  %1191 = vmatprep.mubr.bf16.mxu0 %v1117_v19 }
 0x1a6   : > { %1151 = vmatmul.mubr.bf16.vlgmr.msra.gmra.mrb[4].mxu1 %v3075_v45  ;;  %1192 = vmatmul.mubr.bf16.vlgmr.msra.gmra.mrb[8].mxu0 %v3075_v45 }
 0x1a7   : > { %1201 = vmatpush1.bf16.msra.mxu1 %v3724_v43  ;;  %1232 = vmatprep.mubr.bf16.mxu1 %v1117_v19  ;;  %v3776_v19 = vld [vmem:[#allocation34_spill] sm:$0xff] }
 0x1a8   : > { %1202 = vmatprep.subr.bf16.mxu1 %v3725_v57  ;;  %1330 = vmatpush1.bf16.msra.mxu0 %v2385_v2  ;;  %v3731_v2 = vld [vmem:[#allocation40_spill] sm:$0xff] }
 0x1a9   : > { %1331 = vmatprep.subr.bf16.mxu0 %v2391_v3  ;;  %v3732_v3 = vld [vmem:[#allocation41_spill] sm:$0xff] }
 0x1ab   : > { %1203 = vmatpush1.bf16.msra.mxu1 %v3726_v53 }
 0x1ac   : > { %1204 = vmatprep.subr.bf16.mxu1 %v3727_v40  ;;  %1332 = vmatpush1.bf16.msra.mxu0 %v2397_v4  ;;  %v3733_v4 = vld [vmem:[#allocation42_spill] sm:$0xff] }
 0x1ad   : > { %1333 = vmatprep.subr.bf16.mxu0 %v2403_v5  ;;  %v3734_v5 = vld [vmem:[#allocation43_spill] sm:$0xff] }
 0x1af   : > { %1205 = vmatpush1.bf16.msra.mxu1 %v3728_v59 }
 0x1b0   : > { %1206 = vmatprep.subr.bf16.mxu1 %v3729_v37  ;;  %1334 = vmatpush1.bf16.msra.mxu0 %v2409_v6  ;;  %v3735_v6 = vld [vmem:[#allocation44_spill] sm:$0xff] }
 0x1b1   : > { %1335 = vmatprep.subr.bf16.mxu0 %v2415_v7  ;;  %v3736_v7 = vld [vmem:[#allocation45_spill] sm:$0xff] }
 0x1b3   : > { %1207 = vmatpush1.bf16.msra.mxu1 %v3730_v39 }
 0x1b4   : > { %1208 = vmatprep.subr.bf16.mxu1 %v3731_v2  ;;  %1336 = vmatpush1.bf16.msra.mxu0 %v2421_v8  ;;  %v3737_v8 = vld [vmem:[#allocation46_spill] sm:$0xff] }
 0x1b5   : > { %1337 = vmatprep.subr.bf16.mxu0 %v2437_v11  ;;  %v3738_v11 = vld [vmem:[#allocation47_spill] sm:$0xff] }
 0x1b7   : > { %1209 = vmatpush1.bf16.msra.mxu1 %v3732_v3 }
 0x1b8   : > { %1210 = vmatprep.subr.bf16.mxu1 %v3733_v4  ;;  %1338 = vmatpush1.bf16.msra.mxu0 %v2455_v14  ;;  %v3739_v14 = vld [vmem:[#allocation48_spill] sm:$0xff] }
 0x1b9   : > { %1339 = vmatprep.subr.bf16.mxu0 %v2462_v15  ;;  %v3740_v15 = vld [vmem:[#allocation49_spill] sm:$0xff] }
 0x1bb   : > { %1211 = vmatpush1.bf16.msra.mxu1 %v3734_v5 }
 0x1bc   : > { %1212 = vmatprep.subr.bf16.mxu1 %v3735_v6  ;;  %1340 = vmatpush1.bf16.msra.mxu0 %v2479_v18  ;;  %v3741_v18 = vld [vmem:[#allocation50_spill] sm:$0xff] }
 0x1bd   : > { %1341 = vmatprep.subr.bf16.mxu0 %v2491_v20  ;;  %v3742_v20 = vld [vmem:[#allocation51_spill] sm:$0xff] }
 0x1bf   : > { %1213 = vmatpush1.bf16.msra.mxu1 %v3736_v7 }
 0x1c0   : > { %1214 = vmatprep.subr.bf16.mxu1 %v3737_v8  ;;  %1342 = vmatpush1.bf16.msra.mxu0 %v2496_v21  ;;  %v3743_v21 = vld [vmem:[#allocation52_spill] sm:$0xff] }
 0x1c1   : > { %1343 = vmatprep.subr.bf16.mxu0 %v2515_v27  ;;  %v3744_v27 = vld [vmem:[#allocation53_spill] sm:$0xff] }
 0x1c3   : > { %1215 = vmatpush1.bf16.msra.mxu1 %v3738_v11 }
 0x1c4   : > { %1216 = vmatprep.subr.bf16.mxu1 %v3739_v14  ;;  %1344 = vmatpush1.bf16.msra.mxu0 %v2529_v31  ;;  %v3745_v31 = vld [vmem:[#allocation54_spill] sm:$0xff] }
 0x1c5   : > { %1345 = vmatprep.subr.bf16.mxu0 %v2541_v33  ;;  %v3746_v33 = vld [vmem:[#allocation55_spill] sm:$0xff] }
 0x1c7   : > { %1217 = vmatpush1.bf16.msra.mxu1 %v3740_v15 }
 0x1c8   : > { %1218 = vmatprep.subr.bf16.mxu1 %v3741_v18  ;;  %1346 = vmatpush1.bf16.msra.mxu0 %v2546_v34  ;;  %v3747_v34 = vld [vmem:[#allocation56_spill] sm:$0xff] }
 0x1c9   : > { %1347 = vmatprep.subr.bf16.mxu0 %v2568_v38  ;;  %v3748_v38 = vld [vmem:[#allocation57_spill] sm:$0xff] }
 0x1cb   : > { %1219 = vmatpush1.bf16.msra.mxu1 %v3742_v20 }
 0x1cc   : > { %1220 = vmatprep.subr.bf16.mxu1 %v3743_v21  ;;  %1348 = vmatpush1.bf16.msra.mxu0 %v2584_v42  ;;  %v3749_v42 = vld [vmem:[#allocation58_spill] sm:$0xff] }
 0x1cd   : > { %1349 = vmatprep.subr.bf16.mxu0 %v2596_v44  ;;  %v3750_v44 = vld [vmem:[#allocation59_spill] sm:$0xff] }
 0x1cf   : > { %1221 = vmatpush1.bf16.msra.mxu1 %v3744_v27 }
 0x1d0   : > { %1222 = vmatprep.subr.bf16.mxu1 %v3745_v31  ;;  %1350 = vmatpush1.bf16.msra.mxu0 %v2601_v46  ;;  %v3751_v46 = vld [vmem:[#allocation3_spill] sm:$0xff] }
 0x1d1   : > { %1351 = vmatprep.subr.bf16.mxu0 %v2622_v50  ;;  %v3752_v50 = vld [vmem:[#allocation4_spill] sm:$0xff] }
 0x1d3   : > { %1223 = vmatpush1.bf16.msra.mxu1 %v3746_v33 }
 0x1d4   : > { %1224 = vmatprep.subr.bf16.mxu1 %v3747_v34  ;;  %1352 = vmatpush1.bf16.msra.mxu0 %v2636_v52  ;;  %v3753_v52 = vld [vmem:[#allocation5_spill] sm:$0xff] }
 0x1d5   : > { %1353 = vmatprep.subr.bf16.mxu0 %v2648_v54  ;;  %v3755_v54 = vld [vmem:[#allocation7_spill] sm:$0xff] }
 0x1d7   : > { %1225 = vmatpush1.bf16.msra.mxu1 %v3748_v38 }
 0x1d8   : > { %1226 = vmatprep.subr.bf16.mxu1 %v3749_v42  ;;  %1354 = vmatpush1.bf16.msra.mxu0 %v2653_v55  ;;  %v3756_v55 = vld [vmem:[#allocation9_spill] sm:$0xff] }
 0x1d9   : > { %1355 = vmatprep.subr.bf16.mxu0 %v2672_v58  ;;  %v3757_v58 = vld [vmem:[#allocation10_spill] sm:$0xff] }
 0x1db   : > { %1227 = vmatpush1.bf16.msra.mxu1 %v3750_v44 }
 0x1dc   : > { %1228 = vmatprep.subr.bf16.mxu1 %v2970_v23  ;;  %1356 = vmatpush1.bf16.msra.mxu0 %v2684_v60  ;;  %v3762_v60 = vld [vmem:[#allocation17_spill] sm:$0xff] }
 0x1dd   : > { %1357 = vmatprep.subr.bf16.mxu0 %v2696_v62  ;;  %v3763_v62 = vld [vmem:[#allocation18_spill] sm:$0xff] }
 0x1df   : > { %1229 = vmatpush1.bf16.msra.mxu1 %v2977_v29 }
 0x1e0   : > { %1230 = vmatprep.subr.bf16.mxu1 %v2984_v48  ;;  %1358 = vmatpush1.bf16.msra.mxu0 %v2701_v63  ;;  %v3764_v63 = vld [vmem:[#allocation19_spill] sm:$0xff] }
 0x1e1   : > { %1359 = vmatprep.subr.bf16.mxu0 %v2720_v24 }
 0x1e3   : > { %1231 = vmatpush1.bf16.msra.mxu1 %v2991_v0 }
 0x1e4   : > { %1370 = vmatprep.subr.bf16.mxu1 %v2426_v9  ;;  %1360 = vmatpush1.bf16.msra.mxu0 %v2725_v25  ;;  %v3754_v9 = vld [vmem:[#allocation6_spill] sm:$0xff] }
 0x1e5   : > { %1411 = vmatprep.subr.bf16.mxu0 %v2744_v36 }
 0x1e6   : > { %1233 = vmatmul.mubr.bf16.vlgmr.msra.gmra.mrb[8].mxu1 %v3075_v45  ;;  %v3777_v45 = vld [vmem:[#allocation36_spill] sm:$0xff] }
 0x1e7   : > { %1371 = vmatpush1.bf16.msra.mxu1 %v2431_v10  ;;  %v3758_v10 = vld [vmem:[#allocation12_spill] sm:$0xff] }
 0x1e8   : > { %1372 = vmatprep.subr.bf16.mxu1 %v2443_v12  ;;  %v3759_v12 = vld [vmem:[#allocation14_spill] sm:$0xff] }
 0x1eb   : > { %1373 = vmatpush1.bf16.msra.mxu1 %v2449_v13  ;;  %v3760_v13 = vld [vmem:[#allocation15_spill] sm:$0xff] }
 0x1ec   : > { %1374 = vmatprep.subr.bf16.mxu1 %v2467_v16  ;;  %v3761_v16 = vld [vmem:[#allocation16_spill] sm:$0xff] }
 0x1ef   : > { %1375 = vmatpush1.bf16.msra.mxu1 %v3751_v46  ;;  %v2220_v46 = vld [vmem:[%s3539_s2 + $0x4] ss:$24 sps:$4 sm:$0xff]  }
 0x1f0   : > { %1376 = vmatprep.subr.bf16.mxu1 %v3752_v50  ;;  %v1957_v50 = vld [vmem:[%s2365_s6 + $0x6] sm:$0x3f] }
 0x1f3   : > { %1377 = vmatpush1.bf16.msra.mxu1 %v3753_v52 }
 0x1f4   : > { %1378 = vmatprep.subr.bf16.mxu1 %v3754_v9 }
 0x1f7   : > { %1379 = vmatpush1.bf16.msra.mxu1 %v3755_v54  ;;  %v3778_v54 = vld [vmem:[#allocation8_spill] sm:$0xff] }
 0x1f8   : > { %1380 = vmatprep.subr.bf16.mxu1 %v3756_v55 }
 0x1fb   : > { %1381 = vmatpush1.bf16.msra.mxu1 %v3757_v58 }
 0x1fc   : > { %1382 = vmatprep.subr.bf16.mxu1 %v3758_v10 }
 0x1ff   : > { %1383 = vmatpush1.bf16.msra.mxu1 %v3759_v12  ;;  %v3779_v12 = vld [vmem:[#allocation60_spill] sm:$0xff] }
 0x200   : > { %1384 = vmatprep.subr.bf16.mxu1 %v3760_v13 }
 0x203   : > { %1385 = vmatpush1.bf16.msra.mxu1 %v3761_v16  ;;  %v1253_v16 = vrot.slane %v1957_v50, 2 }
 0x204   : > { %1386 = vmatprep.subr.bf16.mxu1 %v3762_v60 }
 0x207   : > { %1387 = vmatpush1.bf16.msra.mxu1 %v3763_v62 }
 0x208   : > { %1388 = vmatprep.subr.bf16.mxu1 %v3764_v63 }
 0x20b   : > { %1389 = vmatpush1.bf16.msra.mxu1 %v3765_v30 }
 0x20c   : > { %1390 = vmatprep.subr.bf16.mxu1 %v3766_v28 }
 0x20f   : > { %1391 = vmatpush1.bf16.msra.mxu1 %v3767_v47 }
 0x210   : > { %1392 = vmatprep.subr.bf16.mxu1 %v3768_v41 }
 0x213   : > { %1393 = vmatpush1.bf16.msra.mxu1 %v3769_v35 }
 0x214   : > { %1394 = vmatprep.subr.bf16.mxu1 %v3770_v32 }
 0x217   : > { %1395 = vmatpush1.bf16.msra.mxu1 %v3771_v1 }
 0x218   : > { %1396 = vmatprep.subr.bf16.mxu1 %v3772_v17 }
 0x21b   : > { %1397 = vmatpush1.bf16.msra.mxu1 %v3773_v51 }
 0x21c   : > { %1398 = vmatprep.subr.bf16.mxu1 %v3774_v61 }
 0x21f   : > { %1399 = vmatpush1.bf16.msra.mxu1 %v3775_v49 }
 0x220   : > { %1400 = vmatprep.subr.bf16.mxu1 %v3776_v19 }
 0x223   : > { %1401 = vmatpush1.bf16.msra.mxu1 %v3777_v45 }
 0x224   : > { %1540 = vmatprep.subr.bf16.mxu1 %v2220_v46  ;;  %v3780_v46 = vld [vmem:[#allocation61_spill] sm:$0xff] }
 0x279   : > { %v1152_v52 = vpop.f32.mrb[4].mxu1  ;;  %v1193_v9 = vpop.f32.mrb[8].mxu0 }
 0x27a   : > { %v1153_v55 = vadd.f32 %v1152_v52, %v3778_v54  ;;  %v1154_v58 = vpop.f32.mrb[5].mxu1  ;;  %v1195_v10 = vpop.f32.mrb[9].mxu0 }
 0x27b   : > { %v1155_v13 = vadd.f32 %v1154_v58, %v3779_v12  ;;  %v1156_v60 = vpop.f32.mrb[6].mxu1  ;;  %v1197_v62 = vpop.f32.mrb[10].mxu0  ;;  %v1196_v52 = vadd.f32 %v1195_v10, %v3780_v46  ;;  %v3781_v58 = vld [vmem:[#allocation62_spill] sm:$0xff] }
 0x27c   : > { %v1245_v63 = vadd.f32 %v1957_v50, %v1153_v55  ;;  %v1157_v30 = vpop.f32.mrb[7].mxu1  ;;  %v1198_v28 = vpop.f32.mrb[11].mxu0  ;;  %v1194_v12 = vadd.f32 %v1193_v9, %v3781_v58  ;;  %v1263_v60 = vrot.slane %v1957_v50, 4  ;;  %v1958_v62 = vld [vmem:[%s2370_s10 + $0xc] sm:$0x3f] }
 0x27d   : > { %v1255_v41 = vadd.f32 %v1253_v16, %v1155_v13  ;;  %v1279_v9 = vrot.slane %v1958_v62, 2 }
 0x27e   : > { %v1959_v47 = vmul.f32 -1.442695, %v1245_v63  ;;  %v1271_v63 = vadd.f32 %v1958_v62, %v1196_v52 }
 0x27f   : > { %v1960_v35 = vmul.f32 -1.442695, %v1255_v41 }
 0x280   : > { %2160 = vpow2.f32 %v1959_v47  ;;  %v1961_v16 = vmul.f32 -1.442695, %v1271_v63 }
 0x281   : > { %2162 = vpow2.f32 %v1960_v35 }
 0x28a   : > { %v2161_v32 = vpop.eup %2160 }
 0x28b   : > { %v1249_v1 = vadd.f32 1.0, %v2161_v32  ;;  %v2163_v17 = vpop.eup %2162 }
 0x28c   : > { %v1259_v51 = vadd.f32 1.0, %v2163_v17 }
 0x28d   : > { %2164 = vrcp.f32 %v1249_v1 }
 0x28e   : > { %2166 = vrcp.f32 %v1259_v51 }
 0x297   : > { %v2165_v55 = vpop.eup %2164 }
 0x298   : > { %v1262_v30 = vmul.f32 %v2165_v55, %v1194_v12  ;;  %v2167_v28 = vpop.eup %2166  ;;  %v3782_v12 = vld [vmem:[#allocation13_spill] sm:$0xff] }
 0x299   : > { %v1267_v47 = vsub.f32 1.0, %v2167_v28  ;;  %v1269_v32 = vmul.f32 %v2167_v28, %v3071_v26  ;;  %v1289_v28 = vrot.slane %v1958_v62, 4 }
 0x29a   : > { %v1265_v13 = vadd.f32 %v1263_v60, %v1262_v30 }
 0x29c   : > { %2168 = vtanh.f32 %v1265_v13 }
 0x29d   : > { %2170 = vpow2.f32 %v1961_v16 }
 0x2a6   : > { %v2169_v41 = vpop.eup %2168 }
 0x2a7   : > { %v1268_v35 = vmul.f32 %v2169_v41, %v1267_v47  ;;  %v2171_v1 = vpop.eup %2170 }
 0x2a8   : > { %v1275_v50 = vadd.f32 1.0, %v2171_v1 }
 0x2a9   : > { %v1270_v10 = vadd.f32 %v1269_v32, %v1268_v35 }
 0x2aa   : > { %2172 = vrcp.f32 %v1275_v50 }
 0x2ab   : > { %1964 = vst [vmem:[%s2360_s28 + $0x2] sm:$0x3] %v1270_v10 }
 0x2b4   : > { %v2173_v30 = vpop.eup %2172 }
 0x2b9   : > { %v1234_v17 = vpop.f32.mrb[8].mxu1 }
 0x2ba   : > { %v1235_v51 = vadd.f32 %v1234_v17, %v3782_v12  ;;  %v1236_v52 = vpop.f32.mrb[9].mxu1  ;;  %v1295_v17 = vrot.slane %v3071_v26, 2  ;;  %v2222_v26 = vld [vmem:[%s3539_s2 + $0x34] ss:$24 sps:$4 sm:$0xff]  }
 0x2bb   : > { %v1237_v60 = vadd.f32 %v1236_v52, %v3065_v56  ;;  %v1238_v55 = vpop.f32.mrb[10].mxu1 }
 0x2bc   : > { %v1281_v63 = vadd.f32 %v1279_v9, %v1235_v51  ;;  %v1239_v13 = vpop.f32.mrb[11].mxu1 }
 0x2bd   : > { %v1288_v16 = vmul.f32 %v2173_v30, %v1237_v60  ;;  %v2259_v13 = vld [vmem:[%s3539_s2 + $0xc8] ss:$24 sps:$4 sm:$0xff]  }
 0x2be   : > { %v1962_v47 = vmul.f32 -1.442695, %v1281_v63 }
 0x2bf   : > { %v1291_v32 = vadd.f32 %v1289_v28, %v1288_v16  ;;  %v2260_v16 = vld [vmem:[%s3539_s2 + $0xfc] ss:$24 sps:$4 sm:$0xff]   ;;  %v2262_v28 = vld [vmem:[%s3539_s2 + $0x12c] ss:$24 sps:$4 sm:$0xff]  }
 0x2c0   : > { %2174 = vpow2.f32 %v1962_v47  ;;  %v2261_v47 = vld [vmem:[%s3539_s2 + $0xf8] ss:$24 sps:$4 sm:$0xff]  }
 0x2ca   : > { %v2175_v41 = vpop.eup %2174 }
 0x2cb   : > { %v1285_v35 = vadd.f32 1.0, %v2175_v41  ;;  %v2263_v41 = vld [vmem:[%s3539_s2 + $0x128] ss:$24 sps:$4 sm:$0xff]  }
 0x2cd   : > { %2176 = vrcp.f32 %v1285_v35  ;;  %v2264_v35 = vld [vmem:[%s3539_s2 + $0x15c] ss:$24 sps:$4 sm:$0xff]  }
 0x2ce   : > { %2178 = vtanh.f32 %v1291_v32  ;;  %v2265_v32 = vld [vmem:[%s3539_s2 + $0x158] ss:$24 sps:$4 sm:$0xff]  }
 0x2d7   : > { %v2177_v1 = vpop.eup %2176 }
 0x2d8   : > { %v1293_v50 = vsub.f32 1.0, %v2177_v1  ;;  %v2179_v12 = vpop.eup %2178  ;;  %v1297_v52 = vmul.f32 %v2177_v1, %v1295_v17  ;;  %v2266_v1 = vld [vmem:[%s3539_s2 + $0x18c] ss:$24 sps:$4 sm:$0xff]   ;;  %v2268_v17 = vld [vmem:[%s3539_s2 + $0x1bc] ss:$24 sps:$4 sm:$0xff]  }
 0x2da   : > { %v1294_v55 = vmul.f32 %v2179_v12, %v1293_v50  ;;  %v2258_v12 = vld [vmem:[%s3539_s2 + $0xcc] ss:$24 sps:$4 sm:$0xff]   ;;  %v2267_v50 = vld [vmem:[%s3539_s2 + $0x188] ss:$24 sps:$4 sm:$0xff]  }
 0x2dc   : > { %v1298_v56 = vadd.f32 %v1297_v52, %v1294_v55  ;;  %v2269_v52 = vld [vmem:[%s3539_s2 + $0x1b8] ss:$24 sps:$4 sm:$0xff]   ;;  %v2270_v55 = vld [vmem:[%s3539_s2 + $0x1ec] ss:$24 sps:$4 sm:$0xff]  }
 0x2de   : > { %v1301_v9 = vcombine.low %v1270_v10, %v1298_v56  ;;  %1965 = vst [vmem:[%s2375_s13 + $0x4] sm:$0x3] %v1298_v56  ;;  %v2221_v56 = vld [vmem:[%s3539_s2] ss:$24 sps:$4 sm:$0xff]  }
 0x2df   : > { %v2257_v10 = vld [vmem:[%s3539_s2 + $0x98] ss:$24 sps:$4 sm:$0xff]  }
 0x2e0   : > { %1963 = vst.sshfl [vmem:[#allocation2] sm:$0x33 pattern:$0x76325410] %v1301_v9  ;;  %v2271_v9 = vld [vmem:[%s3539_s2 + $0x1e8] ss:$24 sps:$4 sm:$0xff]  }
 0x2e7   : > { %v3190_v51 = vld [vmem:[#allocation2] sm:$0xf] }
 0x2e8   : > { %v1323_v62 = vrot.slane %v3190_v51, %v3723_v22 }
 0x2ea   : > { %v1324_v60 = vcombine.high %v1323_v62, %v1323_v62  ;;  %v3194_v63 = vpack.c.bf16 %v1323_v62, %v1323_v62  ;;  %v2272_v62 = vld [vmem:[%s3539_s2 + $0x21c] ss:$24 sps:$4 sm:$0xff]  }
 0x2ec   : > { %v1328_v30 = vpack.c.bf16 %v1324_v60, %v1324_v60  ;;  %v2273_v60 = vld [vmem:[%s3539_s2 + $0x218] ss:$24 sps:$4 sm:$0xff]  }
 0x2ee   : > { %1361 = vmatprep.mubr.bf16.mxu0 %v1328_v30  ;;  %1402 = vmatprep.mubr.bf16.mxu1 %v1328_v30 }
 0x2ef   : > { %1362 = vmatmul.mubr.bf16.vlgmr.msra.gmra.mrb[12].mxu0 %v3194_v63  ;;  %1403 = vmatmul.mubr.bf16.vlgmr.msra.gmra.mrb[12].mxu1 %v3194_v63 }
 0x2f0   : > { %1412 = vmatpush1.bf16.msra.mxu0 %v3724_v43  ;;  %1443 = vmatprep.mubr.bf16.mxu0 %v1328_v30  ;;  %v2223_v43 = vld [vmem:[%s3539_s2 + $0x30] ss:$24 sps:$4 sm:$0xff]   ;;  %v2274_v30 = vld [vmem:[%s3539_s2 + $0x24c] ss:$24 sps:$4 sm:$0xff]  }
 0x2f1   : > { %1413 = vmatprep.subr.bf16.mxu0 %v3725_v57  ;;  %1541 = vmatpush1.bf16.msra.mxu1 %v2221_v56  ;;  %v2224_v57 = vld [vmem:[%s3539_s2 + $0x64] ss:$24 sps:$4 sm:$0xff]  }
 0x2f2   : > { %1542 = vmatprep.subr.bf16.mxu1 %v2222_v26  ;;  %v2276_v56 = vld [vmem:[%s3539_s2 + $0x27c] ss:$24 sps:$4 sm:$0xff]   ;;  %v2277_v26 = vld [vmem:[%s3539_s2 + $0x278] ss:$24 sps:$4 sm:$0xff]  }
 0x2f4   : > { %1414 = vmatpush1.bf16.msra.mxu0 %v3726_v53  ;;  %v2225_v53 = vld [vmem:[%s3539_s2 + $0x60] ss:$24 sps:$4 sm:$0xff]  }
 0x2f5   : > { %1415 = vmatprep.subr.bf16.mxu0 %v3727_v40  ;;  %1543 = vmatpush1.bf16.msra.mxu1 %v2223_v43  ;;  %v2226_v40 = vld [vmem:[%s3539_s2 + $0x94] ss:$24 sps:$4 sm:$0xff]  }
 0x2f6   : > { %1544 = vmatprep.subr.bf16.mxu1 %v2224_v57  ;;  %v1966_v43 = vld [vmem:[%s2365_s6 + $0xc] sm:$0x3f] }
 0x2f8   : > { %1416 = vmatpush1.bf16.msra.mxu0 %v3728_v59  ;;  %v2227_v59 = vld [vmem:[%s3539_s2 + $0x90] ss:$24 sps:$4 sm:$0xff]  }
 0x2f9   : > { %1417 = vmatprep.subr.bf16.mxu0 %v3729_v37  ;;  %1545 = vmatpush1.bf16.msra.mxu1 %v2225_v53  ;;  %v2228_v37 = vld [vmem:[%s3539_s2 + $0xc4] ss:$24 sps:$4 sm:$0xff]  }
 0x2fa   : > { %1546 = vmatprep.subr.bf16.mxu1 %v2226_v40 }
 0x2fc   : > { %1418 = vmatpush1.bf16.msra.mxu0 %v3730_v39  ;;  %v2229_v39 = vld [vmem:[%s3539_s2 + $0xc0] ss:$24 sps:$4 sm:$0xff]  }
 0x2fd   : > { %1419 = vmatprep.subr.bf16.mxu0 %v3731_v2  ;;  %1547 = vmatpush1.bf16.msra.mxu1 %v2227_v59  ;;  %v2230_v2 = vld [vmem:[%s3539_s2 + $0xf4] ss:$24 sps:$4 sm:$0xff]  }
 0x2fe   : > { %1548 = vmatprep.subr.bf16.mxu1 %v2228_v37 }
 0x300   : > { %1420 = vmatpush1.bf16.msra.mxu0 %v3732_v3  ;;  %v2231_v3 = vld [vmem:[%s3539_s2 + $0xf0] ss:$24 sps:$4 sm:$0xff]  }
 0x301   : > { %1421 = vmatprep.subr.bf16.mxu0 %v3733_v4  ;;  %1549 = vmatpush1.bf16.msra.mxu1 %v2229_v39  ;;  %v2232_v4 = vld [vmem:[%s3539_s2 + $0x124] ss:$24 sps:$4 sm:$0xff]   ;;  %v3783_v39 = vld [vmem:[#allocation60_spill] sm:$0xff] }
 0x302   : > { %1550 = vmatprep.subr.bf16.mxu1 %v2230_v2 }
 0x304   : > { %1422 = vmatpush1.bf16.msra.mxu0 %v3734_v5  ;;  %v2233_v5 = vld [vmem:[%s3539_s2 + $0x120] ss:$24 sps:$4 sm:$0xff]  }
 0x305   : > { %1423 = vmatprep.subr.bf16.mxu0 %v3735_v6  ;;  %1551 = vmatpush1.bf16.msra.mxu1 %v2231_v3  ;;  %v2234_v6 = vld [vmem:[%s3539_s2 + $0x154] ss:$24 sps:$4 sm:$0xff]   ;;  %v1464_v3 = vrot.slane %v1966_v43, 2 }
 0x306   : > { %1552 = vmatprep.subr.bf16.mxu1 %v2232_v4 }
 0x308   : > { %1424 = vmatpush1.bf16.msra.mxu0 %v3736_v7  ;;  %v2235_v7 = vld [vmem:[%s3539_s2 + $0x150] ss:$24 sps:$4 sm:$0xff]  }
 0x309   : > { %1425 = vmatprep.subr.bf16.mxu0 %v3737_v8  ;;  %1553 = vmatpush1.bf16.msra.mxu1 %v2233_v5  ;;  %v2236_v8 = vld [vmem:[%s3539_s2 + $0x184] ss:$24 sps:$4 sm:$0xff]  }
 0x30a   : > { %1554 = vmatprep.subr.bf16.mxu1 %v2234_v6 }
 0x30c   : > { %1426 = vmatpush1.bf16.msra.mxu0 %v3738_v11  ;;  %v2237_v11 = vld [vmem:[%s3539_s2 + $0x180] ss:$24 sps:$4 sm:$0xff]  }
 0x30d   : > { %1427 = vmatprep.subr.bf16.mxu0 %v3739_v14  ;;  %1555 = vmatpush1.bf16.msra.mxu1 %v2235_v7  ;;  %v2238_v14 = vld [vmem:[%s3539_s2 + $0x1b4] ss:$24 sps:$4 sm:$0xff]  }
 0x30e   : > { %1556 = vmatprep.subr.bf16.mxu1 %v2236_v8 }
 0x310   : > { %1428 = vmatpush1.bf16.msra.mxu0 %v3740_v15  ;;  %v2239_v15 = vld [vmem:[%s3539_s2 + $0x1b0] ss:$24 sps:$4 sm:$0xff]  }
 0x311   : > { %1429 = vmatprep.subr.bf16.mxu0 %v3741_v18  ;;  %1557 = vmatpush1.bf16.msra.mxu1 %v2237_v11  ;;  %v2240_v18 = vld [vmem:[%s3539_s2 + $0x1e4] ss:$24 sps:$4 sm:$0xff]  }
 0x312   : > { %1558 = vmatprep.subr.bf16.mxu1 %v2238_v14 }
 0x314   : > { %1430 = vmatpush1.bf16.msra.mxu0 %v3742_v20  ;;  %v2241_v20 = vld [vmem:[%s3539_s2 + $0x1e0] ss:$24 sps:$4 sm:$0xff]  }
 0x315   : > { %1431 = vmatprep.subr.bf16.mxu0 %v3743_v21  ;;  %1559 = vmatpush1.bf16.msra.mxu1 %v2239_v15  ;;  %v2242_v21 = vld [vmem:[%s3539_s2 + $0x214] ss:$24 sps:$4 sm:$0xff]  }
 0x316   : > { %1560 = vmatprep.subr.bf16.mxu1 %v2240_v18 }
 0x318   : > { %1432 = vmatpush1.bf16.msra.mxu0 %v3744_v27  ;;  %v2243_v27 = vld [vmem:[%s3539_s2 + $0x210] ss:$24 sps:$4 sm:$0xff]  }
 0x319   : > { %1433 = vmatprep.subr.bf16.mxu0 %v3745_v31  ;;  %1561 = vmatpush1.bf16.msra.mxu1 %v2241_v20  ;;  %v2244_v31 = vld [vmem:[%s3539_s2 + $0x244] ss:$24 sps:$4 sm:$0xff]  }
 0x31a   : > { %1562 = vmatprep.subr.bf16.mxu1 %v2242_v21  ;;  %v1474_v21 = vrot.slane %v1966_v43, 4 }
 0x31c   : > { %1434 = vmatpush1.bf16.msra.mxu0 %v3746_v33  ;;  %v2245_v33 = vld [vmem:[%s3539_s2 + $0x240] ss:$24 sps:$4 sm:$0xff]  }
 0x31d   : > { %1435 = vmatprep.subr.bf16.mxu0 %v3747_v34  ;;  %1563 = vmatpush1.bf16.msra.mxu1 %v2243_v27  ;;  %v2246_v34 = vld [vmem:[%s3539_s2 + $0x274] ss:$24 sps:$4 sm:$0xff]   ;;  %v1967_v27 = vld [vmem:[%s2370_s10 + $0x6] sm:$0x3f] }
 0x31e   : > { %1564 = vmatprep.subr.bf16.mxu1 %v2244_v31 }
 0x320   : > { %1436 = vmatpush1.bf16.msra.mxu0 %v3748_v38  ;;  %v2247_v38 = vld [vmem:[%s3539_s2 + $0x270] ss:$24 sps:$4 sm:$0xff]  }
 0x321   : > { %1437 = vmatprep.subr.bf16.mxu0 %v3749_v42  ;;  %1565 = vmatpush1.bf16.msra.mxu1 %v2245_v33  ;;  %v2248_v42 = vld [vmem:[%s3539_s2 + $0x2a4] ss:$24 sps:$4 sm:$0xff]  }
 0x322   : > { %1566 = vmatprep.subr.bf16.mxu1 %v2246_v34 }
 0x324   : > { %1438 = vmatpush1.bf16.msra.mxu0 %v3750_v44  ;;  %v2249_v44 = vld [vmem:[%s3539_s2 + $0x2a0] ss:$24 sps:$4 sm:$0xff]  }
 0x325   : > { %1439 = vmatprep.subr.bf16.mxu0 %v2970_v23  ;;  %1567 = vmatpush1.bf16.msra.mxu1 %v2247_v38  ;;  %v2250_v23 = vld [vmem:[%s3539_s2 + $0xc] ss:$24 sps:$4 sm:$0xff]  }
 0x326   : > { %1568 = vmatprep.subr.bf16.mxu1 %v2248_v42 }
 0x328   : > { %1440 = vmatpush1.bf16.msra.mxu0 %v2977_v29  ;;  %v2251_v29 = vld [vmem:[%s3539_s2 + $0x8] ss:$24 sps:$4 sm:$0xff]  }
 0x329   : > { %1441 = vmatprep.subr.bf16.mxu0 %v2984_v48  ;;  %1569 = vmatpush1.bf16.msra.mxu1 %v2249_v44  ;;  %v2256_v48 = vld [vmem:[%s3539_s2 + $0x9c] ss:$24 sps:$4 sm:$0xff]  }
 0x32a   : > { %1570 = vmatprep.subr.bf16.mxu1 %v2720_v24  ;;  %v2253_v24 = vld [vmem:[%s3539_s2 + $0x38] ss:$24 sps:$4 sm:$0xff]  }
 0x32c   : > { %1442 = vmatpush1.bf16.msra.mxu0 %v2991_v0  ;;  %v2252_v0 = vld [vmem:[%s3539_s2 + $0x3c] ss:$24 sps:$4 sm:$0xff]  }
 0x32d   : > { %1581 = vmatprep.subr.bf16.mxu0 %v2250_v23  ;;  %1571 = vmatpush1.bf16.msra.mxu1 %v2725_v25  ;;  %v2255_v25 = vld [vmem:[%s3539_s2 + $0x68] ss:$24 sps:$4 sm:$0xff]  }
 0x32e   : > { %1622 = vmatprep.subr.bf16.mxu1 %v2744_v36  ;;  %v2254_v36 = vld [vmem:[%s3539_s2 + $0x6c] ss:$24 sps:$4 sm:$0xff]  }
 0x32f   : > { %1444 = vmatmul.mubr.bf16.vlgmr.msra.gmra.mrb[16].mxu0 %v3194_v63  ;;  %v2275_v63 = vld [vmem:[%s3539_s2 + $0x248] ss:$24 sps:$4 sm:$0xff]  }
 0x330   : > { %1582 = vmatpush1.bf16.msra.mxu0 %v2251_v29 }
 0x331   : > { %1583 = vmatprep.subr.bf16.mxu0 %v2252_v0 }
 0x334   : > { %1584 = vmatpush1.bf16.msra.mxu0 %v2253_v24 }
 0x335   : > { %1585 = vmatprep.subr.bf16.mxu0 %v2254_v36 }
 0x338   : > { %1586 = vmatpush1.bf16.msra.mxu0 %v2255_v25 }
 0x339   : > { %1587 = vmatprep.subr.bf16.mxu0 %v2256_v48 }
 0x33c   : > { %1588 = vmatpush1.bf16.msra.mxu0 %v2257_v10  ;;  %v1490_v10 = vrot.slane %v1967_v27, 2 }
 0x33d   : > { %1589 = vmatprep.subr.bf16.mxu0 %v2258_v12 }
 0x340   : > { %1590 = vmatpush1.bf16.msra.mxu0 %v2259_v13  ;;  %v3784_v13 = vld [vmem:[#allocation13_spill] sm:$0xff] }
 0x341   : > { %1591 = vmatprep.subr.bf16.mxu0 %v2260_v16 }
 0x344   : > { %1592 = vmatpush1.bf16.msra.mxu0 %v2261_v47 }
 0x345   : > { %1593 = vmatprep.subr.bf16.mxu0 %v2262_v28  ;;  %v3785_v28 = vld [vmem:[#allocation63_spill] sm:$0xff] }
 0x348   : > { %1594 = vmatpush1.bf16.msra.mxu0 %v2263_v41 }
 0x349   : > { %1595 = vmatprep.subr.bf16.mxu0 %v2264_v35 }
 0x34c   : > { %1596 = vmatpush1.bf16.msra.mxu0 %v2265_v32 }
 0x34d   : > { %1597 = vmatprep.subr.bf16.mxu0 %v2266_v1 }
 0x350   : > { %1598 = vmatpush1.bf16.msra.mxu0 %v2267_v50 }
 0x351   : > { %1599 = vmatprep.subr.bf16.mxu0 %v2268_v17 }
 0x354   : > { %1600 = vmatpush1.bf16.msra.mxu0 %v2269_v52 }
 0x355   : > { %1601 = vmatprep.subr.bf16.mxu0 %v2270_v55  ;;  %v1500_v55 = vrot.slane %v1967_v27, 4 }
 0x358   : > { %1602 = vmatpush1.bf16.msra.mxu0 %v2271_v9 }
 0x359   : > { %1603 = vmatprep.subr.bf16.mxu0 %v2272_v62 }
 0x35c   : > { %1604 = vmatpush1.bf16.msra.mxu0 %v2273_v60 }
 0x35d   : > { %1605 = vmatprep.subr.bf16.mxu0 %v2274_v30 }
 0x360   : > { %1606 = vmatpush1.bf16.msra.mxu0 %v2275_v63  ;;  %v1506_v63 = vrot.slane %v3190_v51, 2 }
 0x361   : > { %1607 = vmatprep.subr.bf16.mxu0 %v2276_v56 }
 0x364   : > { %1608 = vmatpush1.bf16.msra.mxu0 %v2277_v26 }
 0x365   : > { %1609 = vmatprep.subr.bf16.mxu0 %v3774_v61 }
 0x368   : > { %1610 = vmatpush1.bf16.msra.mxu0 %v3775_v49 }
 0x369   : > { %1611 = vmatprep.subr.bf16.mxu0 %v3776_v19 }
 0x36c   : > { %1612 = vmatpush1.bf16.msra.mxu0 %v3777_v45 }
 0x3c2   : > { %v1363_v57 = vpop.f32.mrb[12].mxu0  ;;  %v1404_v53 = vpop.f32.mrb[12].mxu1 }
 0x3c3   : > { %v1364_v40 = vadd.f32 %v1363_v57, %v3778_v54  ;;  %v1365_v59 = vpop.f32.mrb[13].mxu0  ;;  %v1406_v37 = vpop.f32.mrb[13].mxu1  ;;  %v1405_v20 = vadd.f32 %v1404_v53, %v3781_v58 }
 0x3c4   : > { %v1366_v2 = vadd.f32 %v1365_v59, %v3783_v39  ;;  %v1367_v4 = vpop.f32.mrb[14].mxu0  ;;  %v1408_v5 = vpop.f32.mrb[14].mxu1  ;;  %v1407_v18 = vadd.f32 %v1406_v37, %v3780_v46 }
 0x3c5   : > { %v1456_v6 = vadd.f32 %v1966_v43, %v1364_v40  ;;  %v1368_v61 = vpop.f32.mrb[15].mxu0  ;;  %v1409_v49 = vpop.f32.mrb[15].mxu1  ;;  %v2280_v5 = vld [vmem:[%s3539_s2 + $0x40] ss:$24 sps:$4 sm:$0xff]  }
 0x3c6   : > { %v1466_v19 = vadd.f32 %v1464_v3, %v1366_v2  ;;  %v1482_v34 = vadd.f32 %v1967_v27, %v1407_v18  ;;  %v2282_v61 = vld [vmem:[%s3539_s2 + $0x70] ss:$24 sps:$4 sm:$0xff]   ;;  %v2283_v49 = vld [vmem:[%s3539_s2 + $0xa4] ss:$24 sps:$4 sm:$0xff]  }
 0x3c7   : > { %v1968_v7 = vmul.f32 -1.442695, %v1456_v6  ;;  %v2281_v6 = vld [vmem:[%s3539_s2 + $0x74] ss:$24 sps:$4 sm:$0xff]   ;;  %v2291_v18 = vld [vmem:[%s3539_s2 + $0x164] ss:$24 sps:$4 sm:$0xff]  }
 0x3c8   : > { %v1969_v45 = vmul.f32 -1.442695, %v1466_v19  ;;  %v1970_v42 = vmul.f32 -1.442695, %v1482_v34  ;;  %v2285_v19 = vld [vmem:[%s3539_s2 + $0xd4] ss:$24 sps:$4 sm:$0xff]  }
 0x3c9   : > { %2180 = vpow2.f32 %v1968_v7  ;;  %v2284_v7 = vld [vmem:[%s3539_s2 + $0xa0] ss:$24 sps:$4 sm:$0xff]   ;;  %v2294_v27 = vld [vmem:[%s3539_s2 + $0x190] ss:$24 sps:$4 sm:$0xff]   ;;  %v2297_v34 = vld [vmem:[%s3539_s2 + $0x1f4] ss:$24 sps:$4 sm:$0xff]  }
 0x3ca   : > { %2182 = vpow2.f32 %v1969_v45  ;;  %v2286_v45 = vld [vmem:[%s3539_s2 + $0xd0] ss:$24 sps:$4 sm:$0xff]  }
 0x3d3   : > { %v2181_v8 = vpop.eup %2180 }
 0x3d4   : > { %v1460_v11 = vadd.f32 1.0, %v2181_v8  ;;  %v2183_v14 = vpop.eup %2182  ;;  %v2287_v8 = vld [vmem:[%s3539_s2 + $0x104] ss:$24 sps:$4 sm:$0xff]  }
 0x3d5   : > { %v1470_v15 = vadd.f32 1.0, %v2183_v14  ;;  %v2289_v14 = vld [vmem:[%s3539_s2 + $0x134] ss:$24 sps:$4 sm:$0xff]  }
 0x3d6   : > { %2184 = vrcp.f32 %v1460_v11  ;;  %v2288_v11 = vld [vmem:[%s3539_s2 + $0x100] ss:$24 sps:$4 sm:$0xff]  }
 0x3d7   : > { %2186 = vrcp.f32 %v1470_v15  ;;  %v2290_v15 = vld [vmem:[%s3539_s2 + $0x130] ss:$24 sps:$4 sm:$0xff]  }
 0x3e0   : > { %v2185_v31 = vpop.eup %2184 }
 0x3e1   : > { %v1473_v33 = vmul.f32 %v2185_v31, %v1405_v20  ;;  %v2187_v44 = vpop.eup %2186  ;;  %v2292_v20 = vld [vmem:[%s3539_s2 + $0x160] ss:$24 sps:$4 sm:$0xff]   ;;  %v2295_v31 = vld [vmem:[%s3539_s2 + $0x1c4] ss:$24 sps:$4 sm:$0xff]  }
 0x3e2   : > { %v1478_v23 = vsub.f32 1.0, %v2187_v44  ;;  %v1480_v24 = vmul.f32 %v2187_v44, %v3190_v51  ;;  %v2278_v51 = vld [vmem:[%s3539_s2 + $0x10] ss:$24 sps:$4 sm:$0xff]   ;;  %v2300_v44 = vld [vmem:[%s3539_s2 + $0x220] ss:$24 sps:$4 sm:$0xff]  }
 0x3e3   : > { %v1476_v38 = vadd.f32 %v1474_v21, %v1473_v33  ;;  %v2293_v21 = vld [vmem:[%s3539_s2 + $0x194] ss:$24 sps:$4 sm:$0xff]   ;;  %v2296_v33 = vld [vmem:[%s3539_s2 + $0x1c0] ss:$24 sps:$4 sm:$0xff]  }
 0x3e5   : > { %2188 = vtanh.f32 %v1476_v38  ;;  %v2298_v38 = vld [vmem:[%s3539_s2 + $0x1f0] ss:$24 sps:$4 sm:$0xff]  }
 0x3e6   : > { %2190 = vpow2.f32 %v1970_v42  ;;  %v2299_v42 = vld [vmem:[%s3539_s2 + $0x224] ss:$24 sps:$4 sm:$0xff]  }
 0x3ef   : > { %v2189_v29 = vpop.eup %2188 }
 0x3f0   : > { %v1479_v0 = vmul.f32 %v2189_v29, %v1478_v23  ;;  %v2191_v25 = vpop.eup %2190  ;;  %v2301_v23 = vld [vmem:[%s3539_s2 + $0x254] ss:$24 sps:$4 sm:$0xff]   ;;  %v2302_v29 = vld [vmem:[%s3539_s2 + $0x250] ss:$24 sps:$4 sm:$0xff]  }
 0x3f1   : > { %v1486_v48 = vadd.f32 1.0, %v2191_v25  ;;  %v2306_v25 = vld [vmem:[%s3539_s2 + $0x2b0] ss:$24 sps:$4 sm:$0xff]  }
 0x3f2   : > { %v1481_v36 = vadd.f32 %v1480_v24, %v1479_v0  ;;  %v2303_v0 = vld [vmem:[%s3539_s2 + $0x284] ss:$24 sps:$4 sm:$0xff]   ;;  %v2304_v24 = vld [vmem:[%s3539_s2 + $0x280] ss:$24 sps:$4 sm:$0xff]  }
 0x3f3   : > { %2192 = vrcp.f32 %v1486_v48  ;;  %v2307_v48 = vld [vmem:[%s3539_s2 + $0x2e4] ss:$24 sps:$4 sm:$0xff]  }
 0x3f4   : > { %1973 = vst [vmem:[%s2360_s28 + $0x4] sm:$0x3] %v1481_v36 }
 0x3fd   : > { %v2193_v32 = vpop.eup %2192 }
 0x402   : > { %v1445_v12 = vpop.f32.mrb[16].mxu0 }
 0x403   : > { %v1446_v16 = vadd.f32 %v1445_v12, %v3784_v13  ;;  %v1447_v47 = vpop.f32.mrb[17].mxu0  ;;  %v1975_v12 = vld [vmem:[%s2365_s6 + $0x12] sm:$0x3f] }
 0x404   : > { %v1448_v41 = vadd.f32 %v1447_v47, %v3785_v28  ;;  %v1449_v35 = vpop.f32.mrb[18].mxu0 }
 0x405   : > { %v1492_v1 = vadd.f32 %v1490_v10, %v1446_v16  ;;  %v1450_v50 = vpop.f32.mrb[19].mxu0  ;;  %v2308_v10 = vld [vmem:[%s3539_s2 + $0x2e0] ss:$24 sps:$4 sm:$0xff]  }
 0x406   : > { %v1499_v17 = vmul.f32 %v2193_v32, %v1448_v41  ;;  %v1674_v50 = vrot.slane %v1975_v12, 2 }
 0x407   : > { %v1971_v52 = vmul.f32 -1.442695, %v1492_v1 }
 0x408   : > { %v1502_v60 = vadd.f32 %v1500_v55, %v1499_v17 }
 0x409   : > { %2194 = vpow2.f32 %v1971_v52 }
 0x413   : > { %v2195_v9 = vpop.eup %2194 }
 0x414   : > { %v1496_v62 = vadd.f32 1.0, %v2195_v9 }
 0x416   : > { %2196 = vrcp.f32 %v1496_v62 }
 0x417   : > { %2198 = vtanh.f32 %v1502_v60 }
 0x420   : > { %v2197_v30 = vpop.eup %2196 }
 0x421   : > { %v1504_v56 = vsub.f32 1.0, %v2197_v30  ;;  %v2199_v26 = vpop.eup %2198  ;;  %v1508_v43 = vmul.f32 %v2197_v30, %v1506_v63 }
 0x423   : > { %v1505_v57 = vmul.f32 %v2199_v26, %v1504_v56 }
 0x425   : > { %v1509_v53 = vadd.f32 %v1508_v43, %v1505_v57 }
 0x427   : > { %v1512_v40 = vcombine.low %v1481_v36, %v1509_v53  ;;  %1974 = vst [vmem:[%s2375_s13 + $0x2] sm:$0x3] %v1509_v53  ;;  %v2305_v36 = vld [vmem:[%s3539_s2 + $0x2b4] ss:$24 sps:$4 sm:$0xff]   ;;  %v1684_v53 = vrot.slane %v1975_v12, 4 }
 0x429   : > { %1972 = vst.sshfl [vmem:[#allocation2] sm:$0x33 pattern:$0x76325410] %v1512_v40  ;;  %v1665_v40 = vld [vmem:[%s2370_s10] sm:$0x3f] }
 0x430   : > { %v3420_v59 = vld [vmem:[#allocation2] sm:$0xf] }
 0x431   : > { %v1534_v37 = vrot.slane %v3420_v59, %v3723_v22  ;;  %v2279_v22 = vld [vmem:[%s3539_s2 + $0x44] ss:$24 sps:$4 sm:$0xff]  }
 0x433   : > { %v1535_v2 = vcombine.high %v1534_v37, %v1534_v37  ;;  %v3424_v4 = vpack.c.bf16 %v1534_v37, %v1534_v37 }
 0x435   : > { %v1539_v3 = vpack.c.bf16 %v1535_v2, %v1535_v2 }
 0x437   : > { %1572 = vmatprep.mubr.bf16.mxu1 %v1539_v3  ;;  %1613 = vmatprep.mubr.bf16.mxu0 %v1539_v3 }
 0x438   : > { %1573 = vmatmul.mubr.bf16.vlgmr.msra.gmra.mrb[16].mxu1 %v3424_v4  ;;  %1614 = vmatmul.mubr.bf16.vlgmr.msra.gmra.mrb[20].mxu0 %v3424_v4 }
 0x439   : > { %1623 = vmatpush1.bf16.msra.mxu1 %v2278_v51  ;;  %1654 = vmatprep.mubr.bf16.mxu1 %v1539_v3 }
 0x43a   : > { %1624 = vmatprep.subr.bf16.mxu1 %v2279_v22 }
 0x43d   : > { %1625 = vmatpush1.bf16.msra.mxu1 %v2280_v5 }
 0x43e   : > { %1626 = vmatprep.subr.bf16.mxu1 %v2281_v6 }
 0x441   : > { %1627 = vmatpush1.bf16.msra.mxu1 %v2282_v61 }
 0x442   : > { %1628 = vmatprep.subr.bf16.mxu1 %v2283_v49 }
 0x445   : > { %1629 = vmatpush1.bf16.msra.mxu1 %v2284_v7 }
 0x446   : > { %1630 = vmatprep.subr.bf16.mxu1 %v2285_v19  ;;  %v1700_v19 = vrot.slane %v1665_v40, 2 }
 0x449   : > { %1631 = vmatpush1.bf16.msra.mxu1 %v2286_v45 }
 0x44a   : > { %1632 = vmatprep.subr.bf16.mxu1 %v2287_v8 }
 0x44d   : > { %1633 = vmatpush1.bf16.msra.mxu1 %v2288_v11 }
 0x44e   : > { %1634 = vmatprep.subr.bf16.mxu1 %v2289_v14 }
 0x451   : > { %1635 = vmatpush1.bf16.msra.mxu1 %v2290_v15 }
 0x452   : > { %1636 = vmatprep.subr.bf16.mxu1 %v2291_v18 }
 0x455   : > { %1637 = vmatpush1.bf16.msra.mxu1 %v2292_v20 }
 0x456   : > { %1638 = vmatprep.subr.bf16.mxu1 %v2293_v21 }
 0x459   : > { %1639 = vmatpush1.bf16.msra.mxu1 %v2294_v27 }
 0x45a   : > { %1640 = vmatprep.subr.bf16.mxu1 %v2295_v31 }
 0x45d   : > { %1641 = vmatpush1.bf16.msra.mxu1 %v2296_v33  ;;  %v1710_v33 = vrot.slane %v1665_v40, 4 }
 0x45e   : > { %1642 = vmatprep.subr.bf16.mxu1 %v2297_v34 }
 0x461   : > { %1643 = vmatpush1.bf16.msra.mxu1 %v2298_v38 }
 0x462   : > { %1644 = vmatprep.subr.bf16.mxu1 %v2299_v42 }
 0x465   : > { %1645 = vmatpush1.bf16.msra.mxu1 %v2300_v44 }
 0x466   : > { %1646 = vmatprep.subr.bf16.mxu1 %v2301_v23 }
 0x469   : > { %1647 = vmatpush1.bf16.msra.mxu1 %v2302_v29 }
 0x46a   : > { %1648 = vmatprep.subr.bf16.mxu1 %v2303_v0 }
 0x46d   : > { %1649 = vmatpush1.bf16.msra.mxu1 %v2304_v24 }
 0x46e   : > { %1650 = vmatprep.subr.bf16.mxu1 %v2305_v36 }
 0x471   : > { %1651 = vmatpush1.bf16.msra.mxu1 %v2306_v25 }
 0x472   : > { %1652 = vmatprep.subr.bf16.mxu1 %v2307_v48 }
 0x475   : > { %1653 = vmatpush1.bf16.msra.mxu1 %v2308_v10 }
 0x478   : > { %1655 = vmatmul.mubr.bf16.vlgmr.msra.gmra.mrb[20].mxu1 %v3424_v4 }
 0x50b   : > { %v1574_v16 = vpop.f32.mrb[16].mxu1  ;;  %v1615_v47 = vpop.f32.mrb[20].mxu0 }
 0x50c   : > { %v1575_v41 = vadd.f32 %v1574_v16, %v3778_v54  ;;  %v1576_v35 = vpop.f32.mrb[17].mxu1  ;;  %v1617_v32 = vpop.f32.mrb[21].mxu0 }
 0x50d   : > { %v1577_v1 = vadd.f32 %v1576_v35, %v3783_v39  ;;  %v1578_v17 = vpop.f32.mrb[18].mxu1  ;;  %v1619_v52 = vpop.f32.mrb[22].mxu0  ;;  %v1618_v57 = vadd.f32 %v1617_v32, %v3780_v46  ;;  %v1616_v39 = vadd.f32 %v1615_v47, %v3781_v58 }
 0x50e   : > { %v1666_v55 = vadd.f32 %v1975_v12, %v1575_v41  ;;  %v1579_v9 = vpop.f32.mrb[19].mxu1  ;;  %v1620_v62 = vpop.f32.mrb[23].mxu0 }
 0x50f   : > { %v1676_v30 = vadd.f32 %v1674_v50, %v1577_v1  ;;  %v1692_v3 = vadd.f32 %v1665_v40, %v1618_v57 }
 0x510   : > { %v1976_v60 = vmul.f32 -1.442695, %v1666_v55 }
 0x511   : > { %v1977_v63 = vmul.f32 -1.442695, %v1676_v30  ;;  %v1978_v51 = vmul.f32 -1.442695, %v1692_v3 }
 0x512   : > { %2200 = vpow2.f32 %v1976_v60 }
 0x513   : > { %2202 = vpow2.f32 %v1977_v63 }
 0x51c   : > { %v2201_v56 = vpop.eup %2200 }
 0x51d   : > { %v1670_v26 = vadd.f32 1.0, %v2201_v56  ;;  %v2203_v54 = vpop.eup %2202 }
 0x51e   : > { %v1680_v43 = vadd.f32 1.0, %v2203_v54 }
 0x51f   : > { %2204 = vrcp.f32 %v1670_v26 }
 0x520   : > { %2206 = vrcp.f32 %v1680_v43 }
 0x529   : > { %v2205_v37 = vpop.eup %2204 }
 0x52a   : > { %v1683_v2 = vmul.f32 %v2205_v37, %v1616_v39  ;;  %v2207_v22 = vpop.eup %2206 }
 0x52b   : > { %v1688_v5 = vsub.f32 1.0, %v2207_v22  ;;  %v1690_v49 = vmul.f32 %v2207_v22, %v3420_v59 }
 0x52c   : > { %v1686_v4 = vadd.f32 %v1684_v53, %v1683_v2 }
 0x52e   : > { %2208 = vtanh.f32 %v1686_v4 }
 0x52f   : > { %2210 = vpow2.f32 %v1978_v51 }
 0x538   : > { %v2209_v6 = vpop.eup %2208 }
 0x539   : > { %v1689_v61 = vmul.f32 %v2209_v6, %v1688_v5  ;;  %v2211_v7 = vpop.eup %2210 }
 0x53a   : > { %v1696_v58 = vadd.f32 1.0, %v2211_v7 }
 0x53b   : > { %v1691_v46 = vadd.f32 %v1690_v49, %v1689_v61 }
 0x53c   : > { %2212 = vrcp.f32 %v1696_v58 }
 0x53d   : > { %1981 = vst [vmem:[%s2360_s28 + $0x6] sm:$0x3] %v1691_v46 }
 0x546   : > { %v2213_v18 = vpop.eup %2212 }
 0x54b   : > { %v1656_v45 = vpop.f32.mrb[20].mxu1 }
 0x54c   : > { %v1657_v8 = vadd.f32 %v1656_v45, %v3784_v13  ;;  %v1658_v11 = vpop.f32.mrb[21].mxu1  ;;  %v1716_v13 = vrot.slane %v3420_v59, 2 }
 0x54d   : > { %v1659_v14 = vadd.f32 %v1658_v11, %v3785_v28  ;;  %v1660_v15 = vpop.f32.mrb[22].mxu1 }
 0x54e   : > { %v1702_v20 = vadd.f32 %v1700_v19, %v1657_v8  ;;  %v1661_v21 = vpop.f32.mrb[23].mxu1 }
 0x54f   : > { %v1709_v27 = vmul.f32 %v2213_v18, %v1659_v14 }
 0x550   : > { %v1979_v31 = vmul.f32 -1.442695, %v1702_v20 }
 0x551   : > { %v1712_v42 = vadd.f32 %v1710_v33, %v1709_v27 }
 0x552   : > { %2214 = vpow2.f32 %v1979_v31 }
 0x55c   : > { %v2215_v34 = vpop.eup %2214 }
 0x55d   : > { %v1706_v38 = vadd.f32 1.0, %v2215_v34 }
 0x55f   : > { %2216 = vrcp.f32 %v1706_v38 }
 0x560   : > { %2218 = vtanh.f32 %v1712_v42 }
 0x569   : > { %v2217_v44 = vpop.eup %2216 }
 0x56a   : > { %v1714_v23 = vsub.f32 1.0, %v2217_v44  ;;  %v2219_v29 = vpop.eup %2218  ;;  %v1718_v28 = vmul.f32 %v2217_v44, %v1716_v13 }
 0x56c   : > { %v1715_v0 = vmul.f32 %v2219_v29, %v1714_v23 }
 0x56e   : > { %v1719_v24 = vadd.f32 %v1718_v28, %v1715_v0 }
 0x570   : > { %v1722_v36 = vcombine.low %v1691_v46, %v1719_v24  ;;  %1734 = vst [vmem:[%s2375_s13] sm:$0x3] %v1719_v24 }
 0x572   : > { %1980 = vst.sshfl [vmem:[#allocation2] sm:$0x33 pattern:$0x76325410] %v1722_v36 }
 0x573 PF: > { %s16_s18 = sadd.s32 1, %s2315_s18  }
 0x574   : > { %p13_p6 = scmp.ge.s32.totalorder %s16_s18, 4  }
 0x576   :  { %15 = sbr.rel (!%p13_p6) target bundleno = 1 (0x1), region = 97 }

// kernel: skill_recognition_forward.17
= control target key start
LH: loop header
LB: loop body
LE: loop exit
PB: predicated region body
PF: predicated region fallthrough
CT: control target
= control target key end

     0   :  { %13 = vsyncpa [#allocation4], 0  ;;  %s3937_s0 = inlined_call_operand.vmem [shape: f32[8,2,384], index: 0, kind: input, shape index: {}]   ;;  %s3938_s1 = inlined_call_operand.vmem [shape: f32[8,2,384], index: 1, kind: input, shape index: {}]   ;;  %s3939_s2 = inlined_call_operand.vmem [shape: bf16[256,768], index: 2, kind: input, shape index: {}]   ;;  %s3940_s3 = inlined_call_operand.vmem [shape: f32[1,768], index: 3, kind: input, shape index: {}]   ;;  %s3941_s4 = inlined_call_operand.vmem [shape: bf16[256,12], index: 4, kind: input, shape index: {}]   ;;  %s3942_s5 = inlined_call_operand.vmem [shape: f32[1,12], index: 5, kind: input, shape index: {}]   ;;  %s3943_s6 = inlined_call_operand.hbm [shape: f32[2,6], index: 6, kind: output, shape index: {0}]   ;;  %s3944_s7 = inlined_call_operand.hbm [shape: f32[2,6], index: 7, kind: output, shape index: {1}]  }
   0x1   :  { %14 = vsyncpa [#allocation6], 0  ;;  %s2671_s24 = smov 0  }
   0x2 LB: > { %s2677_s25 = sadd.s32 4294967295, %s2624_s24   ;;  %p2028_p0 = scmp.ge.s32.totalorder %s2624_s24, 1  ;;  %s2624_s24 = sphi %s2671_s24, %s20_s24  }
   0x3   : > { %p250_p1 = scmp.lt.s32.totalorder %s2624_s24, 3 }
   0x5   : > { %p251_p2 = pnand %p2028_p0, %p250_p1 }
   0x7   : > { %254 = sbr.rel (%p251_p2) target bundleno = 1804 (0x70c), region = 44 }
   0xe   : > { %s2029_s26 = sshll.u32 %s2677_s25, 2  ;;  %s292_s27 = ssub.s32 1, %s2677_s25 }
   0xf   : > { %p286_p3 = scmp.lt.s32.totalorder %s2029_s26, 7  ;;  %s2031_s28 = sshll.u32 %s292_s27, 2 }
  0x10   : > { %p294_p4 = scmp.lt.s32.totalorder %s2031_s28, 7  ;;  %p2033_p5 = scmp.ne.s32.totalorder %s2677_s25, 0 }
  0x11   : > { %s4196_s26 = smov (!%p286_p3, %s2029_s26), 7  ;;  %v2626_v0 = vmov (!%p2033_p5), 0.0  }
  0x12   : > { %s4198_s28 = smov (!%p294_p4, %s2031_s28), 7  ;;  %s2203_s29 = smul.u32 6, %s4196_s26  ;;  %306 = vst [vmem:[#allocation2] sm:$0xf] (!%p2033_p5), %v2626_v0 }
  0x13   : > { %s2204_s30 = smul.u32 6, %s4198_s28 }
  0x14   : > { %s2686_s10 = scalar_lea.vmem %s3937_s0, %s2203_s29  ;;  %305 = sbr.rel (%p2033_p5) target bundleno = 27 (0x1b), region = 48 }
  0x15   : > { %s2691_s13 = scalar_lea.vmem %s3938_s1, %s2204_s30 }
  0x1b PF: > { %v2697_v1 = vld [vmem:[%s3939_s2 + $0x4] ss:$24 sps:$4 sm:$0xff]   ;;  %v2702_v2 = vld [vmem:[%s3939_s2] ss:$24 sps:$4 sm:$0xff]   ;;  %v2708_v3 = vld [vmem:[%s3939_s2 + $0x34] ss:$24 sps:$4 sm:$0xff]   ;;  %v409_v25 = vlaneseq }
  0x1c   : > { %929 = vmatprep.subr.bf16.mxu0 %v2697_v1  ;;  %v2714_v4 = vld [vmem:[%s3939_s2 + $0x30] ss:$24 sps:$4 sm:$0xff]   ;;  %v2720_v5 = vld [vmem:[%s3939_s2 + $0x64] ss:$24 sps:$4 sm:$0xff]   ;;  %v2726_v6 = vld [vmem:[%s3939_s2 + $0x60] ss:$24 sps:$4 sm:$0xff]  }
  0x1d   : > { %930 = vmatpush1.bf16.msra.mxu0 %v2702_v2  ;;  %v2732_v7 = vld [vmem:[%s3939_s2 + $0x94] ss:$24 sps:$4 sm:$0xff]   ;;  %v2738_v8 = vld [vmem:[%s3939_s2 + $0x90] ss:$24 sps:$4 sm:$0xff]   ;;  %v2754_v11 = vld [vmem:[%s3939_s2 + $0xc4] ss:$24 sps:$4 sm:$0xff]  }
  0x1e   : > { %931 = vmatprep.subr.bf16.mxu0 %v2708_v3  ;;  %v2743_v9 = vld [vmem:[%s3939_s2 + $0xc] ss:$24 sps:$4 sm:$0xff]   ;;  %v2748_v10 = vld [vmem:[%s3939_s2 + $0x8] ss:$24 sps:$4 sm:$0xff]   ;;  %v2760_v12 = vld [vmem:[%s3939_s2 + $0x3c] ss:$24 sps:$4 sm:$0xff]  }
  0x1f   : > { %970 = vmatprep.subr.bf16.mxu1 %v2743_v9  ;;  %v2766_v13 = vld [vmem:[%s3939_s2 + $0x38] ss:$24 sps:$4 sm:$0xff]   ;;  %v2779_v15 = vld [vmem:[%s3939_s2 + $0xf4] ss:$24 sps:$4 sm:$0xff]   ;;  %v2790_v17 = vld [vmem:[%s3939_s2 + $0x68] ss:$24 sps:$4 sm:$0xff]  }
  0x20   : > { %971 = vmatpush1.bf16.msra.mxu1 %v2748_v10  ;;  %v2772_v14 = vld [vmem:[%s3939_s2 + $0xc0] ss:$24 sps:$4 sm:$0xff]   ;;  %v2784_v16 = vld [vmem:[%s3939_s2 + $0x6c] ss:$24 sps:$4 sm:$0xff]   ;;  %4056 = vst [vmem:[#allocation10_spill] sm:$0xff] %v2790_v17  ;;  %v2840_v30 = vshrl.u32 %v409_v25, 7 }
  0x21   : > { %932 = vmatpush1.bf16.msra.mxu0 %v2714_v4  ;;  %972 = vmatprep.subr.bf16.mxu1 %v2760_v12  ;;  %4055 = vst [vmem:[#allocation9_spill] sm:$0xff] %v2784_v16  ;;  %v2796_v18 = vld [vmem:[%s3939_s2 + $0xf0] ss:$24 sps:$4 sm:$0xff]   ;;  %v2802_v19 = vld [vmem:[%s3939_s2 + $0x9c] ss:$24 sps:$4 sm:$0xff]   ;;  %p2156_p6 = scmp.ne.s32.totalorder %s2677_s25, 1 }
  0x22   : > { %933 = vmatprep.subr.bf16.mxu0 %v2720_v5  ;;  %4057 = vst [vmem:[#allocation11_spill] sm:$0xff] %v2802_v19  ;;  %v2808_v20 = vld [vmem:[%s3939_s2 + $0x124] ss:$24 sps:$4 sm:$0xff]   ;;  %v2813_v21 = vld [vmem:[%s3939_s2 + $0x120] ss:$24 sps:$4 sm:$0xff]   ;;  %4061 = vst [vmem:[#allocation15_spill] sm:$0xff] %v2840_v30 }
  0x23   : > { %v2819_v22 = vld [vmem:[%s3939_s2 + $0x98] ss:$24 sps:$4 sm:$0xff]   ;;  %v2627_v23 = vmov 1983009808   ;;  %v2826_v26 = vld [vmem:[%s3939_s2 + $0xcc] ss:$24 sps:$4 sm:$0xff]  }
  0x24   : > { %973 = vmatpush1.bf16.msra.mxu1 %v2766_v13  ;;  %4058 = vst [vmem:[#allocation12_spill] sm:$0xff] %v2819_v22  ;;  %v407_v24 = vunpack.c.l.s4 %v2627_v23  ;;  %4059 = vst [vmem:[#allocation13_spill] sm:$0xff] %v2826_v26  ;;  %v2832_v27 = vld [vmem:[%s3939_s2 + $0x154] ss:$24 sps:$4 sm:$0xff]   ;;  %v2838_v28 = vld [vmem:[%s3939_s2 + $0xc8] ss:$24 sps:$4 sm:$0xff]  }
  0x25   : > { %934 = vmatpush1.bf16.msra.mxu0 %v2726_v6  ;;  %974 = vmatprep.subr.bf16.mxu1 %v2784_v16  ;;  %4060 = vst [vmem:[#allocation14_spill] sm:$0xff] %v2838_v28  ;;  %v2846_v31 = vld [vmem:[%s3939_s2 + $0x150] ss:$24 sps:$4 sm:$0xff]   ;;  %v2852_v32 = vld [vmem:[%s3939_s2 + $0xfc] ss:$24 sps:$4 sm:$0xff]   ;;  %vm1934_vm0 = vcmask (!%p2156_p6), 41984  }
  0x26   : > { %935 = vmatprep.subr.bf16.mxu0 %v2732_v7  ;;  %v408_v29 = vunpack.c.0.s8 %v407_v24  ;;  %4062 = vst [vmem:[#allocation16_spill] sm:$0xff] %v2852_v32  ;;  %v2858_v33 = vld [vmem:[%s3939_s2 + $0x184] ss:$24 sps:$4 sm:$0xff]   ;;  %v2863_v34 = vld [vmem:[%s3939_s2 + $0x180] ss:$24 sps:$4 sm:$0xff]   ;;  %s2628_s9 = smov (!%p2156_p6), 122  }
  0x27   : > { %v2869_v35 = vld [vmem:[%s3939_s2 + $0xf8] ss:$24 sps:$4 sm:$0xff]   ;;  %v2879_v37 = vld [vmem:[%s3939_s2 + $0x12c] ss:$24 sps:$4 sm:$0xff]   ;;  %v2887_v39 = vld [vmem:[#allocation2] sm:$0xf] }
  0x28   : > { %975 = vmatpush1.bf16.msra.mxu1 %v2790_v17  ;;  %4063 = vst [vmem:[#allocation17_spill] sm:$0xff] %v2869_v35  ;;  %v2872_v36 = vsub.s32 %v408_v29, %v2840_v30  ;;  %4065 = vst [vmem:[#allocation19_spill] sm:$0xff] %v2879_v37  ;;  %v2885_v38 = vld [vmem:[%s3939_s2 + $0x1b4] ss:$24 sps:$4 sm:$0xff]   ;;  %v2893_v40 = vld [vmem:[%s3939_s2 + $0x128] ss:$24 sps:$4 sm:$0xff]  }
  0x29   : > { %936 = vmatpush1.bf16.msra.mxu0 %v2738_v8  ;;  %976 = vmatprep.subr.bf16.mxu1 %v2802_v19  ;;  %4066 = vst [vmem:[#allocation20_spill] sm:$0xff] %v2887_v39  ;;  %4067 = vst [vmem:[#allocation21_spill] sm:$0xff] %v2893_v40  ;;  %v2901_v42 = vld [vmem:[%s3939_s2 + $0x1b0] ss:$24 sps:$4 sm:$0xff]   ;;  %v2907_v43 = vld [vmem:[%s3939_s2 + $0x15c] ss:$24 sps:$4 sm:$0xff]  }
  0x2a   : > { %937 = vmatprep.subr.bf16.mxu0 %v2754_v11  ;;  %4064 = vst [vmem:[#allocation18_spill] sm:$0xff] %v2872_v36  ;;  %v412_v41 = vrot.slane %v2887_v39, %v2872_v36  ;;  %4068 = vst [vmem:[#allocation22_spill] sm:$0xff] %v2907_v43  ;;  %v2913_v44 = vld [vmem:[%s3939_s2 + $0x1e4] ss:$24 sps:$4 sm:$0xff]   ;;  %v2918_v46 = vld [vmem:[%s3939_s2 + $0x1e0] ss:$24 sps:$4 sm:$0xff]  }
  0x2b   : > { %v2924_v47 = vld [vmem:[%s3939_s2 + $0x158] ss:$24 sps:$4 sm:$0xff]   ;;  %v2933_v49 = vld [vmem:[%s3939_s2 + $0x18c] ss:$24 sps:$4 sm:$0xff]   ;;  %v2947_v51 = vld [vmem:[%s3939_s2 + $0x188] ss:$24 sps:$4 sm:$0xff]  }
  0x2c   : > { %977 = vmatpush1.bf16.msra.mxu1 %v2819_v22  ;;  %v413_v45 = vcombine.high %v412_v41, %v412_v41  ;;  %4069 = vst [vmem:[#allocation23_spill] sm:$0xff] %v2924_v47  ;;  %4070 = vst [vmem:[#allocation24_spill] sm:$0xff] %v2933_v49  ;;  %v2939_v50 = vld [vmem:[%s3939_s2 + $0x214] ss:$24 sps:$4 sm:$0xff]   ;;  %v2953_v52 = vld [vmem:[%s3939_s2 + $0x210] ss:$24 sps:$4 sm:$0xff]   ;;  %v3063_v39 = vpack.c.bf16 %v412_v41, %v412_v41 }
  0x2d   : > { %938 = vmatpush1.bf16.msra.mxu0 %v2772_v14  ;;  %978 = vmatprep.subr.bf16.mxu1 %v2826_v26  ;;  %4071 = vst [vmem:[#allocation25_spill] sm:$0xff] %v2947_v51  ;;  %v2959_v53 = vld [vmem:[%s3939_s2 + $0x1bc] ss:$24 sps:$4 sm:$0xff]   ;;  %v2970_v55 = vld [vmem:[%s3939_s2 + $0x240] ss:$24 sps:$4 sm:$0xff]  }
  0x2e   : > { %939 = vmatprep.subr.bf16.mxu0 %v2779_v15  ;;  %v2926_v48 = vpack.c.bf16 %v413_v45, %v413_v45  ;;  %4072 = vst [vmem:[#allocation26_spill] sm:$0xff] %v2959_v53  ;;  %v2965_v54 = vld [vmem:[%s3939_s2 + $0x244] ss:$24 sps:$4 sm:$0xff]   ;;  %v2976_v56 = vld [vmem:[%s3939_s2 + $0x1b8] ss:$24 sps:$4 sm:$0xff]  }
  0x2f   : > { %4073 = vst [vmem:[#allocation27_spill] sm:$0xff] %v2976_v56  ;;  %v2983_v57 = vld [vmem:[%s3939_s2 + $0x1ec] ss:$24 sps:$4 sm:$0xff]   ;;  %v2995_v59 = vld [vmem:[%s3939_s2 + $0x1e8] ss:$24 sps:$4 sm:$0xff]  }
  0x30   : > { %979 = vmatpush1.bf16.msra.mxu1 %v2838_v28  ;;  %961 = vmatprep.mubr.bf16.mxu0 %v2926_v48  ;;  %4074 = vst [vmem:[#allocation28_spill] sm:$0xff] %v2983_v57  ;;  %v2989_v58 = vld [vmem:[%s3939_s2 + $0x274] ss:$24 sps:$4 sm:$0xff]   ;;  %4075 = vst [vmem:[#allocation29_spill] sm:$0xff] %v2995_v59  ;;  %v3001_v60 = vld [vmem:[%s3939_s2 + $0x270] ss:$24 sps:$4 sm:$0xff]  }
  0x31   : > { %940 = vmatpush1.bf16.msra.mxu0 %v2796_v18  ;;  %980 = vmatprep.subr.bf16.mxu1 %v2852_v32  ;;  %v3007_v61 = vld [vmem:[%s3939_s2 + $0x21c] ss:$24 sps:$4 sm:$0xff]   ;;  %v3018_v63 = vld [vmem:[%s3939_s2 + $0x2a0] ss:$24 sps:$4 sm:$0xff]   ;;  %v3031_v23 = vld [vmem:[%s3939_s2 + $0x24c] ss:$24 sps:$4 sm:$0xff]  }
  0x32   : > { %941 = vmatprep.subr.bf16.mxu0 %v2808_v20  ;;  %1002 = vmatprep.mubr.bf16.mxu1 %v2926_v48  ;;  %4076 = vst [vmem:[#allocation30_spill] sm:$0xff] %v3007_v61  ;;  %v3013_v62 = vld [vmem:[%s3939_s2 + $0x2a4] ss:$24 sps:$4 sm:$0xff]   ;;  %v3024_v0 = vld [vmem:[%s3939_s2 + $0x218] ss:$24 sps:$4 sm:$0xff]   ;;  %4078 = vst [vmem:[#allocation32_spill] sm:$0xff] %v3031_v23 }
  0x33   : > { %4077 = vst [vmem:[#allocation31_spill] sm:$0xff] %v3024_v0  ;;  %v3037_v24 = vld [vmem:[%s3939_s2 + $0x2d4] ss:$24 sps:$4 sm:$0xff]   ;;  %v3042_v25 = vld [vmem:[%s3939_s2 + $0x2d0] ss:$24 sps:$4 sm:$0xff]  }
  0x34   : > { %981 = vmatpush1.bf16.msra.mxu1 %v2869_v35  ;;  %v3048_v29 = vld [vmem:[%s3939_s2 + $0x248] ss:$24 sps:$4 sm:$0xff]   ;;  %v3055_v45 = vld [vmem:[%s3939_s2 + $0x27c] ss:$24 sps:$4 sm:$0xff]   ;;  %v3081_v41 = vld [vmem:[%s3939_s2 + $0x2ac] ss:$24 sps:$4 sm:$0xff]  }
  0x35   : > { %942 = vmatpush1.bf16.msra.mxu0 %v2813_v21  ;;  %982 = vmatprep.subr.bf16.mxu1 %v2879_v37  ;;  %4079 = vst [vmem:[#allocation33_spill] sm:$0xff] %v3048_v29  ;;  %4080 = vst [vmem:[#allocation34_spill] sm:$0xff] %v3055_v45  ;;  %v3061_v36 = vld [vmem:[%s3939_s2 + $0x14] ss:$24 sps:$4 sm:$0xff]   ;;  %v3068_v30 = vld [vmem:[%s3939_s2 + $0x10] ss:$24 sps:$4 sm:$0xff]  }
  0x36   : > { %943 = vmatprep.subr.bf16.mxu0 %v2832_v27  ;;  %4081 = vst [vmem:[#allocation35_spill] sm:$0xff] %v3068_v30  ;;  %4083 = vst [vmem:[#allocation37_spill] sm:$0xff] %v3081_v41 }
  0x38   : > { %983 = vmatpush1.bf16.msra.mxu1 %v2893_v40 }
  0x39   : > { %944 = vmatpush1.bf16.msra.mxu0 %v2846_v31  ;;  %984 = vmatprep.subr.bf16.mxu1 %v2907_v43 }
  0x3a   : > { %945 = vmatprep.subr.bf16.mxu0 %v2858_v33 }
  0x3c   : > { %985 = vmatpush1.bf16.msra.mxu1 %v2924_v47 }
  0x3d   : > { %946 = vmatpush1.bf16.msra.mxu0 %v2863_v34  ;;  %986 = vmatprep.subr.bf16.mxu1 %v2933_v49 }
  0x3e   : > { %947 = vmatprep.subr.bf16.mxu0 %v2885_v38 }
  0x40   : > { %987 = vmatpush1.bf16.msra.mxu1 %v2947_v51 }
  0x41   : > { %948 = vmatpush1.bf16.msra.mxu0 %v2901_v42  ;;  %988 = vmatprep.subr.bf16.mxu1 %v2959_v53 }
  0x42   : > { %949 = vmatprep.subr.bf16.mxu0 %v2913_v44 }
  0x44   : > { %989 = vmatpush1.bf16.msra.mxu1 %v2976_v56 }
  0x45   : > { %950 = vmatpush1.bf16.msra.mxu0 %v2918_v46  ;;  %990 = vmatprep.subr.bf16.mxu1 %v2983_v57 }
  0x46   : > { %951 = vmatprep.subr.bf16.mxu0 %v2939_v50 }
  0x48   : > { %991 = vmatpush1.bf16.msra.mxu1 %v2995_v59 }
  0x49   : > { %952 = vmatpush1.bf16.msra.mxu0 %v2953_v52  ;;  %992 = vmatprep.subr.bf16.mxu1 %v3007_v61  ;;  %v3106_v61 = vld [vmem:[%s3939_s2 + $0x2dc] ss:$24 sps:$4 sm:$0xff]  }
  0x4a   : > { %953 = vmatprep.subr.bf16.mxu0 %v2965_v54  ;;  %4087 = vst [vmem:[#allocation41_spill] sm:$0xff] %v3106_v61 }
  0x4c   : > { %993 = vmatpush1.bf16.msra.mxu1 %v3024_v0  ;;  %v3100_v0 = vld [vmem:[%s3939_s2 + $0x40] ss:$24 sps:$4 sm:$0xff]  }
  0x4d   : > { %954 = vmatpush1.bf16.msra.mxu0 %v2970_v55  ;;  %994 = vmatprep.subr.bf16.mxu1 %v3031_v23  ;;  %v3074_v23 = vld [vmem:[%s3939_s2 + $0x278] ss:$24 sps:$4 sm:$0xff]   ;;  %4086 = vst [vmem:[#allocation40_spill] sm:$0xff] %v3100_v0 }
  0x4e   : > { %955 = vmatprep.subr.bf16.mxu0 %v2989_v58  ;;  %4082 = vst [vmem:[#allocation36_spill] sm:$0xff] %v3074_v23 }
  0x50   : > { %995 = vmatpush1.bf16.msra.mxu1 %v3048_v29  ;;  %v3087_v29 = vld [vmem:[%s3939_s2 + $0x44] ss:$24 sps:$4 sm:$0xff]  }
  0x51   : > { %956 = vmatpush1.bf16.msra.mxu0 %v3001_v60  ;;  %996 = vmatprep.subr.bf16.mxu1 %v3055_v45  ;;  %4084 = vst [vmem:[#allocation38_spill] sm:$0xff] %v3087_v29  ;;  %v3094_v45 = vld [vmem:[%s3939_s2 + $0x2a8] ss:$24 sps:$4 sm:$0xff]  }
  0x52   : > { %957 = vmatprep.subr.bf16.mxu0 %v3013_v62  ;;  %4085 = vst [vmem:[#allocation39_spill] sm:$0xff] %v3094_v45 }
  0x54   : > { %997 = vmatpush1.bf16.msra.mxu1 %v3074_v23  ;;  %v3112_v23 = vld [vmem:[%s3939_s2 + $0x74] ss:$24 sps:$4 sm:$0xff]  }
  0x55   : > { %958 = vmatpush1.bf16.msra.mxu0 %v3018_v63  ;;  %998 = vmatprep.subr.bf16.mxu1 %v3081_v41  ;;  %4088 = vst [vmem:[#allocation42_spill] sm:$0xff] %v3112_v23 }
  0x56   : > { %959 = vmatprep.subr.bf16.mxu0 %v3037_v24 }
  0x58   : > { %999 = vmatpush1.bf16.msra.mxu1 %v3094_v45 }
  0x59   : > { %960 = vmatpush1.bf16.msra.mxu0 %v3042_v25  ;;  %1000 = vmatprep.subr.bf16.mxu1 %v3106_v61 }
  0x5a   : > { %1011 = vmatprep.subr.bf16.mxu0 %v3061_v36 }
  0x5c   : > { %962 = vmatmul.mubr.bf16.vlgmr.msra.gmra.mrb[0].mxu0 %v3063_v39 }
  0x5d   : > { %1012 = vmatpush1.bf16.msra.mxu0 %v3068_v30  ;;  %1043 = vmatprep.mubr.bf16.mxu0 %v2926_v48  ;;  %v3119_v30 = vld [vmem:[%s3939_s2 + $0x2d8] ss:$24 sps:$4 sm:$0xff]   ;;  %v3132_v48 = vld [vmem:[%s3939_s2 + $0xa4] ss:$24 sps:$4 sm:$0xff]  }
  0x5e   : > { %1013 = vmatprep.subr.bf16.mxu0 %v3087_v29  ;;  %4089 = vst [vmem:[#allocation43_spill] sm:$0xff] %v3119_v30  ;;  %v3125_v29 = vld [vmem:[%s3939_s2 + $0x70] ss:$24 sps:$4 sm:$0xff]   ;;  %4091 = vst [vmem:[#allocation45_spill] sm:$0xff] %v3132_v48  ;;  %1001 = vmatpush1.bf16.msra.mxu1 %v3119_v30 }
  0x5f   : > { %4090 = vst [vmem:[#allocation44_spill] sm:$0xff] %v3125_v29  ;;  %1135 = vmatprep.subr.bf16.mxu1 %v2697_v1 }
  0x61   : > { %1014 = vmatpush1.bf16.msra.mxu0 %v3100_v0  ;;  %v3139_v0 = vld [vmem:[%s3939_s2 + $0xa0] ss:$24 sps:$4 sm:$0xff]   ;;  %1003 = vmatmul.mubr.bf16.vlgmr.msra.gmra.mrb[0].mxu1 %v3063_v39 }
  0x62   : > { %1015 = vmatprep.subr.bf16.mxu0 %v3112_v23  ;;  %4092 = vst [vmem:[#allocation46_spill] sm:$0xff] %v3139_v0  ;;  %v3146_v23 = vld [vmem:[%s3939_s2 + $0xd4] ss:$24 sps:$4 sm:$0xff]   ;;  %1136 = vmatpush1.bf16.msra.mxu1 %v2702_v2 }
  0x63   : > { %4093 = vst [vmem:[#allocation47_spill] sm:$0xff] %v3146_v23  ;;  %1137 = vmatprep.subr.bf16.mxu1 %v2708_v3 }
  0x65   : > { %1016 = vmatpush1.bf16.msra.mxu0 %v3125_v29  ;;  %v3154_v29 = vld [vmem:[%s3939_s2 + $0xd0] ss:$24 sps:$4 sm:$0xff]  }
  0x66   : > { %1017 = vmatprep.subr.bf16.mxu0 %v3132_v48  ;;  %4094 = vst [vmem:[#allocation48_spill] sm:$0xff] %v3154_v29  ;;  %v3161_v48 = vld [vmem:[%s3939_s2 + $0x104] ss:$24 sps:$4 sm:$0xff]   ;;  %1138 = vmatpush1.bf16.msra.mxu1 %v2714_v4 }
  0x67   : > { %4095 = vst [vmem:[#allocation49_spill] sm:$0xff] %v3161_v48  ;;  %1139 = vmatprep.subr.bf16.mxu1 %v2720_v5 }
  0x69   : > { %1018 = vmatpush1.bf16.msra.mxu0 %v3139_v0  ;;  %v3168_v0 = vld [vmem:[%s3939_s2 + $0x100] ss:$24 sps:$4 sm:$0xff]  }
  0x6a   : > { %1019 = vmatprep.subr.bf16.mxu0 %v3146_v23  ;;  %4096 = vst [vmem:[#allocation50_spill] sm:$0xff] %v3168_v0  ;;  %v3175_v23 = vld [vmem:[%s3939_s2 + $0x134] ss:$24 sps:$4 sm:$0xff]   ;;  %1140 = vmatpush1.bf16.msra.mxu1 %v2726_v6 }
  0x6b   : > { %4097 = vst [vmem:[#allocation51_spill] sm:$0xff] %v3175_v23  ;;  %1141 = vmatprep.subr.bf16.mxu1 %v2732_v7 }
  0x6d   : > { %1020 = vmatpush1.bf16.msra.mxu0 %v3154_v29  ;;  %v3182_v29 = vld [vmem:[%s3939_s2 + $0x130] ss:$24 sps:$4 sm:$0xff]  }
  0x6e   : > { %1021 = vmatprep.subr.bf16.mxu0 %v3161_v48  ;;  %4098 = vst [vmem:[#allocation52_spill] sm:$0xff] %v3182_v29  ;;  %v3189_v48 = vld [vmem:[%s3939_s2 + $0x164] ss:$24 sps:$4 sm:$0xff]   ;;  %1142 = vmatpush1.bf16.msra.mxu1 %v2738_v8 }
  0x6f   : > { %4099 = vst [vmem:[#allocation53_spill] sm:$0xff] %v3189_v48  ;;  %1143 = vmatprep.subr.bf16.mxu1 %v2754_v11 }
  0x71   : > { %1022 = vmatpush1.bf16.msra.mxu0 %v3168_v0  ;;  %v3196_v0 = vld [vmem:[%s3939_s2 + $0x160] ss:$24 sps:$4 sm:$0xff]  }
  0x72   : > { %1023 = vmatprep.subr.bf16.mxu0 %v3175_v23  ;;  %4100 = vst [vmem:[#allocation54_spill] sm:$0xff] %v3196_v0  ;;  %v3203_v23 = vld [vmem:[%s3939_s2 + $0x194] ss:$24 sps:$4 sm:$0xff]   ;;  %1144 = vmatpush1.bf16.msra.mxu1 %v2772_v14 }
  0x73   : > { %4101 = vst [vmem:[#allocation55_spill] sm:$0xff] %v3203_v23  ;;  %1145 = vmatprep.subr.bf16.mxu1 %v2779_v15 }
  0x75   : > { %1024 = vmatpush1.bf16.msra.mxu0 %v3182_v29  ;;  %v3210_v29 = vld [vmem:[%s3939_s2 + $0x190] ss:$24 sps:$4 sm:$0xff]  }
  0x76   : > { %1025 = vmatprep.subr.bf16.mxu0 %v3189_v48  ;;  %4102 = vst [vmem:[#allocation56_spill] sm:$0xff] %v3210_v29  ;;  %v3217_v48 = vld [vmem:[%s3939_s2 + $0x1c4] ss:$24 sps:$4 sm:$0xff]   ;;  %1146 = vmatpush1.bf16.msra.mxu1 %v2796_v18 }
  0x77   : > { %4103 = vst [vmem:[#allocation57_spill] sm:$0xff] %v3217_v48  ;;  %1147 = vmatprep.subr.bf16.mxu1 %v2808_v20 }
  0x79   : > { %1026 = vmatpush1.bf16.msra.mxu0 %v3196_v0  ;;  %v3224_v0 = vld [vmem:[%s3939_s2 + $0x1c0] ss:$24 sps:$4 sm:$0xff]  }
  0x7a   : > { %1027 = vmatprep.subr.bf16.mxu0 %v3203_v23  ;;  %4104 = vst [vmem:[#allocation58_spill] sm:$0xff] %v3224_v0  ;;  %v3231_v23 = vld [vmem:[%s3939_s2 + $0x1f4] ss:$24 sps:$4 sm:$0xff]   ;;  %1148 = vmatpush1.bf16.msra.mxu1 %v2813_v21 }
  0x7b   : > { %4105 = vst [vmem:[#allocation59_spill] sm:$0xff] %v3231_v23  ;;  %1149 = vmatprep.subr.bf16.mxu1 %v2832_v27 }
  0x7d   : > { %1028 = vmatpush1.bf16.msra.mxu0 %v3210_v29  ;;  %v3238_v29 = vld [vmem:[%s3939_s2 + $0x1f0] ss:$24 sps:$4 sm:$0xff]  }
  0x7e   : > { %1029 = vmatprep.subr.bf16.mxu0 %v3217_v48  ;;  %4106 = vst [vmem:[#allocation60_spill] sm:$0xff] %v3238_v29  ;;  %v3245_v48 = vld [vmem:[%s3939_s2 + $0x224] ss:$24 sps:$4 sm:$0xff]   ;;  %1150 = vmatpush1.bf16.msra.mxu1 %v2846_v31 }
  0x7f   : > { %4107 = vst [vmem:[#allocation61_spill] sm:$0xff] %v3245_v48  ;;  %1151 = vmatprep.subr.bf16.mxu1 %v2858_v33 }
  0x81   : > { %1030 = vmatpush1.bf16.msra.mxu0 %v3224_v0  ;;  %v3252_v0 = vld [vmem:[%s3939_s2 + $0x220] ss:$24 sps:$4 sm:$0xff]  }
  0x82   : > { %1031 = vmatprep.subr.bf16.mxu0 %v3231_v23  ;;  %4108 = vst [vmem:[#allocation62_spill] sm:$0xff] %v3252_v0  ;;  %v3259_v23 = vld [vmem:[%s3939_s2 + $0x254] ss:$24 sps:$4 sm:$0xff]   ;;  %1152 = vmatpush1.bf16.msra.mxu1 %v2863_v34 }
  0x83   : > { %4109 = vst [vmem:[#allocation63_spill] sm:$0xff] %v3259_v23  ;;  %1153 = vmatprep.subr.bf16.mxu1 %v2885_v38 }
  0x85   : > { %1032 = vmatpush1.bf16.msra.mxu0 %v3238_v29  ;;  %v3266_v29 = vld [vmem:[%s3939_s2 + $0x250] ss:$24 sps:$4 sm:$0xff]  }
  0x86   : > { %1033 = vmatprep.subr.bf16.mxu0 %v3245_v48  ;;  %4110 = vst [vmem:[#allocation64_spill] sm:$0xff] %v3266_v29  ;;  %v3273_v48 = vld [vmem:[%s3939_s2 + $0x284] ss:$24 sps:$4 sm:$0xff]   ;;  %1154 = vmatpush1.bf16.msra.mxu1 %v2901_v42 }
  0x87   : > { %4111 = vst [vmem:[#allocation65_spill] sm:$0xff] %v3273_v48  ;;  %1155 = vmatprep.subr.bf16.mxu1 %v2913_v44 }
  0x89   : > { %1034 = vmatpush1.bf16.msra.mxu0 %v3252_v0  ;;  %v3280_v0 = vld [vmem:[%s3939_s2 + $0x280] ss:$24 sps:$4 sm:$0xff]  }
  0x8a   : > { %1035 = vmatprep.subr.bf16.mxu0 %v3259_v23  ;;  %4112 = vst [vmem:[#allocation66_spill] sm:$0xff] %v3280_v0  ;;  %v3287_v23 = vld [vmem:[%s3939_s2 + $0x2b4] ss:$24 sps:$4 sm:$0xff]   ;;  %1156 = vmatpush1.bf16.msra.mxu1 %v2918_v46 }
  0x8b   : > { %1157 = vmatprep.subr.bf16.mxu1 %v2939_v50 }
  0x8d   : > { %1036 = vmatpush1.bf16.msra.mxu0 %v3266_v29  ;;  %v3294_v29 = vld [vmem:[%s3939_s2 + $0x2b0] ss:$24 sps:$4 sm:$0xff]  }
  0x8e   : > { %1037 = vmatprep.subr.bf16.mxu0 %v3273_v48  ;;  %v3301_v48 = vld [vmem:[%s3939_s2 + $0x2e4] ss:$24 sps:$4 sm:$0xff]   ;;  %1158 = vmatpush1.bf16.msra.mxu1 %v2953_v52 }
  0x8f   : > { %1159 = vmatprep.subr.bf16.mxu1 %v2965_v54 }
  0x91   : > { %1038 = vmatpush1.bf16.msra.mxu0 %v3280_v0  ;;  %v3308_v0 = vld [vmem:[%s3939_s2 + $0x2e0] ss:$24 sps:$4 sm:$0xff]  }
  0x92   : > { %1039 = vmatprep.subr.bf16.mxu0 %v3287_v23  ;;  %1160 = vmatpush1.bf16.msra.mxu1 %v2970_v55 }
  0x93   : > { %1161 = vmatprep.subr.bf16.mxu1 %v2989_v58 }
  0x95   : > { %1040 = vmatpush1.bf16.msra.mxu0 %v3294_v29 }
  0x96   : > { %1041 = vmatprep.subr.bf16.mxu0 %v3301_v48  ;;  %1162 = vmatpush1.bf16.msra.mxu1 %v3001_v60 }
  0x97   : > { %1163 = vmatprep.subr.bf16.mxu1 %v3013_v62 }
  0x99   : > { %1042 = vmatpush1.bf16.msra.mxu0 %v3308_v0 }
  0x9a   : > { %1176 = vmatprep.subr.bf16.mxu0 %v2743_v9  ;;  %1164 = vmatpush1.bf16.msra.mxu1 %v3018_v63 }
  0x9b   : > { %1165 = vmatprep.subr.bf16.mxu1 %v3037_v24 }
  0x9c   : > { %1044 = vmatmul.mubr.bf16.vlgmr.msra.gmra.mrb[4].mxu0 %v3063_v39  ;;  %v4113_v39 = vld [vmem:[#allocation30_spill] sm:$0xff] }
  0x9d   : > { %1177 = vmatpush1.bf16.msra.mxu0 %v2748_v10 }
  0x9e   : > { %1178 = vmatprep.subr.bf16.mxu0 %v2760_v12  ;;  %1166 = vmatpush1.bf16.msra.mxu1 %v3042_v25 }
  0x9f   : > { %1217 = vmatprep.subr.bf16.mxu1 %v3061_v36 }
  0xa1   : > { %1179 = vmatpush1.bf16.msra.mxu0 %v2766_v13 }
  0xa2   : > { %1180 = vmatprep.subr.bf16.mxu0 %v2784_v16 }
  0xa5   : > { %1181 = vmatpush1.bf16.msra.mxu0 %v2790_v17 }
  0xa6   : > { %1182 = vmatprep.subr.bf16.mxu0 %v2802_v19 }
  0xa9   : > { %1183 = vmatpush1.bf16.msra.mxu0 %v2819_v22 }
  0xaa   : > { %1184 = vmatprep.subr.bf16.mxu0 %v2826_v26 }
  0xad   : > { %1185 = vmatpush1.bf16.msra.mxu0 %v2838_v28 }
  0xae   : > { %1186 = vmatprep.subr.bf16.mxu0 %v2852_v32 }
  0xb1   : > { %1187 = vmatpush1.bf16.msra.mxu0 %v2869_v35 }
  0xb2   : > { %1188 = vmatprep.subr.bf16.mxu0 %v2879_v37  ;;  %v4114_v37 = vld [vmem:[#allocation31_spill] sm:$0xff] }
  0xb5   : > { %1189 = vmatpush1.bf16.msra.mxu0 %v2893_v40 }
  0xb6   : > { %1190 = vmatprep.subr.bf16.mxu0 %v2907_v43  ;;  %v4115_v43 = vld [vmem:[#allocation32_spill] sm:$0xff] }
  0xb9   : > { %1191 = vmatpush1.bf16.msra.mxu0 %v2924_v47  ;;  %v4116_v47 = vld [vmem:[#allocation33_spill] sm:$0xff] }
  0xba   : > { %1192 = vmatprep.subr.bf16.mxu0 %v2933_v49  ;;  %v4117_v49 = vld [vmem:[#allocation34_spill] sm:$0xff] }
  0xbd   : > { %1193 = vmatpush1.bf16.msra.mxu0 %v2947_v51  ;;  %v4118_v51 = vld [vmem:[#allocation36_spill] sm:$0xff] }
  0xbe   : > { %1194 = vmatprep.subr.bf16.mxu0 %v2959_v53 }
  0xc1   : > { %1195 = vmatpush1.bf16.msra.mxu0 %v2976_v56 }
  0xc2   : > { %1196 = vmatprep.subr.bf16.mxu0 %v2983_v57 }
  0xc5   : > { %1197 = vmatpush1.bf16.msra.mxu0 %v2995_v59 }
  0xc6   : > { %1198 = vmatprep.subr.bf16.mxu0 %v4113_v39  ;;  %v4119_v39 = vld [vmem:[#allocation15_spill] sm:$0xff] }
  0xc9   : > { %1199 = vmatpush1.bf16.msra.mxu0 %v4114_v37  ;;  %v421_v37 = vsub.s32 0, %v4119_v39 }
  0xca   : > { %1200 = vmatprep.subr.bf16.mxu0 %v4115_v43 }
  0xcd   : > { %1201 = vmatpush1.bf16.msra.mxu0 %v4116_v47  ;;  %v403_v47 = vld [vmem:[%s3940_s3] sm:$0x3f] }
  0xce   : > { %1202 = vmatprep.subr.bf16.mxu0 %v4117_v49  ;;  %v425_v49 = vsub.s32 1, %v4119_v39  ;;  %v3360_v43 = vrot.slane %v403_v47, %v421_v37 }
  0xd0   : > { %4120 = vst [vmem:[#allocation15_spill] sm:$0xff] %v3360_v43 }
  0xd1   : > { %1203 = vmatpush1.bf16.msra.mxu0 %v4118_v51  ;;  %v3362_v51 = vrot.slane %v403_v47, %v425_v49 }
  0xd2   : > { %1204 = vmatprep.subr.bf16.mxu0 %v3081_v41  ;;  %v1052_v41 = vld [vmem:[%s2686_s10] sm:$0x3f] }
  0xd3   : > { %4121 = vst [vmem:[#allocation67_spill] sm:$0xff] %v3362_v51 }
  0xd5   : > { %1205 = vmatpush1.bf16.msra.mxu0 %v3094_v45 }
  0xd6   : > { %1206 = vmatprep.subr.bf16.mxu0 %v3106_v61 }
  0xd9   : > { %1207 = vmatpush1.bf16.msra.mxu0 %v3119_v30 }
  0xda   : > { %1342 = vmatprep.subr.bf16.mxu0 %v2697_v1  ;;  %v1063_v1 = vrot.slane %v1052_v41, 2 }
 0x12f   : > { %v963_v45 = vpop.f32.mrb[0].mxu0 }
 0x130   : > { %v964_v61 = vadd.f32 %v963_v45, %v3360_v43  ;;  %v965_v59 = vpop.f32.mrb[1].mxu0  ;;  %v433_v45 = vsub.s32 3, %v4119_v39  ;;  %v4124_v43 = vld [vmem:[#allocation20_spill] sm:$0xff] }
 0x131   : > { %v966_v30 = vadd.f32 %v965_v59, %v3362_v51  ;;  %v967_v57 = vpop.f32.mrb[2].mxu0  ;;  %v429_v59 = vsub.s32 2, %v4119_v39 }
 0x132   : > { %v1055_v56 = vadd.f32 %v1052_v41, %v964_v61  ;;  %v968_v53 = vpop.f32.mrb[3].mxu0  ;;  %v3369_v57 = vrot.slane %v403_v47, %v433_v45  ;;  %v2130_v61 = vld [vmem:[%s2691_s13 + $0x12] sm:$0x3f] }
 0x133   : > { %v1065_v35 = vadd.f32 %v1063_v1, %v966_v30  ;;  %v3371_v53 = vrot.slane %v403_v47, %v429_v59 }
 0x134   : > { %v2131_v40 = vmul.f32 -1.442695, %v1055_v56  ;;  %v1004_v28 = vpop.f32.mrb[0].mxu1  ;;  %4122 = vst [vmem:[#allocation68_spill] sm:$0xff] %v3369_v57 }
 0x135   : > { %v2132_v32 = vmul.f32 -1.442695, %v1065_v35  ;;  %v1006_v37 = vpop.f32.mrb[1].mxu1  ;;  %4123 = vst [vmem:[#allocation69_spill] sm:$0xff] %v3371_v53  ;;  %v1005_v56 = vadd.f32 %v1004_v28, %v3371_v53  ;;  %v437_v28 = vsub.s32 4, %v4119_v39 }
 0x136   : > { %2374 = vpow2.f32 %v2131_v40  ;;  %v1008_v49 = vpop.f32.mrb[2].mxu1  ;;  %v1007_v35 = vadd.f32 %v1006_v37, %v3369_v57 }
 0x137   : > { %2376 = vpow2.f32 %v2132_v32  ;;  %v1009_v26 = vpop.f32.mrb[3].mxu1  ;;  %v1073_v32 = vrot.slane %v1052_v41, 4  ;;  %v441_v41 = vsub.s32 5, %v4119_v39 }
 0x138   : > { %v1081_v1 = vadd.f32 %v2130_v61, %v1007_v35  ;;  %v3379_v35 = vrot.slane %v403_v47, %v437_v28 }
 0x13a   : > { %v2133_v51 = vmul.f32 -1.442695, %v1081_v1  ;;  %4125 = vst [vmem:[#allocation20_spill] sm:$0xff] %v3379_v35 }
 0x140   : > { %v2375_v22 = vpop.eup %2374 }
 0x141   : > { %v1059_v19 = vadd.f32 1.0, %v2375_v22  ;;  %v2377_v30 = vpop.eup %2376 }
 0x142   : > { %v1069_v40 = vadd.f32 1.0, %v2377_v30 }
 0x143   : > { %2378 = vrcp.f32 %v1059_v19 }
 0x144   : > { %2380 = vrcp.f32 %v1069_v40  ;;  %v3381_v40 = vrot.slane %v403_v47, %v441_v41  ;;  %v1105_v47 = vrot.slane %v4124_v43, 2 }
 0x146   : > { %4126 = vst [vmem:[#allocation70_spill] sm:$0xff] %v3381_v40 }
 0x14d   : > { %v2379_v26 = vpop.eup %2378 }
 0x14e   : > { %v1072_v22 = vmul.f32 %v2379_v26, %v1005_v56  ;;  %v2381_v19 = vpop.eup %2380  ;;  %v1089_v56 = vrot.slane %v2130_v61, 2 }
 0x14f   : > { %v1077_v45 = vsub.f32 1.0, %v2381_v19  ;;  %v1079_v17 = vmul.f32 %v2381_v19, %v4124_v43  ;;  %v4128_v43 = vld [vmem:[#allocation35_spill] sm:$0xff] }
 0x150   : > { %v1075_v49 = vadd.f32 %v1073_v32, %v1072_v22 }
 0x152   : > { %2382 = vtanh.f32 %v1075_v49 }
 0x153   : > { %2384 = vpow2.f32 %v2133_v51 }
 0x15c   : > { %v2383_v59 = vpop.eup %2382 }
 0x15d   : > { %v1078_v16 = vmul.f32 %v2383_v59, %v1077_v45  ;;  %v2385_v37 = vpop.eup %2384  ;;  %v1099_v45 = vrot.slane %v2130_v61, 4 }
 0x15e   : > { %v1085_v57 = vadd.f32 1.0, %v2385_v37 }
 0x15f   : > { %v1080_v30 = vadd.f32 %v1079_v17, %v1078_v16 }
 0x160   : > { %2386 = vrcp.f32 %v1085_v57 }
 0x16a   : > { %v2387_v32 = vpop.eup %2386 }
 0x16f   : > { %v1045_v51 = vpop.f32.mrb[4].mxu0 }
 0x170   : > { %v1046_v26 = vadd.f32 %v1045_v51, %v3379_v35  ;;  %v1047_v1 = vpop.f32.mrb[5].mxu0 }
 0x171   : > { %v1048_v22 = vadd.f32 %v1047_v1, %v3381_v40  ;;  %v1049_v49 = vpop.f32.mrb[6].mxu0 }
 0x172   : > { %v1091_v16 = vadd.f32 %v1089_v56, %v1046_v26  ;;  %v1050_v17 = vpop.f32.mrb[7].mxu0 }
 0x173   : > { %v1098_v57 = vmul.f32 %v2387_v32, %v1048_v22  ;;  %v4127_v32 = vld [vmem:[#allocation18_spill] sm:$0xff]  ;;  %v4132_v17 = vld [vmem:[#allocation44_spill] sm:$0xff] }
 0x174   : > { %v2134_v19 = vmul.f32 -1.442695, %v1091_v16 }
 0x175   : > { %v1101_v37 = vadd.f32 %v1099_v45, %v1098_v57  ;;  %v4133_v57 = vld [vmem:[#allocation45_spill] sm:$0xff]  ;;  %v4166_v45 = vld [vmem:[#allocation23_spill] sm:$0xff] }
 0x176   : > { %2388 = vpow2.f32 %v2134_v19  ;;  %v4134_v19 = vld [vmem:[#allocation46_spill] sm:$0xff] }
 0x180   : > { %v2389_v39 = vpop.eup %2388 }
 0x181   : > { %v1095_v59 = vadd.f32 1.0, %v2389_v39  ;;  %v4167_v39 = vld [vmem:[#allocation24_spill] sm:$0xff] }
 0x183   : > { %2390 = vrcp.f32 %v1095_v59  ;;  %v4168_v59 = vld [vmem:[#allocation25_spill] sm:$0xff] }
 0x184   : > { %2392 = vtanh.f32 %v1101_v37  ;;  %v4169_v37 = vld [vmem:[#allocation26_spill] sm:$0xff] }
 0x18d   : > { %v2391_v28 = vpop.eup %2390 }
 0x18e   : > { %v1103_v41 = vsub.f32 1.0, %v2391_v28  ;;  %v2393_v51 = vpop.eup %2392  ;;  %v1107_v35 = vmul.f32 %v2391_v28, %v1105_v47  ;;  %v4170_v47 = vld [vmem:[#allocation27_spill] sm:$0xff]  ;;  %v4171_v28 = vld [vmem:[#allocation28_spill] sm:$0xff] }
 0x190   : > { %v1104_v53 = vmul.f32 %v2393_v51, %v1103_v41  ;;  %v4172_v41 = vld [vmem:[#allocation29_spill] sm:$0xff]  ;;  %v4173_v51 = vld [vmem:[#allocation30_spill] sm:$0xff] }
 0x192   : > { %v1108_v1 = vadd.f32 %v1107_v35, %v1104_v53  ;;  %v4129_v53 = vld [vmem:[#allocation38_spill] sm:$0xff] }
 0x193   : > { %v4131_v35 = vld [vmem:[#allocation42_spill] sm:$0xff] }
 0x194   : > { %v1111_v49 = vcombine.low %v1080_v30, %v1108_v1  ;;  %v4130_v30 = vld [vmem:[#allocation40_spill] sm:$0xff]  ;;  %v4174_v1 = vld [vmem:[#allocation31_spill] sm:$0xff] }
 0x196   : > { %2135 = vst.sshfl [vmem:[#allocation2] sm:$0x33 pattern:$0x76325410] %v1111_v49  ;;  %v4175_v49 = vld [vmem:[#allocation32_spill] sm:$0xff] }
 0x19d   : > { %v3386_v56 = vld [vmem:[#allocation2] sm:$0xf] }
 0x19e   : > { %v1129_v61 = vrot.slane %v3386_v56, %v4127_v32 }
 0x1a0   : > { %v1130_v26 = vcombine.high %v1129_v61, %v1129_v61  ;;  %v3390_v16 = vpack.c.bf16 %v1129_v61, %v1129_v61  ;;  %v4176_v61 = vld [vmem:[#allocation33_spill] sm:$0xff] }
 0x1a2   : > { %v1134_v22 = vpack.c.bf16 %v1130_v26, %v1130_v26  ;;  %v4177_v26 = vld [vmem:[#allocation34_spill] sm:$0xff] }
 0x1a4   : > { %1167 = vmatprep.mubr.bf16.mxu1 %v1134_v22  ;;  %1208 = vmatprep.mubr.bf16.mxu0 %v1134_v22 }
 0x1a5   : > { %1168 = vmatmul.mubr.bf16.vlgmr.msra.gmra.mrb[4].mxu1 %v3390_v16  ;;  %1209 = vmatmul.mubr.bf16.vlgmr.msra.gmra.mrb[8].mxu0 %v3390_v16 }
 0x1a6   : > { %1218 = vmatpush1.bf16.msra.mxu1 %v4128_v43  ;;  %1249 = vmatprep.mubr.bf16.mxu1 %v1134_v22  ;;  %v4178_v22 = vld [vmem:[#allocation36_spill] sm:$0xff] }
 0x1a7   : > { %1219 = vmatprep.subr.bf16.mxu1 %v4129_v53  ;;  %1343 = vmatpush1.bf16.msra.mxu0 %v2702_v2  ;;  %v4135_v2 = vld [vmem:[#allocation47_spill] sm:$0xff] }
 0x1a8   : > { %1344 = vmatprep.subr.bf16.mxu0 %v2708_v3  ;;  %v4136_v3 = vld [vmem:[#allocation48_spill] sm:$0xff] }
 0x1aa   : > { %1220 = vmatpush1.bf16.msra.mxu1 %v4130_v30 }
 0x1ab   : > { %1221 = vmatprep.subr.bf16.mxu1 %v4131_v35  ;;  %1345 = vmatpush1.bf16.msra.mxu0 %v2714_v4  ;;  %v4137_v4 = vld [vmem:[#allocation49_spill] sm:$0xff] }
 0x1ac   : > { %1346 = vmatprep.subr.bf16.mxu0 %v2720_v5  ;;  %v4138_v5 = vld [vmem:[#allocation50_spill] sm:$0xff] }
 0x1ae   : > { %1222 = vmatpush1.bf16.msra.mxu1 %v4132_v17 }
 0x1af   : > { %1223 = vmatprep.subr.bf16.mxu1 %v4133_v57  ;;  %1347 = vmatpush1.bf16.msra.mxu0 %v2726_v6  ;;  %v4139_v6 = vld [vmem:[#allocation51_spill] sm:$0xff] }
 0x1b0   : > { %1348 = vmatprep.subr.bf16.mxu0 %v2732_v7  ;;  %v4140_v7 = vld [vmem:[#allocation52_spill] sm:$0xff] }
 0x1b2   : > { %1224 = vmatpush1.bf16.msra.mxu1 %v4134_v19 }
 0x1b3   : > { %1225 = vmatprep.subr.bf16.mxu1 %v4135_v2  ;;  %1349 = vmatpush1.bf16.msra.mxu0 %v2738_v8  ;;  %v4141_v8 = vld [vmem:[#allocation53_spill] sm:$0xff] }
 0x1b4   : > { %1350 = vmatprep.subr.bf16.mxu0 %v2754_v11  ;;  %v4142_v11 = vld [vmem:[#allocation54_spill] sm:$0xff] }
 0x1b6   : > { %1226 = vmatpush1.bf16.msra.mxu1 %v4136_v3 }
 0x1b7   : > { %1227 = vmatprep.subr.bf16.mxu1 %v4137_v4  ;;  %1351 = vmatpush1.bf16.msra.mxu0 %v2772_v14  ;;  %v4143_v14 = vld [vmem:[#allocation55_spill] sm:$0xff] }
 0x1b8   : > { %1352 = vmatprep.subr.bf16.mxu0 %v2779_v15  ;;  %v4144_v15 = vld [vmem:[#allocation56_spill] sm:$0xff] }
 0x1ba   : > { %1228 = vmatpush1.bf16.msra.mxu1 %v4138_v5 }
 0x1bb   : > { %1229 = vmatprep.subr.bf16.mxu1 %v4139_v6  ;;  %1353 = vmatpush1.bf16.msra.mxu0 %v2796_v18  ;;  %v4145_v18 = vld [vmem:[#allocation57_spill] sm:$0xff] }
 0x1bc   : > { %1354 = vmatprep.subr.bf16.mxu0 %v2808_v20  ;;  %v4146_v20 = vld [vmem:[#allocation58_spill] sm:$0xff] }
 0x1be   : > { %1230 = vmatpush1.bf16.msra.mxu1 %v4140_v7 }
 0x1bf   : > { %1231 = vmatprep.subr.bf16.mxu1 %v4141_v8  ;;  %1355 = vmatpush1.bf16.msra.mxu0 %v2813_v21  ;;  %v4147_v21 = vld [vmem:[#allocation59_spill] sm:$0xff] }
 0x1c0   : > { %1356 = vmatprep.subr.bf16.mxu0 %v2832_v27  ;;  %v4148_v27 = vld [vmem:[#allocation60_spill] sm:$0xff] }
 0x1c2   : > { %1232 = vmatpush1.bf16.msra.mxu1 %v4142_v11 }
 0x1c3   : > { %1233 = vmatprep.subr.bf16.mxu1 %v4143_v14  ;;  %1357 = vmatpush1.bf16.msra.mxu0 %v2846_v31  ;;  %v4149_v31 = vld [vmem:[#allocation61_spill] sm:$0xff] }
 0x1c4   : > { %1358 = vmatprep.subr.bf16.mxu0 %v2858_v33  ;;  %v4150_v33 = vld [vmem:[#allocation62_spill] sm:$0xff] }
 0x1c6   : > { %1234 = vmatpush1.bf16.msra.mxu1 %v4144_v15 }
 0x1c7   : > { %1235 = vmatprep.subr.bf16.mxu1 %v4145_v18  ;;  %1359 = vmatpush1.bf16.msra.mxu0 %v2863_v34  ;;  %v4151_v34 = vld [vmem:[#allocation63_spill] sm:$0xff] }
 0x1c8   : > { %1360 = vmatprep.subr.bf16.mxu0 %v2885_v38  ;;  %v4152_v38 = vld [vmem:[#allocation64_spill] sm:$0xff] }
 0x1ca   : > { %1236 = vmatpush1.bf16.msra.mxu1 %v4146_v20 }
 0x1cb   : > { %1237 = vmatprep.subr.bf16.mxu1 %v4147_v21  ;;  %1361 = vmatpush1.bf16.msra.mxu0 %v2901_v42  ;;  %v4153_v42 = vld [vmem:[#allocation65_spill] sm:$0xff] }
 0x1cc   : > { %1362 = vmatprep.subr.bf16.mxu0 %v2913_v44  ;;  %v4154_v44 = vld [vmem:[#allocation66_spill] sm:$0xff] }
 0x1ce   : > { %1238 = vmatpush1.bf16.msra.mxu1 %v4148_v27 }
 0x1cf   : > { %1239 = vmatprep.subr.bf16.mxu1 %v4149_v31  ;;  %1363 = vmatpush1.bf16.msra.mxu0 %v2918_v46  ;;  %v4155_v46 = vld [vmem:[#allocation9_spill] sm:$0xff] }
 0x1d0   : > { %1364 = vmatprep.subr.bf16.mxu0 %v2939_v50  ;;  %v4156_v50 = vld [vmem:[#allocation10_spill] sm:$0xff] }
 0x1d2   : > { %1240 = vmatpush1.bf16.msra.mxu1 %v4150_v33 }
 0x1d3   : > { %1241 = vmatprep.subr.bf16.mxu1 %v4151_v34  ;;  %1365 = vmatpush1.bf16.msra.mxu0 %v2953_v52  ;;  %v4157_v52 = vld [vmem:[#allocation11_spill] sm:$0xff] }
 0x1d4   : > { %1366 = vmatprep.subr.bf16.mxu0 %v2965_v54  ;;  %v4158_v54 = vld [vmem:[#allocation12_spill] sm:$0xff] }
 0x1d6   : > { %1242 = vmatpush1.bf16.msra.mxu1 %v4152_v38 }
 0x1d7   : > { %1243 = vmatprep.subr.bf16.mxu1 %v4153_v42  ;;  %1367 = vmatpush1.bf16.msra.mxu0 %v2970_v55  ;;  %v4160_v55 = vld [vmem:[#allocation14_spill] sm:$0xff] }
 0x1d8   : > { %1368 = vmatprep.subr.bf16.mxu0 %v2989_v58  ;;  %v4161_v58 = vld [vmem:[#allocation16_spill] sm:$0xff] }
 0x1da   : > { %1244 = vmatpush1.bf16.msra.mxu1 %v4154_v44 }
 0x1db   : > { %1245 = vmatprep.subr.bf16.mxu1 %v3287_v23  ;;  %1369 = vmatpush1.bf16.msra.mxu0 %v3001_v60  ;;  %v4162_v60 = vld [vmem:[#allocation17_spill] sm:$0xff] }
 0x1dc   : > { %1370 = vmatprep.subr.bf16.mxu0 %v3013_v62 }
 0x1de   : > { %1246 = vmatpush1.bf16.msra.mxu1 %v3294_v29 }
 0x1df   : > { %1247 = vmatprep.subr.bf16.mxu1 %v3301_v48  ;;  %1371 = vmatpush1.bf16.msra.mxu0 %v3018_v63 }
 0x1e0   : > { %1372 = vmatprep.subr.bf16.mxu0 %v3037_v24 }
 0x1e2   : > { %1248 = vmatpush1.bf16.msra.mxu1 %v3308_v0 }
 0x1e3   : > { %1383 = vmatprep.subr.bf16.mxu1 %v2743_v9  ;;  %1373 = vmatpush1.bf16.msra.mxu0 %v3042_v25  ;;  %v4159_v9 = vld [vmem:[#allocation13_spill] sm:$0xff] }
 0x1e4   : > { %1424 = vmatprep.subr.bf16.mxu0 %v3061_v36 }
 0x1e5   : > { %1250 = vmatmul.mubr.bf16.vlgmr.msra.gmra.mrb[8].mxu1 %v3390_v16  ;;  %v4179_v16 = vld [vmem:[#allocation37_spill] sm:$0xff] }
 0x1e6   : > { %1384 = vmatpush1.bf16.msra.mxu1 %v2748_v10  ;;  %v4163_v10 = vld [vmem:[#allocation19_spill] sm:$0xff] }
 0x1e7   : > { %1385 = vmatprep.subr.bf16.mxu1 %v2760_v12  ;;  %v4164_v12 = vld [vmem:[#allocation21_spill] sm:$0xff] }
 0x1ea   : > { %1386 = vmatpush1.bf16.msra.mxu1 %v2766_v13  ;;  %v4165_v13 = vld [vmem:[#allocation22_spill] sm:$0xff] }
 0x1eb   : > { %1387 = vmatprep.subr.bf16.mxu1 %v4155_v46  ;;  %v4180_v46 = vld [vmem:[#allocation39_spill] sm:$0xff] }
 0x1ee   : > { %1388 = vmatpush1.bf16.msra.mxu1 %v4156_v50  ;;  %v4181_v50 = vld [vmem:[#allocation41_spill] sm:$0xff] }
 0x1ef   : > { %1389 = vmatprep.subr.bf16.mxu1 %v4157_v52  ;;  %v4182_v52 = vld [vmem:[#allocation43_spill] sm:$0xff] }
 0x1f2   : > { %1390 = vmatpush1.bf16.msra.mxu1 %v4158_v54  ;;  %v2454_v54 = vld [vmem:[%s3939_s2 + $0x4] ss:$24 sps:$4 sm:$0xff]  }
 0x1f3   : > { %1391 = vmatprep.subr.bf16.mxu1 %v4159_v9  ;;  %v2136_v9 = vld [vmem:[%s2686_s10 + $0x6] sm:$0x3f] }
 0x1f6   : > { %1392 = vmatpush1.bf16.msra.mxu1 %v4160_v55 }
 0x1f7   : > { %1393 = vmatprep.subr.bf16.mxu1 %v4161_v58 }
 0x1fa   : > { %1394 = vmatpush1.bf16.msra.mxu1 %v4162_v60  ;;  %v4183_v60 = vld [vmem:[#allocation15_spill] sm:$0xff] }
 0x1fb   : > { %1395 = vmatprep.subr.bf16.mxu1 %v4163_v10 }
 0x1fe   : > { %1396 = vmatpush1.bf16.msra.mxu1 %v4164_v12 }
 0x1ff   : > { %1397 = vmatprep.subr.bf16.mxu1 %v4165_v13 }
 0x202   : > { %1398 = vmatpush1.bf16.msra.mxu1 %v4166_v45  ;;  %v4184_v45 = vld [vmem:[#allocation67_spill] sm:$0xff] }
 0x203   : > { %1399 = vmatprep.subr.bf16.mxu1 %v4167_v39 }
 0x206   : > { %1400 = vmatpush1.bf16.msra.mxu1 %v4168_v59  ;;  %v1270_v59 = vrot.slane %v2136_v9, 2 }
 0x207   : > { %1401 = vmatprep.subr.bf16.mxu1 %v4169_v37 }
 0x20a   : > { %1402 = vmatpush1.bf16.msra.mxu1 %v4170_v47 }
 0x20b   : > { %1403 = vmatprep.subr.bf16.mxu1 %v4171_v28 }
 0x20e   : > { %1404 = vmatpush1.bf16.msra.mxu1 %v4172_v41 }
 0x20f   : > { %1405 = vmatprep.subr.bf16.mxu1 %v4173_v51 }
 0x212   : > { %1406 = vmatpush1.bf16.msra.mxu1 %v4174_v1 }
 0x213   : > { %1407 = vmatprep.subr.bf16.mxu1 %v4175_v49 }
 0x216   : > { %1408 = vmatpush1.bf16.msra.mxu1 %v4176_v61 }
 0x217   : > { %1409 = vmatprep.subr.bf16.mxu1 %v4177_v26 }
 0x21a   : > { %1410 = vmatpush1.bf16.msra.mxu1 %v4178_v22 }
 0x21b   : > { %1411 = vmatprep.subr.bf16.mxu1 %v4179_v16 }
 0x21e   : > { %1412 = vmatpush1.bf16.msra.mxu1 %v4180_v46 }
 0x21f   : > { %1413 = vmatprep.subr.bf16.mxu1 %v4181_v50 }
 0x222   : > { %1414 = vmatpush1.bf16.msra.mxu1 %v4182_v52  ;;  %v4185_v52 = vld [vmem:[#allocation68_spill] sm:$0xff] }
 0x223   : > { %1549 = vmatprep.subr.bf16.mxu1 %v2454_v54 }
 0x278   : > { %v1169_v55 = vpop.f32.mrb[4].mxu1  ;;  %v1210_v58 = vpop.f32.mrb[8].mxu0 }
 0x279   : > { %v1170_v10 = vadd.f32 %v1169_v55, %v4183_v60  ;;  %v1171_v12 = vpop.f32.mrb[5].mxu1  ;;  %v1212_v13 = vpop.f32.mrb[9].mxu0 }
 0x27a   : > { %v1172_v39 = vadd.f32 %v1171_v12, %v4184_v45  ;;  %v1173_v37 = vpop.f32.mrb[6].mxu1  ;;  %v1214_v47 = vpop.f32.mrb[10].mxu0  ;;  %v1213_v50 = vadd.f32 %v1212_v13, %v4185_v52  ;;  %v4186_v12 = vld [vmem:[#allocation69_spill] sm:$0xff] }
 0x27b   : > { %v1262_v28 = vadd.f32 %v2136_v9, %v1170_v10  ;;  %v1174_v41 = vpop.f32.mrb[7].mxu1  ;;  %v1215_v51 = vpop.f32.mrb[11].mxu0  ;;  %v1211_v45 = vadd.f32 %v1210_v58, %v4186_v12  ;;  %v1280_v37 = vrot.slane %v2136_v9, 4  ;;  %v2137_v47 = vld [vmem:[%s2691_s13 + $0xc] sm:$0x3f] }
 0x27c   : > { %v1272_v49 = vadd.f32 %v1270_v59, %v1172_v39  ;;  %v1288_v41 = vadd.f32 %v2137_v47, %v1213_v50  ;;  %v1296_v9 = vrot.slane %v2137_v47, 2 }
 0x27d   : > { %v2138_v1 = vmul.f32 -1.442695, %v1262_v28 }
 0x27e   : > { %v2139_v61 = vmul.f32 -1.442695, %v1272_v49  ;;  %v2140_v39 = vmul.f32 -1.442695, %v1288_v41 }
 0x27f   : > { %2394 = vpow2.f32 %v2138_v1 }
 0x280   : > { %2396 = vpow2.f32 %v2139_v61 }
 0x289   : > { %v2395_v26 = vpop.eup %2394 }
 0x28a   : > { %v1266_v54 = vadd.f32 1.0, %v2395_v26  ;;  %v2397_v55 = vpop.eup %2396 }
 0x28b   : > { %v1276_v60 = vadd.f32 1.0, %v2397_v55  ;;  %v4187_v55 = vld [vmem:[#allocation20_spill] sm:$0xff] }
 0x28c   : > { %2398 = vrcp.f32 %v1266_v54 }
 0x28d   : > { %2400 = vrcp.f32 %v1276_v60 }
 0x296   : > { %v2399_v10 = vpop.eup %2398 }
 0x297   : > { %v1279_v46 = vmul.f32 %v2399_v10, %v1211_v45  ;;  %v2401_v59 = vpop.eup %2400 }
 0x298   : > { %v1284_v51 = vsub.f32 1.0, %v2401_v59  ;;  %v1286_v61 = vmul.f32 %v2401_v59, %v3386_v56 }
 0x299   : > { %v1282_v28 = vadd.f32 %v1280_v37, %v1279_v46 }
 0x29b   : > { %2402 = vtanh.f32 %v1282_v28 }
 0x29c   : > { %2404 = vpow2.f32 %v2140_v39 }
 0x2a5   : > { %v2403_v1 = vpop.eup %2402 }
 0x2a6   : > { %v1285_v49 = vmul.f32 %v2403_v1, %v1284_v51  ;;  %v2405_v13 = vpop.eup %2404  ;;  %v1306_v51 = vrot.slane %v2137_v47, 4 }
 0x2a7   : > { %v1292_v54 = vadd.f32 1.0, %v2405_v13 }
 0x2a8   : > { %v1287_v26 = vadd.f32 %v1286_v61, %v1285_v49 }
 0x2a9   : > { %2406 = vrcp.f32 %v1292_v54  ;;  %v1312_v54 = vrot.slane %v3386_v56, 2  ;;  %v2456_v56 = vld [vmem:[%s3939_s2 + $0x34] ss:$24 sps:$4 sm:$0xff]  }
 0x2b3   : > { %v2407_v37 = vpop.eup %2406 }
 0x2b8   : > { %v1251_v58 = vpop.f32.mrb[8].mxu1 }
 0x2b9   : > { %v1252_v45 = vadd.f32 %v1251_v58, %v4187_v55  ;;  %v1253_v60 = vpop.f32.mrb[9].mxu1 }
 0x2ba   : > { %v1254_v46 = vadd.f32 %v1253_v60, %v3381_v40  ;;  %v1255_v50 = vpop.f32.mrb[10].mxu1 }
 0x2bb   : > { %v1298_v10 = vadd.f32 %v1296_v9, %v1252_v45  ;;  %v1256_v41 = vpop.f32.mrb[11].mxu1 }
 0x2bc   : > { %v1305_v28 = vmul.f32 %v2407_v37, %v1254_v46  ;;  %v2496_v41 = vld [vmem:[%s3939_s2 + $0x15c] ss:$24 sps:$4 sm:$0xff]  }
 0x2bd   : > { %v2141_v39 = vmul.f32 -1.442695, %v1298_v10  ;;  %v2495_v10 = vld [vmem:[%s3939_s2 + $0x128] ss:$24 sps:$4 sm:$0xff]  }
 0x2be   : > { %v1308_v49 = vadd.f32 %v1306_v51, %v1305_v28  ;;  %v2497_v28 = vld [vmem:[%s3939_s2 + $0x158] ss:$24 sps:$4 sm:$0xff]   ;;  %v2499_v51 = vld [vmem:[%s3939_s2 + $0x188] ss:$24 sps:$4 sm:$0xff]  }
 0x2bf   : > { %2408 = vpow2.f32 %v2141_v39  ;;  %v2498_v39 = vld [vmem:[%s3939_s2 + $0x18c] ss:$24 sps:$4 sm:$0xff]  }
 0x2c9   : > { %v2409_v59 = vpop.eup %2408 }
 0x2ca   : > { %v1302_v1 = vadd.f32 1.0, %v2409_v59  ;;  %v2500_v59 = vld [vmem:[%s3939_s2 + $0x1bc] ss:$24 sps:$4 sm:$0xff]  }
 0x2cc   : > { %2410 = vrcp.f32 %v1302_v1  ;;  %v2501_v1 = vld [vmem:[%s3939_s2 + $0x1b8] ss:$24 sps:$4 sm:$0xff]  }
 0x2cd   : > { %2412 = vtanh.f32 %v1308_v49  ;;  %v2502_v49 = vld [vmem:[%s3939_s2 + $0x1ec] ss:$24 sps:$4 sm:$0xff]  }
 0x2d6   : > { %v2411_v61 = vpop.eup %2410 }
 0x2d7   : > { %v1310_v13 = vsub.f32 1.0, %v2411_v61  ;;  %v2413_v58 = vpop.eup %2412  ;;  %v1314_v55 = vmul.f32 %v2411_v61, %v1312_v54  ;;  %v2503_v61 = vld [vmem:[%s3939_s2 + $0x1e8] ss:$24 sps:$4 sm:$0xff]   ;;  %v2505_v54 = vld [vmem:[%s3939_s2 + $0x218] ss:$24 sps:$4 sm:$0xff]  }
 0x2d9   : > { %v1311_v60 = vmul.f32 %v2413_v58, %v1310_v13  ;;  %v2504_v13 = vld [vmem:[%s3939_s2 + $0x21c] ss:$24 sps:$4 sm:$0xff]   ;;  %v2506_v58 = vld [vmem:[%s3939_s2 + $0x24c] ss:$24 sps:$4 sm:$0xff]  }
 0x2db   : > { %v1315_v50 = vadd.f32 %v1314_v55, %v1311_v60  ;;  %v2494_v55 = vld [vmem:[%s3939_s2 + $0x12c] ss:$24 sps:$4 sm:$0xff]   ;;  %v2507_v60 = vld [vmem:[%s3939_s2 + $0x248] ss:$24 sps:$4 sm:$0xff]  }
 0x2dd   : > { %v1318_v40 = vcombine.low %v1287_v26, %v1315_v50  ;;  %v2493_v26 = vld [vmem:[%s3939_s2 + $0xf8] ss:$24 sps:$4 sm:$0xff]   ;;  %v2508_v50 = vld [vmem:[%s3939_s2 + $0x27c] ss:$24 sps:$4 sm:$0xff]  }
 0x2df   : > { %2142 = vst.sshfl [vmem:[#allocation2] sm:$0x33 pattern:$0x76325410] %v1318_v40  ;;  %v2455_v40 = vld [vmem:[%s3939_s2] ss:$24 sps:$4 sm:$0xff]  }
 0x2e6   : > { %v3503_v9 = vld [vmem:[#allocation2] sm:$0xf] }
 0x2e7   : > { %v1336_v47 = vrot.slane %v3503_v9, %v4127_v32 }
 0x2e9   : > { %v1337_v45 = vcombine.high %v1336_v47, %v1336_v47  ;;  %v3507_v37 = vpack.c.bf16 %v1336_v47, %v1336_v47  ;;  %v4188_v47 = vld [vmem:[#allocation39_spill] sm:$0xff] }
 0x2eb   : > { %v1341_v46 = vpack.c.bf16 %v1337_v45, %v1337_v45  ;;  %v4189_v45 = vld [vmem:[#allocation41_spill] sm:$0xff] }
 0x2ed   : > { %1374 = vmatprep.mubr.bf16.mxu0 %v1341_v46  ;;  %1415 = vmatprep.mubr.bf16.mxu1 %v1341_v46 }
 0x2ee   : > { %1375 = vmatmul.mubr.bf16.vlgmr.msra.gmra.mrb[12].mxu0 %v3507_v37  ;;  %1416 = vmatmul.mubr.bf16.vlgmr.msra.gmra.mrb[12].mxu1 %v3507_v37 }
 0x2ef   : > { %1425 = vmatpush1.bf16.msra.mxu0 %v4128_v43  ;;  %1456 = vmatprep.mubr.bf16.mxu0 %v1341_v46  ;;  %v2457_v43 = vld [vmem:[%s3939_s2 + $0x30] ss:$24 sps:$4 sm:$0xff]   ;;  %v4190_v46 = vld [vmem:[#allocation43_spill] sm:$0xff] }
 0x2f0   : > { %1426 = vmatprep.subr.bf16.mxu0 %v4129_v53  ;;  %1550 = vmatpush1.bf16.msra.mxu1 %v2455_v40  ;;  %v2458_v53 = vld [vmem:[%s3939_s2 + $0x64] ss:$24 sps:$4 sm:$0xff]  }
 0x2f1   : > { %1551 = vmatprep.subr.bf16.mxu1 %v2456_v56 }
 0x2f3   : > { %1427 = vmatpush1.bf16.msra.mxu0 %v4130_v30  ;;  %v2459_v30 = vld [vmem:[%s3939_s2 + $0x60] ss:$24 sps:$4 sm:$0xff]  }
 0x2f4   : > { %1428 = vmatprep.subr.bf16.mxu0 %v4131_v35  ;;  %1552 = vmatpush1.bf16.msra.mxu1 %v2457_v43  ;;  %v2460_v35 = vld [vmem:[%s3939_s2 + $0x94] ss:$24 sps:$4 sm:$0xff]   ;;  %v4191_v43 = vld [vmem:[#allocation15_spill] sm:$0xff] }
 0x2f5   : > { %1553 = vmatprep.subr.bf16.mxu1 %v2458_v53 }
 0x2f7   : > { %1429 = vmatpush1.bf16.msra.mxu0 %v4132_v17  ;;  %v2461_v17 = vld [vmem:[%s3939_s2 + $0x90] ss:$24 sps:$4 sm:$0xff]  }
 0x2f8   : > { %1430 = vmatprep.subr.bf16.mxu0 %v4133_v57  ;;  %1554 = vmatpush1.bf16.msra.mxu1 %v2459_v30  ;;  %v2462_v57 = vld [vmem:[%s3939_s2 + $0xc4] ss:$24 sps:$4 sm:$0xff]  }
 0x2f9   : > { %1555 = vmatprep.subr.bf16.mxu1 %v2460_v35 }
 0x2fb   : > { %1431 = vmatpush1.bf16.msra.mxu0 %v4134_v19  ;;  %v2463_v19 = vld [vmem:[%s3939_s2 + $0xc0] ss:$24 sps:$4 sm:$0xff]  }
 0x2fc   : > { %1432 = vmatprep.subr.bf16.mxu0 %v4135_v2  ;;  %1556 = vmatpush1.bf16.msra.mxu1 %v2461_v17  ;;  %v2464_v2 = vld [vmem:[%s3939_s2 + $0xf4] ss:$24 sps:$4 sm:$0xff]   ;;  %v4192_v17 = vld [vmem:[#allocation67_spill] sm:$0xff] }
 0x2fd   : > { %1557 = vmatprep.subr.bf16.mxu1 %v2462_v57 }
 0x2ff   : > { %1433 = vmatpush1.bf16.msra.mxu0 %v4136_v3  ;;  %v2465_v3 = vld [vmem:[%s3939_s2 + $0xf0] ss:$24 sps:$4 sm:$0xff]  }
 0x300   : > { %1434 = vmatprep.subr.bf16.mxu0 %v4137_v4  ;;  %1558 = vmatpush1.bf16.msra.mxu1 %v2463_v19  ;;  %v2466_v4 = vld [vmem:[%s3939_s2 + $0x124] ss:$24 sps:$4 sm:$0xff]  }
 0x301   : > { %1559 = vmatprep.subr.bf16.mxu1 %v2464_v2 }
 0x303   : > { %1435 = vmatpush1.bf16.msra.mxu0 %v4138_v5  ;;  %v2467_v5 = vld [vmem:[%s3939_s2 + $0x120] ss:$24 sps:$4 sm:$0xff]  }
 0x304   : > { %1436 = vmatprep.subr.bf16.mxu0 %v4139_v6  ;;  %1560 = vmatpush1.bf16.msra.mxu1 %v2465_v3  ;;  %v2468_v6 = vld [vmem:[%s3939_s2 + $0x154] ss:$24 sps:$4 sm:$0xff]  }
 0x305   : > { %1561 = vmatprep.subr.bf16.mxu1 %v2466_v4 }
 0x307   : > { %1437 = vmatpush1.bf16.msra.mxu0 %v4140_v7  ;;  %v2469_v7 = vld [vmem:[%s3939_s2 + $0x150] ss:$24 sps:$4 sm:$0xff]  }
 0x308   : > { %1438 = vmatprep.subr.bf16.mxu0 %v4141_v8  ;;  %1562 = vmatpush1.bf16.msra.mxu1 %v2467_v5  ;;  %v2470_v8 = vld [vmem:[%s3939_s2 + $0x184] ss:$24 sps:$4 sm:$0xff]  }
 0x309   : > { %1563 = vmatprep.subr.bf16.mxu1 %v2468_v6 }
 0x30b   : > { %1439 = vmatpush1.bf16.msra.mxu0 %v4142_v11  ;;  %v2471_v11 = vld [vmem:[%s3939_s2 + $0x180] ss:$24 sps:$4 sm:$0xff]  }
 0x30c   : > { %1440 = vmatprep.subr.bf16.mxu0 %v4143_v14  ;;  %1564 = vmatpush1.bf16.msra.mxu1 %v2469_v7  ;;  %v2472_v14 = vld [vmem:[%s3939_s2 + $0x1b4] ss:$24 sps:$4 sm:$0xff]  }
 0x30d   : > { %1565 = vmatprep.subr.bf16.mxu1 %v2470_v8 }
 0x30f   : > { %1441 = vmatpush1.bf16.msra.mxu0 %v4144_v15  ;;  %v2473_v15 = vld [vmem:[%s3939_s2 + $0x1b0] ss:$24 sps:$4 sm:$0xff]  }
 0x310   : > { %1442 = vmatprep.subr.bf16.mxu0 %v4145_v18  ;;  %1566 = vmatpush1.bf16.msra.mxu1 %v2471_v11  ;;  %v2474_v18 = vld [vmem:[%s3939_s2 + $0x1e4] ss:$24 sps:$4 sm:$0xff]  }
 0x311   : > { %1567 = vmatprep.subr.bf16.mxu1 %v2472_v14 }
 0x313   : > { %1443 = vmatpush1.bf16.msra.mxu0 %v4146_v20  ;;  %v2475_v20 = vld [vmem:[%s3939_s2 + $0x1e0] ss:$24 sps:$4 sm:$0xff]  }
 0x314   : > { %1444 = vmatprep.subr.bf16.mxu0 %v4147_v21  ;;  %1568 = vmatpush1.bf16.msra.mxu1 %v2473_v15  ;;  %v2476_v21 = vld [vmem:[%s3939_s2 + $0x214] ss:$24 sps:$4 sm:$0xff]  }
 0x315   : > { %1569 = vmatprep.subr.bf16.mxu1 %v2474_v18 }
 0x317   : > { %1445 = vmatpush1.bf16.msra.mxu0 %v4148_v27  ;;  %v2477_v27 = vld [vmem:[%s3939_s2 + $0x210] ss:$24 sps:$4 sm:$0xff]  }
 0x318   : > { %1446 = vmatprep.subr.bf16.mxu0 %v4149_v31  ;;  %1570 = vmatpush1.bf16.msra.mxu1 %v2475_v20  ;;  %v2478_v31 = vld [vmem:[%s3939_s2 + $0x244] ss:$24 sps:$4 sm:$0xff]  }
 0x319   : > { %1571 = vmatprep.subr.bf16.mxu1 %v2476_v21 }
 0x31b   : > { %1447 = vmatpush1.bf16.msra.mxu0 %v4150_v33  ;;  %v2479_v33 = vld [vmem:[%s3939_s2 + $0x240] ss:$24 sps:$4 sm:$0xff]  }
 0x31c   : > { %1448 = vmatprep.subr.bf16.mxu0 %v4151_v34  ;;  %1572 = vmatpush1.bf16.msra.mxu1 %v2477_v27  ;;  %v2480_v34 = vld [vmem:[%s3939_s2 + $0x274] ss:$24 sps:$4 sm:$0xff]   ;;  %v2144_v27 = vld [vmem:[%s2691_s13 + $0x6] sm:$0x3f] }
 0x31d   : > { %1573 = vmatprep.subr.bf16.mxu1 %v2478_v31 }
 0x31f   : > { %1449 = vmatpush1.bf16.msra.mxu0 %v4152_v38  ;;  %v2481_v38 = vld [vmem:[%s3939_s2 + $0x270] ss:$24 sps:$4 sm:$0xff]  }
 0x320   : > { %1450 = vmatprep.subr.bf16.mxu0 %v4153_v42  ;;  %1574 = vmatpush1.bf16.msra.mxu1 %v2479_v33  ;;  %v2491_v42 = vld [vmem:[%s3939_s2 + $0xc8] ss:$24 sps:$4 sm:$0xff]  }
 0x321   : > { %1575 = vmatprep.subr.bf16.mxu1 %v2480_v34 }
 0x323   : > { %1451 = vmatpush1.bf16.msra.mxu0 %v4154_v44  ;;  %v2492_v44 = vld [vmem:[%s3939_s2 + $0xfc] ss:$24 sps:$4 sm:$0xff]  }
 0x324   : > { %1452 = vmatprep.subr.bf16.mxu0 %v3287_v23  ;;  %1576 = vmatpush1.bf16.msra.mxu1 %v2481_v38  ;;  %v2482_v23 = vld [vmem:[%s3939_s2 + $0xc] ss:$24 sps:$4 sm:$0xff]  }
 0x325   : > { %1577 = vmatprep.subr.bf16.mxu1 %v3013_v62  ;;  %v2483_v62 = vld [vmem:[%s3939_s2 + $0x8] ss:$24 sps:$4 sm:$0xff]  }
 0x327   : > { %1453 = vmatpush1.bf16.msra.mxu0 %v3294_v29  ;;  %v2489_v29 = vld [vmem:[%s3939_s2 + $0x98] ss:$24 sps:$4 sm:$0xff]  }
 0x328   : > { %1454 = vmatprep.subr.bf16.mxu0 %v3301_v48  ;;  %1578 = vmatpush1.bf16.msra.mxu1 %v3018_v63  ;;  %v2484_v63 = vld [vmem:[%s3939_s2 + $0x3c] ss:$24 sps:$4 sm:$0xff]   ;;  %v2490_v48 = vld [vmem:[%s3939_s2 + $0xcc] ss:$24 sps:$4 sm:$0xff]  }
 0x329   : > { %1579 = vmatprep.subr.bf16.mxu1 %v3037_v24  ;;  %v2487_v24 = vld [vmem:[%s3939_s2 + $0x68] ss:$24 sps:$4 sm:$0xff]  }
 0x32b   : > { %1455 = vmatpush1.bf16.msra.mxu0 %v3308_v0  ;;  %v2485_v0 = vld [vmem:[%s3939_s2 + $0x38] ss:$24 sps:$4 sm:$0xff]  }
 0x32c   : > { %1590 = vmatprep.subr.bf16.mxu0 %v2482_v23  ;;  %1580 = vmatpush1.bf16.msra.mxu1 %v3042_v25  ;;  %v2488_v25 = vld [vmem:[%s3939_s2 + $0x9c] ss:$24 sps:$4 sm:$0xff]  }
 0x32d   : > { %1631 = vmatprep.subr.bf16.mxu1 %v3061_v36  ;;  %v2486_v36 = vld [vmem:[%s3939_s2 + $0x6c] ss:$24 sps:$4 sm:$0xff]  }
 0x32e   : > { %1457 = vmatmul.mubr.bf16.vlgmr.msra.gmra.mrb[16].mxu0 %v3507_v37  ;;  %v2143_v37 = vld [vmem:[%s2686_s10 + $0xc] sm:$0x3f] }
 0x32f   : > { %1591 = vmatpush1.bf16.msra.mxu0 %v2483_v62  ;;  %v1477_v19 = vrot.slane %v2143_v37, 2  ;;  %v1487_v21 = vrot.slane %v2143_v37, 4 }
 0x330   : > { %1592 = vmatprep.subr.bf16.mxu0 %v2484_v63 }
 0x333   : > { %1593 = vmatpush1.bf16.msra.mxu0 %v2485_v0 }
 0x334   : > { %1594 = vmatprep.subr.bf16.mxu0 %v2486_v36 }
 0x337   : > { %1595 = vmatpush1.bf16.msra.mxu0 %v2487_v24 }
 0x338   : > { %1596 = vmatprep.subr.bf16.mxu0 %v2488_v25 }
 0x33b   : > { %1597 = vmatpush1.bf16.msra.mxu0 %v2489_v29 }
 0x33c   : > { %1598 = vmatprep.subr.bf16.mxu0 %v2490_v48 }
 0x33f   : > { %1599 = vmatpush1.bf16.msra.mxu0 %v2491_v42  ;;  %v1503_v42 = vrot.slane %v2144_v27, 2 }
 0x340   : > { %1600 = vmatprep.subr.bf16.mxu0 %v2492_v44 }
 0x343   : > { %1601 = vmatpush1.bf16.msra.mxu0 %v2493_v26  ;;  %v4193_v26 = vld [vmem:[#allocation20_spill] sm:$0xff] }
 0x344   : > { %1602 = vmatprep.subr.bf16.mxu0 %v2494_v55 }
 0x347   : > { %1603 = vmatpush1.bf16.msra.mxu0 %v2495_v10 }
 0x348   : > { %1604 = vmatprep.subr.bf16.mxu0 %v2496_v41  ;;  %v4194_v41 = vld [vmem:[#allocation70_spill] sm:$0xff] }
 0x34b   : > { %1605 = vmatpush1.bf16.msra.mxu0 %v2497_v28 }
 0x34c   : > { %1606 = vmatprep.subr.bf16.mxu0 %v2498_v39 }
 0x34f   : > { %1607 = vmatpush1.bf16.msra.mxu0 %v2499_v51 }
 0x350   : > { %1608 = vmatprep.subr.bf16.mxu0 %v2500_v59 }
 0x353   : > { %1609 = vmatpush1.bf16.msra.mxu0 %v2501_v1 }
 0x354   : > { %1610 = vmatprep.subr.bf16.mxu0 %v2502_v49 }
 0x357   : > { %1611 = vmatpush1.bf16.msra.mxu0 %v2503_v61 }
 0x358   : > { %1612 = vmatprep.subr.bf16.mxu0 %v2504_v13  ;;  %v1513_v13 = vrot.slane %v2144_v27, 4 }
 0x35b   : > { %1613 = vmatpush1.bf16.msra.mxu0 %v2505_v54 }
 0x35c   : > { %1614 = vmatprep.subr.bf16.mxu0 %v2506_v58 }
 0x35f   : > { %1615 = vmatpush1.bf16.msra.mxu0 %v2507_v60 }
 0x360   : > { %1616 = vmatprep.subr.bf16.mxu0 %v2508_v50 }
 0x363   : > { %1617 = vmatpush1.bf16.msra.mxu0 %v4178_v22 }
 0x364   : > { %1618 = vmatprep.subr.bf16.mxu0 %v4179_v16 }
 0x367   : > { %1619 = vmatpush1.bf16.msra.mxu0 %v4188_v47  ;;  %v1519_v47 = vrot.slane %v3503_v9, 2 }
 0x368   : > { %1620 = vmatprep.subr.bf16.mxu0 %v4189_v45 }
 0x36b   : > { %1621 = vmatpush1.bf16.msra.mxu0 %v4190_v46 }
 0x3c1   : > { %v1376_v40 = vpop.f32.mrb[12].mxu0  ;;  %v1417_v56 = vpop.f32.mrb[12].mxu1 }
 0x3c2   : > { %v1377_v53 = vadd.f32 %v1376_v40, %v4191_v43  ;;  %v1378_v30 = vpop.f32.mrb[13].mxu0  ;;  %v1419_v35 = vpop.f32.mrb[13].mxu1  ;;  %v1418_v20 = vadd.f32 %v1417_v56, %v4186_v12 }
 0x3c3   : > { %v1379_v57 = vadd.f32 %v1378_v30, %v4192_v17  ;;  %v1380_v2 = vpop.f32.mrb[14].mxu0  ;;  %v1421_v22 = vpop.f32.mrb[14].mxu1  ;;  %v1420_v18 = vadd.f32 %v1419_v35, %v4185_v52 }
 0x3c4   : > { %v1469_v3 = vadd.f32 %v2143_v37, %v1377_v53  ;;  %v1381_v16 = vpop.f32.mrb[15].mxu0  ;;  %v1422_v4 = vpop.f32.mrb[15].mxu1  ;;  %v2511_v22 = vld [vmem:[%s3939_s2 + $0x40] ss:$24 sps:$4 sm:$0xff]  }
 0x3c5   : > { %v1479_v6 = vadd.f32 %v1477_v19, %v1379_v57  ;;  %v1495_v34 = vadd.f32 %v2144_v27, %v1420_v18  ;;  %v2513_v16 = vld [vmem:[%s3939_s2 + $0x70] ss:$24 sps:$4 sm:$0xff]   ;;  %v2514_v4 = vld [vmem:[%s3939_s2 + $0xa4] ss:$24 sps:$4 sm:$0xff]  }
 0x3c6   : > { %v2145_v5 = vmul.f32 -1.442695, %v1469_v3  ;;  %v2512_v3 = vld [vmem:[%s3939_s2 + $0x74] ss:$24 sps:$4 sm:$0xff]   ;;  %v2522_v18 = vld [vmem:[%s3939_s2 + $0x164] ss:$24 sps:$4 sm:$0xff]  }
 0x3c7   : > { %v2146_v7 = vmul.f32 -1.442695, %v1479_v6  ;;  %v2147_v23 = vmul.f32 -1.442695, %v1495_v34  ;;  %v2516_v6 = vld [vmem:[%s3939_s2 + $0xd4] ss:$24 sps:$4 sm:$0xff]  }
 0x3c8   : > { %2414 = vpow2.f32 %v2145_v5  ;;  %v2515_v5 = vld [vmem:[%s3939_s2 + $0xa0] ss:$24 sps:$4 sm:$0xff]   ;;  %v2525_v27 = vld [vmem:[%s3939_s2 + $0x190] ss:$24 sps:$4 sm:$0xff]   ;;  %v2528_v34 = vld [vmem:[%s3939_s2 + $0x1f4] ss:$24 sps:$4 sm:$0xff]  }
 0x3c9   : > { %2416 = vpow2.f32 %v2146_v7  ;;  %v2517_v7 = vld [vmem:[%s3939_s2 + $0xd0] ss:$24 sps:$4 sm:$0xff]  }
 0x3d2   : > { %v2415_v8 = vpop.eup %2414 }
 0x3d3   : > { %v1473_v11 = vadd.f32 1.0, %v2415_v8  ;;  %v2417_v14 = vpop.eup %2416  ;;  %v2518_v8 = vld [vmem:[%s3939_s2 + $0x104] ss:$24 sps:$4 sm:$0xff]  }
 0x3d4   : > { %v1483_v15 = vadd.f32 1.0, %v2417_v14  ;;  %v2520_v14 = vld [vmem:[%s3939_s2 + $0x134] ss:$24 sps:$4 sm:$0xff]  }
 0x3d5   : > { %2418 = vrcp.f32 %v1473_v11  ;;  %v2519_v11 = vld [vmem:[%s3939_s2 + $0x100] ss:$24 sps:$4 sm:$0xff]  }
 0x3d6   : > { %2420 = vrcp.f32 %v1483_v15  ;;  %v2521_v15 = vld [vmem:[%s3939_s2 + $0x130] ss:$24 sps:$4 sm:$0xff]  }
 0x3df   : > { %v2419_v31 = vpop.eup %2418 }
 0x3e0   : > { %v1486_v33 = vmul.f32 %v2419_v31, %v1418_v20  ;;  %v2421_v62 = vpop.eup %2420  ;;  %v2523_v20 = vld [vmem:[%s3939_s2 + $0x160] ss:$24 sps:$4 sm:$0xff]   ;;  %v2526_v31 = vld [vmem:[%s3939_s2 + $0x1c4] ss:$24 sps:$4 sm:$0xff]  }
 0x3e1   : > { %v1491_v63 = vsub.f32 1.0, %v2421_v62  ;;  %v1493_v24 = vmul.f32 %v2421_v62, %v3503_v9  ;;  %v2509_v9 = vld [vmem:[%s3939_s2 + $0x10] ss:$24 sps:$4 sm:$0xff]   ;;  %v2531_v62 = vld [vmem:[%s3939_s2 + $0x220] ss:$24 sps:$4 sm:$0xff]  }
 0x3e2   : > { %v1489_v38 = vadd.f32 %v1487_v21, %v1486_v33  ;;  %v2524_v21 = vld [vmem:[%s3939_s2 + $0x194] ss:$24 sps:$4 sm:$0xff]   ;;  %v2527_v33 = vld [vmem:[%s3939_s2 + $0x1c0] ss:$24 sps:$4 sm:$0xff]  }
 0x3e4   : > { %2422 = vtanh.f32 %v1489_v38  ;;  %v2529_v38 = vld [vmem:[%s3939_s2 + $0x1f0] ss:$24 sps:$4 sm:$0xff]  }
 0x3e5   : > { %2424 = vpow2.f32 %v2147_v23  ;;  %v2530_v23 = vld [vmem:[%s3939_s2 + $0x224] ss:$24 sps:$4 sm:$0xff]  }
 0x3ee   : > { %v2423_v0 = vpop.eup %2422 }
 0x3ef   : > { %v1492_v36 = vmul.f32 %v2423_v0, %v1491_v63  ;;  %v2425_v29 = vpop.eup %2424  ;;  %v2532_v63 = vld [vmem:[%s3939_s2 + $0x254] ss:$24 sps:$4 sm:$0xff]   ;;  %v2533_v0 = vld [vmem:[%s3939_s2 + $0x250] ss:$24 sps:$4 sm:$0xff]  }
 0x3f0   : > { %v1499_v48 = vadd.f32 1.0, %v2425_v29  ;;  %v2537_v29 = vld [vmem:[%s3939_s2 + $0x2b0] ss:$24 sps:$4 sm:$0xff]  }
 0x3f1   : > { %v1494_v25 = vadd.f32 %v1493_v24, %v1492_v36  ;;  %v2534_v36 = vld [vmem:[%s3939_s2 + $0x284] ss:$24 sps:$4 sm:$0xff]   ;;  %v2535_v24 = vld [vmem:[%s3939_s2 + $0x280] ss:$24 sps:$4 sm:$0xff]  }
 0x3f2   : > { %2426 = vrcp.f32 %v1499_v48  ;;  %v2538_v48 = vld [vmem:[%s3939_s2 + $0x2e4] ss:$24 sps:$4 sm:$0xff]  }
 0x3fc   : > { %v2427_v51 = vpop.eup %2426 }
 0x401   : > { %v1458_v44 = vpop.f32.mrb[16].mxu0 }
 0x402   : > { %v1459_v55 = vadd.f32 %v1458_v44, %v4193_v26  ;;  %v1460_v10 = vpop.f32.mrb[17].mxu0  ;;  %v2150_v44 = vld [vmem:[%s2686_s10 + $0x12] sm:$0x3f] }
 0x403   : > { %v1461_v28 = vadd.f32 %v1460_v10, %v4194_v41  ;;  %v1462_v39 = vpop.f32.mrb[18].mxu0 }
 0x404   : > { %v1505_v59 = vadd.f32 %v1503_v42, %v1459_v55  ;;  %v1463_v1 = vpop.f32.mrb[19].mxu0  ;;  %v2539_v42 = vld [vmem:[%s3939_s2 + $0x2e0] ss:$24 sps:$4 sm:$0xff]  }
 0x405   : > { %v1512_v49 = vmul.f32 %v2427_v51, %v1461_v28  ;;  %v1683_v1 = vrot.slane %v2150_v44, 2 }
 0x406   : > { %v2148_v61 = vmul.f32 -1.442695, %v1505_v59 }
 0x407   : > { %v1515_v60 = vadd.f32 %v1513_v13, %v1512_v49 }
 0x408   : > { %2428 = vpow2.f32 %v2148_v61 }
 0x412   : > { %v2429_v54 = vpop.eup %2428 }
 0x413   : > { %v1509_v58 = vadd.f32 1.0, %v2429_v54 }
 0x415   : > { %2430 = vrcp.f32 %v1509_v58 }
 0x416   : > { %2432 = vtanh.f32 %v1515_v60 }
 0x41f   : > { %v2431_v50 = vpop.eup %2430 }
 0x420   : > { %v1517_v45 = vsub.f32 1.0, %v2431_v50  ;;  %v2433_v46 = vpop.eup %2432  ;;  %v1521_v37 = vmul.f32 %v2431_v50, %v1519_v47 }
 0x422   : > { %v1518_v40 = vmul.f32 %v2433_v46, %v1517_v45 }
 0x424   : > { %v1522_v56 = vadd.f32 %v1521_v37, %v1518_v40 }
 0x426   : > { %v1525_v53 = vcombine.low %v1494_v25, %v1522_v56  ;;  %v2536_v25 = vld [vmem:[%s3939_s2 + $0x2b4] ss:$24 sps:$4 sm:$0xff]   ;;  %v1693_v56 = vrot.slane %v2150_v44, 4 }
 0x428   : > { %2149 = vst.sshfl [vmem:[#allocation2] sm:$0x33 pattern:$0x76325410] %v1525_v53  ;;  %v1674_v53 = vld [vmem:[%s2691_s13] sm:$0x3f] }
 0x42f   : > { %v3725_v30 = vld [vmem:[#allocation2] sm:$0xf] }
 0x430   : > { %v1543_v35 = vrot.slane %v3725_v30, %v4127_v32  ;;  %v2510_v32 = vld [vmem:[%s3939_s2 + $0x44] ss:$24 sps:$4 sm:$0xff]  }
 0x432   : > { %v1544_v57 = vcombine.high %v1543_v35, %v1543_v35  ;;  %v3729_v2 = vpack.c.bf16 %v1543_v35, %v1543_v35 }
 0x434   : > { %v1548_v19 = vpack.c.bf16 %v1544_v57, %v1544_v57 }
 0x436   : > { %1581 = vmatprep.mubr.bf16.mxu1 %v1548_v19  ;;  %1622 = vmatprep.mubr.bf16.mxu0 %v1548_v19 }
 0x437   : > { %1582 = vmatmul.mubr.bf16.vlgmr.msra.gmra.mrb[16].mxu1 %v3729_v2  ;;  %1623 = vmatmul.mubr.bf16.vlgmr.msra.gmra.mrb[20].mxu0 %v3729_v2 }
 0x438   : > { %1632 = vmatpush1.bf16.msra.mxu1 %v2509_v9  ;;  %1663 = vmatprep.mubr.bf16.mxu1 %v1548_v19 }
 0x439   : > { %1633 = vmatprep.subr.bf16.mxu1 %v2510_v32 }
 0x43c   : > { %1634 = vmatpush1.bf16.msra.mxu1 %v2511_v22 }
 0x43d   : > { %1635 = vmatprep.subr.bf16.mxu1 %v2512_v3 }
 0x440   : > { %1636 = vmatpush1.bf16.msra.mxu1 %v2513_v16 }
 0x441   : > { %1637 = vmatprep.subr.bf16.mxu1 %v2514_v4 }
 0x444   : > { %1638 = vmatpush1.bf16.msra.mxu1 %v2515_v5 }
 0x445   : > { %1639 = vmatprep.subr.bf16.mxu1 %v2516_v6 }
 0x448   : > { %1640 = vmatpush1.bf16.msra.mxu1 %v2517_v7 }
 0x449   : > { %1641 = vmatprep.subr.bf16.mxu1 %v2518_v8 }
 0x44c   : > { %1642 = vmatpush1.bf16.msra.mxu1 %v2519_v11 }
 0x44d   : > { %1643 = vmatprep.subr.bf16.mxu1 %v2520_v14 }
 0x450   : > { %1644 = vmatpush1.bf16.msra.mxu1 %v2521_v15 }
 0x451   : > { %1645 = vmatprep.subr.bf16.mxu1 %v2522_v18 }
 0x454   : > { %1646 = vmatpush1.bf16.msra.mxu1 %v2523_v20 }
 0x455   : > { %1647 = vmatprep.subr.bf16.mxu1 %v2524_v21 }
 0x458   : > { %1648 = vmatpush1.bf16.msra.mxu1 %v2525_v27 }
 0x459   : > { %1649 = vmatprep.subr.bf16.mxu1 %v2526_v31 }
 0x45c   : > { %1650 = vmatpush1.bf16.msra.mxu1 %v2527_v33  ;;  %v1719_v33 = vrot.slane %v1674_v53, 4 }
 0x45d   : > { %1651 = vmatprep.subr.bf16.mxu1 %v2528_v34 }
 0x460   : > { %1652 = vmatpush1.bf16.msra.mxu1 %v2529_v38 }
 0x461   : > { %1653 = vmatprep.subr.bf16.mxu1 %v2530_v23 }
 0x464   : > { %1654 = vmatpush1.bf16.msra.mxu1 %v2531_v62 }
 0x465   : > { %1655 = vmatprep.subr.bf16.mxu1 %v2532_v63  ;;  %v1725_v63 = vrot.slane %v3725_v30, 2 }
 0x468   : > { %1656 = vmatpush1.bf16.msra.mxu1 %v2533_v0 }
 0x469   : > { %1657 = vmatprep.subr.bf16.mxu1 %v2534_v36 }
 0x46c   : > { %1658 = vmatpush1.bf16.msra.mxu1 %v2535_v24 }
 0x46d   : > { %1659 = vmatprep.subr.bf16.mxu1 %v2536_v25 }
 0x470   : > { %1660 = vmatpush1.bf16.msra.mxu1 %v2537_v29  ;;  %v2540_v29 = vld [vmem:[%s3941_s4 + $0x40] sm:$0xff] (!%p2156_p6)  }
 0x471   : > { %1661 = vmatprep.subr.bf16.mxu1 %v2538_v48  ;;  %v2541_v48 = vld [vmem:[%s3941_s4] sm:$0xff] (!%p2156_p6)   ;;  %2181 = vmatprep.subr.bf16.mxu0 (!%p2156_p6), %v2540_v29 }
 0x472   : > { %2182 = vmatpush3.bf16.msra.mxu0 (!%p2156_p6), %v2541_v48 }
 0x474   : > { %1662 = vmatpush1.bf16.msra.mxu1 %v2539_v42  ;;  %v2543_v42 = vld [vmem:[%s3941_s4 + $0x8] sm:$0xff] (!%p2156_p6)  }
 0x477   : > { %1664 = vmatmul.mubr.bf16.vlgmr.msra.gmra.mrb[20].mxu1 %v3729_v2 }
 0x50a   : > { %v1583_v55 = vpop.f32.mrb[16].mxu1  ;;  %v1624_v10 = vpop.f32.mrb[20].mxu0 }
 0x50b   : > { %v1584_v28 = vadd.f32 %v1583_v55, %v4191_v43  ;;  %v1585_v39 = vpop.f32.mrb[17].mxu1  ;;  %v1626_v51 = vpop.f32.mrb[21].mxu0  ;;  %v2545_v55 = vld [vmem:[%s3941_s4 + $0x10] sm:$0xff] (!%p2156_p6)  }
 0x50c   : > { %v1586_v59 = vadd.f32 %v1585_v39, %v4192_v17  ;;  %v1587_v49 = vpop.f32.mrb[18].mxu1  ;;  %v1628_v61 = vpop.f32.mrb[22].mxu0  ;;  %v1627_v40 = vadd.f32 %v1626_v51, %v4185_v52  ;;  %v1625_v17 = vadd.f32 %v1624_v10, %v4186_v12  ;;  %v1709_v12 = vrot.slane %v1674_v53, 2  ;;  %v2546_v10 = vld [vmem:[%s3941_s4 + $0x58] sm:$0xff] (!%p2156_p6)   ;;  %v2548_v39 = vld [vmem:[%s3941_s4 + $0x60] sm:$0xff] (!%p2156_p6)  }
 0x50d   : > { %v1675_v13 = vadd.f32 %v2150_v44, %v1584_v28  ;;  %v1588_v54 = vpop.f32.mrb[19].mxu1  ;;  %v1629_v58 = vpop.f32.mrb[23].mxu0  ;;  %v2544_v44 = vld [vmem:[%s3941_s4 + $0x50] sm:$0xff] (!%p2156_p6)   ;;  %v2547_v28 = vld [vmem:[%s3941_s4 + $0x18] sm:$0xff] (!%p2156_p6)   ;;  %v2549_v51 = vld [vmem:[%s3941_s4 + $0x20] sm:$0xff] (!%p2156_p6)  }
 0x50e   : > { %v1685_v50 = vadd.f32 %v1683_v1, %v1586_v59  ;;  %v1701_v19 = vadd.f32 %v1674_v53, %v1627_v40  ;;  %v2550_v59 = vld [vmem:[%s3941_s4 + $0x68] sm:$0xff] (!%p2156_p6)   ;;  %v2552_v54 = vld [vmem:[%s3941_s4 + $0x70] sm:$0xff] (!%p2156_p6)  }
 0x50f   : > { %v2151_v60 = vmul.f32 -1.442695, %v1675_v13  ;;  %v2551_v61 = vld [vmem:[%s3941_s4 + $0x28] sm:$0xff] (!%p2156_p6)   ;;  %v2553_v58 = vld [vmem:[%s3941_s4 + $0x30] sm:$0xff] (!%p2156_p6)  }
 0x510   : > { %v2152_v47 = vmul.f32 -1.442695, %v1685_v50  ;;  %v2153_v9 = vmul.f32 -1.442695, %v1701_v19  ;;  %v2555_v50 = vld [vmem:[%s3941_s4 + $0x38] sm:$0xff] (!%p2156_p6)  }
 0x511   : > { %2434 = vpow2.f32 %v2151_v60  ;;  %v2554_v60 = vld [vmem:[%s3941_s4 + $0x78] sm:$0xff] (!%p2156_p6)  }
 0x512   : > { %2436 = vpow2.f32 %v2152_v47 }
 0x51b   : > { %v2435_v45 = vpop.eup %2434 }
 0x51c   : > { %v1679_v46 = vadd.f32 1.0, %v2435_v45  ;;  %v2437_v43 = vpop.eup %2436 }
 0x51d   : > { %v1689_v37 = vadd.f32 1.0, %v2437_v43 }
 0x51e   : > { %2438 = vrcp.f32 %v1679_v46  ;;  %v2158_v46 = vld [vmem:[%s3942_s5] ss:$0 sm:$0xff] (!%p2156_p6) }
 0x51f   : > { %2440 = vrcp.f32 %v1689_v37 }
 0x528   : > { %v2439_v35 = vpop.eup %2438 }
 0x529   : > { %v1692_v57 = vmul.f32 %v2439_v35, %v1625_v17  ;;  %v2441_v32 = vpop.eup %2440 }
 0x52a   : > { %v1697_v22 = vsub.f32 1.0, %v2441_v32  ;;  %v1699_v4 = vmul.f32 %v2441_v32, %v3725_v30  ;;  %v2542_v30 = vld [vmem:[%s3941_s4 + $0x48] sm:$0xff] (!%p2156_p6)  }
 0x52b   : > { %v1695_v2 = vadd.f32 %v1693_v56, %v1692_v57  ;;  %2183 = vmatprep.subr.bf16.mxu0 (!%p2156_p6), %v2542_v30 }
 0x52c   : > { %2184 = vmatpush3.bf16.msra.mxu0 (!%p2156_p6), %v2543_v42 }
 0x52d   : > { %2442 = vtanh.f32 %v1695_v2  ;;  %2185 = vmatprep.subr.bf16.mxu0 (!%p2156_p6), %v2544_v44 }
 0x52e   : > { %2444 = vpow2.f32 %v2153_v9 }
 0x530   : > { %2186 = vmatpush3.bf16.msra.mxu0 (!%p2156_p6), %v2545_v55 }
 0x531   : > { %2187 = vmatprep.subr.bf16.mxu0 (!%p2156_p6), %v2546_v10 }
 0x534   : > { %2188 = vmatpush3.bf16.msra.mxu0 (!%p2156_p6), %v2547_v28 }
 0x535   : > { %2189 = vmatprep.subr.bf16.mxu0 (!%p2156_p6), %v2548_v39 }
 0x537   : > { %v2443_v3 = vpop.eup %2442 }
 0x538   : > { %v1698_v16 = vmul.f32 %v2443_v3, %v1697_v22  ;;  %v2445_v52 = vpop.eup %2444  ;;  %2190 = vmatpush3.bf16.msra.mxu0 (!%p2156_p6), %v2549_v51 }
 0x539   : > { %v1705_v6 = vadd.f32 1.0, %v2445_v52  ;;  %2191 = vmatprep.subr.bf16.mxu0 (!%p2156_p6), %v2550_v59 }
 0x53a   : > { %v1700_v5 = vadd.f32 %v1699_v4, %v1698_v16 }
 0x53b   : > { %2446 = vrcp.f32 %v1705_v6 }
 0x53c   : > { %2192 = vmatpush3.bf16.msra.mxu0 (!%p2156_p6), %v2551_v61 }
 0x53d   : > { %2193 = vmatprep.subr.bf16.mxu0 (!%p2156_p6), %v2552_v54 }
 0x540   : > { %2194 = vmatpush3.bf16.msra.mxu0 (!%p2156_p6), %v2553_v58 }
 0x541   : > { %2195 = vmatprep.subr.bf16.mxu0 (!%p2156_p6), %v2554_v60 }
 0x544   : > { %2196 = vmatpush3.bf16.msra.mxu0 (!%p2156_p6), %v2555_v50 }
 0x545   : > { %v2447_v18 = vpop.eup %2446 }
 0x54a   : > { %v1665_v7 = vpop.f32.mrb[20].mxu1 }
 0x54b   : > { %v1666_v8 = vadd.f32 %v1665_v7, %v4193_v26  ;;  %v1667_v11 = vpop.f32.mrb[21].mxu1 }
 0x54c   : > { %v1668_v14 = vadd.f32 %v1667_v11, %v4194_v41  ;;  %v1669_v15 = vpop.f32.mrb[22].mxu1 }
 0x54d   : > { %v1711_v20 = vadd.f32 %v1709_v12, %v1666_v8  ;;  %v1670_v21 = vpop.f32.mrb[23].mxu1 }
 0x54e   : > { %v1718_v27 = vmul.f32 %v2447_v18, %v1668_v14 }
 0x54f   : > { %v2154_v31 = vmul.f32 -1.442695, %v1711_v20 }
 0x550   : > { %v1721_v23 = vadd.f32 %v1719_v33, %v1718_v27 }
 0x551   : > { %2448 = vpow2.f32 %v2154_v31 }
 0x55b   : > { %v2449_v34 = vpop.eup %2448 }
 0x55c   : > { %v1715_v38 = vadd.f32 1.0, %v2449_v34 }
 0x55e   : > { %2450 = vrcp.f32 %v1715_v38 }
 0x55f   : > { %2452 = vtanh.f32 %v1721_v23 }
 0x568   : > { %v2451_v62 = vpop.eup %2450 }
 0x569   : > { %v1723_v26 = vsub.f32 1.0, %v2451_v62  ;;  %v2453_v0 = vpop.eup %2452  ;;  %v1727_v36 = vmul.f32 %v2451_v62, %v1725_v63 }
 0x56b   : > { %v1724_v41 = vmul.f32 %v2453_v0, %v1723_v26  ;;  %1744 = sbr.rel (%p2156_p6) target bundleno = 1756 (0x6dc), region = 52 }
 0x56d   : > { %v1728_v24 = vadd.f32 %v1727_v36, %v1724_v41 }
 0x56f   : > { %v1731_v25 = vcombine.low %v1700_v5, %v1728_v24 }
 0x571   : > { %2155 = vst.sshfl [vmem:[#allocation2] sm:$0x33 pattern:$0x76325410] %v1731_v25 }
 0x578   : > { %v2157_v1 = vld.sshfl [vmem:[#allocation2] sm:$0x33 pattern:$0x76325410] }
 0x579   : > { %v1754_v49 = vcombine.high %v2157_v1, %v2157_v1  ;;  %v1757_v47 = vpack.c.bf16 %v2157_v1, %v2157_v1 }
 0x57b   : > { %v1758_v13 = vpack.c.bf16 %v1754_v49, %v1754_v49 }
 0x57d   : > { %1926 = vmatprep.mubr.bf16.mxu0 %v1758_v13 }
 0x57e   : > { %1927 = vmatmul.mubr.bf16.vlgmr.msra.gmra.mrb[0].mxu0 %v1757_v47 }
 0x651   : > { %v2197_v45 = vpop.f32.mrb[0].mxu0 }
 0x652   : > { %v2198_v43 = vpop.f32.mrb[1].mxu0 }
 0x653   : > { %v2199_v37 = vadd.f32 %v2198_v43, %v2197_v45  ;;  %v2200_v40 = vpop.f32.mrb[2].mxu0 }
 0x654   : > { %v2201_v17 = vpop.f32.mrb[3].mxu0 }
 0x655   : > { %v1929_v56 = vadd.f32 %v2199_v37, %v2158_v46 }
 0x657   : > { %v1936_v53 = vmax.f32 %v1929_v56, -20.0  ;;  %1935 = vst.msk [vmem:[#allocation3] sm:$0x3] %vm1934_vm0, %v1929_v56 }
 0x659   : > { %v1937_v35 = vmin.f32 %v1936_v53, 2.0 }
 0x65b   : > { %v1938_v57 = vmul.f32 1.442695, %v1937_v35 }
 0x65d   : > { %2556 = vpow2.f32 %v1938_v57 }
 0x667   : > { %v2557_v19 = vpop.eup %2556 }
 0x668   : > { %1941 = vrot.lane.b32.xlu0 %v2557_v19, %s2628_s9 }
 0x6da   : > { %v1942_v2 = vpop.permute.xlu0 %1941 }
 0x6db   : > { %1944 = vst.msk [vmem:[#allocation5] sm:$0x3] %vm1934_vm0, %v1942_v2 }
 0x6dc PF: > { %p2213_p7 = scmp.eq.s32.totalorder %s2677_s25, 1  ;;  %s2629_s11 = smov [#allocation3]  }
 0x6dd   : > { %s1952_s12 = sshll.u32 %s2629_s11, 4  ;;  %s2630_s14 = smov [#allocation5]   ;;  %s1953_s12 = int_to_ptr.vmem [resolvable:$true] %s1952_s12 }
 0x6de   : > { %s1963_s15 = sshll.u32 %s2630_s14, 4  ;;  %s2558_s16 = scalar_lea.vmem %s1953_s12, 32  ;;  %s1964_s15 = int_to_ptr.vmem [resolvable:$true] %s1963_s15 }
 0x6df   : > { %p2559_p8 = scmp.ne.s32.totalorder %s1953_s12, %s2558_s16  ;;  %p2565_p11 = scmp.lt.s32.totalorder %s1953_s12, %s1953_s12 }
 0x6e0   : > { %p2566_p12 = scmp.lt.s32.totalorder %s2558_s16, %s2558_s16 }
 0x6e1   : > { %p2560_p9 = pnand %p2559_p8, %p2213_p7 }
 0x6e2   : > { %p2567_p13 = por %p2566_p12, %p2565_p11 }
 0x6e3   : > { %p2561_p10 = pneg %p2560_p9 }
 0x6e5   : > { %p2568_p0 = pnand %p2567_p13, %p2561_p10 }
 0x6e7   : > { %2571 = shalt.err (!%p2568_p0)
}
 0x6e8   : > { %s2572_s10 = scalar_lea.hbm %s3943_s6, 32 }
 0x6e9   : > { %p2573_p1 = scmp.ne.s32.totalorder %s3943_s6, %s2572_s10  ;;  %p2578_p4 = scmp.lt.u32.totalorder %s2572_s10, %s3943_s6 }
 0x6eb   : > { %p2574_p2 = pnand %p2573_p1, %p2213_p7 }
 0x6ed   : > { %p2575_p3 = pneg %p2574_p2 }
 0x6ef   : > { %p2580_p5 = pnand %p2578_p4, %p2575_p3 }
 0x6f1   : > { %2583 = shalt.err (!%p2580_p5)
}
 0x6f2   : > { %2206 = dma.vmem_to_hbm [thread:$0]  (%p2213_p7), %s1953_s12, 32, %s3943_s6, [#allocation4]  }
 0x6f3   : > { %s2584_s26 = scalar_lea.vmem %s1964_s15, 32  ;;  %p2591_p10 = scmp.lt.s32.totalorder %s1964_s15, %s1964_s15 }
 0x6f4   : > { %p2585_p6 = scmp.ne.s32.totalorder %s1964_s15, %s2584_s26  ;;  %p2592_p11 = scmp.lt.s32.totalorder %s2584_s26, %s2584_s26 }
 0x6f6   : > { %p2586_p8 = pnand %p2585_p6, %p2213_p7  ;;  %p2593_p12 = por %p2592_p11, %p2591_p10 }
 0x6f8   : > { %p2587_p9 = pneg %p2586_p8 }
 0x6fa   : > { %p2594_p13 = pnand %p2593_p12, %p2587_p9 }
 0x6fc   : > { %2597 = shalt.err (!%p2594_p13)
}
 0x6fd   : > { %s2598_s29 = scalar_lea.hbm %s3944_s7, 32 }
 0x6fe   : > { %p2599_p0 = scmp.ne.s32.totalorder %s3944_s7, %s2598_s29  ;;  %p2604_p3 = scmp.lt.u32.totalorder %s2598_s29, %s3944_s7 }
 0x700   : > { %p2600_p1 = pnand %p2599_p0, %p2213_p7 }
 0x702   : > { %p2601_p2 = pneg %p2600_p1 }
 0x704   : > { %p2606_p4 = pnand %p2604_p3, %p2601_p2 }
 0x706   : > { %2609 = shalt.err (!%p2606_p4)
}
 0x707   : > { %2208 = dma.vmem_to_hbm [thread:$0]  (%p2213_p7), %s1964_s15, 32, %s3944_s7, [#allocation6]  }
 0x708   : > { %2615 = dma.done.wait (%p2213_p7), [#allocation4], 32  }
 0x709   : > { %2617 = vsyncadd (%p2213_p7), [#allocation4], 4294967264 }
 0x70a   : > { %2619 = dma.done.wait (%p2213_p7), [#allocation6], 32  }
 0x70b   : > { %2621 = vsyncadd (%p2213_p7), [#allocation6], 4294967264 }
 0x70c PF: > { %s20_s24 = sadd.s32 1, %s2624_s24  }
 0x70d   : > { %p17_p5 = scmp.ge.s32.totalorder %s20_s24, 4  }
 0x70f   :  { %19 = sbr.rel (!%p17_p5) target bundleno = 2 (0x2), region = 96 }
 0x716   :  { %1980 = vsyncpa [#allocation4], 1 }
 0x717   :  { %1982 = vsyncpa [#allocation4 + $0x1], 1 }
 0x718   :  { %1983 = vsyncpa [#allocation6], 1 }

</bundles_post_ra>
